<compile_context>
chip_gen: v7x
topology: tpu7x:2x2x1
jax: 0.10.0
libtpu: 0.0.40
codegen_flags: <defaults>
</compile_context>

<pallas_src>
import jax
import jax.numpy as jnp
from jax.experimental import pallas as pl
from jax.experimental.pallas import tpu as pltpu


# ---------------------------------------------------------------------------
# Fused kernel: one grid step == one image
# ---------------------------------------------------------------------------
def _kmnist_fused_kernel(x1p_ref, w1_ref, b1_ref, w2_ref, b2_ref,
                         wf1_ref, bf1_ref, wf2_ref, bf2_ref,
                         o_ref,
                         z1_ref, y1_ref, z2_ref, flat_ref):
    """Full KMNIST forward for one image.

    x1p_ref : (1, 896, 16) bf16  conv1 im2col patches, rows r = h*32 + w
                                 (h in [0,28), w in [0,32); w>=28 is junk),
                                 cols = 9 taps (ky*3+kx) zero-padded to 16.
    w1_ref  : (16, 32)  bf16     conv1 weights (tap, cout), rows 9..15 zero.
    w2_ref  : (288, 64) bf16     conv2 weights ((ky*3+kx)*32 + cin, cout).
    wf1_ref : (3136,128) bf16    fc1 weights, rows in (h,w,c) NHWC order.
    wf2_ref : (128, 128) bf16    fc2 weights, N zero-padded 10 -> 128.
    o_ref   : (1, 1, 128) f32    logits (cols 10..127 are zero padding).
    scratch : z1 (896,32), y1 (264,32), z2 (224,64), flat (1,3136), all f32.
    """
    f32 = jnp.float32
    bf16 = jnp.bfloat16

    # ----------------- conv1: im2col matmul + bias + ReLU -----------------
    z1 = jnp.dot(x1p_ref[0], w1_ref[...], preferred_element_type=f32)
    z1_ref[...] = jnp.maximum(z1 + b1_ref[...], 0.0)          # (896, 32)

    # ----------------- maxpool1 (2x2/2) -> padded 16x16 grid --------------
    # Horizontal pair max, in place: z1[r] <- max(z1[r], z1[r+1]).
    z1_ref[0:891, :] = jnp.maximum(z1_ref[0:891, :], z1_ref[1:892, :])
    # y1 holds the pooled 14x14x32 map embedded in a zero-padded 16x16 grid,
    # flattened row-major (pixel (h,w) at row (h+1)*16 + (w+1)); the extra
    # rows past 256 keep conv2's shifted slices in bounds.
    y1_ref[...] = jnp.zeros_like(y1_ref)
    for hp in range(14):
        for wp in range(14):
            src = 64 * hp + 2 * wp
            dst = (hp + 1) * 16 + (wp + 1)
            y1_ref[dst:dst + 1, :] = jnp.maximum(
                z1_ref[src:src + 1, :], z1_ref[src + 32:src + 33, :])

    # ----------------- conv2: 9 shifted-slice matmuls + bias + ReLU -------
    # Output rows r = h*16 + w (h in [0,14), w in [0,16); w>=14 is junk that
    # the second pooling never selects).
    acc = jnp.zeros((224, 64), f32)
    for ky in range(3):
        for kx in range(3):
            off = ky * 16 + kx
            t = ky * 3 + kx
            acc += jnp.dot(y1_ref[off:off + 224, :].astype(bf16),
                           w2_ref[t * 32:(t + 1) * 32, :],
                           preferred_element_type=f32)
    z2_ref[...] = jnp.maximum(acc + b2_ref[...], 0.0)          # (224, 64)

    # ----------------- maxpool2 (2x2/2) + NHWC flatten ---------------------
    z2_ref[0:221, :] = jnp.maximum(z2_ref[0:221, :], z2_ref[1:222, :])
    for hp in range(7):
        for wp in range(7):
            src = 32 * hp + 2 * wp
            i = hp * 7 + wp
            flat_ref[0:1, 64 * i:64 * (i + 1)] = jnp.maximum(
                z2_ref[src:src + 1, :], z2_ref[src + 16:src + 17, :])

    # ----------------- fc1 + ReLU + fc2 (lane-dense padded store) ---------
    h = jnp.dot(flat_ref[...].astype(bf16), wf1_ref[...],
                preferred_element_type=f32)
    h = jnp.maximum(h + bf1_ref[...], 0.0)
    o = jnp.dot(h.astype(bf16), wf2_ref[...], preferred_element_type=f32)
    o_ref[0] = o + bf2_ref[...]


# ---------------------------------------------------------------------------
# Glue: tiny conv1 im2col (Cin=1) built in XLA, pooling-friendly row layout
# ---------------------------------------------------------------------------
def _conv1_patches(x_nchw):
    """(B,1,28,28) -> (B,896,16) bf16 conv1 patches; rows r = h*32 + w."""
    B = x_nchw.shape[0]
    x = x_nchw.reshape(B, 28, 28).astype(jnp.float32)
    x_zp = jnp.pad(x, ((0, 0), (1, 1), (1, 5)))            # (B, 30, 34)
    taps = [x_zp[:, ky:ky + 28, kx:kx + 32]
            for ky in range(3) for kx in range(3)]          # 9 x (B, 28, 32)
    p = jnp.stack(taps, axis=-1)                            # (B, 28, 32, 9)
    p = jnp.pad(p, ((0, 0), (0, 0), (0, 0), (0, 7)))        # K 9 -> 16
    return p.reshape(B, 28 * 32, 16).astype(jnp.bfloat16)


# ---------------------------------------------------------------------------
# One-time weight re-layout (outside jit): PyTorch shapes -> kernel shapes
# ---------------------------------------------------------------------------
def prepare_params(params):
    # conv1: (32,1,3,3) -> (tap, cout), taps padded 9 -> 16
    c1_w = jnp.transpose(params["conv1_w"], (2, 3, 1, 0)).reshape(9, 32)
    c1_w = jnp.pad(c1_w, ((0, 7), (0, 0)))
    # conv2: (64,32,3,3) -> ((ky*3+kx)*32 + cin, cout)
    c2_w = jnp.transpose(params["conv2_w"], (2, 3, 1, 0)).reshape(288, 64)
    # fc1: permute columns from PyTorch's (C,H,W) flatten order to (H,W,C)
    f1_w = jnp.transpose(params["fc1_w"].reshape(128, 64, 7, 7),
                         (2, 3, 1, 0)).reshape(3136, 128)
    # fc2: pad N 10 -> 128 for a lane-dense store (sliced back in glue)
    f2_w = jnp.pad(params["fc2_w"].T, ((0, 0), (0, 118)))
    f2_b = jnp.pad(params["fc2_b"], (0, 118))
    return {
        "c1_w": c1_w.astype(jnp.bfloat16),
        "c1_b": params["conv1_b"].reshape(1, 32).astype(jnp.float32),
        "c2_w": c2_w.astype(jnp.bfloat16),
        "c2_b": params["conv2_b"].reshape(1, 64).astype(jnp.float32),
        "f1_w": f1_w.astype(jnp.bfloat16),
        "f1_b": params["fc1_b"].reshape(1, 128).astype(jnp.float32),
        "f2_w": f2_w.astype(jnp.bfloat16),
        "f2_b": f2_b.reshape(1, 128).astype(jnp.float32),
    }


# ---------------------------------------------------------------------------
# Forward pass (mirrors KMNISTModel.forward) -- one pallas_call
# ---------------------------------------------------------------------------
def kmnist_forward(prep, x_nchw):
    B = x_nchw.shape[0]
    x1p = _conv1_patches(x_nchw)

    out = pl.pallas_call(
        _kmnist_fused_kernel,
        out_shape=jax.ShapeDtypeStruct((B, 1, 128), jnp.float32),
        grid_spec=pltpu.PrefetchScalarGridSpec(
            num_scalar_prefetch=0,
            grid=(B,),
            in_specs=[
                pl.BlockSpec((1, 896, 16), lambda b: (b, 0, 0)),  # conv1 patches
                pl.BlockSpec((16, 32), lambda b: (0, 0)),         # conv1 w
                pl.BlockSpec((1, 32), lambda b: (0, 0)),          # conv1 b
                pl.BlockSpec((288, 64), lambda b: (0, 0)),        # conv2 w
                pl.BlockSpec((1, 64), lambda b: (0, 0)),          # conv2 b
                pl.BlockSpec((3136, 128), lambda b: (0, 0)),      # fc1 w
                pl.BlockSpec((1, 128), lambda b: (0, 0)),         # fc1 b
                pl.BlockSpec((128, 128), lambda b: (0, 0)),       # fc2 w (padded)
                pl.BlockSpec((1, 128), lambda b: (0, 0)),         # fc2 b (padded)
            ],
            out_specs=pl.BlockSpec((1, 1, 128), lambda b: (b, 0, 0)),
            scratch_shapes=[
                pltpu.VMEM((896, 32), jnp.float32),   # conv1 output (pre-pool)
                pltpu.VMEM((264, 32), jnp.float32),   # pooled conv1, padded grid
                pltpu.VMEM((224, 64), jnp.float32),   # conv2 output (pre-pool)
                pltpu.VMEM((1, 3136), jnp.float32),   # flattened pooled conv2
            ],
        ),
        compiler_params=pltpu.CompilerParams(
            dimension_semantics=("parallel",),
            vmem_limit_bytes=32 * 1024 * 1024,
        ),
    )(x1p, prep["c1_w"], prep["c1_b"], prep["c2_w"], prep["c2_b"],
      prep["f1_w"], prep["f1_b"], prep["f2_w"], prep["f2_b"])

    return out.reshape(B, 128)[:, :10]


# ---------------------------------------------------------------------------
# Pure-JAX reference (for validation only)
# ---------------------------------------------------------------------------
def _reference_forward(params, x):
    dn = ("NCHW", "OIHW", "NCHW")
    y = jax.lax.conv_general_dilated(x, params["conv1_w"], (1, 1), "SAME",
                                     dimension_numbers=dn)
    y = jax.nn.relu(y + params["conv1_b"].reshape(1, -1, 1, 1))
    y = jax.lax.reduce_window(y, -jnp.inf, jax.lax.max,
                              (1, 1, 2, 2), (1, 1, 2, 2), "VALID")
    y = jax.lax.conv_general_dilated(y, params["conv2_w"], (1, 1), "SAME",
                                     dimension_numbers=dn)
    y = jax.nn.relu(y + params["conv2_b"].reshape(1, -1, 1, 1))
    y = jax.lax.reduce_window(y, -jnp.inf, jax.lax.max,
                              (1, 1, 2, 2), (1, 1, 2, 2), "VALID")
    y = y.reshape(y.shape[0], -1)
    y = jax.nn.relu(y @ params["fc1_w"].T + params["fc1_b"])
    return y @ params["fc2_w"].T + params["fc2_b"]


if __name__ == "__main__":
    key = jax.random.PRNGKey(0)
    ks = jax.random.split(key, 9)
    # Deterministic synthetic parameters in PyTorch shapes:
    # conv (Cout,Cin,kh,kw), linear (out,in).
    params = {
        "conv1_w": 0.10 * jax.random.normal(ks[0], (32, 1, 3, 3), jnp.float32),
        "conv1_b": 0.10 * jax.random.normal(ks[1], (32,), jnp.float32),
        "conv2_w": 0.05 * jax.random.normal(ks[2], (64, 32, 3, 3), jnp.float32),
        "conv2_b": 0.05 * jax.random.normal(ks[3], (64,), jnp.float32),
        "fc1_w": 0.02 * jax.random.normal(ks[4], (128, 64 * 7 * 7), jnp.float32),
        "fc1_b": 0.02 * jax.random.normal(ks[5], (128,), jnp.float32),
        "fc2_w": 0.05 * jax.random.normal(ks[6], (10, 128), jnp.float32),
        "fc2_b": 0.05 * jax.random.normal(ks[7], (10,), jnp.float32),
    }
    # Spatial size fixed at 28x28 by fc1's 64*7*7 input; batch = 2.
    x = jax.random.normal(ks[8], (2, 1, 28, 28), jnp.float32)

    prep = prepare_params(params)          # one-time weight re-layout, outside jit
    fwd = jax.jit(kmnist_forward)
    out = jax.block_until_ready(fwd(prep, x))

    assert out.shape == (2, 10)
    assert bool(jnp.all(jnp.isfinite(out)))
    ref = _reference_forward(params, x)
    max_err = float(jnp.max(jnp.abs(out - ref)))
    assert max_err < 1e-1, f"kernel/reference mismatch: max abs err {max_err}"
    print("KERNEL_OK")
</pallas_src>

<mosaic_0001>
module attributes {stable_mosaic.version = 11 : i64} {
  func.func @_kmnist_fused_kernel(%arg0: i32, %arg1: memref<1x896x16xbf16, #tpu.memory_space<vmem>>, %arg2: memref<16x32xbf16, #tpu.memory_space<vmem>>, %arg3: memref<1x32xf32, #tpu.memory_space<vmem>>, %arg4: memref<288x64xbf16, #tpu.memory_space<vmem>>, %arg5: memref<1x64xf32, #tpu.memory_space<vmem>>, %arg6: memref<3136x128xbf16, #tpu.memory_space<vmem>>, %arg7: memref<1x128xf32, #tpu.memory_space<vmem>>, %arg8: memref<128x128xbf16, #tpu.memory_space<vmem>>, %arg9: memref<1x128xf32, #tpu.memory_space<vmem>>, %arg10: memref<1x1x128xf32, #tpu.memory_space<vmem>>, %arg11: memref<896x32xf32, #tpu.memory_space<vmem>>, %arg12: memref<264x32xf32, #tpu.memory_space<vmem>>, %arg13: memref<224x64xf32, #tpu.memory_space<vmem>>, %arg14: memref<1x3136xf32, #tpu.memory_space<vmem>>) attributes {dimension_semantics = [#tpu.dimension_semantics<parallel>], iteration_bounds = array<i64: 2>, scalar_prefetch = 0 : i64, scratch_operands = 4 : i64, tpu.core_type = #tpu.core_type<tc>, window_params = [{transform_indices = @transform_0, window_bounds = array<i64: 1, 896, 16>}, {pipeline_mode = #tpu.pipeline_mode<synchronous>, transform_indices = @transform_1, window_bounds = array<i64: 16, 32>}, {pipeline_mode = #tpu.pipeline_mode<synchronous>, transform_indices = @transform_2, window_bounds = array<i64: 1, 32>}, {pipeline_mode = #tpu.pipeline_mode<synchronous>, transform_indices = @transform_3, window_bounds = array<i64: 288, 64>}, {pipeline_mode = #tpu.pipeline_mode<synchronous>, transform_indices = @transform_4, window_bounds = array<i64: 1, 64>}, {pipeline_mode = #tpu.pipeline_mode<synchronous>, transform_indices = @transform_5, window_bounds = array<i64: 3136, 128>}, {pipeline_mode = #tpu.pipeline_mode<synchronous>, transform_indices = @transform_6, window_bounds = array<i64: 1, 128>}, {pipeline_mode = #tpu.pipeline_mode<synchronous>, transform_indices = @transform_7, window_bounds = array<i64: 128, 128>}, {pipeline_mode = #tpu.pipeline_mode<synchronous>, transform_indices = @transform_8, window_bounds = array<i64: 1, 128>}, {transform_indices = @transform_9, window_bounds = array<i64: 1, 1, 128>}]} {
    %c0 = arith.constant 0 : index
    %c0_0 = arith.constant 0 : index
    %c0_1 = arith.constant 0 : index
    %0 = vector.load %arg1[%c0, %c0_0, %c0_1] : memref<1x896x16xbf16, #tpu.memory_space<vmem>>, vector<1x896x16xbf16>
    %1 = vector.shape_cast %0 : vector<1x896x16xbf16> to vector<896x16xbf16>
    %c0_2 = arith.constant 0 : index
    %c0_3 = arith.constant 0 : index
    %2 = vector.load %arg2[%c0_2, %c0_3] : memref<16x32xbf16, #tpu.memory_space<vmem>>, vector<16x32xbf16>
    %cst = arith.constant dense<0.000000e+00> : vector<896x32xf32>
    %3 = tpu.matmul %1, %2, %cst {dimension_numbers = #tpu.dot_dimension_numbers<[1], [0], [0], [1], [0, 0, 1, 1], [], []>} : vector<896x16xbf16>, vector<16x32xbf16>, vector<896x32xf32> -> vector<896x32xf32>
    %c0_4 = arith.constant 0 : index
    %c0_5 = arith.constant 0 : index
    %4 = vector.load %arg3[%c0_4, %c0_5] : memref<1x32xf32, #tpu.memory_space<vmem>>, vector<1x32xf32>
    %5 = vector.broadcast %4 : vector<1x32xf32> to vector<896x32xf32>
    %6 = arith.addf %3, %5 : vector<896x32xf32>
    %cst_6 = arith.constant 0.000000e+00 : f32
    %7 = vector.broadcast %cst_6 : f32 to vector<896x32xf32>
    %8 = arith.maximumf %6, %7 : vector<896x32xf32>
    %c0_7 = arith.constant 0 : index
    %c0_8 = arith.constant 0 : index
    %9 = vector.load %arg11[%c0_7, %c0_8] : memref<896x32xf32, #tpu.memory_space<vmem>>, vector<896x32xf32>
    tpu.vector_store %arg11[%c0_7, %c0_8], %8 {strides = array<i32>} : memref<896x32xf32, #tpu.memory_space<vmem>>, vector<896x32xf32>,
    %c0_9 = arith.constant 0 : index
    %c0_10 = arith.constant 0 : index
    %10 = vector.load %arg11[%c0_9, %c0_10] : memref<896x32xf32, #tpu.memory_space<vmem>>, vector<891x32xf32>
    %c1 = arith.constant 1 : index
    %c0_11 = arith.constant 0 : index
    %11 = vector.load %arg11[%c1, %c0_11] : memref<896x32xf32, #tpu.memory_space<vmem>>, vector<891x32xf32>
    %12 = arith.maximumf %10, %11 : vector<891x32xf32>
    %c0_12 = arith.constant 0 : index
    %c0_13 = arith.constant 0 : index
    %13 = vector.load %arg11[%c0_12, %c0_13] : memref<896x32xf32, #tpu.memory_space<vmem>>, vector<891x32xf32>
    tpu.vector_store %arg11[%c0_12, %c0_13], %12 {strides = array<i32>} : memref<896x32xf32, #tpu.memory_space<vmem>>, vector<891x32xf32>,
    %cst_14 = arith.constant 0.000000e+00 : f32
    %14 = vector.broadcast %cst_14 : f32 to vector<264x32xf32>
    %c0_15 = arith.constant 0 : index
    %c0_16 = arith.constant 0 : index
    %15 = vector.load %arg12[%c0_15, %c0_16] : memref<264x32xf32, #tpu.memory_space<vmem>>, vector<264x32xf32>
    tpu.vector_store %arg12[%c0_15, %c0_16], %14 {strides = array<i32>} : memref<264x32xf32, #tpu.memory_space<vmem>>, vector<264x32xf32>,
    %c0_17 = arith.constant 0 : index
    %c0_18 = arith.constant 0 : index
    %16 = vector.load %arg11[%c0_17, %c0_18] : memref<896x32xf32, #tpu.memory_space<vmem>>, vector<1x32xf32>
    %c32 = arith.constant 32 : index
    %c0_19 = arith.constant 0 : index
    %17 = vector.load %arg11[%c32, %c0_19] : memref<896x32xf32, #tpu.memory_space<vmem>>, vector<1x32xf32>
    %18 = arith.maximumf %16, %17 : vector<1x32xf32>
    %c17 = arith.constant 17 : index
    %c0_20 = arith.constant 0 : index
    %19 = vector.load %arg12[%c17, %c0_20] : memref<264x32xf32, #tpu.memory_space<vmem>>, vector<1x32xf32>
    tpu.vector_store %arg12[%c17, %c0_20], %18 {strides = array<i32>} : memref<264x32xf32, #tpu.memory_space<vmem>>, vector<1x32xf32>,
    %c2 = arith.constant 2 : index
    %c0_21 = arith.constant 0 : index
    %20 = vector.load %arg11[%c2, %c0_21] : memref<896x32xf32, #tpu.memory_space<vmem>>, vector<1x32xf32>
    %c34 = arith.constant 34 : index
    %c0_22 = arith.constant 0 : index
    %21 = vector.load %arg11[%c34, %c0_22] : memref<896x32xf32, #tpu.memory_space<vmem>>, vector<1x32xf32>
    %22 = arith.maximumf %20, %21 : vector<1x32xf32>
    %c18 = arith.constant 18 : index
    %c0_23 = arith.constant 0 : index
    %23 = vector.load %arg12[%c18, %c0_23] : memref<264x32xf32, #tpu.memory_space<vmem>>, vector<1x32xf32>
    tpu.vector_store %arg12[%c18, %c0_23], %22 {strides = array<i32>} : memref<264x32xf32, #tpu.memory_space<vmem>>, vector<1x32xf32>,
    %c4 = arith.constant 4 : index
    %c0_24 = arith.constant 0 : index
    %24 = vector.load %arg11[%c4, %c0_24] : memref<896x32xf32, #tpu.memory_space<vmem>>, vector<1x32xf32>
    %c36 = arith.constant 36 : index
    %c0_25 = arith.constant 0 : index
    %25 = vector.load %arg11[%c36, %c0_25] : memref<896x32xf32, #tpu.memory_space<vmem>>, vector<1x32xf32>
    %26 = arith.maximumf %24, %25 : vector<1x32xf32>
    %c19 = arith.constant 19 : index
    %c0_26 = arith.constant 0 : index
    %27 = vector.load %arg12[%c19, %c0_26] : memref<264x32xf32, #tpu.memory_space<vmem>>, vector<1x32xf32>
    tpu.vector_store %arg12[%c19, %c0_26], %26 {strides = array<i32>} : memref<264x32xf32, #tpu.memory_space<vmem>>, vector<1x32xf32>,
    %c6 = arith.constant 6 : index
    %c0_27 = arith.constant 0 : index
    %28 = vector.load %arg11[%c6, %c0_27] : memref<896x32xf32, #tpu.memory_space<vmem>>, vector<1x32xf32>
    %c38 = arith.constant 38 : index
    %c0_28 = arith.constant 0 : index
    %29 = vector.load %arg11[%c38, %c0_28] : memref<896x32xf32, #tpu.memory_space<vmem>>, vector<1x32xf32>
    %30 = arith.maximumf %28, %29 : vector<1x32xf32>
    %c20 = arith.constant 20 : index
    %c0_29 = arith.constant 0 : index
    %31 = vector.load %arg12[%c20, %c0_29] : memref<264x32xf32, #tpu.memory_space<vmem>>, vector<1x32xf32>
    tpu.vector_store %arg12[%c20, %c0_29], %30 {strides = array<i32>} : memref<264x32xf32, #tpu.memory_space<vmem>>, vector<1x32xf32>,
    %c8 = arith.constant 8 : index
    %c0_30 = arith.constant 0 : index
    %32 = vector.load %arg11[%c8, %c0_30] : memref<896x32xf32, #tpu.memory_space<vmem>>, vector<1x32xf32>
    %c40 = arith.constant 40 : index
    %c0_31 = arith.constant 0 : index
    %33 = vector.load %arg11[%c40, %c0_31] : memref<896x32xf32, #tpu.memory_space<vmem>>, vector<1x32xf32>
    %34 = arith.maximumf %32, %33 : vector<1x32xf32>
    %c21 = arith.constant 21 : index
    %c0_32 = arith.constant 0 : index
    %35 = vector.load %arg12[%c21, %c0_32] : memref<264x32xf32, #tpu.memory_space<vmem>>, vector<1x32xf32>
    tpu.vector_store %arg12[%c21, %c0_32], %34 {strides = array<i32>} : memref<264x32xf32, #tpu.memory_space<vmem>>, vector<1x32xf32>,
    %c10 = arith.constant 10 : index
    %c0_33 = arith.constant 0 : index
    %36 = vector.load %arg11[%c10, %c0_33] : memref<896x32xf32, #tpu.memory_space<vmem>>, vector<1x32xf32>
    %c42 = arith.constant 42 : index
    %c0_34 = arith.constant 0 : index
    %37 = vector.load %arg11[%c42, %c0_34] : memref<896x32xf32, #tpu.memory_space<vmem>>, vector<1x32xf32>
    %38 = arith.maximumf %36, %37 : vector<1x32xf32>
    %c22 = arith.constant 22 : index
    %c0_35 = arith.constant 0 : index
    %39 = vector.load %arg12[%c22, %c0_35] : memref<264x32xf32, #tpu.memory_space<vmem>>, vector<1x32xf32>
    tpu.vector_store %arg12[%c22, %c0_35], %38 {strides = array<i32>} : memref<264x32xf32, #tpu.memory_space<vmem>>, vector<1x32xf32>,
    %c12 = arith.constant 12 : index
    %c0_36 = arith.constant 0 : index
    %40 = vector.load %arg11[%c12, %c0_36] : memref<896x32xf32, #tpu.memory_space<vmem>>, vector<1x32xf32>
    %c44 = arith.constant 44 : index
    %c0_37 = arith.constant 0 : index
    %41 = vector.load %arg11[%c44, %c0_37] : memref<896x32xf32, #tpu.memory_space<vmem>>, vector<1x32xf32>
    %42 = arith.maximumf %40, %41 : vector<1x32xf32>
    %c23 = arith.constant 23 : index
    %c0_38 = arith.constant 0 : index
    %43 = vector.load %arg12[%c23, %c0_38] : memref<264x32xf32, #tpu.memory_space<vmem>>, vector<1x32xf32>
    tpu.vector_store %arg12[%c23, %c0_38], %42 {strides = array<i32>} : memref<264x32xf32, #tpu.memory_space<vmem>>, vector<1x32xf32>,
    %c14 = arith.constant 14 : index
    %c0_39 = arith.constant 0 : index
    %44 = vector.load %arg11[%c14, %c0_39] : memref<896x32xf32, #tpu.memory_space<vmem>>, vector<1x32xf32>
    %c46 = arith.constant 46 : index
    %c0_40 = arith.constant 0 : index
    %45 = vector.load %arg11[%c46, %c0_40] : memref<896x32xf32, #tpu.memory_space<vmem>>, vector<1x32xf32>
    %46 = arith.maximumf %44, %45 : vector<1x32xf32>
    %c24 = arith.constant 24 : index
    %c0_41 = arith.constant 0 : index
    %47 = vector.load %arg12[%c24, %c0_41] : memref<264x32xf32, #tpu.memory_space<vmem>>, vector<1x32xf32>
    tpu.vector_store %arg12[%c24, %c0_41], %46 {strides = array<i32>} : memref<264x32xf32, #tpu.memory_space<vmem>>, vector<1x32xf32>,
    %c16 = arith.constant 16 : index
    %c0_42 = arith.constant 0 : index
    %48 = vector.load %arg11[%c16, %c0_42] : memref<896x32xf32, #tpu.memory_space<vmem>>, vector<1x32xf32>
    %c48 = arith.constant 48 : index
    %c0_43 = arith.constant 0 : index
    %49 = vector.load %arg11[%c48, %c0_43] : memref<896x32xf32, #tpu.memory_space<vmem>>, vector<1x32xf32>
    %50 = arith.maximumf %48, %49 : vector<1x32xf32>
    %c25 = arith.constant 25 : index
    %c0_44 = arith.constant 0 : index
    %51 = vector.load %arg12[%c25, %c0_44] : memref<264x32xf32, #tpu.memory_space<vmem>>, vector<1x32xf32>
    tpu.vector_store %arg12[%c25, %c0_44], %50 {strides = array<i32>} : memref<264x32xf32, #tpu.memory_space<vmem>>, vector<1x32xf32>,
    %c18_45 = arith.constant 18 : index
    %c0_46 = arith.constant 0 : index
    %52 = vector.load %arg11[%c18_45, %c0_46] : memref<896x32xf32, #tpu.memory_space<vmem>>, vector<1x32xf32>
    %c50 = arith.constant 50 : index
    %c0_47 = arith.constant 0 : index
    %53 = vector.load %arg11[%c50, %c0_47] : memref<896x32xf32, #tpu.memory_space<vmem>>, vector<1x32xf32>
    %54 = arith.maximumf %52, %53 : vector<1x32xf32>
    %c26 = arith.constant 26 : index
    %c0_48 = arith.constant 0 : index
    %55 = vector.load %arg12[%c26, %c0_48] : memref<264x32xf32, #tpu.memory_space<vmem>>, vector<1x32xf32>
    tpu.vector_store %arg12[%c26, %c0_48], %54 {strides = array<i32>} : memref<264x32xf32, #tpu.memory_space<vmem>>, vector<1x32xf32>,
    %c20_49 = arith.constant 20 : index
    %c0_50 = arith.constant 0 : index
    %56 = vector.load %arg11[%c20_49, %c0_50] : memref<896x32xf32, #tpu.memory_space<vmem>>, vector<1x32xf32>
    %c52 = arith.constant 52 : index
    %c0_51 = arith.constant 0 : index
    %57 = vector.load %arg11[%c52, %c0_51] : memref<896x32xf32, #tpu.memory_space<vmem>>, vector<1x32xf32>
    %58 = arith.maximumf %56, %57 : vector<1x32xf32>
    %c27 = arith.constant 27 : index
    %c0_52 = arith.constant 0 : index
    %59 = vector.load %arg12[%c27, %c0_52] : memref<264x32xf32, #tpu.memory_space<vmem>>, vector<1x32xf32>
    tpu.vector_store %arg12[%c27, %c0_52], %58 {strides = array<i32>} : memref<264x32xf32, #tpu.memory_space<vmem>>, vector<1x32xf32>,
    %c22_53 = arith.constant 22 : index
    %c0_54 = arith.constant 0 : index
    %60 = vector.load %arg11[%c22_53, %c0_54] : memref<896x32xf32, #tpu.memory_space<vmem>>, vector<1x32xf32>
    %c54 = arith.constant 54 : index
    %c0_55 = arith.constant 0 : index
    %61 = vector.load %arg11[%c54, %c0_55] : memref<896x32xf32, #tpu.memory_space<vmem>>, vector<1x32xf32>
    %62 = arith.maximumf %60, %61 : vector<1x32xf32>
    %c28 = arith.constant 28 : index
    %c0_56 = arith.constant 0 : index
    %63 = vector.load %arg12[%c28, %c0_56] : memref<264x32xf32, #tpu.memory_space<vmem>>, vector<1x32xf32>
    tpu.vector_store %arg12[%c28, %c0_56], %62 {strides = array<i32>} : memref<264x32xf32, #tpu.memory_space<vmem>>, vector<1x32xf32>,
    %c24_57 = arith.constant 24 : index
    %c0_58 = arith.constant 0 : index
    %64 = vector.load %arg11[%c24_57, %c0_58] : memref<896x32xf32, #tpu.memory_space<vmem>>, vector<1x32xf32>
    %c56 = arith.constant 56 : index
    %c0_59 = arith.constant 0 : index
    %65 = vector.load %arg11[%c56, %c0_59] : memref<896x32xf32, #tpu.memory_space<vmem>>, vector<1x32xf32>
    %66 = arith.maximumf %64, %65 : vector<1x32xf32>
    %c29 = arith.constant 29 : index
    %c0_60 = arith.constant 0 : index
    %67 = vector.load %arg12[%c29, %c0_60] : memref<264x32xf32, #tpu.memory_space<vmem>>, vector<1x32xf32>
    tpu.vector_store %arg12[%c29, %c0_60], %66 {strides = array<i32>} : memref<264x32xf32, #tpu.memory_space<vmem>>, vector<1x32xf32>,
    %c26_61 = arith.constant 26 : index
    %c0_62 = arith.constant 0 : index
    %68 = vector.load %arg11[%c26_61, %c0_62] : memref<896x32xf32, #tpu.memory_space<vmem>>, vector<1x32xf32>
    %c58 = arith.constant 58 : index
    %c0_63 = arith.constant 0 : index
    %69 = vector.load %arg11[%c58, %c0_63] : memref<896x32xf32, #tpu.memory_space<vmem>>, vector<1x32xf32>
    %70 = arith.maximumf %68, %69 : vector<1x32xf32>
    %c30 = arith.constant 30 : index
    %c0_64 = arith.constant 0 : index
    %71 = vector.load %arg12[%c30, %c0_64] : memref<264x32xf32, #tpu.memory_space<vmem>>, vector<1x32xf32>
    tpu.vector_store %arg12[%c30, %c0_64], %70 {strides = array<i32>} : memref<264x32xf32, #tpu.memory_space<vmem>>, vector<1x32xf32>,
    %c64 = arith.constant 64 : index
    %c0_65 = arith.constant 0 : index
    %72 = vector.load %arg11[%c64, %c0_65] : memref<896x32xf32, #tpu.memory_space<vmem>>, vector<1x32xf32>
    %c96 = arith.constant 96 : index
    %c0_66 = arith.constant 0 : index
    %73 = vector.load %arg11[%c96, %c0_66] : memref<896x32xf32, #tpu.memory_space<vmem>>, vector<1x32xf32>
    %74 = arith.maximumf %72, %73 : vector<1x32xf32>
    %c33 = arith.constant 33 : index
    %c0_67 = arith.constant 0 : index
    %75 = vector.load %arg12[%c33, %c0_67] : memref<264x32xf32, #tpu.memory_space<vmem>>, vector<1x32xf32>
    tpu.vector_store %arg12[%c33, %c0_67], %74 {strides = array<i32>} : memref<264x32xf32, #tpu.memory_space<vmem>>, vector<1x32xf32>,
    %c66 = arith.constant 66 : index
    %c0_68 = arith.constant 0 : index
    %76 = vector.load %arg11[%c66, %c0_68] : memref<896x32xf32, #tpu.memory_space<vmem>>, vector<1x32xf32>
    %c98 = arith.constant 98 : index
    %c0_69 = arith.constant 0 : index
    %77 = vector.load %arg11[%c98, %c0_69] : memref<896x32xf32, #tpu.memory_space<vmem>>, vector<1x32xf32>
    %78 = arith.maximumf %76, %77 : vector<1x32xf32>
    %c34_70 = arith.constant 34 : index
    %c0_71 = arith.constant 0 : index
    %79 = vector.load %arg12[%c34_70, %c0_71] : memref<264x32xf32, #tpu.memory_space<vmem>>, vector<1x32xf32>
    tpu.vector_store %arg12[%c34_70, %c0_71], %78 {strides = array<i32>} : memref<264x32xf32, #tpu.memory_space<vmem>>, vector<1x32xf32>,
    %c68 = arith.constant 68 : index
    %c0_72 = arith.constant 0 : index
    %80 = vector.load %arg11[%c68, %c0_72] : memref<896x32xf32, #tpu.memory_space<vmem>>, vector<1x32xf32>
    %c100 = arith.constant 100 : index
    %c0_73 = arith.constant 0 : index
    %81 = vector.load %arg11[%c100, %c0_73] : memref<896x32xf32, #tpu.memory_space<vmem>>, vector<1x32xf32>
    %82 = arith.maximumf %80, %81 : vector<1x32xf32>
    %c35 = arith.constant 35 : index
    %c0_74 = arith.constant 0 : index
    %83 = vector.load %arg12[%c35, %c0_74] : memref<264x32xf32, #tpu.memory_space<vmem>>, vector<1x32xf32>
    tpu.vector_store %arg12[%c35, %c0_74], %82 {strides = array<i32>} : memref<264x32xf32, #tpu.memory_space<vmem>>, vector<1x32xf32>,
    %c70 = arith.constant 70 : index
    %c0_75 = arith.constant 0 : index
    %84 = vector.load %arg11[%c70, %c0_75] : memref<896x32xf32, #tpu.memory_space<vmem>>, vector<1x32xf32>
    %c102 = arith.constant 102 : index
    %c0_76 = arith.constant 0 : index
    %85 = vector.load %arg11[%c102, %c0_76] : memref<896x32xf32, #tpu.memory_space<vmem>>, vector<1x32xf32>
    %86 = arith.maximumf %84, %85 : vector<1x32xf32>
    %c36_77 = arith.constant 36 : index
    %c0_78 = arith.constant 0 : index
    %87 = vector.load %arg12[%c36_77, %c0_78] : memref<264x32xf32, #tpu.memory_space<vmem>>, vector<1x32xf32>
    tpu.vector_store %arg12[%c36_77, %c0_78], %86 {strides = array<i32>} : memref<264x32xf32, #tpu.memory_space<vmem>>, vector<1x32xf32>,
    %c72 = arith.constant 72 : index
    %c0_79 = arith.constant 0 : index
    %88 = vector.load %arg11[%c72, %c0_79] : memref<896x32xf32, #tpu.memory_space<vmem>>, vector<1x32xf32>
    %c104 = arith.constant 104 : index
    %c0_80 = arith.constant 0 : index
    %89 = vector.load %arg11[%c104, %c0_80] : memref<896x32xf32, #tpu.memory_space<vmem>>, vector<1x32xf32>
    %90 = arith.maximumf %88, %89 : vector<1x32xf32>
    %c37 = arith.constant 37 : index
    %c0_81 = arith.constant 0 : index
    %91 = vector.load %arg12[%c37, %c0_81] : memref<264x32xf32, #tpu.memory_space<vmem>>, vector<1x32xf32>
    tpu.vector_store %arg12[%c37, %c0_81], %90 {strides = array<i32>} : memref<264x32xf32, #tpu.memory_space<vmem>>, vector<1x32xf32>,
    %c74 = arith.constant 74 : index
    %c0_82 = arith.constant 0 : index
    %92 = vector.load %arg11[%c74, %c0_82] : memref<896x32xf32, #tpu.memory_space<vmem>>, vector<1x32xf32>
    %c106 = arith.constant 106 : index
    %c0_83 = arith.constant 0 : index
    %93 = vector.load %arg11[%c106, %c0_83] : memref<896x32xf32, #tpu.memory_space<vmem>>, vector<1x32xf32>
    %94 = arith.maximumf %92, %93 : vector<1x32xf32>
    %c38_84 = arith.constant 38 : index
    %c0_85 = arith.constant 0 : index
    %95 = vector.load %arg12[%c38_84, %c0_85] : memref<264x32xf32, #tpu.memory_space<vmem>>, vector<1x32xf32>
    tpu.vector_store %arg12[%c38_84, %c0_85], %94 {strides = array<i32>} : memref<264x32xf32, #tpu.memory_space<vmem>>, vector<1x32xf32>,
    %c76 = arith.constant 76 : index
    %c0_86 = arith.constant 0 : index
    %96 = vector.load %arg11[%c76, %c0_86] : memref<896x32xf32, #tpu.memory_space<vmem>>, vector<1x32xf32>
    %c108 = arith.constant 108 : index
    %c0_87 = arith.constant 0 : index
    %97 = vector.load %arg11[%c108, %c0_87] : memref<896x32xf32, #tpu.memory_space<vmem>>, vector<1x32xf32>
    %98 = arith.maximumf %96, %97 : vector<1x32xf32>
    %c39 = arith.constant 39 : index
    %c0_88 = arith.constant 0 : index
    %99 = vector.load %arg12[%c39, %c0_88] : memref<264x32xf32, #tpu.memory_space<vmem>>, vector<1x32xf32>
    tpu.vector_store %arg12[%c39, %c0_88], %98 {strides = array<i32>} : memref<264x32xf32, #tpu.memory_space<vmem>>, vector<1x32xf32>,
    %c78 = arith.constant 78 : index
    %c0_89 = arith.constant 0 : index
    %100 = vector.load %arg11[%c78, %c0_89] : memref<896x32xf32, #tpu.memory_space<vmem>>, vector<1x32xf32>
    %c110 = arith.constant 110 : index
    %c0_90 = arith.constant 0 : index
    %101 = vector.load %arg11[%c110, %c0_90] : memref<896x32xf32, #tpu.memory_space<vmem>>, vector<1x32xf32>
    %102 = arith.maximumf %100, %101 : vector<1x32xf32>
    %c40_91 = arith.constant 40 : index
    %c0_92 = arith.constant 0 : index
    %103 = vector.load %arg12[%c40_91, %c0_92] : memref<264x32xf32, #tpu.memory_space<vmem>>, vector<1x32xf32>
    tpu.vector_store %arg12[%c40_91, %c0_92], %102 {strides = array<i32>} : memref<264x32xf32, #tpu.memory_space<vmem>>, vector<1x32xf32>,
    %c80 = arith.constant 80 : index
    %c0_93 = arith.constant 0 : index
    %104 = vector.load %arg11[%c80, %c0_93] : memref<896x32xf32, #tpu.memory_space<vmem>>, vector<1x32xf32>
    %c112 = arith.constant 112 : index
    %c0_94 = arith.constant 0 : index
    %105 = vector.load %arg11[%c112, %c0_94] : memref<896x32xf32, #tpu.memory_space<vmem>>, vector<1x32xf32>
    %106 = arith.maximumf %104, %105 : vector<1x32xf32>
    %c41 = arith.constant 41 : index
    %c0_95 = arith.constant 0 : index
    %107 = vector.load %arg12[%c41, %c0_95] : memref<264x32xf32, #tpu.memory_space<vmem>>, vector<1x32xf32>
    tpu.vector_store %arg12[%c41, %c0_95], %106 {strides = array<i32>} : memref<264x32xf32, #tpu.memory_space<vmem>>, vector<1x32xf32>,
    %c82 = arith.constant 82 : index
    %c0_96 = arith.constant 0 : index
    %108 = vector.load %arg11[%c82, %c0_96] : memref<896x32xf32, #tpu.memory_space<vmem>>, vector<1x32xf32>
    %c114 = arith.constant 114 : index
    %c0_97 = arith.constant 0 : index
    %109 = vector.load %arg11[%c114, %c0_97] : memref<896x32xf32, #tpu.memory_space<vmem>>, vector<1x32xf32>
    %110 = arith.maximumf %108, %109 : vector<1x32xf32>
    %c42_98 = arith.constant 42 : index
    %c0_99 = arith.constant 0 : index
    %111 = vector.load %arg12[%c42_98, %c0_99] : memref<264x32xf32, #tpu.memory_space<vmem>>, vector<1x32xf32>
    tpu.vector_store %arg12[%c42_98, %c0_99], %110 {strides = array<i32>} : memref<264x32xf32, #tpu.memory_space<vmem>>, vector<1x32xf32>,
    %c84 = arith.constant 84 : index
    %c0_100 = arith.constant 0 : index
    %112 = vector.load %arg11[%c84, %c0_100] : memref<896x32xf32, #tpu.memory_space<vmem>>, vector<1x32xf32>
    %c116 = arith.constant 116 : index
    %c0_101 = arith.constant 0 : index
    %113 = vector.load %arg11[%c116, %c0_101] : memref<896x32xf32, #tpu.memory_space<vmem>>, vector<1x32xf32>
    %114 = arith.maximumf %112, %113 : vector<1x32xf32>
    %c43 = arith.constant 43 : index
    %c0_102 = arith.constant 0 : index
    %115 = vector.load %arg12[%c43, %c0_102] : memref<264x32xf32, #tpu.memory_space<vmem>>, vector<1x32xf32>
    tpu.vector_store %arg12[%c43, %c0_102], %114 {strides = array<i32>} : memref<264x32xf32, #tpu.memory_space<vmem>>, vector<1x32xf32>,
    %c86 = arith.constant 86 : index
    %c0_103 = arith.constant 0 : index
    %116 = vector.load %arg11[%c86, %c0_103] : memref<896x32xf32, #tpu.memory_space<vmem>>, vector<1x32xf32>
    %c118 = arith.constant 118 : index
    %c0_104 = arith.constant 0 : index
    %117 = vector.load %arg11[%c118, %c0_104] : memref<896x32xf32, #tpu.memory_space<vmem>>, vector<1x32xf32>
    %118 = arith.maximumf %116, %117 : vector<1x32xf32>
    %c44_105 = arith.constant 44 : index
    %c0_106 = arith.constant 0 : index
    %119 = vector.load %arg12[%c44_105, %c0_106] : memref<264x32xf32, #tpu.memory_space<vmem>>, vector<1x32xf32>
    tpu.vector_store %arg12[%c44_105, %c0_106], %118 {strides = array<i32>} : memref<264x32xf32, #tpu.memory_space<vmem>>, vector<1x32xf32>,
    %c88 = arith.constant 88 : index
    %c0_107 = arith.constant 0 : index
    %120 = vector.load %arg11[%c88, %c0_107] : memref<896x32xf32, #tpu.memory_space<vmem>>, vector<1x32xf32>
    %c120 = arith.constant 120 : index
    %c0_108 = arith.constant 0 : index
    %121 = vector.load %arg11[%c120, %c0_108] : memref<896x32xf32, #tpu.memory_space<vmem>>, vector<1x32xf32>
    %122 = arith.maximumf %120, %121 : vector<1x32xf32>
    %c45 = arith.constant 45 : index
    %c0_109 = arith.constant 0 : index
    %123 = vector.load %arg12[%c45, %c0_109] : memref<264x32xf32, #tpu.memory_space<vmem>>, vector<1x32xf32>
    tpu.vector_store %arg12[%c45, %c0_109], %122 {strides = array<i32>} : memref<264x32xf32, #tpu.memory_space<vmem>>, vector<1x32xf32>,
    %c90 = arith.constant 90 : index
    %c0_110 = arith.constant 0 : index
    %124 = vector.load %arg11[%c90, %c0_110] : memref<896x32xf32, #tpu.memory_space<vmem>>, vector<1x32xf32>
    %c122 = arith.constant 122 : index
    %c0_111 = arith.constant 0 : index
    %125 = vector.load %arg11[%c122, %c0_111] : memref<896x32xf32, #tpu.memory_space<vmem>>, vector<1x32xf32>
    %126 = arith.maximumf %124, %125 : vector<1x32xf32>
    %c46_112 = arith.constant 46 : index
    %c0_113 = arith.constant 0 : index
    %127 = vector.load %arg12[%c46_112, %c0_113] : memref<264x32xf32, #tpu.memory_space<vmem>>, vector<1x32xf32>
    tpu.vector_store %arg12[%c46_112, %c0_113], %126 {strides = array<i32>} : memref<264x32xf32, #tpu.memory_space<vmem>>, vector<1x32xf32>,
    %c128 = arith.constant 128 : index
    %c0_114 = arith.constant 0 : index
    %128 = vector.load %arg11[%c128, %c0_114] : memref<896x32xf32, #tpu.memory_space<vmem>>, vector<1x32xf32>
    %c160 = arith.constant 160 : index
    %c0_115 = arith.constant 0 : index
    %129 = vector.load %arg11[%c160, %c0_115] : memref<896x32xf32, #tpu.memory_space<vmem>>, vector<1x32xf32>
    %130 = arith.maximumf %128, %129 : vector<1x32xf32>
    %c49 = arith.constant 49 : index
    %c0_116 = arith.constant 0 : index
    %131 = vector.load %arg12[%c49, %c0_116] : memref<264x32xf32, #tpu.memory_space<vmem>>, vector<1x32xf32>
    tpu.vector_store %arg12[%c49, %c0_116], %130 {strides = array<i32>} : memref<264x32xf32, #tpu.memory_space<vmem>>, vector<1x32xf32>,
    %c130 = arith.constant 130 : index
    %c0_117 = arith.constant 0 : index
    %132 = vector.load %arg11[%c130, %c0_117] : memref<896x32xf32, #tpu.memory_space<vmem>>, vector<1x32xf32>
    %c162 = arith.constant 162 : index
    %c0_118 = arith.constant 0 : index
    %133 = vector.load %arg11[%c162, %c0_118] : memref<896x32xf32, #tpu.memory_space<vmem>>, vector<1x32xf32>
    %134 = arith.maximumf %132, %133 : vector<1x32xf32>
    %c50_119 = arith.constant 50 : index
    %c0_120 = arith.constant 0 : index
    %135 = vector.load %arg12[%c50_119, %c0_120] : memref<264x32xf32, #tpu.memory_space<vmem>>, vector<1x32xf32>
    tpu.vector_store %arg12[%c50_119, %c0_120], %134 {strides = array<i32>} : memref<264x32xf32, #tpu.memory_space<vmem>>, vector<1x32xf32>,
    %c132 = arith.constant 132 : index
    %c0_121 = arith.constant 0 : index
    %136 = vector.load %arg11[%c132, %c0_121] : memref<896x32xf32, #tpu.memory_space<vmem>>, vector<1x32xf32>
    %c164 = arith.constant 164 : index
    %c0_122 = arith.constant 0 : index
    %137 = vector.load %arg11[%c164, %c0_122] : memref<896x32xf32, #tpu.memory_space<vmem>>, vector<1x32xf32>
    %138 = arith.maximumf %136, %137 : vector<1x32xf32>
    %c51 = arith.constant 51 : index
    %c0_123 = arith.constant 0 : index
    %139 = vector.load %arg12[%c51, %c0_123] : memref<264x32xf32, #tpu.memory_space<vmem>>, vector<1x32xf32>
    tpu.vector_store %arg12[%c51, %c0_123], %138 {strides = array<i32>} : memref<264x32xf32, #tpu.memory_space<vmem>>, vector<1x32xf32>,
    %c134 = arith.constant 134 : index
    %c0_124 = arith.constant 0 : index
    %140 = vector.load %arg11[%c134, %c0_124] : memref<896x32xf32, #tpu.memory_space<vmem>>, vector<1x32xf32>
    %c166 = arith.constant 166 : index
    %c0_125 = arith.constant 0 : index
    %141 = vector.load %arg11[%c166, %c0_125] : memref<896x32xf32, #tpu.memory_space<vmem>>, vector<1x32xf32>
    %142 = arith.maximumf %140, %141 : vector<1x32xf32>
    %c52_126 = arith.constant 52 : index
    %c0_127 = arith.constant 0 : index
    %143 = vector.load %arg12[%c52_126, %c0_127] : memref<264x32xf32, #tpu.memory_space<vmem>>, vector<1x32xf32>
    tpu.vector_store %arg12[%c52_126, %c0_127], %142 {strides = array<i32>} : memref<264x32xf32, #tpu.memory_space<vmem>>, vector<1x32xf32>,
    %c136 = arith.constant 136 : index
    %c0_128 = arith.constant 0 : index
    %144 = vector.load %arg11[%c136, %c0_128] : memref<896x32xf32, #tpu.memory_space<vmem>>, vector<1x32xf32>
    %c168 = arith.constant 168 : index
    %c0_129 = arith.constant 0 : index
    %145 = vector.load %arg11[%c168, %c0_129] : memref<896x32xf32, #tpu.memory_space<vmem>>, vector<1x32xf32>
    %146 = arith.maximumf %144, %145 : vector<1x32xf32>
    %c53 = arith.constant 53 : index
    %c0_130 = arith.constant 0 : index
    %147 = vector.load %arg12[%c53, %c0_130] : memref<264x32xf32, #tpu.memory_space<vmem>>, vector<1x32xf32>
    tpu.vector_store %arg12[%c53, %c0_130], %146 {strides = array<i32>} : memref<264x32xf32, #tpu.memory_space<vmem>>, vector<1x32xf32>,
    %c138 = arith.constant 138 : index
    %c0_131 = arith.constant 0 : index
    %148 = vector.load %arg11[%c138, %c0_131] : memref<896x32xf32, #tpu.memory_space<vmem>>, vector<1x32xf32>
    %c170 = arith.constant 170 : index
    %c0_132 = arith.constant 0 : index
    %149 = vector.load %arg11[%c170, %c0_132] : memref<896x32xf32, #tpu.memory_space<vmem>>, vector<1x32xf32>
    %150 = arith.maximumf %148, %149 : vector<1x32xf32>
    %c54_133 = arith.constant 54 : index
    %c0_134 = arith.constant 0 : index
    %151 = vector.load %arg12[%c54_133, %c0_134] : memref<264x32xf32, #tpu.memory_space<vmem>>, vector<1x32xf32>
    tpu.vector_store %arg12[%c54_133, %c0_134], %150 {strides = array<i32>} : memref<264x32xf32, #tpu.memory_space<vmem>>, vector<1x32xf32>,
    %c140 = arith.constant 140 : index
    %c0_135 = arith.constant 0 : index
    %152 = vector.load %arg11[%c140, %c0_135] : memref<896x32xf32, #tpu.memory_space<vmem>>, vector<1x32xf32>
    %c172 = arith.constant 172 : index
    %c0_136 = arith.constant 0 : index
    %153 = vector.load %arg11[%c172, %c0_136] : memref<896x32xf32, #tpu.memory_space<vmem>>, vector<1x32xf32>
    %154 = arith.maximumf %152, %153 : vector<1x32xf32>
    %c55 = arith.constant 55 : index
    %c0_137 = arith.constant 0 : index
    %155 = vector.load %arg12[%c55, %c0_137] : memref<264x32xf32, #tpu.memory_space<vmem>>, vector<1x32xf32>
    tpu.vector_store %arg12[%c55, %c0_137], %154 {strides = array<i32>} : memref<264x32xf32, #tpu.memory_space<vmem>>, vector<1x32xf32>,
    %c142 = arith.constant 142 : index
    %c0_138 = arith.constant 0 : index
    %156 = vector.load %arg11[%c142, %c0_138] : memref<896x32xf32, #tpu.memory_space<vmem>>, vector<1x32xf32>
    %c174 = arith.constant 174 : index
    %c0_139 = arith.constant 0 : index
    %157 = vector.load %arg11[%c174, %c0_139] : memref<896x32xf32, #tpu.memory_space<vmem>>, vector<1x32xf32>
    %158 = arith.maximumf %156, %157 : vector<1x32xf32>
    %c56_140 = arith.constant 56 : index
    %c0_141 = arith.constant 0 : index
    %159 = vector.load %arg12[%c56_140, %c0_141] : memref<264x32xf32, #tpu.memory_space<vmem>>, vector<1x32xf32>
    tpu.vector_store %arg12[%c56_140, %c0_141], %158 {strides = array<i32>} : memref<264x32xf32, #tpu.memory_space<vmem>>, vector<1x32xf32>,
    %c144 = arith.constant 144 : index
    %c0_142 = arith.constant 0 : index
    %160 = vector.load %arg11[%c144, %c0_142] : memref<896x32xf32, #tpu.memory_space<vmem>>, vector<1x32xf32>
    %c176 = arith.constant 176 : index
    %c0_143 = arith.constant 0 : index
    %161 = vector.load %arg11[%c176, %c0_143] : memref<896x32xf32, #tpu.memory_space<vmem>>, vector<1x32xf32>
    %162 = arith.maximumf %160, %161 : vector<1x32xf32>
    %c57 = arith.constant 57 : index
    %c0_144 = arith.constant 0 : index
    %163 = vector.load %arg12[%c57, %c0_144] : memref<264x32xf32, #tpu.memory_space<vmem>>, vector<1x32xf32>
    tpu.vector_store %arg12[%c57, %c0_144], %162 {strides = array<i32>} : memref<264x32xf32, #tpu.memory_space<vmem>>, vector<1x32xf32>,
    %c146 = arith.constant 146 : index
    %c0_145 = arith.constant 0 : index
    %164 = vector.load %arg11[%c146, %c0_145] : memref<896x32xf32, #tpu.memory_space<vmem>>, vector<1x32xf32>
    %c178 = arith.constant 178 : index
    %c0_146 = arith.constant 0 : index
    %165 = vector.load %arg11[%c178, %c0_146] : memref<896x32xf32, #tpu.memory_space<vmem>>, vector<1x32xf32>
    %166 = arith.maximumf %164, %165 : vector<1x32xf32>
    %c58_147 = arith.constant 58 : index
    %c0_148 = arith.constant 0 : index
    %167 = vector.load %arg12[%c58_147, %c0_148] : memref<264x32xf32, #tpu.memory_space<vmem>>, vector<1x32xf32>
    tpu.vector_store %arg12[%c58_147, %c0_148], %166 {strides = array<i32>} : memref<264x32xf32, #tpu.memory_space<vmem>>, vector<1x32xf32>,
    %c148 = arith.constant 148 : index
    %c0_149 = arith.constant 0 : index
    %168 = vector.load %arg11[%c148, %c0_149] : memref<896x32xf32, #tpu.memory_space<vmem>>, vector<1x32xf32>
    %c180 = arith.constant 180 : index
    %c0_150 = arith.constant 0 : index
    %169 = vector.load %arg11[%c180, %c0_150] : memref<896x32xf32, #tpu.memory_space<vmem>>, vector<1x32xf32>
    %170 = arith.maximumf %168, %169 : vector<1x32xf32>
    %c59 = arith.constant 59 : index
    %c0_151 = arith.constant 0 : index
    %171 = vector.load %arg12[%c59, %c0_151] : memref<264x32xf32, #tpu.memory_space<vmem>>, vector<1x32xf32>
    tpu.vector_store %arg12[%c59, %c0_151], %170 {strides = array<i32>} : memref<264x32xf32, #tpu.memory_space<vmem>>, vector<1x32xf32>,
    %c150 = arith.constant 150 : index
    %c0_152 = arith.constant 0 : index
    %172 = vector.load %arg11[%c150, %c0_152] : memref<896x32xf32, #tpu.memory_space<vmem>>, vector<1x32xf32>
    %c182 = arith.constant 182 : index
    %c0_153 = arith.constant 0 : index
    %173 = vector.load %arg11[%c182, %c0_153] : memref<896x32xf32, #tpu.memory_space<vmem>>, vector<1x32xf32>
    %174 = arith.maximumf %172, %173 : vector<1x32xf32>
    %c60 = arith.constant 60 : index
    %c0_154 = arith.constant 0 : index
    %175 = vector.load %arg12[%c60, %c0_154] : memref<264x32xf32, #tpu.memory_space<vmem>>, vector<1x32xf32>
    tpu.vector_store %arg12[%c60, %c0_154], %174 {strides = array<i32>} : memref<264x32xf32, #tpu.memory_space<vmem>>, vector<1x32xf32>,
    %c152 = arith.constant 152 : index
    %c0_155 = arith.constant 0 : index
    %176 = vector.load %arg11[%c152, %c0_155] : memref<896x32xf32, #tpu.memory_space<vmem>>, vector<1x32xf32>
    %c184 = arith.constant 184 : index
    %c0_156 = arith.constant 0 : index
    %177 = vector.load %arg11[%c184, %c0_156] : memref<896x32xf32, #tpu.memory_space<vmem>>, vector<1x32xf32>
    %178 = arith.maximumf %176, %177 : vector<1x32xf32>
    %c61 = arith.constant 61 : index
    %c0_157 = arith.constant 0 : index
    %179 = vector.load %arg12[%c61, %c0_157] : memref<264x32xf32, #tpu.memory_space<vmem>>, vector<1x32xf32>
    tpu.vector_store %arg12[%c61, %c0_157], %178 {strides = array<i32>} : memref<264x32xf32, #tpu.memory_space<vmem>>, vector<1x32xf32>,
    %c154 = arith.constant 154 : index
    %c0_158 = arith.constant 0 : index
    %180 = vector.load %arg11[%c154, %c0_158] : memref<896x32xf32, #tpu.memory_space<vmem>>, vector<1x32xf32>
    %c186 = arith.constant 186 : index
    %c0_159 = arith.constant 0 : index
    %181 = vector.load %arg11[%c186, %c0_159] : memref<896x32xf32, #tpu.memory_space<vmem>>, vector<1x32xf32>
    %182 = arith.maximumf %180, %181 : vector<1x32xf32>
    %c62 = arith.constant 62 : index
    %c0_160 = arith.constant 0 : index
    %183 = vector.load %arg12[%c62, %c0_160] : memref<264x32xf32, #tpu.memory_space<vmem>>, vector<1x32xf32>
    tpu.vector_store %arg12[%c62, %c0_160], %182 {strides = array<i32>} : memref<264x32xf32, #tpu.memory_space<vmem>>, vector<1x32xf32>,
    %c192 = arith.constant 192 : index
    %c0_161 = arith.constant 0 : index
    %184 = vector.load %arg11[%c192, %c0_161] : memref<896x32xf32, #tpu.memory_space<vmem>>, vector<1x32xf32>
    %c224 = arith.constant 224 : index
    %c0_162 = arith.constant 0 : index
    %185 = vector.load %arg11[%c224, %c0_162] : memref<896x32xf32, #tpu.memory_space<vmem>>, vector<1x32xf32>
    %186 = arith.maximumf %184, %185 : vector<1x32xf32>
    %c65 = arith.constant 65 : index
    %c0_163 = arith.constant 0 : index
    %187 = vector.load %arg12[%c65, %c0_163] : memref<264x32xf32, #tpu.memory_space<vmem>>, vector<1x32xf32>
    tpu.vector_store %arg12[%c65, %c0_163], %186 {strides = array<i32>} : memref<264x32xf32, #tpu.memory_space<vmem>>, vector<1x32xf32>,
    %c194 = arith.constant 194 : index
    %c0_164 = arith.constant 0 : index
    %188 = vector.load %arg11[%c194, %c0_164] : memref<896x32xf32, #tpu.memory_space<vmem>>, vector<1x32xf32>
    %c226 = arith.constant 226 : index
    %c0_165 = arith.constant 0 : index
    %189 = vector.load %arg11[%c226, %c0_165] : memref<896x32xf32, #tpu.memory_space<vmem>>, vector<1x32xf32>
    %190 = arith.maximumf %188, %189 : vector<1x32xf32>
    %c66_166 = arith.constant 66 : index
    %c0_167 = arith.constant 0 : index
    %191 = vector.load %arg12[%c66_166, %c0_167] : memref<264x32xf32, #tpu.memory_space<vmem>>, vector<1x32xf32>
    tpu.vector_store %arg12[%c66_166, %c0_167], %190 {strides = array<i32>} : memref<264x32xf32, #tpu.memory_space<vmem>>, vector<1x32xf32>,
    %c196 = arith.constant 196 : index
    %c0_168 = arith.constant 0 : index
    %192 = vector.load %arg11[%c196, %c0_168] : memref<896x32xf32, #tpu.memory_space<vmem>>, vector<1x32xf32>
    %c228 = arith.constant 228 : index
    %c0_169 = arith.constant 0 : index
    %193 = vector.load %arg11[%c228, %c0_169] : memref<896x32xf32, #tpu.memory_space<vmem>>, vector<1x32xf32>
    %194 = arith.maximumf %192, %193 : vector<1x32xf32>
    %c67 = arith.constant 67 : index
    %c0_170 = arith.constant 0 : index
    %195 = vector.load %arg12[%c67, %c0_170] : memref<264x32xf32, #tpu.memory_space<vmem>>, vector<1x32xf32>
    tpu.vector_store %arg12[%c67, %c0_170], %194 {strides = array<i32>} : memref<264x32xf32, #tpu.memory_space<vmem>>, vector<1x32xf32>,
    %c198 = arith.constant 198 : index
    %c0_171 = arith.constant 0 : index
    %196 = vector.load %arg11[%c198, %c0_171] : memref<896x32xf32, #tpu.memory_space<vmem>>, vector<1x32xf32>
    %c230 = arith.constant 230 : index
    %c0_172 = arith.constant 0 : index
    %197 = vector.load %arg11[%c230, %c0_172] : memref<896x32xf32, #tpu.memory_space<vmem>>, vector<1x32xf32>
    %198 = arith.maximumf %196, %197 : vector<1x32xf32>
    %c68_173 = arith.constant 68 : index
    %c0_174 = arith.constant 0 : index
    %199 = vector.load %arg12[%c68_173, %c0_174] : memref<264x32xf32, #tpu.memory_space<vmem>>, vector<1x32xf32>
    tpu.vector_store %arg12[%c68_173, %c0_174], %198 {strides = array<i32>} : memref<264x32xf32, #tpu.memory_space<vmem>>, vector<1x32xf32>,
    %c200 = arith.constant 200 : index
    %c0_175 = arith.constant 0 : index
    %200 = vector.load %arg11[%c200, %c0_175] : memref<896x32xf32, #tpu.memory_space<vmem>>, vector<1x32xf32>
    %c232 = arith.constant 232 : index
    %c0_176 = arith.constant 0 : index
    %201 = vector.load %arg11[%c232, %c0_176] : memref<896x32xf32, #tpu.memory_space<vmem>>, vector<1x32xf32>
    %202 = arith.maximumf %200, %201 : vector<1x32xf32>
    %c69 = arith.constant 69 : index
    %c0_177 = arith.constant 0 : index
    %203 = vector.load %arg12[%c69, %c0_177] : memref<264x32xf32, #tpu.memory_space<vmem>>, vector<1x32xf32>
    tpu.vector_store %arg12[%c69, %c0_177], %202 {strides = array<i32>} : memref<264x32xf32, #tpu.memory_space<vmem>>, vector<1x32xf32>,
    %c202 = arith.constant 202 : index
    %c0_178 = arith.constant 0 : index
    %204 = vector.load %arg11[%c202, %c0_178] : memref<896x32xf32, #tpu.memory_space<vmem>>, vector<1x32xf32>
    %c234 = arith.constant 234 : index
    %c0_179 = arith.constant 0 : index
    %205 = vector.load %arg11[%c234, %c0_179] : memref<896x32xf32, #tpu.memory_space<vmem>>, vector<1x32xf32>
    %206 = arith.maximumf %204, %205 : vector<1x32xf32>
    %c70_180 = arith.constant 70 : index
    %c0_181 = arith.constant 0 : index
    %207 = vector.load %arg12[%c70_180, %c0_181] : memref<264x32xf32, #tpu.memory_space<vmem>>, vector<1x32xf32>
    tpu.vector_store %arg12[%c70_180, %c0_181], %206 {strides = array<i32>} : memref<264x32xf32, #tpu.memory_space<vmem>>, vector<1x32xf32>,
    %c204 = arith.constant 204 : index
    %c0_182 = arith.constant 0 : index
    %208 = vector.load %arg11[%c204, %c0_182] : memref<896x32xf32, #tpu.memory_space<vmem>>, vector<1x32xf32>
    %c236 = arith.constant 236 : index
    %c0_183 = arith.constant 0 : index
    %209 = vector.load %arg11[%c236, %c0_183] : memref<896x32xf32, #tpu.memory_space<vmem>>, vector<1x32xf32>
    %210 = arith.maximumf %208, %209 : vector<1x32xf32>
    %c71 = arith.constant 71 : index
    %c0_184 = arith.constant 0 : index
    %211 = vector.load %arg12[%c71, %c0_184] : memref<264x32xf32, #tpu.memory_space<vmem>>, vector<1x32xf32>
    tpu.vector_store %arg12[%c71, %c0_184], %210 {strides = array<i32>} : memref<264x32xf32, #tpu.memory_space<vmem>>, vector<1x32xf32>,
    %c206 = arith.constant 206 : index
    %c0_185 = arith.constant 0 : index
    %212 = vector.load %arg11[%c206, %c0_185] : memref<896x32xf32, #tpu.memory_space<vmem>>, vector<1x32xf32>
    %c238 = arith.constant 238 : index
    %c0_186 = arith.constant 0 : index
    %213 = vector.load %arg11[%c238, %c0_186] : memref<896x32xf32, #tpu.memory_space<vmem>>, vector<1x32xf32>
    %214 = arith.maximumf %212, %213 : vector<1x32xf32>
    %c72_187 = arith.constant 72 : index
    %c0_188 = arith.constant 0 : index
    %215 = vector.load %arg12[%c72_187, %c0_188] : memref<264x32xf32, #tpu.memory_space<vmem>>, vector<1x32xf32>
    tpu.vector_store %arg12[%c72_187, %c0_188], %214 {strides = array<i32>} : memref<264x32xf32, #tpu.memory_space<vmem>>, vector<1x32xf32>,
    %c208 = arith.constant 208 : index
    %c0_189 = arith.constant 0 : index
    %216 = vector.load %arg11[%c208, %c0_189] : memref<896x32xf32, #tpu.memory_space<vmem>>, vector<1x32xf32>
    %c240 = arith.constant 240 : index
    %c0_190 = arith.constant 0 : index
    %217 = vector.load %arg11[%c240, %c0_190] : memref<896x32xf32, #tpu.memory_space<vmem>>, vector<1x32xf32>
    %218 = arith.maximumf %216, %217 : vector<1x32xf32>
    %c73 = arith.constant 73 : index
    %c0_191 = arith.constant 0 : index
    %219 = vector.load %arg12[%c73, %c0_191] : memref<264x32xf32, #tpu.memory_space<vmem>>, vector<1x32xf32>
    tpu.vector_store %arg12[%c73, %c0_191], %218 {strides = array<i32>} : memref<264x32xf32, #tpu.memory_space<vmem>>, vector<1x32xf32>,
    %c210 = arith.constant 210 : index
    %c0_192 = arith.constant 0 : index
    %220 = vector.load %arg11[%c210, %c0_192] : memref<896x32xf32, #tpu.memory_space<vmem>>, vector<1x32xf32>
    %c242 = arith.constant 242 : index
    %c0_193 = arith.constant 0 : index
    %221 = vector.load %arg11[%c242, %c0_193] : memref<896x32xf32, #tpu.memory_space<vmem>>, vector<1x32xf32>
    %222 = arith.maximumf %220, %221 : vector<1x32xf32>
    %c74_194 = arith.constant 74 : index
    %c0_195 = arith.constant 0 : index
    %223 = vector.load %arg12[%c74_194, %c0_195] : memref<264x32xf32, #tpu.memory_space<vmem>>, vector<1x32xf32>
    tpu.vector_store %arg12[%c74_194, %c0_195], %222 {strides = array<i32>} : memref<264x32xf32, #tpu.memory_space<vmem>>, vector<1x32xf32>,
    %c212 = arith.constant 212 : index
    %c0_196 = arith.constant 0 : index
    %224 = vector.load %arg11[%c212, %c0_196] : memref<896x32xf32, #tpu.memory_space<vmem>>, vector<1x32xf32>
    %c244 = arith.constant 244 : index
    %c0_197 = arith.constant 0 : index
    %225 = vector.load %arg11[%c244, %c0_197] : memref<896x32xf32, #tpu.memory_space<vmem>>, vector<1x32xf32>
    %226 = arith.maximumf %224, %225 : vector<1x32xf32>
    %c75 = arith.constant 75 : index
    %c0_198 = arith.constant 0 : index
    %227 = vector.load %arg12[%c75, %c0_198] : memref<264x32xf32, #tpu.memory_space<vmem>>, vector<1x32xf32>
    tpu.vector_store %arg12[%c75, %c0_198], %226 {strides = array<i32>} : memref<264x32xf32, #tpu.memory_space<vmem>>, vector<1x32xf32>,
    %c214 = arith.constant 214 : index
    %c0_199 = arith.constant 0 : index
    %228 = vector.load %arg11[%c214, %c0_199] : memref<896x32xf32, #tpu.memory_space<vmem>>, vector<1x32xf32>
    %c246 = arith.constant 246 : index
    %c0_200 = arith.constant 0 : index
    %229 = vector.load %arg11[%c246, %c0_200] : memref<896x32xf32, #tpu.memory_space<vmem>>, vector<1x32xf32>
    %230 = arith.maximumf %228, %229 : vector<1x32xf32>
    %c76_201 = arith.constant 76 : index
    %c0_202 = arith.constant 0 : index
    %231 = vector.load %arg12[%c76_201, %c0_202] : memref<264x32xf32, #tpu.memory_space<vmem>>, vector<1x32xf32>
    tpu.vector_store %arg12[%c76_201, %c0_202], %230 {strides = array<i32>} : memref<264x32xf32, #tpu.memory_space<vmem>>, vector<1x32xf32>,
    %c216 = arith.constant 216 : index
    %c0_203 = arith.constant 0 : index
    %232 = vector.load %arg11[%c216, %c0_203] : memref<896x32xf32, #tpu.memory_space<vmem>>, vector<1x32xf32>
    %c248 = arith.constant 248 : index
    %c0_204 = arith.constant 0 : index
    %233 = vector.load %arg11[%c248, %c0_204] : memref<896x32xf32, #tpu.memory_space<vmem>>, vector<1x32xf32>
    %234 = arith.maximumf %232, %233 : vector<1x32xf32>
    %c77 = arith.constant 77 : index
    %c0_205 = arith.constant 0 : index
    %235 = vector.load %arg12[%c77, %c0_205] : memref<264x32xf32, #tpu.memory_space<vmem>>, vector<1x32xf32>
    tpu.vector_store %arg12[%c77, %c0_205], %234 {strides = array<i32>} : memref<264x32xf32, #tpu.memory_space<vmem>>, vector<1x32xf32>,
    %c218 = arith.constant 218 : index
    %c0_206 = arith.constant 0 : index
    %236 = vector.load %arg11[%c218, %c0_206] : memref<896x32xf32, #tpu.memory_space<vmem>>, vector<1x32xf32>
    %c250 = arith.constant 250 : index
    %c0_207 = arith.constant 0 : index
    %237 = vector.load %arg11[%c250, %c0_207] : memref<896x32xf32, #tpu.memory_space<vmem>>, vector<1x32xf32>
    %238 = arith.maximumf %236, %237 : vector<1x32xf32>
    %c78_208 = arith.constant 78 : index
    %c0_209 = arith.constant 0 : index
    %239 = vector.load %arg12[%c78_208, %c0_209] : memref<264x32xf32, #tpu.memory_space<vmem>>, vector<1x32xf32>
    tpu.vector_store %arg12[%c78_208, %c0_209], %238 {strides = array<i32>} : memref<264x32xf32, #tpu.memory_space<vmem>>, vector<1x32xf32>,
    %c256 = arith.constant 256 : index
    %c0_210 = arith.constant 0 : index
    %240 = vector.load %arg11[%c256, %c0_210] : memref<896x32xf32, #tpu.memory_space<vmem>>, vector<1x32xf32>
    %c288 = arith.constant 288 : index
    %c0_211 = arith.constant 0 : index
    %241 = vector.load %arg11[%c288, %c0_211] : memref<896x32xf32, #tpu.memory_space<vmem>>, vector<1x32xf32>
    %242 = arith.maximumf %240, %241 : vector<1x32xf32>
    %c81 = arith.constant 81 : index
    %c0_212 = arith.constant 0 : index
    %243 = vector.load %arg12[%c81, %c0_212] : memref<264x32xf32, #tpu.memory_space<vmem>>, vector<1x32xf32>
    tpu.vector_store %arg12[%c81, %c0_212], %242 {strides = array<i32>} : memref<264x32xf32, #tpu.memory_space<vmem>>, vector<1x32xf32>,
    %c258 = arith.constant 258 : index
    %c0_213 = arith.constant 0 : index
    %244 = vector.load %arg11[%c258, %c0_213] : memref<896x32xf32, #tpu.memory_space<vmem>>, vector<1x32xf32>
    %c290 = arith.constant 290 : index
    %c0_214 = arith.constant 0 : index
    %245 = vector.load %arg11[%c290, %c0_214] : memref<896x32xf32, #tpu.memory_space<vmem>>, vector<1x32xf32>
    %246 = arith.maximumf %244, %245 : vector<1x32xf32>
    %c82_215 = arith.constant 82 : index
    %c0_216 = arith.constant 0 : index
    %247 = vector.load %arg12[%c82_215, %c0_216] : memref<264x32xf32, #tpu.memory_space<vmem>>, vector<1x32xf32>
    tpu.vector_store %arg12[%c82_215, %c0_216], %246 {strides = array<i32>} : memref<264x32xf32, #tpu.memory_space<vmem>>, vector<1x32xf32>,
    %c260 = arith.constant 260 : index
    %c0_217 = arith.constant 0 : index
    %248 = vector.load %arg11[%c260, %c0_217] : memref<896x32xf32, #tpu.memory_space<vmem>>, vector<1x32xf32>
    %c292 = arith.constant 292 : index
    %c0_218 = arith.constant 0 : index
    %249 = vector.load %arg11[%c292, %c0_218] : memref<896x32xf32, #tpu.memory_space<vmem>>, vector<1x32xf32>
    %250 = arith.maximumf %248, %249 : vector<1x32xf32>
    %c83 = arith.constant 83 : index
    %c0_219 = arith.constant 0 : index
    %251 = vector.load %arg12[%c83, %c0_219] : memref<264x32xf32, #tpu.memory_space<vmem>>, vector<1x32xf32>
    tpu.vector_store %arg12[%c83, %c0_219], %250 {strides = array<i32>} : memref<264x32xf32, #tpu.memory_space<vmem>>, vector<1x32xf32>,
    %c262 = arith.constant 262 : index
    %c0_220 = arith.constant 0 : index
    %252 = vector.load %arg11[%c262, %c0_220] : memref<896x32xf32, #tpu.memory_space<vmem>>, vector<1x32xf32>
    %c294 = arith.constant 294 : index
    %c0_221 = arith.constant 0 : index
    %253 = vector.load %arg11[%c294, %c0_221] : memref<896x32xf32, #tpu.memory_space<vmem>>, vector<1x32xf32>
    %254 = arith.maximumf %252, %253 : vector<1x32xf32>
    %c84_222 = arith.constant 84 : index
    %c0_223 = arith.constant 0 : index
    %255 = vector.load %arg12[%c84_222, %c0_223] : memref<264x32xf32, #tpu.memory_space<vmem>>, vector<1x32xf32>
    tpu.vector_store %arg12[%c84_222, %c0_223], %254 {strides = array<i32>} : memref<264x32xf32, #tpu.memory_space<vmem>>, vector<1x32xf32>,
    %c264 = arith.constant 264 : index
    %c0_224 = arith.constant 0 : index
    %256 = vector.load %arg11[%c264, %c0_224] : memref<896x32xf32, #tpu.memory_space<vmem>>, vector<1x32xf32>
    %c296 = arith.constant 296 : index
    %c0_225 = arith.constant 0 : index
    %257 = vector.load %arg11[%c296, %c0_225] : memref<896x32xf32, #tpu.memory_space<vmem>>, vector<1x32xf32>
    %258 = arith.maximumf %256, %257 : vector<1x32xf32>
    %c85 = arith.constant 85 : index
    %c0_226 = arith.constant 0 : index
    %259 = vector.load %arg12[%c85, %c0_226] : memref<264x32xf32, #tpu.memory_space<vmem>>, vector<1x32xf32>
    tpu.vector_store %arg12[%c85, %c0_226], %258 {strides = array<i32>} : memref<264x32xf32, #tpu.memory_space<vmem>>, vector<1x32xf32>,
    %c266 = arith.constant 266 : index
    %c0_227 = arith.constant 0 : index
    %260 = vector.load %arg11[%c266, %c0_227] : memref<896x32xf32, #tpu.memory_space<vmem>>, vector<1x32xf32>
    %c298 = arith.constant 298 : index
    %c0_228 = arith.constant 0 : index
    %261 = vector.load %arg11[%c298, %c0_228] : memref<896x32xf32, #tpu.memory_space<vmem>>, vector<1x32xf32>
    %262 = arith.maximumf %260, %261 : vector<1x32xf32>
    %c86_229 = arith.constant 86 : index
    %c0_230 = arith.constant 0 : index
    %263 = vector.load %arg12[%c86_229, %c0_230] : memref<264x32xf32, #tpu.memory_space<vmem>>, vector<1x32xf32>
    tpu.vector_store %arg12[%c86_229, %c0_230], %262 {strides = array<i32>} : memref<264x32xf32, #tpu.memory_space<vmem>>, vector<1x32xf32>,
    %c268 = arith.constant 268 : index
    %c0_231 = arith.constant 0 : index
    %264 = vector.load %arg11[%c268, %c0_231] : memref<896x32xf32, #tpu.memory_space<vmem>>, vector<1x32xf32>
    %c300 = arith.constant 300 : index
    %c0_232 = arith.constant 0 : index
    %265 = vector.load %arg11[%c300, %c0_232] : memref<896x32xf32, #tpu.memory_space<vmem>>, vector<1x32xf32>
    %266 = arith.maximumf %264, %265 : vector<1x32xf32>
    %c87 = arith.constant 87 : index
    %c0_233 = arith.constant 0 : index
    %267 = vector.load %arg12[%c87, %c0_233] : memref<264x32xf32, #tpu.memory_space<vmem>>, vector<1x32xf32>
    tpu.vector_store %arg12[%c87, %c0_233], %266 {strides = array<i32>} : memref<264x32xf32, #tpu.memory_space<vmem>>, vector<1x32xf32>,
    %c270 = arith.constant 270 : index
    %c0_234 = arith.constant 0 : index
    %268 = vector.load %arg11[%c270, %c0_234] : memref<896x32xf32, #tpu.memory_space<vmem>>, vector<1x32xf32>
    %c302 = arith.constant 302 : index
    %c0_235 = arith.constant 0 : index
    %269 = vector.load %arg11[%c302, %c0_235] : memref<896x32xf32, #tpu.memory_space<vmem>>, vector<1x32xf32>
    %270 = arith.maximumf %268, %269 : vector<1x32xf32>
    %c88_236 = arith.constant 88 : index
    %c0_237 = arith.constant 0 : index
    %271 = vector.load %arg12[%c88_236, %c0_237] : memref<264x32xf32, #tpu.memory_space<vmem>>, vector<1x32xf32>
    tpu.vector_store %arg12[%c88_236, %c0_237], %270 {strides = array<i32>} : memref<264x32xf32, #tpu.memory_space<vmem>>, vector<1x32xf32>,
    %c272 = arith.constant 272 : index
    %c0_238 = arith.constant 0 : index
    %272 = vector.load %arg11[%c272, %c0_238] : memref<896x32xf32, #tpu.memory_space<vmem>>, vector<1x32xf32>
    %c304 = arith.constant 304 : index
    %c0_239 = arith.constant 0 : index
    %273 = vector.load %arg11[%c304, %c0_239] : memref<896x32xf32, #tpu.memory_space<vmem>>, vector<1x32xf32>
    %274 = arith.maximumf %272, %273 : vector<1x32xf32>
    %c89 = arith.constant 89 : index
    %c0_240 = arith.constant 0 : index
    %275 = vector.load %arg12[%c89, %c0_240] : memref<264x32xf32, #tpu.memory_space<vmem>>, vector<1x32xf32>
    tpu.vector_store %arg12[%c89, %c0_240], %274 {strides = array<i32>} : memref<264x32xf32, #tpu.memory_space<vmem>>, vector<1x32xf32>,
    %c274 = arith.constant 274 : index
    %c0_241 = arith.constant 0 : index
    %276 = vector.load %arg11[%c274, %c0_241] : memref<896x32xf32, #tpu.memory_space<vmem>>, vector<1x32xf32>
    %c306 = arith.constant 306 : index
    %c0_242 = arith.constant 0 : index
    %277 = vector.load %arg11[%c306, %c0_242] : memref<896x32xf32, #tpu.memory_space<vmem>>, vector<1x32xf32>
    %278 = arith.maximumf %276, %277 : vector<1x32xf32>
    %c90_243 = arith.constant 90 : index
    %c0_244 = arith.constant 0 : index
    %279 = vector.load %arg12[%c90_243, %c0_244] : memref<264x32xf32, #tpu.memory_space<vmem>>, vector<1x32xf32>
    tpu.vector_store %arg12[%c90_243, %c0_244], %278 {strides = array<i32>} : memref<264x32xf32, #tpu.memory_space<vmem>>, vector<1x32xf32>,
    %c276 = arith.constant 276 : index
    %c0_245 = arith.constant 0 : index
    %280 = vector.load %arg11[%c276, %c0_245] : memref<896x32xf32, #tpu.memory_space<vmem>>, vector<1x32xf32>
    %c308 = arith.constant 308 : index
    %c0_246 = arith.constant 0 : index
    %281 = vector.load %arg11[%c308, %c0_246] : memref<896x32xf32, #tpu.memory_space<vmem>>, vector<1x32xf32>
    %282 = arith.maximumf %280, %281 : vector<1x32xf32>
    %c91 = arith.constant 91 : index
    %c0_247 = arith.constant 0 : index
    %283 = vector.load %arg12[%c91, %c0_247] : memref<264x32xf32, #tpu.memory_space<vmem>>, vector<1x32xf32>
    tpu.vector_store %arg12[%c91, %c0_247], %282 {strides = array<i32>} : memref<264x32xf32, #tpu.memory_space<vmem>>, vector<1x32xf32>,
    %c278 = arith.constant 278 : index
    %c0_248 = arith.constant 0 : index
    %284 = vector.load %arg11[%c278, %c0_248] : memref<896x32xf32, #tpu.memory_space<vmem>>, vector<1x32xf32>
    %c310 = arith.constant 310 : index
    %c0_249 = arith.constant 0 : index
    %285 = vector.load %arg11[%c310, %c0_249] : memref<896x32xf32, #tpu.memory_space<vmem>>, vector<1x32xf32>
    %286 = arith.maximumf %284, %285 : vector<1x32xf32>
    %c92 = arith.constant 92 : index
    %c0_250 = arith.constant 0 : index
    %287 = vector.load %arg12[%c92, %c0_250] : memref<264x32xf32, #tpu.memory_space<vmem>>, vector<1x32xf32>
    tpu.vector_store %arg12[%c92, %c0_250], %286 {strides = array<i32>} : memref<264x32xf32, #tpu.memory_space<vmem>>, vector<1x32xf32>,
    %c280 = arith.constant 280 : index
    %c0_251 = arith.constant 0 : index
    %288 = vector.load %arg11[%c280, %c0_251] : memref<896x32xf32, #tpu.memory_space<vmem>>, vector<1x32xf32>
    %c312 = arith.constant 312 : index
    %c0_252 = arith.constant 0 : index
    %289 = vector.load %arg11[%c312, %c0_252] : memref<896x32xf32, #tpu.memory_space<vmem>>, vector<1x32xf32>
    %290 = arith.maximumf %288, %289 : vector<1x32xf32>
    %c93 = arith.constant 93 : index
    %c0_253 = arith.constant 0 : index
    %291 = vector.load %arg12[%c93, %c0_253] : memref<264x32xf32, #tpu.memory_space<vmem>>, vector<1x32xf32>
    tpu.vector_store %arg12[%c93, %c0_253], %290 {strides = array<i32>} : memref<264x32xf32, #tpu.memory_space<vmem>>, vector<1x32xf32>,
    %c282 = arith.constant 282 : index
    %c0_254 = arith.constant 0 : index
    %292 = vector.load %arg11[%c282, %c0_254] : memref<896x32xf32, #tpu.memory_space<vmem>>, vector<1x32xf32>
    %c314 = arith.constant 314 : index
    %c0_255 = arith.constant 0 : index
    %293 = vector.load %arg11[%c314, %c0_255] : memref<896x32xf32, #tpu.memory_space<vmem>>, vector<1x32xf32>
    %294 = arith.maximumf %292, %293 : vector<1x32xf32>
    %c94 = arith.constant 94 : index
    %c0_256 = arith.constant 0 : index
    %295 = vector.load %arg12[%c94, %c0_256] : memref<264x32xf32, #tpu.memory_space<vmem>>, vector<1x32xf32>
    tpu.vector_store %arg12[%c94, %c0_256], %294 {strides = array<i32>} : memref<264x32xf32, #tpu.memory_space<vmem>>, vector<1x32xf32>,
    %c320 = arith.constant 320 : index
    %c0_257 = arith.constant 0 : index
    %296 = vector.load %arg11[%c320, %c0_257] : memref<896x32xf32, #tpu.memory_space<vmem>>, vector<1x32xf32>
    %c352 = arith.constant 352 : index
    %c0_258 = arith.constant 0 : index
    %297 = vector.load %arg11[%c352, %c0_258] : memref<896x32xf32, #tpu.memory_space<vmem>>, vector<1x32xf32>
    %298 = arith.maximumf %296, %297 : vector<1x32xf32>
    %c97 = arith.constant 97 : index
    %c0_259 = arith.constant 0 : index
    %299 = vector.load %arg12[%c97, %c0_259] : memref<264x32xf32, #tpu.memory_space<vmem>>, vector<1x32xf32>
    tpu.vector_store %arg12[%c97, %c0_259], %298 {strides = array<i32>} : memref<264x32xf32, #tpu.memory_space<vmem>>, vector<1x32xf32>,
    %c322 = arith.constant 322 : index
    %c0_260 = arith.constant 0 : index
    %300 = vector.load %arg11[%c322, %c0_260] : memref<896x32xf32, #tpu.memory_space<vmem>>, vector<1x32xf32>
    %c354 = arith.constant 354 : index
    %c0_261 = arith.constant 0 : index
    %301 = vector.load %arg11[%c354, %c0_261] : memref<896x32xf32, #tpu.memory_space<vmem>>, vector<1x32xf32>
    %302 = arith.maximumf %300, %301 : vector<1x32xf32>
    %c98_262 = arith.constant 98 : index
    %c0_263 = arith.constant 0 : index
    %303 = vector.load %arg12[%c98_262, %c0_263] : memref<264x32xf32, #tpu.memory_space<vmem>>, vector<1x32xf32>
    tpu.vector_store %arg12[%c98_262, %c0_263], %302 {strides = array<i32>} : memref<264x32xf32, #tpu.memory_space<vmem>>, vector<1x32xf32>,
    %c324 = arith.constant 324 : index
    %c0_264 = arith.constant 0 : index
    %304 = vector.load %arg11[%c324, %c0_264] : memref<896x32xf32, #tpu.memory_space<vmem>>, vector<1x32xf32>
    %c356 = arith.constant 356 : index
    %c0_265 = arith.constant 0 : index
    %305 = vector.load %arg11[%c356, %c0_265] : memref<896x32xf32, #tpu.memory_space<vmem>>, vector<1x32xf32>
    %306 = arith.maximumf %304, %305 : vector<1x32xf32>
    %c99 = arith.constant 99 : index
    %c0_266 = arith.constant 0 : index
    %307 = vector.load %arg12[%c99, %c0_266] : memref<264x32xf32, #tpu.memory_space<vmem>>, vector<1x32xf32>
    tpu.vector_store %arg12[%c99, %c0_266], %306 {strides = array<i32>} : memref<264x32xf32, #tpu.memory_space<vmem>>, vector<1x32xf32>,
    %c326 = arith.constant 326 : index
    %c0_267 = arith.constant 0 : index
    %308 = vector.load %arg11[%c326, %c0_267] : memref<896x32xf32, #tpu.memory_space<vmem>>, vector<1x32xf32>
    %c358 = arith.constant 358 : index
    %c0_268 = arith.constant 0 : index
    %309 = vector.load %arg11[%c358, %c0_268] : memref<896x32xf32, #tpu.memory_space<vmem>>, vector<1x32xf32>
    %310 = arith.maximumf %308, %309 : vector<1x32xf32>
    %c100_269 = arith.constant 100 : index
    %c0_270 = arith.constant 0 : index
    %311 = vector.load %arg12[%c100_269, %c0_270] : memref<264x32xf32, #tpu.memory_space<vmem>>, vector<1x32xf32>
    tpu.vector_store %arg12[%c100_269, %c0_270], %310 {strides = array<i32>} : memref<264x32xf32, #tpu.memory_space<vmem>>, vector<1x32xf32>,
    %c328 = arith.constant 328 : index
    %c0_271 = arith.constant 0 : index
    %312 = vector.load %arg11[%c328, %c0_271] : memref<896x32xf32, #tpu.memory_space<vmem>>, vector<1x32xf32>
    %c360 = arith.constant 360 : index
    %c0_272 = arith.constant 0 : index
    %313 = vector.load %arg11[%c360, %c0_272] : memref<896x32xf32, #tpu.memory_space<vmem>>, vector<1x32xf32>
    %314 = arith.maximumf %312, %313 : vector<1x32xf32>
    %c101 = arith.constant 101 : index
    %c0_273 = arith.constant 0 : index
    %315 = vector.load %arg12[%c101, %c0_273] : memref<264x32xf32, #tpu.memory_space<vmem>>, vector<1x32xf32>
    tpu.vector_store %arg12[%c101, %c0_273], %314 {strides = array<i32>} : memref<264x32xf32, #tpu.memory_space<vmem>>, vector<1x32xf32>,
    %c330 = arith.constant 330 : index
    %c0_274 = arith.constant 0 : index
    %316 = vector.load %arg11[%c330, %c0_274] : memref<896x32xf32, #tpu.memory_space<vmem>>, vector<1x32xf32>
    %c362 = arith.constant 362 : index
    %c0_275 = arith.constant 0 : index
    %317 = vector.load %arg11[%c362, %c0_275] : memref<896x32xf32, #tpu.memory_space<vmem>>, vector<1x32xf32>
    %318 = arith.maximumf %316, %317 : vector<1x32xf32>
    %c102_276 = arith.constant 102 : index
    %c0_277 = arith.constant 0 : index
    %319 = vector.load %arg12[%c102_276, %c0_277] : memref<264x32xf32, #tpu.memory_space<vmem>>, vector<1x32xf32>
    tpu.vector_store %arg12[%c102_276, %c0_277], %318 {strides = array<i32>} : memref<264x32xf32, #tpu.memory_space<vmem>>, vector<1x32xf32>,
    %c332 = arith.constant 332 : index
    %c0_278 = arith.constant 0 : index
    %320 = vector.load %arg11[%c332, %c0_278] : memref<896x32xf32, #tpu.memory_space<vmem>>, vector<1x32xf32>
    %c364 = arith.constant 364 : index
    %c0_279 = arith.constant 0 : index
    %321 = vector.load %arg11[%c364, %c0_279] : memref<896x32xf32, #tpu.memory_space<vmem>>, vector<1x32xf32>
    %322 = arith.maximumf %320, %321 : vector<1x32xf32>
    %c103 = arith.constant 103 : index
    %c0_280 = arith.constant 0 : index
    %323 = vector.load %arg12[%c103, %c0_280] : memref<264x32xf32, #tpu.memory_space<vmem>>, vector<1x32xf32>
    tpu.vector_store %arg12[%c103, %c0_280], %322 {strides = array<i32>} : memref<264x32xf32, #tpu.memory_space<vmem>>, vector<1x32xf32>,
    %c334 = arith.constant 334 : index
    %c0_281 = arith.constant 0 : index
    %324 = vector.load %arg11[%c334, %c0_281] : memref<896x32xf32, #tpu.memory_space<vmem>>, vector<1x32xf32>
    %c366 = arith.constant 366 : index
    %c0_282 = arith.constant 0 : index
    %325 = vector.load %arg11[%c366, %c0_282] : memref<896x32xf32, #tpu.memory_space<vmem>>, vector<1x32xf32>
    %326 = arith.maximumf %324, %325 : vector<1x32xf32>
    %c104_283 = arith.constant 104 : index
    %c0_284 = arith.constant 0 : index
    %327 = vector.load %arg12[%c104_283, %c0_284] : memref<264x32xf32, #tpu.memory_space<vmem>>, vector<1x32xf32>
    tpu.vector_store %arg12[%c104_283, %c0_284], %326 {strides = array<i32>} : memref<264x32xf32, #tpu.memory_space<vmem>>, vector<1x32xf32>,
    %c336 = arith.constant 336 : index
    %c0_285 = arith.constant 0 : index
    %328 = vector.load %arg11[%c336, %c0_285] : memref<896x32xf32, #tpu.memory_space<vmem>>, vector<1x32xf32>
    %c368 = arith.constant 368 : index
    %c0_286 = arith.constant 0 : index
    %329 = vector.load %arg11[%c368, %c0_286] : memref<896x32xf32, #tpu.memory_space<vmem>>, vector<1x32xf32>
    %330 = arith.maximumf %328, %329 : vector<1x32xf32>
    %c105 = arith.constant 105 : index
    %c0_287 = arith.constant 0 : index
    %331 = vector.load %arg12[%c105, %c0_287] : memref<264x32xf32, #tpu.memory_space<vmem>>, vector<1x32xf32>
    tpu.vector_store %arg12[%c105, %c0_287], %330 {strides = array<i32>} : memref<264x32xf32, #tpu.memory_space<vmem>>, vector<1x32xf32>,
    %c338 = arith.constant 338 : index
    %c0_288 = arith.constant 0 : index
    %332 = vector.load %arg11[%c338, %c0_288] : memref<896x32xf32, #tpu.memory_space<vmem>>, vector<1x32xf32>
    %c370 = arith.constant 370 : index
    %c0_289 = arith.constant 0 : index
    %333 = vector.load %arg11[%c370, %c0_289] : memref<896x32xf32, #tpu.memory_space<vmem>>, vector<1x32xf32>
    %334 = arith.maximumf %332, %333 : vector<1x32xf32>
    %c106_290 = arith.constant 106 : index
    %c0_291 = arith.constant 0 : index
    %335 = vector.load %arg12[%c106_290, %c0_291] : memref<264x32xf32, #tpu.memory_space<vmem>>, vector<1x32xf32>
    tpu.vector_store %arg12[%c106_290, %c0_291], %334 {strides = array<i32>} : memref<264x32xf32, #tpu.memory_space<vmem>>, vector<1x32xf32>,
    %c340 = arith.constant 340 : index
    %c0_292 = arith.constant 0 : index
    %336 = vector.load %arg11[%c340, %c0_292] : memref<896x32xf32, #tpu.memory_space<vmem>>, vector<1x32xf32>
    %c372 = arith.constant 372 : index
    %c0_293 = arith.constant 0 : index
    %337 = vector.load %arg11[%c372, %c0_293] : memref<896x32xf32, #tpu.memory_space<vmem>>, vector<1x32xf32>
    %338 = arith.maximumf %336, %337 : vector<1x32xf32>
    %c107 = arith.constant 107 : index
    %c0_294 = arith.constant 0 : index
    %339 = vector.load %arg12[%c107, %c0_294] : memref<264x32xf32, #tpu.memory_space<vmem>>, vector<1x32xf32>
    tpu.vector_store %arg12[%c107, %c0_294], %338 {strides = array<i32>} : memref<264x32xf32, #tpu.memory_space<vmem>>, vector<1x32xf32>,
    %c342 = arith.constant 342 : index
    %c0_295 = arith.constant 0 : index
    %340 = vector.load %arg11[%c342, %c0_295] : memref<896x32xf32, #tpu.memory_space<vmem>>, vector<1x32xf32>
    %c374 = arith.constant 374 : index
    %c0_296 = arith.constant 0 : index
    %341 = vector.load %arg11[%c374, %c0_296] : memref<896x32xf32, #tpu.memory_space<vmem>>, vector<1x32xf32>
    %342 = arith.maximumf %340, %341 : vector<1x32xf32>
    %c108_297 = arith.constant 108 : index
    %c0_298 = arith.constant 0 : index
    %343 = vector.load %arg12[%c108_297, %c0_298] : memref<264x32xf32, #tpu.memory_space<vmem>>, vector<1x32xf32>
    tpu.vector_store %arg12[%c108_297, %c0_298], %342 {strides = array<i32>} : memref<264x32xf32, #tpu.memory_space<vmem>>, vector<1x32xf32>,
    %c344 = arith.constant 344 : index
    %c0_299 = arith.constant 0 : index
    %344 = vector.load %arg11[%c344, %c0_299] : memref<896x32xf32, #tpu.memory_space<vmem>>, vector<1x32xf32>
    %c376 = arith.constant 376 : index
    %c0_300 = arith.constant 0 : index
    %345 = vector.load %arg11[%c376, %c0_300] : memref<896x32xf32, #tpu.memory_space<vmem>>, vector<1x32xf32>
    %346 = arith.maximumf %344, %345 : vector<1x32xf32>
    %c109 = arith.constant 109 : index
    %c0_301 = arith.constant 0 : index
    %347 = vector.load %arg12[%c109, %c0_301] : memref<264x32xf32, #tpu.memory_space<vmem>>, vector<1x32xf32>
    tpu.vector_store %arg12[%c109, %c0_301], %346 {strides = array<i32>} : memref<264x32xf32, #tpu.memory_space<vmem>>, vector<1x32xf32>,
    %c346 = arith.constant 346 : index
    %c0_302 = arith.constant 0 : index
    %348 = vector.load %arg11[%c346, %c0_302] : memref<896x32xf32, #tpu.memory_space<vmem>>, vector<1x32xf32>
    %c378 = arith.constant 378 : index
    %c0_303 = arith.constant 0 : index
    %349 = vector.load %arg11[%c378, %c0_303] : memref<896x32xf32, #tpu.memory_space<vmem>>, vector<1x32xf32>
    %350 = arith.maximumf %348, %349 : vector<1x32xf32>
    %c110_304 = arith.constant 110 : index
    %c0_305 = arith.constant 0 : index
    %351 = vector.load %arg12[%c110_304, %c0_305] : memref<264x32xf32, #tpu.memory_space<vmem>>, vector<1x32xf32>
    tpu.vector_store %arg12[%c110_304, %c0_305], %350 {strides = array<i32>} : memref<264x32xf32, #tpu.memory_space<vmem>>, vector<1x32xf32>,
    %c384 = arith.constant 384 : index
    %c0_306 = arith.constant 0 : index
    %352 = vector.load %arg11[%c384, %c0_306] : memref<896x32xf32, #tpu.memory_space<vmem>>, vector<1x32xf32>
    %c416 = arith.constant 416 : index
    %c0_307 = arith.constant 0 : index
    %353 = vector.load %arg11[%c416, %c0_307] : memref<896x32xf32, #tpu.memory_space<vmem>>, vector<1x32xf32>
    %354 = arith.maximumf %352, %353 : vector<1x32xf32>
    %c113 = arith.constant 113 : index
    %c0_308 = arith.constant 0 : index
    %355 = vector.load %arg12[%c113, %c0_308] : memref<264x32xf32, #tpu.memory_space<vmem>>, vector<1x32xf32>
    tpu.vector_store %arg12[%c113, %c0_308], %354 {strides = array<i32>} : memref<264x32xf32, #tpu.memory_space<vmem>>, vector<1x32xf32>,
    %c386 = arith.constant 386 : index
    %c0_309 = arith.constant 0 : index
    %356 = vector.load %arg11[%c386, %c0_309] : memref<896x32xf32, #tpu.memory_space<vmem>>, vector<1x32xf32>
    %c418 = arith.constant 418 : index
    %c0_310 = arith.constant 0 : index
    %357 = vector.load %arg11[%c418, %c0_310] : memref<896x32xf32, #tpu.memory_space<vmem>>, vector<1x32xf32>
    %358 = arith.maximumf %356, %357 : vector<1x32xf32>
    %c114_311 = arith.constant 114 : index
    %c0_312 = arith.constant 0 : index
    %359 = vector.load %arg12[%c114_311, %c0_312] : memref<264x32xf32, #tpu.memory_space<vmem>>, vector<1x32xf32>
    tpu.vector_store %arg12[%c114_311, %c0_312], %358 {strides = array<i32>} : memref<264x32xf32, #tpu.memory_space<vmem>>, vector<1x32xf32>,
    %c388 = arith.constant 388 : index
    %c0_313 = arith.constant 0 : index
    %360 = vector.load %arg11[%c388, %c0_313] : memref<896x32xf32, #tpu.memory_space<vmem>>, vector<1x32xf32>
    %c420 = arith.constant 420 : index
    %c0_314 = arith.constant 0 : index
    %361 = vector.load %arg11[%c420, %c0_314] : memref<896x32xf32, #tpu.memory_space<vmem>>, vector<1x32xf32>
    %362 = arith.maximumf %360, %361 : vector<1x32xf32>
    %c115 = arith.constant 115 : index
    %c0_315 = arith.constant 0 : index
    %363 = vector.load %arg12[%c115, %c0_315] : memref<264x32xf32, #tpu.memory_space<vmem>>, vector<1x32xf32>
    tpu.vector_store %arg12[%c115, %c0_315], %362 {strides = array<i32>} : memref<264x32xf32, #tpu.memory_space<vmem>>, vector<1x32xf32>,
    %c390 = arith.constant 390 : index
    %c0_316 = arith.constant 0 : index
    %364 = vector.load %arg11[%c390, %c0_316] : memref<896x32xf32, #tpu.memory_space<vmem>>, vector<1x32xf32>
    %c422 = arith.constant 422 : index
    %c0_317 = arith.constant 0 : index
    %365 = vector.load %arg11[%c422, %c0_317] : memref<896x32xf32, #tpu.memory_space<vmem>>, vector<1x32xf32>
    %366 = arith.maximumf %364, %365 : vector<1x32xf32>
    %c116_318 = arith.constant 116 : index
    %c0_319 = arith.constant 0 : index
    %367 = vector.load %arg12[%c116_318, %c0_319] : memref<264x32xf32, #tpu.memory_space<vmem>>, vector<1x32xf32>
    tpu.vector_store %arg12[%c116_318, %c0_319], %366 {strides = array<i32>} : memref<264x32xf32, #tpu.memory_space<vmem>>, vector<1x32xf32>,
    %c392 = arith.constant 392 : index
    %c0_320 = arith.constant 0 : index
    %368 = vector.load %arg11[%c392, %c0_320] : memref<896x32xf32, #tpu.memory_space<vmem>>, vector<1x32xf32>
    %c424 = arith.constant 424 : index
    %c0_321 = arith.constant 0 : index
    %369 = vector.load %arg11[%c424, %c0_321] : memref<896x32xf32, #tpu.memory_space<vmem>>, vector<1x32xf32>
    %370 = arith.maximumf %368, %369 : vector<1x32xf32>
    %c117 = arith.constant 117 : index
    %c0_322 = arith.constant 0 : index
    %371 = vector.load %arg12[%c117, %c0_322] : memref<264x32xf32, #tpu.memory_space<vmem>>, vector<1x32xf32>
    tpu.vector_store %arg12[%c117, %c0_322], %370 {strides = array<i32>} : memref<264x32xf32, #tpu.memory_space<vmem>>, vector<1x32xf32>,
    %c394 = arith.constant 394 : index
    %c0_323 = arith.constant 0 : index
    %372 = vector.load %arg11[%c394, %c0_323] : memref<896x32xf32, #tpu.memory_space<vmem>>, vector<1x32xf32>
    %c426 = arith.constant 426 : index
    %c0_324 = arith.constant 0 : index
    %373 = vector.load %arg11[%c426, %c0_324] : memref<896x32xf32, #tpu.memory_space<vmem>>, vector<1x32xf32>
    %374 = arith.maximumf %372, %373 : vector<1x32xf32>
    %c118_325 = arith.constant 118 : index
    %c0_326 = arith.constant 0 : index
    %375 = vector.load %arg12[%c118_325, %c0_326] : memref<264x32xf32, #tpu.memory_space<vmem>>, vector<1x32xf32>
    tpu.vector_store %arg12[%c118_325, %c0_326], %374 {strides = array<i32>} : memref<264x32xf32, #tpu.memory_space<vmem>>, vector<1x32xf32>,
    %c396 = arith.constant 396 : index
    %c0_327 = arith.constant 0 : index
    %376 = vector.load %arg11[%c396, %c0_327] : memref<896x32xf32, #tpu.memory_space<vmem>>, vector<1x32xf32>
    %c428 = arith.constant 428 : index
    %c0_328 = arith.constant 0 : index
    %377 = vector.load %arg11[%c428, %c0_328] : memref<896x32xf32, #tpu.memory_space<vmem>>, vector<1x32xf32>
    %378 = arith.maximumf %376, %377 : vector<1x32xf32>
    %c119 = arith.constant 119 : index
    %c0_329 = arith.constant 0 : index
    %379 = vector.load %arg12[%c119, %c0_329] : memref<264x32xf32, #tpu.memory_space<vmem>>, vector<1x32xf32>
    tpu.vector_store %arg12[%c119, %c0_329], %378 {strides = array<i32>} : memref<264x32xf32, #tpu.memory_space<vmem>>, vector<1x32xf32>,
    %c398 = arith.constant 398 : index
    %c0_330 = arith.constant 0 : index
    %380 = vector.load %arg11[%c398, %c0_330] : memref<896x32xf32, #tpu.memory_space<vmem>>, vector<1x32xf32>
    %c430 = arith.constant 430 : index
    %c0_331 = arith.constant 0 : index
    %381 = vector.load %arg11[%c430, %c0_331] : memref<896x32xf32, #tpu.memory_space<vmem>>, vector<1x32xf32>
    %382 = arith.maximumf %380, %381 : vector<1x32xf32>
    %c120_332 = arith.constant 120 : index
    %c0_333 = arith.constant 0 : index
    %383 = vector.load %arg12[%c120_332, %c0_333] : memref<264x32xf32, #tpu.memory_space<vmem>>, vector<1x32xf32>
    tpu.vector_store %arg12[%c120_332, %c0_333], %382 {strides = array<i32>} : memref<264x32xf32, #tpu.memory_space<vmem>>, vector<1x32xf32>,
    %c400 = arith.constant 400 : index
    %c0_334 = arith.constant 0 : index
    %384 = vector.load %arg11[%c400, %c0_334] : memref<896x32xf32, #tpu.memory_space<vmem>>, vector<1x32xf32>
    %c432 = arith.constant 432 : index
    %c0_335 = arith.constant 0 : index
    %385 = vector.load %arg11[%c432, %c0_335] : memref<896x32xf32, #tpu.memory_space<vmem>>, vector<1x32xf32>
    %386 = arith.maximumf %384, %385 : vector<1x32xf32>
    %c121 = arith.constant 121 : index
    %c0_336 = arith.constant 0 : index
    %387 = vector.load %arg12[%c121, %c0_336] : memref<264x32xf32, #tpu.memory_space<vmem>>, vector<1x32xf32>
    tpu.vector_store %arg12[%c121, %c0_336], %386 {strides = array<i32>} : memref<264x32xf32, #tpu.memory_space<vmem>>, vector<1x32xf32>,
    %c402 = arith.constant 402 : index
    %c0_337 = arith.constant 0 : index
    %388 = vector.load %arg11[%c402, %c0_337] : memref<896x32xf32, #tpu.memory_space<vmem>>, vector<1x32xf32>
    %c434 = arith.constant 434 : index
    %c0_338 = arith.constant 0 : index
    %389 = vector.load %arg11[%c434, %c0_338] : memref<896x32xf32, #tpu.memory_space<vmem>>, vector<1x32xf32>
    %390 = arith.maximumf %388, %389 : vector<1x32xf32>
    %c122_339 = arith.constant 122 : index
    %c0_340 = arith.constant 0 : index
    %391 = vector.load %arg12[%c122_339, %c0_340] : memref<264x32xf32, #tpu.memory_space<vmem>>, vector<1x32xf32>
    tpu.vector_store %arg12[%c122_339, %c0_340], %390 {strides = array<i32>} : memref<264x32xf32, #tpu.memory_space<vmem>>, vector<1x32xf32>,
    %c404 = arith.constant 404 : index
    %c0_341 = arith.constant 0 : index
    %392 = vector.load %arg11[%c404, %c0_341] : memref<896x32xf32, #tpu.memory_space<vmem>>, vector<1x32xf32>
    %c436 = arith.constant 436 : index
    %c0_342 = arith.constant 0 : index
    %393 = vector.load %arg11[%c436, %c0_342] : memref<896x32xf32, #tpu.memory_space<vmem>>, vector<1x32xf32>
    %394 = arith.maximumf %392, %393 : vector<1x32xf32>
    %c123 = arith.constant 123 : index
    %c0_343 = arith.constant 0 : index
    %395 = vector.load %arg12[%c123, %c0_343] : memref<264x32xf32, #tpu.memory_space<vmem>>, vector<1x32xf32>
    tpu.vector_store %arg12[%c123, %c0_343], %394 {strides = array<i32>} : memref<264x32xf32, #tpu.memory_space<vmem>>, vector<1x32xf32>,
    %c406 = arith.constant 406 : index
    %c0_344 = arith.constant 0 : index
    %396 = vector.load %arg11[%c406, %c0_344] : memref<896x32xf32, #tpu.memory_space<vmem>>, vector<1x32xf32>
    %c438 = arith.constant 438 : index
    %c0_345 = arith.constant 0 : index
    %397 = vector.load %arg11[%c438, %c0_345] : memref<896x32xf32, #tpu.memory_space<vmem>>, vector<1x32xf32>
    %398 = arith.maximumf %396, %397 : vector<1x32xf32>
    %c124 = arith.constant 124 : index
    %c0_346 = arith.constant 0 : index
    %399 = vector.load %arg12[%c124, %c0_346] : memref<264x32xf32, #tpu.memory_space<vmem>>, vector<1x32xf32>
    tpu.vector_store %arg12[%c124, %c0_346], %398 {strides = array<i32>} : memref<264x32xf32, #tpu.memory_space<vmem>>, vector<1x32xf32>,
    %c408 = arith.constant 408 : index
    %c0_347 = arith.constant 0 : index
    %400 = vector.load %arg11[%c408, %c0_347] : memref<896x32xf32, #tpu.memory_space<vmem>>, vector<1x32xf32>
    %c440 = arith.constant 440 : index
    %c0_348 = arith.constant 0 : index
    %401 = vector.load %arg11[%c440, %c0_348] : memref<896x32xf32, #tpu.memory_space<vmem>>, vector<1x32xf32>
    %402 = arith.maximumf %400, %401 : vector<1x32xf32>
    %c125 = arith.constant 125 : index
    %c0_349 = arith.constant 0 : index
    %403 = vector.load %arg12[%c125, %c0_349] : memref<264x32xf32, #tpu.memory_space<vmem>>, vector<1x32xf32>
    tpu.vector_store %arg12[%c125, %c0_349], %402 {strides = array<i32>} : memref<264x32xf32, #tpu.memory_space<vmem>>, vector<1x32xf32>,
    %c410 = arith.constant 410 : index
    %c0_350 = arith.constant 0 : index
    %404 = vector.load %arg11[%c410, %c0_350] : memref<896x32xf32, #tpu.memory_space<vmem>>, vector<1x32xf32>
    %c442 = arith.constant 442 : index
    %c0_351 = arith.constant 0 : index
    %405 = vector.load %arg11[%c442, %c0_351] : memref<896x32xf32, #tpu.memory_space<vmem>>, vector<1x32xf32>
    %406 = arith.maximumf %404, %405 : vector<1x32xf32>
    %c126 = arith.constant 126 : index
    %c0_352 = arith.constant 0 : index
    %407 = vector.load %arg12[%c126, %c0_352] : memref<264x32xf32, #tpu.memory_space<vmem>>, vector<1x32xf32>
    tpu.vector_store %arg12[%c126, %c0_352], %406 {strides = array<i32>} : memref<264x32xf32, #tpu.memory_space<vmem>>, vector<1x32xf32>,
    %c448 = arith.constant 448 : index
    %c0_353 = arith.constant 0 : index
    %408 = vector.load %arg11[%c448, %c0_353] : memref<896x32xf32, #tpu.memory_space<vmem>>, vector<1x32xf32>
    %c480 = arith.constant 480 : index
    %c0_354 = arith.constant 0 : index
    %409 = vector.load %arg11[%c480, %c0_354] : memref<896x32xf32, #tpu.memory_space<vmem>>, vector<1x32xf32>
    %410 = arith.maximumf %408, %409 : vector<1x32xf32>
    %c129 = arith.constant 129 : index
    %c0_355 = arith.constant 0 : index
    %411 = vector.load %arg12[%c129, %c0_355] : memref<264x32xf32, #tpu.memory_space<vmem>>, vector<1x32xf32>
    tpu.vector_store %arg12[%c129, %c0_355], %410 {strides = array<i32>} : memref<264x32xf32, #tpu.memory_space<vmem>>, vector<1x32xf32>,
    %c450 = arith.constant 450 : index
    %c0_356 = arith.constant 0 : index
    %412 = vector.load %arg11[%c450, %c0_356] : memref<896x32xf32, #tpu.memory_space<vmem>>, vector<1x32xf32>
    %c482 = arith.constant 482 : index
    %c0_357 = arith.constant 0 : index
    %413 = vector.load %arg11[%c482, %c0_357] : memref<896x32xf32, #tpu.memory_space<vmem>>, vector<1x32xf32>
    %414 = arith.maximumf %412, %413 : vector<1x32xf32>
    %c130_358 = arith.constant 130 : index
    %c0_359 = arith.constant 0 : index
    %415 = vector.load %arg12[%c130_358, %c0_359] : memref<264x32xf32, #tpu.memory_space<vmem>>, vector<1x32xf32>
    tpu.vector_store %arg12[%c130_358, %c0_359], %414 {strides = array<i32>} : memref<264x32xf32, #tpu.memory_space<vmem>>, vector<1x32xf32>,
    %c452 = arith.constant 452 : index
    %c0_360 = arith.constant 0 : index
    %416 = vector.load %arg11[%c452, %c0_360] : memref<896x32xf32, #tpu.memory_space<vmem>>, vector<1x32xf32>
    %c484 = arith.constant 484 : index
    %c0_361 = arith.constant 0 : index
    %417 = vector.load %arg11[%c484, %c0_361] : memref<896x32xf32, #tpu.memory_space<vmem>>, vector<1x32xf32>
    %418 = arith.maximumf %416, %417 : vector<1x32xf32>
    %c131 = arith.constant 131 : index
    %c0_362 = arith.constant 0 : index
    %419 = vector.load %arg12[%c131, %c0_362] : memref<264x32xf32, #tpu.memory_space<vmem>>, vector<1x32xf32>
    tpu.vector_store %arg12[%c131, %c0_362], %418 {strides = array<i32>} : memref<264x32xf32, #tpu.memory_space<vmem>>, vector<1x32xf32>,
    %c454 = arith.constant 454 : index
    %c0_363 = arith.constant 0 : index
    %420 = vector.load %arg11[%c454, %c0_363] : memref<896x32xf32, #tpu.memory_space<vmem>>, vector<1x32xf32>
    %c486 = arith.constant 486 : index
    %c0_364 = arith.constant 0 : index
    %421 = vector.load %arg11[%c486, %c0_364] : memref<896x32xf32, #tpu.memory_space<vmem>>, vector<1x32xf32>
    %422 = arith.maximumf %420, %421 : vector<1x32xf32>
    %c132_365 = arith.constant 132 : index
    %c0_366 = arith.constant 0 : index
    %423 = vector.load %arg12[%c132_365, %c0_366] : memref<264x32xf32, #tpu.memory_space<vmem>>, vector<1x32xf32>
    tpu.vector_store %arg12[%c132_365, %c0_366], %422 {strides = array<i32>} : memref<264x32xf32, #tpu.memory_space<vmem>>, vector<1x32xf32>,
    %c456 = arith.constant 456 : index
    %c0_367 = arith.constant 0 : index
    %424 = vector.load %arg11[%c456, %c0_367] : memref<896x32xf32, #tpu.memory_space<vmem>>, vector<1x32xf32>
    %c488 = arith.constant 488 : index
    %c0_368 = arith.constant 0 : index
    %425 = vector.load %arg11[%c488, %c0_368] : memref<896x32xf32, #tpu.memory_space<vmem>>, vector<1x32xf32>
    %426 = arith.maximumf %424, %425 : vector<1x32xf32>
    %c133 = arith.constant 133 : index
    %c0_369 = arith.constant 0 : index
    %427 = vector.load %arg12[%c133, %c0_369] : memref<264x32xf32, #tpu.memory_space<vmem>>, vector<1x32xf32>
    tpu.vector_store %arg12[%c133, %c0_369], %426 {strides = array<i32>} : memref<264x32xf32, #tpu.memory_space<vmem>>, vector<1x32xf32>,
    %c458 = arith.constant 458 : index
    %c0_370 = arith.constant 0 : index
    %428 = vector.load %arg11[%c458, %c0_370] : memref<896x32xf32, #tpu.memory_space<vmem>>, vector<1x32xf32>
    %c490 = arith.constant 490 : index
    %c0_371 = arith.constant 0 : index
    %429 = vector.load %arg11[%c490, %c0_371] : memref<896x32xf32, #tpu.memory_space<vmem>>, vector<1x32xf32>
    %430 = arith.maximumf %428, %429 : vector<1x32xf32>
    %c134_372 = arith.constant 134 : index
    %c0_373 = arith.constant 0 : index
    %431 = vector.load %arg12[%c134_372, %c0_373] : memref<264x32xf32, #tpu.memory_space<vmem>>, vector<1x32xf32>
    tpu.vector_store %arg12[%c134_372, %c0_373], %430 {strides = array<i32>} : memref<264x32xf32, #tpu.memory_space<vmem>>, vector<1x32xf32>,
    %c460 = arith.constant 460 : index
    %c0_374 = arith.constant 0 : index
    %432 = vector.load %arg11[%c460, %c0_374] : memref<896x32xf32, #tpu.memory_space<vmem>>, vector<1x32xf32>
    %c492 = arith.constant 492 : index
    %c0_375 = arith.constant 0 : index
    %433 = vector.load %arg11[%c492, %c0_375] : memref<896x32xf32, #tpu.memory_space<vmem>>, vector<1x32xf32>
    %434 = arith.maximumf %432, %433 : vector<1x32xf32>
    %c135 = arith.constant 135 : index
    %c0_376 = arith.constant 0 : index
    %435 = vector.load %arg12[%c135, %c0_376] : memref<264x32xf32, #tpu.memory_space<vmem>>, vector<1x32xf32>
    tpu.vector_store %arg12[%c135, %c0_376], %434 {strides = array<i32>} : memref<264x32xf32, #tpu.memory_space<vmem>>, vector<1x32xf32>,
    %c462 = arith.constant 462 : index
    %c0_377 = arith.constant 0 : index
    %436 = vector.load %arg11[%c462, %c0_377] : memref<896x32xf32, #tpu.memory_space<vmem>>, vector<1x32xf32>
    %c494 = arith.constant 494 : index
    %c0_378 = arith.constant 0 : index
    %437 = vector.load %arg11[%c494, %c0_378] : memref<896x32xf32, #tpu.memory_space<vmem>>, vector<1x32xf32>
    %438 = arith.maximumf %436, %437 : vector<1x32xf32>
    %c136_379 = arith.constant 136 : index
    %c0_380 = arith.constant 0 : index
    %439 = vector.load %arg12[%c136_379, %c0_380] : memref<264x32xf32, #tpu.memory_space<vmem>>, vector<1x32xf32>
    tpu.vector_store %arg12[%c136_379, %c0_380], %438 {strides = array<i32>} : memref<264x32xf32, #tpu.memory_space<vmem>>, vector<1x32xf32>,
    %c464 = arith.constant 464 : index
    %c0_381 = arith.constant 0 : index
    %440 = vector.load %arg11[%c464, %c0_381] : memref<896x32xf32, #tpu.memory_space<vmem>>, vector<1x32xf32>
    %c496 = arith.constant 496 : index
    %c0_382 = arith.constant 0 : index
    %441 = vector.load %arg11[%c496, %c0_382] : memref<896x32xf32, #tpu.memory_space<vmem>>, vector<1x32xf32>
    %442 = arith.maximumf %440, %441 : vector<1x32xf32>
    %c137 = arith.constant 137 : index
    %c0_383 = arith.constant 0 : index
    %443 = vector.load %arg12[%c137, %c0_383] : memref<264x32xf32, #tpu.memory_space<vmem>>, vector<1x32xf32>
    tpu.vector_store %arg12[%c137, %c0_383], %442 {strides = array<i32>} : memref<264x32xf32, #tpu.memory_space<vmem>>, vector<1x32xf32>,
    %c466 = arith.constant 466 : index
    %c0_384 = arith.constant 0 : index
    %444 = vector.load %arg11[%c466, %c0_384] : memref<896x32xf32, #tpu.memory_space<vmem>>, vector<1x32xf32>
    %c498 = arith.constant 498 : index
    %c0_385 = arith.constant 0 : index
    %445 = vector.load %arg11[%c498, %c0_385] : memref<896x32xf32, #tpu.memory_space<vmem>>, vector<1x32xf32>
    %446 = arith.maximumf %444, %445 : vector<1x32xf32>
    %c138_386 = arith.constant 138 : index
    %c0_387 = arith.constant 0 : index
    %447 = vector.load %arg12[%c138_386, %c0_387] : memref<264x32xf32, #tpu.memory_space<vmem>>, vector<1x32xf32>
    tpu.vector_store %arg12[%c138_386, %c0_387], %446 {strides = array<i32>} : memref<264x32xf32, #tpu.memory_space<vmem>>, vector<1x32xf32>,
    %c468 = arith.constant 468 : index
    %c0_388 = arith.constant 0 : index
    %448 = vector.load %arg11[%c468, %c0_388] : memref<896x32xf32, #tpu.memory_space<vmem>>, vector<1x32xf32>
    %c500 = arith.constant 500 : index
    %c0_389 = arith.constant 0 : index
    %449 = vector.load %arg11[%c500, %c0_389] : memref<896x32xf32, #tpu.memory_space<vmem>>, vector<1x32xf32>
    %450 = arith.maximumf %448, %449 : vector<1x32xf32>
    %c139 = arith.constant 139 : index
    %c0_390 = arith.constant 0 : index
    %451 = vector.load %arg12[%c139, %c0_390] : memref<264x32xf32, #tpu.memory_space<vmem>>, vector<1x32xf32>
    tpu.vector_store %arg12[%c139, %c0_390], %450 {strides = array<i32>} : memref<264x32xf32, #tpu.memory_space<vmem>>, vector<1x32xf32>,
    %c470 = arith.constant 470 : index
    %c0_391 = arith.constant 0 : index
    %452 = vector.load %arg11[%c470, %c0_391] : memref<896x32xf32, #tpu.memory_space<vmem>>, vector<1x32xf32>
    %c502 = arith.constant 502 : index
    %c0_392 = arith.constant 0 : index
    %453 = vector.load %arg11[%c502, %c0_392] : memref<896x32xf32, #tpu.memory_space<vmem>>, vector<1x32xf32>
    %454 = arith.maximumf %452, %453 : vector<1x32xf32>
    %c140_393 = arith.constant 140 : index
    %c0_394 = arith.constant 0 : index
    %455 = vector.load %arg12[%c140_393, %c0_394] : memref<264x32xf32, #tpu.memory_space<vmem>>, vector<1x32xf32>
    tpu.vector_store %arg12[%c140_393, %c0_394], %454 {strides = array<i32>} : memref<264x32xf32, #tpu.memory_space<vmem>>, vector<1x32xf32>,
    %c472 = arith.constant 472 : index
    %c0_395 = arith.constant 0 : index
    %456 = vector.load %arg11[%c472, %c0_395] : memref<896x32xf32, #tpu.memory_space<vmem>>, vector<1x32xf32>
    %c504 = arith.constant 504 : index
    %c0_396 = arith.constant 0 : index
    %457 = vector.load %arg11[%c504, %c0_396] : memref<896x32xf32, #tpu.memory_space<vmem>>, vector<1x32xf32>
    %458 = arith.maximumf %456, %457 : vector<1x32xf32>
    %c141 = arith.constant 141 : index
    %c0_397 = arith.constant 0 : index
    %459 = vector.load %arg12[%c141, %c0_397] : memref<264x32xf32, #tpu.memory_space<vmem>>, vector<1x32xf32>
    tpu.vector_store %arg12[%c141, %c0_397], %458 {strides = array<i32>} : memref<264x32xf32, #tpu.memory_space<vmem>>, vector<1x32xf32>,
    %c474 = arith.constant 474 : index
    %c0_398 = arith.constant 0 : index
    %460 = vector.load %arg11[%c474, %c0_398] : memref<896x32xf32, #tpu.memory_space<vmem>>, vector<1x32xf32>
    %c506 = arith.constant 506 : index
    %c0_399 = arith.constant 0 : index
    %461 = vector.load %arg11[%c506, %c0_399] : memref<896x32xf32, #tpu.memory_space<vmem>>, vector<1x32xf32>
    %462 = arith.maximumf %460, %461 : vector<1x32xf32>
    %c142_400 = arith.constant 142 : index
    %c0_401 = arith.constant 0 : index
    %463 = vector.load %arg12[%c142_400, %c0_401] : memref<264x32xf32, #tpu.memory_space<vmem>>, vector<1x32xf32>
    tpu.vector_store %arg12[%c142_400, %c0_401], %462 {strides = array<i32>} : memref<264x32xf32, #tpu.memory_space<vmem>>, vector<1x32xf32>,
    %c512 = arith.constant 512 : index
    %c0_402 = arith.constant 0 : index
    %464 = vector.load %arg11[%c512, %c0_402] : memref<896x32xf32, #tpu.memory_space<vmem>>, vector<1x32xf32>
    %c544 = arith.constant 544 : index
    %c0_403 = arith.constant 0 : index
    %465 = vector.load %arg11[%c544, %c0_403] : memref<896x32xf32, #tpu.memory_space<vmem>>, vector<1x32xf32>
    %466 = arith.maximumf %464, %465 : vector<1x32xf32>
    %c145 = arith.constant 145 : index
    %c0_404 = arith.constant 0 : index
    %467 = vector.load %arg12[%c145, %c0_404] : memref<264x32xf32, #tpu.memory_space<vmem>>, vector<1x32xf32>
    tpu.vector_store %arg12[%c145, %c0_404], %466 {strides = array<i32>} : memref<264x32xf32, #tpu.memory_space<vmem>>, vector<1x32xf32>,
    %c514 = arith.constant 514 : index
    %c0_405 = arith.constant 0 : index
    %468 = vector.load %arg11[%c514, %c0_405] : memref<896x32xf32, #tpu.memory_space<vmem>>, vector<1x32xf32>
    %c546 = arith.constant 546 : index
    %c0_406 = arith.constant 0 : index
    %469 = vector.load %arg11[%c546, %c0_406] : memref<896x32xf32, #tpu.memory_space<vmem>>, vector<1x32xf32>
    %470 = arith.maximumf %468, %469 : vector<1x32xf32>
    %c146_407 = arith.constant 146 : index
    %c0_408 = arith.constant 0 : index
    %471 = vector.load %arg12[%c146_407, %c0_408] : memref<264x32xf32, #tpu.memory_space<vmem>>, vector<1x32xf32>
    tpu.vector_store %arg12[%c146_407, %c0_408], %470 {strides = array<i32>} : memref<264x32xf32, #tpu.memory_space<vmem>>, vector<1x32xf32>,
    %c516 = arith.constant 516 : index
    %c0_409 = arith.constant 0 : index
    %472 = vector.load %arg11[%c516, %c0_409] : memref<896x32xf32, #tpu.memory_space<vmem>>, vector<1x32xf32>
    %c548 = arith.constant 548 : index
    %c0_410 = arith.constant 0 : index
    %473 = vector.load %arg11[%c548, %c0_410] : memref<896x32xf32, #tpu.memory_space<vmem>>, vector<1x32xf32>
    %474 = arith.maximumf %472, %473 : vector<1x32xf32>
    %c147 = arith.constant 147 : index
    %c0_411 = arith.constant 0 : index
    %475 = vector.load %arg12[%c147, %c0_411] : memref<264x32xf32, #tpu.memory_space<vmem>>, vector<1x32xf32>
    tpu.vector_store %arg12[%c147, %c0_411], %474 {strides = array<i32>} : memref<264x32xf32, #tpu.memory_space<vmem>>, vector<1x32xf32>,
    %c518 = arith.constant 518 : index
    %c0_412 = arith.constant 0 : index
    %476 = vector.load %arg11[%c518, %c0_412] : memref<896x32xf32, #tpu.memory_space<vmem>>, vector<1x32xf32>
    %c550 = arith.constant 550 : index
    %c0_413 = arith.constant 0 : index
    %477 = vector.load %arg11[%c550, %c0_413] : memref<896x32xf32, #tpu.memory_space<vmem>>, vector<1x32xf32>
    %478 = arith.maximumf %476, %477 : vector<1x32xf32>
    %c148_414 = arith.constant 148 : index
    %c0_415 = arith.constant 0 : index
    %479 = vector.load %arg12[%c148_414, %c0_415] : memref<264x32xf32, #tpu.memory_space<vmem>>, vector<1x32xf32>
    tpu.vector_store %arg12[%c148_414, %c0_415], %478 {strides = array<i32>} : memref<264x32xf32, #tpu.memory_space<vmem>>, vector<1x32xf32>,
    %c520 = arith.constant 520 : index
    %c0_416 = arith.constant 0 : index
    %480 = vector.load %arg11[%c520, %c0_416] : memref<896x32xf32, #tpu.memory_space<vmem>>, vector<1x32xf32>
    %c552 = arith.constant 552 : index
    %c0_417 = arith.constant 0 : index
    %481 = vector.load %arg11[%c552, %c0_417] : memref<896x32xf32, #tpu.memory_space<vmem>>, vector<1x32xf32>
    %482 = arith.maximumf %480, %481 : vector<1x32xf32>
    %c149 = arith.constant 149 : index
    %c0_418 = arith.constant 0 : index
    %483 = vector.load %arg12[%c149, %c0_418] : memref<264x32xf32, #tpu.memory_space<vmem>>, vector<1x32xf32>
    tpu.vector_store %arg12[%c149, %c0_418], %482 {strides = array<i32>} : memref<264x32xf32, #tpu.memory_space<vmem>>, vector<1x32xf32>,
    %c522 = arith.constant 522 : index
    %c0_419 = arith.constant 0 : index
    %484 = vector.load %arg11[%c522, %c0_419] : memref<896x32xf32, #tpu.memory_space<vmem>>, vector<1x32xf32>
    %c554 = arith.constant 554 : index
    %c0_420 = arith.constant 0 : index
    %485 = vector.load %arg11[%c554, %c0_420] : memref<896x32xf32, #tpu.memory_space<vmem>>, vector<1x32xf32>
    %486 = arith.maximumf %484, %485 : vector<1x32xf32>
    %c150_421 = arith.constant 150 : index
    %c0_422 = arith.constant 0 : index
    %487 = vector.load %arg12[%c150_421, %c0_422] : memref<264x32xf32, #tpu.memory_space<vmem>>, vector<1x32xf32>
    tpu.vector_store %arg12[%c150_421, %c0_422], %486 {strides = array<i32>} : memref<264x32xf32, #tpu.memory_space<vmem>>, vector<1x32xf32>,
    %c524 = arith.constant 524 : index
    %c0_423 = arith.constant 0 : index
    %488 = vector.load %arg11[%c524, %c0_423] : memref<896x32xf32, #tpu.memory_space<vmem>>, vector<1x32xf32>
    %c556 = arith.constant 556 : index
    %c0_424 = arith.constant 0 : index
    %489 = vector.load %arg11[%c556, %c0_424] : memref<896x32xf32, #tpu.memory_space<vmem>>, vector<1x32xf32>
    %490 = arith.maximumf %488, %489 : vector<1x32xf32>
    %c151 = arith.constant 151 : index
    %c0_425 = arith.constant 0 : index
    %491 = vector.load %arg12[%c151, %c0_425] : memref<264x32xf32, #tpu.memory_space<vmem>>, vector<1x32xf32>
    tpu.vector_store %arg12[%c151, %c0_425], %490 {strides = array<i32>} : memref<264x32xf32, #tpu.memory_space<vmem>>, vector<1x32xf32>,
    %c526 = arith.constant 526 : index
    %c0_426 = arith.constant 0 : index
    %492 = vector.load %arg11[%c526, %c0_426] : memref<896x32xf32, #tpu.memory_space<vmem>>, vector<1x32xf32>
    %c558 = arith.constant 558 : index
    %c0_427 = arith.constant 0 : index
    %493 = vector.load %arg11[%c558, %c0_427] : memref<896x32xf32, #tpu.memory_space<vmem>>, vector<1x32xf32>
    %494 = arith.maximumf %492, %493 : vector<1x32xf32>
    %c152_428 = arith.constant 152 : index
    %c0_429 = arith.constant 0 : index
    %495 = vector.load %arg12[%c152_428, %c0_429] : memref<264x32xf32, #tpu.memory_space<vmem>>, vector<1x32xf32>
    tpu.vector_store %arg12[%c152_428, %c0_429], %494 {strides = array<i32>} : memref<264x32xf32, #tpu.memory_space<vmem>>, vector<1x32xf32>,
    %c528 = arith.constant 528 : index
    %c0_430 = arith.constant 0 : index
    %496 = vector.load %arg11[%c528, %c0_430] : memref<896x32xf32, #tpu.memory_space<vmem>>, vector<1x32xf32>
    %c560 = arith.constant 560 : index
    %c0_431 = arith.constant 0 : index
    %497 = vector.load %arg11[%c560, %c0_431] : memref<896x32xf32, #tpu.memory_space<vmem>>, vector<1x32xf32>
    %498 = arith.maximumf %496, %497 : vector<1x32xf32>
    %c153 = arith.constant 153 : index
    %c0_432 = arith.constant 0 : index
    %499 = vector.load %arg12[%c153, %c0_432] : memref<264x32xf32, #tpu.memory_space<vmem>>, vector<1x32xf32>
    tpu.vector_store %arg12[%c153, %c0_432], %498 {strides = array<i32>} : memref<264x32xf32, #tpu.memory_space<vmem>>, vector<1x32xf32>,
    %c530 = arith.constant 530 : index
    %c0_433 = arith.constant 0 : index
    %500 = vector.load %arg11[%c530, %c0_433] : memref<896x32xf32, #tpu.memory_space<vmem>>, vector<1x32xf32>
    %c562 = arith.constant 562 : index
    %c0_434 = arith.constant 0 : index
    %501 = vector.load %arg11[%c562, %c0_434] : memref<896x32xf32, #tpu.memory_space<vmem>>, vector<1x32xf32>
    %502 = arith.maximumf %500, %501 : vector<1x32xf32>
    %c154_435 = arith.constant 154 : index
    %c0_436 = arith.constant 0 : index
    %503 = vector.load %arg12[%c154_435, %c0_436] : memref<264x32xf32, #tpu.memory_space<vmem>>, vector<1x32xf32>
    tpu.vector_store %arg12[%c154_435, %c0_436], %502 {strides = array<i32>} : memref<264x32xf32, #tpu.memory_space<vmem>>, vector<1x32xf32>,
    %c532 = arith.constant 532 : index
    %c0_437 = arith.constant 0 : index
    %504 = vector.load %arg11[%c532, %c0_437] : memref<896x32xf32, #tpu.memory_space<vmem>>, vector<1x32xf32>
    %c564 = arith.constant 564 : index
    %c0_438 = arith.constant 0 : index
    %505 = vector.load %arg11[%c564, %c0_438] : memref<896x32xf32, #tpu.memory_space<vmem>>, vector<1x32xf32>
    %506 = arith.maximumf %504, %505 : vector<1x32xf32>
    %c155 = arith.constant 155 : index
    %c0_439 = arith.constant 0 : index
    %507 = vector.load %arg12[%c155, %c0_439] : memref<264x32xf32, #tpu.memory_space<vmem>>, vector<1x32xf32>
    tpu.vector_store %arg12[%c155, %c0_439], %506 {strides = array<i32>} : memref<264x32xf32, #tpu.memory_space<vmem>>, vector<1x32xf32>,
    %c534 = arith.constant 534 : index
    %c0_440 = arith.constant 0 : index
    %508 = vector.load %arg11[%c534, %c0_440] : memref<896x32xf32, #tpu.memory_space<vmem>>, vector<1x32xf32>
    %c566 = arith.constant 566 : index
    %c0_441 = arith.constant 0 : index
    %509 = vector.load %arg11[%c566, %c0_441] : memref<896x32xf32, #tpu.memory_space<vmem>>, vector<1x32xf32>
    %510 = arith.maximumf %508, %509 : vector<1x32xf32>
    %c156 = arith.constant 156 : index
    %c0_442 = arith.constant 0 : index
    %511 = vector.load %arg12[%c156, %c0_442] : memref<264x32xf32, #tpu.memory_space<vmem>>, vector<1x32xf32>
    tpu.vector_store %arg12[%c156, %c0_442], %510 {strides = array<i32>} : memref<264x32xf32, #tpu.memory_space<vmem>>, vector<1x32xf32>,
    %c536 = arith.constant 536 : index
    %c0_443 = arith.constant 0 : index
    %512 = vector.load %arg11[%c536, %c0_443] : memref<896x32xf32, #tpu.memory_space<vmem>>, vector<1x32xf32>
    %c568 = arith.constant 568 : index
    %c0_444 = arith.constant 0 : index
    %513 = vector.load %arg11[%c568, %c0_444] : memref<896x32xf32, #tpu.memory_space<vmem>>, vector<1x32xf32>
    %514 = arith.maximumf %512, %513 : vector<1x32xf32>
    %c157 = arith.constant 157 : index
    %c0_445 = arith.constant 0 : index
    %515 = vector.load %arg12[%c157, %c0_445] : memref<264x32xf32, #tpu.memory_space<vmem>>, vector<1x32xf32>
    tpu.vector_store %arg12[%c157, %c0_445], %514 {strides = array<i32>} : memref<264x32xf32, #tpu.memory_space<vmem>>, vector<1x32xf32>,
    %c538 = arith.constant 538 : index
    %c0_446 = arith.constant 0 : index
    %516 = vector.load %arg11[%c538, %c0_446] : memref<896x32xf32, #tpu.memory_space<vmem>>, vector<1x32xf32>
    %c570 = arith.constant 570 : index
    %c0_447 = arith.constant 0 : index
    %517 = vector.load %arg11[%c570, %c0_447] : memref<896x32xf32, #tpu.memory_space<vmem>>, vector<1x32xf32>
    %518 = arith.maximumf %516, %517 : vector<1x32xf32>
    %c158 = arith.constant 158 : index
    %c0_448 = arith.constant 0 : index
    %519 = vector.load %arg12[%c158, %c0_448] : memref<264x32xf32, #tpu.memory_space<vmem>>, vector<1x32xf32>
    tpu.vector_store %arg12[%c158, %c0_448], %518 {strides = array<i32>} : memref<264x32xf32, #tpu.memory_space<vmem>>, vector<1x32xf32>,
    %c576 = arith.constant 576 : index
    %c0_449 = arith.constant 0 : index
    %520 = vector.load %arg11[%c576, %c0_449] : memref<896x32xf32, #tpu.memory_space<vmem>>, vector<1x32xf32>
    %c608 = arith.constant 608 : index
    %c0_450 = arith.constant 0 : index
    %521 = vector.load %arg11[%c608, %c0_450] : memref<896x32xf32, #tpu.memory_space<vmem>>, vector<1x32xf32>
    %522 = arith.maximumf %520, %521 : vector<1x32xf32>
    %c161 = arith.constant 161 : index
    %c0_451 = arith.constant 0 : index
    %523 = vector.load %arg12[%c161, %c0_451] : memref<264x32xf32, #tpu.memory_space<vmem>>, vector<1x32xf32>
    tpu.vector_store %arg12[%c161, %c0_451], %522 {strides = array<i32>} : memref<264x32xf32, #tpu.memory_space<vmem>>, vector<1x32xf32>,
    %c578 = arith.constant 578 : index
    %c0_452 = arith.constant 0 : index
    %524 = vector.load %arg11[%c578, %c0_452] : memref<896x32xf32, #tpu.memory_space<vmem>>, vector<1x32xf32>
    %c610 = arith.constant 610 : index
    %c0_453 = arith.constant 0 : index
    %525 = vector.load %arg11[%c610, %c0_453] : memref<896x32xf32, #tpu.memory_space<vmem>>, vector<1x32xf32>
    %526 = arith.maximumf %524, %525 : vector<1x32xf32>
    %c162_454 = arith.constant 162 : index
    %c0_455 = arith.constant 0 : index
    %527 = vector.load %arg12[%c162_454, %c0_455] : memref<264x32xf32, #tpu.memory_space<vmem>>, vector<1x32xf32>
    tpu.vector_store %arg12[%c162_454, %c0_455], %526 {strides = array<i32>} : memref<264x32xf32, #tpu.memory_space<vmem>>, vector<1x32xf32>,
    %c580 = arith.constant 580 : index
    %c0_456 = arith.constant 0 : index
    %528 = vector.load %arg11[%c580, %c0_456] : memref<896x32xf32, #tpu.memory_space<vmem>>, vector<1x32xf32>
    %c612 = arith.constant 612 : index
    %c0_457 = arith.constant 0 : index
    %529 = vector.load %arg11[%c612, %c0_457] : memref<896x32xf32, #tpu.memory_space<vmem>>, vector<1x32xf32>
    %530 = arith.maximumf %528, %529 : vector<1x32xf32>
    %c163 = arith.constant 163 : index
    %c0_458 = arith.constant 0 : index
    %531 = vector.load %arg12[%c163, %c0_458] : memref<264x32xf32, #tpu.memory_space<vmem>>, vector<1x32xf32>
    tpu.vector_store %arg12[%c163, %c0_458], %530 {strides = array<i32>} : memref<264x32xf32, #tpu.memory_space<vmem>>, vector<1x32xf32>,
    %c582 = arith.constant 582 : index
    %c0_459 = arith.constant 0 : index
    %532 = vector.load %arg11[%c582, %c0_459] : memref<896x32xf32, #tpu.memory_space<vmem>>, vector<1x32xf32>
    %c614 = arith.constant 614 : index
    %c0_460 = arith.constant 0 : index
    %533 = vector.load %arg11[%c614, %c0_460] : memref<896x32xf32, #tpu.memory_space<vmem>>, vector<1x32xf32>
    %534 = arith.maximumf %532, %533 : vector<1x32xf32>
    %c164_461 = arith.constant 164 : index
    %c0_462 = arith.constant 0 : index
    %535 = vector.load %arg12[%c164_461, %c0_462] : memref<264x32xf32, #tpu.memory_space<vmem>>, vector<1x32xf32>
    tpu.vector_store %arg12[%c164_461, %c0_462], %534 {strides = array<i32>} : memref<264x32xf32, #tpu.memory_space<vmem>>, vector<1x32xf32>,
    %c584 = arith.constant 584 : index
    %c0_463 = arith.constant 0 : index
    %536 = vector.load %arg11[%c584, %c0_463] : memref<896x32xf32, #tpu.memory_space<vmem>>, vector<1x32xf32>
    %c616 = arith.constant 616 : index
    %c0_464 = arith.constant 0 : index
    %537 = vector.load %arg11[%c616, %c0_464] : memref<896x32xf32, #tpu.memory_space<vmem>>, vector<1x32xf32>
    %538 = arith.maximumf %536, %537 : vector<1x32xf32>
    %c165 = arith.constant 165 : index
    %c0_465 = arith.constant 0 : index
    %539 = vector.load %arg12[%c165, %c0_465] : memref<264x32xf32, #tpu.memory_space<vmem>>, vector<1x32xf32>
    tpu.vector_store %arg12[%c165, %c0_465], %538 {strides = array<i32>} : memref<264x32xf32, #tpu.memory_space<vmem>>, vector<1x32xf32>,
    %c586 = arith.constant 586 : index
    %c0_466 = arith.constant 0 : index
    %540 = vector.load %arg11[%c586, %c0_466] : memref<896x32xf32, #tpu.memory_space<vmem>>, vector<1x32xf32>
    %c618 = arith.constant 618 : index
    %c0_467 = arith.constant 0 : index
    %541 = vector.load %arg11[%c618, %c0_467] : memref<896x32xf32, #tpu.memory_space<vmem>>, vector<1x32xf32>
    %542 = arith.maximumf %540, %541 : vector<1x32xf32>
    %c166_468 = arith.constant 166 : index
    %c0_469 = arith.constant 0 : index
    %543 = vector.load %arg12[%c166_468, %c0_469] : memref<264x32xf32, #tpu.memory_space<vmem>>, vector<1x32xf32>
    tpu.vector_store %arg12[%c166_468, %c0_469], %542 {strides = array<i32>} : memref<264x32xf32, #tpu.memory_space<vmem>>, vector<1x32xf32>,
    %c588 = arith.constant 588 : index
    %c0_470 = arith.constant 0 : index
    %544 = vector.load %arg11[%c588, %c0_470] : memref<896x32xf32, #tpu.memory_space<vmem>>, vector<1x32xf32>
    %c620 = arith.constant 620 : index
    %c0_471 = arith.constant 0 : index
    %545 = vector.load %arg11[%c620, %c0_471] : memref<896x32xf32, #tpu.memory_space<vmem>>, vector<1x32xf32>
    %546 = arith.maximumf %544, %545 : vector<1x32xf32>
    %c167 = arith.constant 167 : index
    %c0_472 = arith.constant 0 : index
    %547 = vector.load %arg12[%c167, %c0_472] : memref<264x32xf32, #tpu.memory_space<vmem>>, vector<1x32xf32>
    tpu.vector_store %arg12[%c167, %c0_472], %546 {strides = array<i32>} : memref<264x32xf32, #tpu.memory_space<vmem>>, vector<1x32xf32>,
    %c590 = arith.constant 590 : index
    %c0_473 = arith.constant 0 : index
    %548 = vector.load %arg11[%c590, %c0_473] : memref<896x32xf32, #tpu.memory_space<vmem>>, vector<1x32xf32>
    %c622 = arith.constant 622 : index
    %c0_474 = arith.constant 0 : index
    %549 = vector.load %arg11[%c622, %c0_474] : memref<896x32xf32, #tpu.memory_space<vmem>>, vector<1x32xf32>
    %550 = arith.maximumf %548, %549 : vector<1x32xf32>
    %c168_475 = arith.constant 168 : index
    %c0_476 = arith.constant 0 : index
    %551 = vector.load %arg12[%c168_475, %c0_476] : memref<264x32xf32, #tpu.memory_space<vmem>>, vector<1x32xf32>
    tpu.vector_store %arg12[%c168_475, %c0_476], %550 {strides = array<i32>} : memref<264x32xf32, #tpu.memory_space<vmem>>, vector<1x32xf32>,
    %c592 = arith.constant 592 : index
    %c0_477 = arith.constant 0 : index
    %552 = vector.load %arg11[%c592, %c0_477] : memref<896x32xf32, #tpu.memory_space<vmem>>, vector<1x32xf32>
    %c624 = arith.constant 624 : index
    %c0_478 = arith.constant 0 : index
    %553 = vector.load %arg11[%c624, %c0_478] : memref<896x32xf32, #tpu.memory_space<vmem>>, vector<1x32xf32>
    %554 = arith.maximumf %552, %553 : vector<1x32xf32>
    %c169 = arith.constant 169 : index
    %c0_479 = arith.constant 0 : index
    %555 = vector.load %arg12[%c169, %c0_479] : memref<264x32xf32, #tpu.memory_space<vmem>>, vector<1x32xf32>
    tpu.vector_store %arg12[%c169, %c0_479], %554 {strides = array<i32>} : memref<264x32xf32, #tpu.memory_space<vmem>>, vector<1x32xf32>,
    %c594 = arith.constant 594 : index
    %c0_480 = arith.constant 0 : index
    %556 = vector.load %arg11[%c594, %c0_480] : memref<896x32xf32, #tpu.memory_space<vmem>>, vector<1x32xf32>
    %c626 = arith.constant 626 : index
    %c0_481 = arith.constant 0 : index
    %557 = vector.load %arg11[%c626, %c0_481] : memref<896x32xf32, #tpu.memory_space<vmem>>, vector<1x32xf32>
    %558 = arith.maximumf %556, %557 : vector<1x32xf32>
    %c170_482 = arith.constant 170 : index
    %c0_483 = arith.constant 0 : index
    %559 = vector.load %arg12[%c170_482, %c0_483] : memref<264x32xf32, #tpu.memory_space<vmem>>, vector<1x32xf32>
    tpu.vector_store %arg12[%c170_482, %c0_483], %558 {strides = array<i32>} : memref<264x32xf32, #tpu.memory_space<vmem>>, vector<1x32xf32>,
    %c596 = arith.constant 596 : index
    %c0_484 = arith.constant 0 : index
    %560 = vector.load %arg11[%c596, %c0_484] : memref<896x32xf32, #tpu.memory_space<vmem>>, vector<1x32xf32>
    %c628 = arith.constant 628 : index
    %c0_485 = arith.constant 0 : index
    %561 = vector.load %arg11[%c628, %c0_485] : memref<896x32xf32, #tpu.memory_space<vmem>>, vector<1x32xf32>
    %562 = arith.maximumf %560, %561 : vector<1x32xf32>
    %c171 = arith.constant 171 : index
    %c0_486 = arith.constant 0 : index
    %563 = vector.load %arg12[%c171, %c0_486] : memref<264x32xf32, #tpu.memory_space<vmem>>, vector<1x32xf32>
    tpu.vector_store %arg12[%c171, %c0_486], %562 {strides = array<i32>} : memref<264x32xf32, #tpu.memory_space<vmem>>, vector<1x32xf32>,
    %c598 = arith.constant 598 : index
    %c0_487 = arith.constant 0 : index
    %564 = vector.load %arg11[%c598, %c0_487] : memref<896x32xf32, #tpu.memory_space<vmem>>, vector<1x32xf32>
    %c630 = arith.constant 630 : index
    %c0_488 = arith.constant 0 : index
    %565 = vector.load %arg11[%c630, %c0_488] : memref<896x32xf32, #tpu.memory_space<vmem>>, vector<1x32xf32>
    %566 = arith.maximumf %564, %565 : vector<1x32xf32>
    %c172_489 = arith.constant 172 : index
    %c0_490 = arith.constant 0 : index
    %567 = vector.load %arg12[%c172_489, %c0_490] : memref<264x32xf32, #tpu.memory_space<vmem>>, vector<1x32xf32>
    tpu.vector_store %arg12[%c172_489, %c0_490], %566 {strides = array<i32>} : memref<264x32xf32, #tpu.memory_space<vmem>>, vector<1x32xf32>,
    %c600 = arith.constant 600 : index
    %c0_491 = arith.constant 0 : index
    %568 = vector.load %arg11[%c600, %c0_491] : memref<896x32xf32, #tpu.memory_space<vmem>>, vector<1x32xf32>
    %c632 = arith.constant 632 : index
    %c0_492 = arith.constant 0 : index
    %569 = vector.load %arg11[%c632, %c0_492] : memref<896x32xf32, #tpu.memory_space<vmem>>, vector<1x32xf32>
    %570 = arith.maximumf %568, %569 : vector<1x32xf32>
    %c173 = arith.constant 173 : index
    %c0_493 = arith.constant 0 : index
    %571 = vector.load %arg12[%c173, %c0_493] : memref<264x32xf32, #tpu.memory_space<vmem>>, vector<1x32xf32>
    tpu.vector_store %arg12[%c173, %c0_493], %570 {strides = array<i32>} : memref<264x32xf32, #tpu.memory_space<vmem>>, vector<1x32xf32>,
    %c602 = arith.constant 602 : index
    %c0_494 = arith.constant 0 : index
    %572 = vector.load %arg11[%c602, %c0_494] : memref<896x32xf32, #tpu.memory_space<vmem>>, vector<1x32xf32>
    %c634 = arith.constant 634 : index
    %c0_495 = arith.constant 0 : index
    %573 = vector.load %arg11[%c634, %c0_495] : memref<896x32xf32, #tpu.memory_space<vmem>>, vector<1x32xf32>
    %574 = arith.maximumf %572, %573 : vector<1x32xf32>
    %c174_496 = arith.constant 174 : index
    %c0_497 = arith.constant 0 : index
    %575 = vector.load %arg12[%c174_496, %c0_497] : memref<264x32xf32, #tpu.memory_space<vmem>>, vector<1x32xf32>
    tpu.vector_store %arg12[%c174_496, %c0_497], %574 {strides = array<i32>} : memref<264x32xf32, #tpu.memory_space<vmem>>, vector<1x32xf32>,
    %c640 = arith.constant 640 : index
    %c0_498 = arith.constant 0 : index
    %576 = vector.load %arg11[%c640, %c0_498] : memref<896x32xf32, #tpu.memory_space<vmem>>, vector<1x32xf32>
    %c672 = arith.constant 672 : index
    %c0_499 = arith.constant 0 : index
    %577 = vector.load %arg11[%c672, %c0_499] : memref<896x32xf32, #tpu.memory_space<vmem>>, vector<1x32xf32>
    %578 = arith.maximumf %576, %577 : vector<1x32xf32>
    %c177 = arith.constant 177 : index
    %c0_500 = arith.constant 0 : index
    %579 = vector.load %arg12[%c177, %c0_500] : memref<264x32xf32, #tpu.memory_space<vmem>>, vector<1x32xf32>
    tpu.vector_store %arg12[%c177, %c0_500], %578 {strides = array<i32>} : memref<264x32xf32, #tpu.memory_space<vmem>>, vector<1x32xf32>,
    %c642 = arith.constant 642 : index
    %c0_501 = arith.constant 0 : index
    %580 = vector.load %arg11[%c642, %c0_501] : memref<896x32xf32, #tpu.memory_space<vmem>>, vector<1x32xf32>
    %c674 = arith.constant 674 : index
    %c0_502 = arith.constant 0 : index
    %581 = vector.load %arg11[%c674, %c0_502] : memref<896x32xf32, #tpu.memory_space<vmem>>, vector<1x32xf32>
    %582 = arith.maximumf %580, %581 : vector<1x32xf32>
    %c178_503 = arith.constant 178 : index
    %c0_504 = arith.constant 0 : index
    %583 = vector.load %arg12[%c178_503, %c0_504] : memref<264x32xf32, #tpu.memory_space<vmem>>, vector<1x32xf32>
    tpu.vector_store %arg12[%c178_503, %c0_504], %582 {strides = array<i32>} : memref<264x32xf32, #tpu.memory_space<vmem>>, vector<1x32xf32>,
    %c644 = arith.constant 644 : index
    %c0_505 = arith.constant 0 : index
    %584 = vector.load %arg11[%c644, %c0_505] : memref<896x32xf32, #tpu.memory_space<vmem>>, vector<1x32xf32>
    %c676 = arith.constant 676 : index
    %c0_506 = arith.constant 0 : index
    %585 = vector.load %arg11[%c676, %c0_506] : memref<896x32xf32, #tpu.memory_space<vmem>>, vector<1x32xf32>
    %586 = arith.maximumf %584, %585 : vector<1x32xf32>
    %c179 = arith.constant 179 : index
    %c0_507 = arith.constant 0 : index
    %587 = vector.load %arg12[%c179, %c0_507] : memref<264x32xf32, #tpu.memory_space<vmem>>, vector<1x32xf32>
    tpu.vector_store %arg12[%c179, %c0_507], %586 {strides = array<i32>} : memref<264x32xf32, #tpu.memory_space<vmem>>, vector<1x32xf32>,
    %c646 = arith.constant 646 : index
    %c0_508 = arith.constant 0 : index
    %588 = vector.load %arg11[%c646, %c0_508] : memref<896x32xf32, #tpu.memory_space<vmem>>, vector<1x32xf32>
    %c678 = arith.constant 678 : index
    %c0_509 = arith.constant 0 : index
    %589 = vector.load %arg11[%c678, %c0_509] : memref<896x32xf32, #tpu.memory_space<vmem>>, vector<1x32xf32>
    %590 = arith.maximumf %588, %589 : vector<1x32xf32>
    %c180_510 = arith.constant 180 : index
    %c0_511 = arith.constant 0 : index
    %591 = vector.load %arg12[%c180_510, %c0_511] : memref<264x32xf32, #tpu.memory_space<vmem>>, vector<1x32xf32>
    tpu.vector_store %arg12[%c180_510, %c0_511], %590 {strides = array<i32>} : memref<264x32xf32, #tpu.memory_space<vmem>>, vector<1x32xf32>,
    %c648 = arith.constant 648 : index
    %c0_512 = arith.constant 0 : index
    %592 = vector.load %arg11[%c648, %c0_512] : memref<896x32xf32, #tpu.memory_space<vmem>>, vector<1x32xf32>
    %c680 = arith.constant 680 : index
    %c0_513 = arith.constant 0 : index
    %593 = vector.load %arg11[%c680, %c0_513] : memref<896x32xf32, #tpu.memory_space<vmem>>, vector<1x32xf32>
    %594 = arith.maximumf %592, %593 : vector<1x32xf32>
    %c181 = arith.constant 181 : index
    %c0_514 = arith.constant 0 : index
    %595 = vector.load %arg12[%c181, %c0_514] : memref<264x32xf32, #tpu.memory_space<vmem>>, vector<1x32xf32>
    tpu.vector_store %arg12[%c181, %c0_514], %594 {strides = array<i32>} : memref<264x32xf32, #tpu.memory_space<vmem>>, vector<1x32xf32>,
    %c650 = arith.constant 650 : index
    %c0_515 = arith.constant 0 : index
    %596 = vector.load %arg11[%c650, %c0_515] : memref<896x32xf32, #tpu.memory_space<vmem>>, vector<1x32xf32>
    %c682 = arith.constant 682 : index
    %c0_516 = arith.constant 0 : index
    %597 = vector.load %arg11[%c682, %c0_516] : memref<896x32xf32, #tpu.memory_space<vmem>>, vector<1x32xf32>
    %598 = arith.maximumf %596, %597 : vector<1x32xf32>
    %c182_517 = arith.constant 182 : index
    %c0_518 = arith.constant 0 : index
    %599 = vector.load %arg12[%c182_517, %c0_518] : memref<264x32xf32, #tpu.memory_space<vmem>>, vector<1x32xf32>
    tpu.vector_store %arg12[%c182_517, %c0_518], %598 {strides = array<i32>} : memref<264x32xf32, #tpu.memory_space<vmem>>, vector<1x32xf32>,
    %c652 = arith.constant 652 : index
    %c0_519 = arith.constant 0 : index
    %600 = vector.load %arg11[%c652, %c0_519] : memref<896x32xf32, #tpu.memory_space<vmem>>, vector<1x32xf32>
    %c684 = arith.constant 684 : index
    %c0_520 = arith.constant 0 : index
    %601 = vector.load %arg11[%c684, %c0_520] : memref<896x32xf32, #tpu.memory_space<vmem>>, vector<1x32xf32>
    %602 = arith.maximumf %600, %601 : vector<1x32xf32>
    %c183 = arith.constant 183 : index
    %c0_521 = arith.constant 0 : index
    %603 = vector.load %arg12[%c183, %c0_521] : memref<264x32xf32, #tpu.memory_space<vmem>>, vector<1x32xf32>
    tpu.vector_store %arg12[%c183, %c0_521], %602 {strides = array<i32>} : memref<264x32xf32, #tpu.memory_space<vmem>>, vector<1x32xf32>,
    %c654 = arith.constant 654 : index
    %c0_522 = arith.constant 0 : index
    %604 = vector.load %arg11[%c654, %c0_522] : memref<896x32xf32, #tpu.memory_space<vmem>>, vector<1x32xf32>
    %c686 = arith.constant 686 : index
    %c0_523 = arith.constant 0 : index
    %605 = vector.load %arg11[%c686, %c0_523] : memref<896x32xf32, #tpu.memory_space<vmem>>, vector<1x32xf32>
    %606 = arith.maximumf %604, %605 : vector<1x32xf32>
    %c184_524 = arith.constant 184 : index
    %c0_525 = arith.constant 0 : index
    %607 = vector.load %arg12[%c184_524, %c0_525] : memref<264x32xf32, #tpu.memory_space<vmem>>, vector<1x32xf32>
    tpu.vector_store %arg12[%c184_524, %c0_525], %606 {strides = array<i32>} : memref<264x32xf32, #tpu.memory_space<vmem>>, vector<1x32xf32>,
    %c656 = arith.constant 656 : index
    %c0_526 = arith.constant 0 : index
    %608 = vector.load %arg11[%c656, %c0_526] : memref<896x32xf32, #tpu.memory_space<vmem>>, vector<1x32xf32>
    %c688 = arith.constant 688 : index
    %c0_527 = arith.constant 0 : index
    %609 = vector.load %arg11[%c688, %c0_527] : memref<896x32xf32, #tpu.memory_space<vmem>>, vector<1x32xf32>
    %610 = arith.maximumf %608, %609 : vector<1x32xf32>
    %c185 = arith.constant 185 : index
    %c0_528 = arith.constant 0 : index
    %611 = vector.load %arg12[%c185, %c0_528] : memref<264x32xf32, #tpu.memory_space<vmem>>, vector<1x32xf32>
    tpu.vector_store %arg12[%c185, %c0_528], %610 {strides = array<i32>} : memref<264x32xf32, #tpu.memory_space<vmem>>, vector<1x32xf32>,
    %c658 = arith.constant 658 : index
    %c0_529 = arith.constant 0 : index
    %612 = vector.load %arg11[%c658, %c0_529] : memref<896x32xf32, #tpu.memory_space<vmem>>, vector<1x32xf32>
    %c690 = arith.constant 690 : index
    %c0_530 = arith.constant 0 : index
    %613 = vector.load %arg11[%c690, %c0_530] : memref<896x32xf32, #tpu.memory_space<vmem>>, vector<1x32xf32>
    %614 = arith.maximumf %612, %613 : vector<1x32xf32>
    %c186_531 = arith.constant 186 : index
    %c0_532 = arith.constant 0 : index
    %615 = vector.load %arg12[%c186_531, %c0_532] : memref<264x32xf32, #tpu.memory_space<vmem>>, vector<1x32xf32>
    tpu.vector_store %arg12[%c186_531, %c0_532], %614 {strides = array<i32>} : memref<264x32xf32, #tpu.memory_space<vmem>>, vector<1x32xf32>,
    %c660 = arith.constant 660 : index
    %c0_533 = arith.constant 0 : index
    %616 = vector.load %arg11[%c660, %c0_533] : memref<896x32xf32, #tpu.memory_space<vmem>>, vector<1x32xf32>
    %c692 = arith.constant 692 : index
    %c0_534 = arith.constant 0 : index
    %617 = vector.load %arg11[%c692, %c0_534] : memref<896x32xf32, #tpu.memory_space<vmem>>, vector<1x32xf32>
    %618 = arith.maximumf %616, %617 : vector<1x32xf32>
    %c187 = arith.constant 187 : index
    %c0_535 = arith.constant 0 : index
    %619 = vector.load %arg12[%c187, %c0_535] : memref<264x32xf32, #tpu.memory_space<vmem>>, vector<1x32xf32>
    tpu.vector_store %arg12[%c187, %c0_535], %618 {strides = array<i32>} : memref<264x32xf32, #tpu.memory_space<vmem>>, vector<1x32xf32>,
    %c662 = arith.constant 662 : index
    %c0_536 = arith.constant 0 : index
    %620 = vector.load %arg11[%c662, %c0_536] : memref<896x32xf32, #tpu.memory_space<vmem>>, vector<1x32xf32>
    %c694 = arith.constant 694 : index
    %c0_537 = arith.constant 0 : index
    %621 = vector.load %arg11[%c694, %c0_537] : memref<896x32xf32, #tpu.memory_space<vmem>>, vector<1x32xf32>
    %622 = arith.maximumf %620, %621 : vector<1x32xf32>
    %c188 = arith.constant 188 : index
    %c0_538 = arith.constant 0 : index
    %623 = vector.load %arg12[%c188, %c0_538] : memref<264x32xf32, #tpu.memory_space<vmem>>, vector<1x32xf32>
    tpu.vector_store %arg12[%c188, %c0_538], %622 {strides = array<i32>} : memref<264x32xf32, #tpu.memory_space<vmem>>, vector<1x32xf32>,
    %c664 = arith.constant 664 : index
    %c0_539 = arith.constant 0 : index
    %624 = vector.load %arg11[%c664, %c0_539] : memref<896x32xf32, #tpu.memory_space<vmem>>, vector<1x32xf32>
    %c696 = arith.constant 696 : index
    %c0_540 = arith.constant 0 : index
    %625 = vector.load %arg11[%c696, %c0_540] : memref<896x32xf32, #tpu.memory_space<vmem>>, vector<1x32xf32>
    %626 = arith.maximumf %624, %625 : vector<1x32xf32>
    %c189 = arith.constant 189 : index
    %c0_541 = arith.constant 0 : index
    %627 = vector.load %arg12[%c189, %c0_541] : memref<264x32xf32, #tpu.memory_space<vmem>>, vector<1x32xf32>
    tpu.vector_store %arg12[%c189, %c0_541], %626 {strides = array<i32>} : memref<264x32xf32, #tpu.memory_space<vmem>>, vector<1x32xf32>,
    %c666 = arith.constant 666 : index
    %c0_542 = arith.constant 0 : index
    %628 = vector.load %arg11[%c666, %c0_542] : memref<896x32xf32, #tpu.memory_space<vmem>>, vector<1x32xf32>
    %c698 = arith.constant 698 : index
    %c0_543 = arith.constant 0 : index
    %629 = vector.load %arg11[%c698, %c0_543] : memref<896x32xf32, #tpu.memory_space<vmem>>, vector<1x32xf32>
    %630 = arith.maximumf %628, %629 : vector<1x32xf32>
    %c190 = arith.constant 190 : index
    %c0_544 = arith.constant 0 : index
    %631 = vector.load %arg12[%c190, %c0_544] : memref<264x32xf32, #tpu.memory_space<vmem>>, vector<1x32xf32>
    tpu.vector_store %arg12[%c190, %c0_544], %630 {strides = array<i32>} : memref<264x32xf32, #tpu.memory_space<vmem>>, vector<1x32xf32>,
    %c704 = arith.constant 704 : index
    %c0_545 = arith.constant 0 : index
    %632 = vector.load %arg11[%c704, %c0_545] : memref<896x32xf32, #tpu.memory_space<vmem>>, vector<1x32xf32>
    %c736 = arith.constant 736 : index
    %c0_546 = arith.constant 0 : index
    %633 = vector.load %arg11[%c736, %c0_546] : memref<896x32xf32, #tpu.memory_space<vmem>>, vector<1x32xf32>
    %634 = arith.maximumf %632, %633 : vector<1x32xf32>
    %c193 = arith.constant 193 : index
    %c0_547 = arith.constant 0 : index
    %635 = vector.load %arg12[%c193, %c0_547] : memref<264x32xf32, #tpu.memory_space<vmem>>, vector<1x32xf32>
    tpu.vector_store %arg12[%c193, %c0_547], %634 {strides = array<i32>} : memref<264x32xf32, #tpu.memory_space<vmem>>, vector<1x32xf32>,
    %c706 = arith.constant 706 : index
    %c0_548 = arith.constant 0 : index
    %636 = vector.load %arg11[%c706, %c0_548] : memref<896x32xf32, #tpu.memory_space<vmem>>, vector<1x32xf32>
    %c738 = arith.constant 738 : index
    %c0_549 = arith.constant 0 : index
    %637 = vector.load %arg11[%c738, %c0_549] : memref<896x32xf32, #tpu.memory_space<vmem>>, vector<1x32xf32>
    %638 = arith.maximumf %636, %637 : vector<1x32xf32>
    %c194_550 = arith.constant 194 : index
    %c0_551 = arith.constant 0 : index
    %639 = vector.load %arg12[%c194_550, %c0_551] : memref<264x32xf32, #tpu.memory_space<vmem>>, vector<1x32xf32>
    tpu.vector_store %arg12[%c194_550, %c0_551], %638 {strides = array<i32>} : memref<264x32xf32, #tpu.memory_space<vmem>>, vector<1x32xf32>,
    %c708 = arith.constant 708 : index
    %c0_552 = arith.constant 0 : index
    %640 = vector.load %arg11[%c708, %c0_552] : memref<896x32xf32, #tpu.memory_space<vmem>>, vector<1x32xf32>
    %c740 = arith.constant 740 : index
    %c0_553 = arith.constant 0 : index
    %641 = vector.load %arg11[%c740, %c0_553] : memref<896x32xf32, #tpu.memory_space<vmem>>, vector<1x32xf32>
    %642 = arith.maximumf %640, %641 : vector<1x32xf32>
    %c195 = arith.constant 195 : index
    %c0_554 = arith.constant 0 : index
    %643 = vector.load %arg12[%c195, %c0_554] : memref<264x32xf32, #tpu.memory_space<vmem>>, vector<1x32xf32>
    tpu.vector_store %arg12[%c195, %c0_554], %642 {strides = array<i32>} : memref<264x32xf32, #tpu.memory_space<vmem>>, vector<1x32xf32>,
    %c710 = arith.constant 710 : index
    %c0_555 = arith.constant 0 : index
    %644 = vector.load %arg11[%c710, %c0_555] : memref<896x32xf32, #tpu.memory_space<vmem>>, vector<1x32xf32>
    %c742 = arith.constant 742 : index
    %c0_556 = arith.constant 0 : index
    %645 = vector.load %arg11[%c742, %c0_556] : memref<896x32xf32, #tpu.memory_space<vmem>>, vector<1x32xf32>
    %646 = arith.maximumf %644, %645 : vector<1x32xf32>
    %c196_557 = arith.constant 196 : index
    %c0_558 = arith.constant 0 : index
    %647 = vector.load %arg12[%c196_557, %c0_558] : memref<264x32xf32, #tpu.memory_space<vmem>>, vector<1x32xf32>
    tpu.vector_store %arg12[%c196_557, %c0_558], %646 {strides = array<i32>} : memref<264x32xf32, #tpu.memory_space<vmem>>, vector<1x32xf32>,
    %c712 = arith.constant 712 : index
    %c0_559 = arith.constant 0 : index
    %648 = vector.load %arg11[%c712, %c0_559] : memref<896x32xf32, #tpu.memory_space<vmem>>, vector<1x32xf32>
    %c744 = arith.constant 744 : index
    %c0_560 = arith.constant 0 : index
    %649 = vector.load %arg11[%c744, %c0_560] : memref<896x32xf32, #tpu.memory_space<vmem>>, vector<1x32xf32>
    %650 = arith.maximumf %648, %649 : vector<1x32xf32>
    %c197 = arith.constant 197 : index
    %c0_561 = arith.constant 0 : index
    %651 = vector.load %arg12[%c197, %c0_561] : memref<264x32xf32, #tpu.memory_space<vmem>>, vector<1x32xf32>
    tpu.vector_store %arg12[%c197, %c0_561], %650 {strides = array<i32>} : memref<264x32xf32, #tpu.memory_space<vmem>>, vector<1x32xf32>,
    %c714 = arith.constant 714 : index
    %c0_562 = arith.constant 0 : index
    %652 = vector.load %arg11[%c714, %c0_562] : memref<896x32xf32, #tpu.memory_space<vmem>>, vector<1x32xf32>
    %c746 = arith.constant 746 : index
    %c0_563 = arith.constant 0 : index
    %653 = vector.load %arg11[%c746, %c0_563] : memref<896x32xf32, #tpu.memory_space<vmem>>, vector<1x32xf32>
    %654 = arith.maximumf %652, %653 : vector<1x32xf32>
    %c198_564 = arith.constant 198 : index
    %c0_565 = arith.constant 0 : index
    %655 = vector.load %arg12[%c198_564, %c0_565] : memref<264x32xf32, #tpu.memory_space<vmem>>, vector<1x32xf32>
    tpu.vector_store %arg12[%c198_564, %c0_565], %654 {strides = array<i32>} : memref<264x32xf32, #tpu.memory_space<vmem>>, vector<1x32xf32>,
    %c716 = arith.constant 716 : index
    %c0_566 = arith.constant 0 : index
    %656 = vector.load %arg11[%c716, %c0_566] : memref<896x32xf32, #tpu.memory_space<vmem>>, vector<1x32xf32>
    %c748 = arith.constant 748 : index
    %c0_567 = arith.constant 0 : index
    %657 = vector.load %arg11[%c748, %c0_567] : memref<896x32xf32, #tpu.memory_space<vmem>>, vector<1x32xf32>
    %658 = arith.maximumf %656, %657 : vector<1x32xf32>
    %c199 = arith.constant 199 : index
    %c0_568 = arith.constant 0 : index
    %659 = vector.load %arg12[%c199, %c0_568] : memref<264x32xf32, #tpu.memory_space<vmem>>, vector<1x32xf32>
    tpu.vector_store %arg12[%c199, %c0_568], %658 {strides = array<i32>} : memref<264x32xf32, #tpu.memory_space<vmem>>, vector<1x32xf32>,
    %c718 = arith.constant 718 : index
    %c0_569 = arith.constant 0 : index
    %660 = vector.load %arg11[%c718, %c0_569] : memref<896x32xf32, #tpu.memory_space<vmem>>, vector<1x32xf32>
    %c750 = arith.constant 750 : index
    %c0_570 = arith.constant 0 : index
    %661 = vector.load %arg11[%c750, %c0_570] : memref<896x32xf32, #tpu.memory_space<vmem>>, vector<1x32xf32>
    %662 = arith.maximumf %660, %661 : vector<1x32xf32>
    %c200_571 = arith.constant 200 : index
    %c0_572 = arith.constant 0 : index
    %663 = vector.load %arg12[%c200_571, %c0_572] : memref<264x32xf32, #tpu.memory_space<vmem>>, vector<1x32xf32>
    tpu.vector_store %arg12[%c200_571, %c0_572], %662 {strides = array<i32>} : memref<264x32xf32, #tpu.memory_space<vmem>>, vector<1x32xf32>,
    %c720 = arith.constant 720 : index
    %c0_573 = arith.constant 0 : index
    %664 = vector.load %arg11[%c720, %c0_573] : memref<896x32xf32, #tpu.memory_space<vmem>>, vector<1x32xf32>
    %c752 = arith.constant 752 : index
    %c0_574 = arith.constant 0 : index
    %665 = vector.load %arg11[%c752, %c0_574] : memref<896x32xf32, #tpu.memory_space<vmem>>, vector<1x32xf32>
    %666 = arith.maximumf %664, %665 : vector<1x32xf32>
    %c201 = arith.constant 201 : index
    %c0_575 = arith.constant 0 : index
    %667 = vector.load %arg12[%c201, %c0_575] : memref<264x32xf32, #tpu.memory_space<vmem>>, vector<1x32xf32>
    tpu.vector_store %arg12[%c201, %c0_575], %666 {strides = array<i32>} : memref<264x32xf32, #tpu.memory_space<vmem>>, vector<1x32xf32>,
    %c722 = arith.constant 722 : index
    %c0_576 = arith.constant 0 : index
    %668 = vector.load %arg11[%c722, %c0_576] : memref<896x32xf32, #tpu.memory_space<vmem>>, vector<1x32xf32>
    %c754 = arith.constant 754 : index
    %c0_577 = arith.constant 0 : index
    %669 = vector.load %arg11[%c754, %c0_577] : memref<896x32xf32, #tpu.memory_space<vmem>>, vector<1x32xf32>
    %670 = arith.maximumf %668, %669 : vector<1x32xf32>
    %c202_578 = arith.constant 202 : index
    %c0_579 = arith.constant 0 : index
    %671 = vector.load %arg12[%c202_578, %c0_579] : memref<264x32xf32, #tpu.memory_space<vmem>>, vector<1x32xf32>
    tpu.vector_store %arg12[%c202_578, %c0_579], %670 {strides = array<i32>} : memref<264x32xf32, #tpu.memory_space<vmem>>, vector<1x32xf32>,
    %c724 = arith.constant 724 : index
    %c0_580 = arith.constant 0 : index
    %672 = vector.load %arg11[%c724, %c0_580] : memref<896x32xf32, #tpu.memory_space<vmem>>, vector<1x32xf32>
    %c756 = arith.constant 756 : index
    %c0_581 = arith.constant 0 : index
    %673 = vector.load %arg11[%c756, %c0_581] : memref<896x32xf32, #tpu.memory_space<vmem>>, vector<1x32xf32>
    %674 = arith.maximumf %672, %673 : vector<1x32xf32>
    %c203 = arith.constant 203 : index
    %c0_582 = arith.constant 0 : index
    %675 = vector.load %arg12[%c203, %c0_582] : memref<264x32xf32, #tpu.memory_space<vmem>>, vector<1x32xf32>
    tpu.vector_store %arg12[%c203, %c0_582], %674 {strides = array<i32>} : memref<264x32xf32, #tpu.memory_space<vmem>>, vector<1x32xf32>,
    %c726 = arith.constant 726 : index
    %c0_583 = arith.constant 0 : index
    %676 = vector.load %arg11[%c726, %c0_583] : memref<896x32xf32, #tpu.memory_space<vmem>>, vector<1x32xf32>
    %c758 = arith.constant 758 : index
    %c0_584 = arith.constant 0 : index
    %677 = vector.load %arg11[%c758, %c0_584] : memref<896x32xf32, #tpu.memory_space<vmem>>, vector<1x32xf32>
    %678 = arith.maximumf %676, %677 : vector<1x32xf32>
    %c204_585 = arith.constant 204 : index
    %c0_586 = arith.constant 0 : index
    %679 = vector.load %arg12[%c204_585, %c0_586] : memref<264x32xf32, #tpu.memory_space<vmem>>, vector<1x32xf32>
    tpu.vector_store %arg12[%c204_585, %c0_586], %678 {strides = array<i32>} : memref<264x32xf32, #tpu.memory_space<vmem>>, vector<1x32xf32>,
    %c728 = arith.constant 728 : index
    %c0_587 = arith.constant 0 : index
    %680 = vector.load %arg11[%c728, %c0_587] : memref<896x32xf32, #tpu.memory_space<vmem>>, vector<1x32xf32>
    %c760 = arith.constant 760 : index
    %c0_588 = arith.constant 0 : index
    %681 = vector.load %arg11[%c760, %c0_588] : memref<896x32xf32, #tpu.memory_space<vmem>>, vector<1x32xf32>
    %682 = arith.maximumf %680, %681 : vector<1x32xf32>
    %c205 = arith.constant 205 : index
    %c0_589 = arith.constant 0 : index
    %683 = vector.load %arg12[%c205, %c0_589] : memref<264x32xf32, #tpu.memory_space<vmem>>, vector<1x32xf32>
    tpu.vector_store %arg12[%c205, %c0_589], %682 {strides = array<i32>} : memref<264x32xf32, #tpu.memory_space<vmem>>, vector<1x32xf32>,
    %c730 = arith.constant 730 : index
    %c0_590 = arith.constant 0 : index
    %684 = vector.load %arg11[%c730, %c0_590] : memref<896x32xf32, #tpu.memory_space<vmem>>, vector<1x32xf32>
    %c762 = arith.constant 762 : index
    %c0_591 = arith.constant 0 : index
    %685 = vector.load %arg11[%c762, %c0_591] : memref<896x32xf32, #tpu.memory_space<vmem>>, vector<1x32xf32>
    %686 = arith.maximumf %684, %685 : vector<1x32xf32>
    %c206_592 = arith.constant 206 : index
    %c0_593 = arith.constant 0 : index
    %687 = vector.load %arg12[%c206_592, %c0_593] : memref<264x32xf32, #tpu.memory_space<vmem>>, vector<1x32xf32>
    tpu.vector_store %arg12[%c206_592, %c0_593], %686 {strides = array<i32>} : memref<264x32xf32, #tpu.memory_space<vmem>>, vector<1x32xf32>,
    %c768 = arith.constant 768 : index
    %c0_594 = arith.constant 0 : index
    %688 = vector.load %arg11[%c768, %c0_594] : memref<896x32xf32, #tpu.memory_space<vmem>>, vector<1x32xf32>
    %c800 = arith.constant 800 : index
    %c0_595 = arith.constant 0 : index
    %689 = vector.load %arg11[%c800, %c0_595] : memref<896x32xf32, #tpu.memory_space<vmem>>, vector<1x32xf32>
    %690 = arith.maximumf %688, %689 : vector<1x32xf32>
    %c209 = arith.constant 209 : index
    %c0_596 = arith.constant 0 : index
    %691 = vector.load %arg12[%c209, %c0_596] : memref<264x32xf32, #tpu.memory_space<vmem>>, vector<1x32xf32>
    tpu.vector_store %arg12[%c209, %c0_596], %690 {strides = array<i32>} : memref<264x32xf32, #tpu.memory_space<vmem>>, vector<1x32xf32>,
    %c770 = arith.constant 770 : index
    %c0_597 = arith.constant 0 : index
    %692 = vector.load %arg11[%c770, %c0_597] : memref<896x32xf32, #tpu.memory_space<vmem>>, vector<1x32xf32>
    %c802 = arith.constant 802 : index
    %c0_598 = arith.constant 0 : index
    %693 = vector.load %arg11[%c802, %c0_598] : memref<896x32xf32, #tpu.memory_space<vmem>>, vector<1x32xf32>
    %694 = arith.maximumf %692, %693 : vector<1x32xf32>
    %c210_599 = arith.constant 210 : index
    %c0_600 = arith.constant 0 : index
    %695 = vector.load %arg12[%c210_599, %c0_600] : memref<264x32xf32, #tpu.memory_space<vmem>>, vector<1x32xf32>
    tpu.vector_store %arg12[%c210_599, %c0_600], %694 {strides = array<i32>} : memref<264x32xf32, #tpu.memory_space<vmem>>, vector<1x32xf32>,
    %c772 = arith.constant 772 : index
    %c0_601 = arith.constant 0 : index
    %696 = vector.load %arg11[%c772, %c0_601] : memref<896x32xf32, #tpu.memory_space<vmem>>, vector<1x32xf32>
    %c804 = arith.constant 804 : index
    %c0_602 = arith.constant 0 : index
    %697 = vector.load %arg11[%c804, %c0_602] : memref<896x32xf32, #tpu.memory_space<vmem>>, vector<1x32xf32>
    %698 = arith.maximumf %696, %697 : vector<1x32xf32>
    %c211 = arith.constant 211 : index
    %c0_603 = arith.constant 0 : index
    %699 = vector.load %arg12[%c211, %c0_603] : memref<264x32xf32, #tpu.memory_space<vmem>>, vector<1x32xf32>
    tpu.vector_store %arg12[%c211, %c0_603], %698 {strides = array<i32>} : memref<264x32xf32, #tpu.memory_space<vmem>>, vector<1x32xf32>,
    %c774 = arith.constant 774 : index
    %c0_604 = arith.constant 0 : index
    %700 = vector.load %arg11[%c774, %c0_604] : memref<896x32xf32, #tpu.memory_space<vmem>>, vector<1x32xf32>
    %c806 = arith.constant 806 : index
    %c0_605 = arith.constant 0 : index
    %701 = vector.load %arg11[%c806, %c0_605] : memref<896x32xf32, #tpu.memory_space<vmem>>, vector<1x32xf32>
    %702 = arith.maximumf %700, %701 : vector<1x32xf32>
    %c212_606 = arith.constant 212 : index
    %c0_607 = arith.constant 0 : index
    %703 = vector.load %arg12[%c212_606, %c0_607] : memref<264x32xf32, #tpu.memory_space<vmem>>, vector<1x32xf32>
    tpu.vector_store %arg12[%c212_606, %c0_607], %702 {strides = array<i32>} : memref<264x32xf32, #tpu.memory_space<vmem>>, vector<1x32xf32>,
    %c776 = arith.constant 776 : index
    %c0_608 = arith.constant 0 : index
    %704 = vector.load %arg11[%c776, %c0_608] : memref<896x32xf32, #tpu.memory_space<vmem>>, vector<1x32xf32>
    %c808 = arith.constant 808 : index
    %c0_609 = arith.constant 0 : index
    %705 = vector.load %arg11[%c808, %c0_609] : memref<896x32xf32, #tpu.memory_space<vmem>>, vector<1x32xf32>
    %706 = arith.maximumf %704, %705 : vector<1x32xf32>
    %c213 = arith.constant 213 : index
    %c0_610 = arith.constant 0 : index
    %707 = vector.load %arg12[%c213, %c0_610] : memref<264x32xf32, #tpu.memory_space<vmem>>, vector<1x32xf32>
    tpu.vector_store %arg12[%c213, %c0_610], %706 {strides = array<i32>} : memref<264x32xf32, #tpu.memory_space<vmem>>, vector<1x32xf32>,
    %c778 = arith.constant 778 : index
    %c0_611 = arith.constant 0 : index
    %708 = vector.load %arg11[%c778, %c0_611] : memref<896x32xf32, #tpu.memory_space<vmem>>, vector<1x32xf32>
    %c810 = arith.constant 810 : index
    %c0_612 = arith.constant 0 : index
    %709 = vector.load %arg11[%c810, %c0_612] : memref<896x32xf32, #tpu.memory_space<vmem>>, vector<1x32xf32>
    %710 = arith.maximumf %708, %709 : vector<1x32xf32>
    %c214_613 = arith.constant 214 : index
    %c0_614 = arith.constant 0 : index
    %711 = vector.load %arg12[%c214_613, %c0_614] : memref<264x32xf32, #tpu.memory_space<vmem>>, vector<1x32xf32>
    tpu.vector_store %arg12[%c214_613, %c0_614], %710 {strides = array<i32>} : memref<264x32xf32, #tpu.memory_space<vmem>>, vector<1x32xf32>,
    %c780 = arith.constant 780 : index
    %c0_615 = arith.constant 0 : index
    %712 = vector.load %arg11[%c780, %c0_615] : memref<896x32xf32, #tpu.memory_space<vmem>>, vector<1x32xf32>
    %c812 = arith.constant 812 : index
    %c0_616 = arith.constant 0 : index
    %713 = vector.load %arg11[%c812, %c0_616] : memref<896x32xf32, #tpu.memory_space<vmem>>, vector<1x32xf32>
    %714 = arith.maximumf %712, %713 : vector<1x32xf32>
    %c215 = arith.constant 215 : index
    %c0_617 = arith.constant 0 : index
    %715 = vector.load %arg12[%c215, %c0_617] : memref<264x32xf32, #tpu.memory_space<vmem>>, vector<1x32xf32>
    tpu.vector_store %arg12[%c215, %c0_617], %714 {strides = array<i32>} : memref<264x32xf32, #tpu.memory_space<vmem>>, vector<1x32xf32>,
    %c782 = arith.constant 782 : index
    %c0_618 = arith.constant 0 : index
    %716 = vector.load %arg11[%c782, %c0_618] : memref<896x32xf32, #tpu.memory_space<vmem>>, vector<1x32xf32>
    %c814 = arith.constant 814 : index
    %c0_619 = arith.constant 0 : index
    %717 = vector.load %arg11[%c814, %c0_619] : memref<896x32xf32, #tpu.memory_space<vmem>>, vector<1x32xf32>
    %718 = arith.maximumf %716, %717 : vector<1x32xf32>
    %c216_620 = arith.constant 216 : index
    %c0_621 = arith.constant 0 : index
    %719 = vector.load %arg12[%c216_620, %c0_621] : memref<264x32xf32, #tpu.memory_space<vmem>>, vector<1x32xf32>
    tpu.vector_store %arg12[%c216_620, %c0_621], %718 {strides = array<i32>} : memref<264x32xf32, #tpu.memory_space<vmem>>, vector<1x32xf32>,
    %c784 = arith.constant 784 : index
    %c0_622 = arith.constant 0 : index
    %720 = vector.load %arg11[%c784, %c0_622] : memref<896x32xf32, #tpu.memory_space<vmem>>, vector<1x32xf32>
    %c816 = arith.constant 816 : index
    %c0_623 = arith.constant 0 : index
    %721 = vector.load %arg11[%c816, %c0_623] : memref<896x32xf32, #tpu.memory_space<vmem>>, vector<1x32xf32>
    %722 = arith.maximumf %720, %721 : vector<1x32xf32>
    %c217 = arith.constant 217 : index
    %c0_624 = arith.constant 0 : index
    %723 = vector.load %arg12[%c217, %c0_624] : memref<264x32xf32, #tpu.memory_space<vmem>>, vector<1x32xf32>
    tpu.vector_store %arg12[%c217, %c0_624], %722 {strides = array<i32>} : memref<264x32xf32, #tpu.memory_space<vmem>>, vector<1x32xf32>,
    %c786 = arith.constant 786 : index
    %c0_625 = arith.constant 0 : index
    %724 = vector.load %arg11[%c786, %c0_625] : memref<896x32xf32, #tpu.memory_space<vmem>>, vector<1x32xf32>
    %c818 = arith.constant 818 : index
    %c0_626 = arith.constant 0 : index
    %725 = vector.load %arg11[%c818, %c0_626] : memref<896x32xf32, #tpu.memory_space<vmem>>, vector<1x32xf32>
    %726 = arith.maximumf %724, %725 : vector<1x32xf32>
    %c218_627 = arith.constant 218 : index
    %c0_628 = arith.constant 0 : index
    %727 = vector.load %arg12[%c218_627, %c0_628] : memref<264x32xf32, #tpu.memory_space<vmem>>, vector<1x32xf32>
    tpu.vector_store %arg12[%c218_627, %c0_628], %726 {strides = array<i32>} : memref<264x32xf32, #tpu.memory_space<vmem>>, vector<1x32xf32>,
    %c788 = arith.constant 788 : index
    %c0_629 = arith.constant 0 : index
    %728 = vector.load %arg11[%c788, %c0_629] : memref<896x32xf32, #tpu.memory_space<vmem>>, vector<1x32xf32>
    %c820 = arith.constant 820 : index
    %c0_630 = arith.constant 0 : index
    %729 = vector.load %arg11[%c820, %c0_630] : memref<896x32xf32, #tpu.memory_space<vmem>>, vector<1x32xf32>
    %730 = arith.maximumf %728, %729 : vector<1x32xf32>
    %c219 = arith.constant 219 : index
    %c0_631 = arith.constant 0 : index
    %731 = vector.load %arg12[%c219, %c0_631] : memref<264x32xf32, #tpu.memory_space<vmem>>, vector<1x32xf32>
    tpu.vector_store %arg12[%c219, %c0_631], %730 {strides = array<i32>} : memref<264x32xf32, #tpu.memory_space<vmem>>, vector<1x32xf32>,
    %c790 = arith.constant 790 : index
    %c0_632 = arith.constant 0 : index
    %732 = vector.load %arg11[%c790, %c0_632] : memref<896x32xf32, #tpu.memory_space<vmem>>, vector<1x32xf32>
    %c822 = arith.constant 822 : index
    %c0_633 = arith.constant 0 : index
    %733 = vector.load %arg11[%c822, %c0_633] : memref<896x32xf32, #tpu.memory_space<vmem>>, vector<1x32xf32>
    %734 = arith.maximumf %732, %733 : vector<1x32xf32>
    %c220 = arith.constant 220 : index
    %c0_634 = arith.constant 0 : index
    %735 = vector.load %arg12[%c220, %c0_634] : memref<264x32xf32, #tpu.memory_space<vmem>>, vector<1x32xf32>
    tpu.vector_store %arg12[%c220, %c0_634], %734 {strides = array<i32>} : memref<264x32xf32, #tpu.memory_space<vmem>>, vector<1x32xf32>,
    %c792 = arith.constant 792 : index
    %c0_635 = arith.constant 0 : index
    %736 = vector.load %arg11[%c792, %c0_635] : memref<896x32xf32, #tpu.memory_space<vmem>>, vector<1x32xf32>
    %c824 = arith.constant 824 : index
    %c0_636 = arith.constant 0 : index
    %737 = vector.load %arg11[%c824, %c0_636] : memref<896x32xf32, #tpu.memory_space<vmem>>, vector<1x32xf32>
    %738 = arith.maximumf %736, %737 : vector<1x32xf32>
    %c221 = arith.constant 221 : index
    %c0_637 = arith.constant 0 : index
    %739 = vector.load %arg12[%c221, %c0_637] : memref<264x32xf32, #tpu.memory_space<vmem>>, vector<1x32xf32>
    tpu.vector_store %arg12[%c221, %c0_637], %738 {strides = array<i32>} : memref<264x32xf32, #tpu.memory_space<vmem>>, vector<1x32xf32>,
    %c794 = arith.constant 794 : index
    %c0_638 = arith.constant 0 : index
    %740 = vector.load %arg11[%c794, %c0_638] : memref<896x32xf32, #tpu.memory_space<vmem>>, vector<1x32xf32>
    %c826 = arith.constant 826 : index
    %c0_639 = arith.constant 0 : index
    %741 = vector.load %arg11[%c826, %c0_639] : memref<896x32xf32, #tpu.memory_space<vmem>>, vector<1x32xf32>
    %742 = arith.maximumf %740, %741 : vector<1x32xf32>
    %c222 = arith.constant 222 : index
    %c0_640 = arith.constant 0 : index
    %743 = vector.load %arg12[%c222, %c0_640] : memref<264x32xf32, #tpu.memory_space<vmem>>, vector<1x32xf32>
    tpu.vector_store %arg12[%c222, %c0_640], %742 {strides = array<i32>} : memref<264x32xf32, #tpu.memory_space<vmem>>, vector<1x32xf32>,
    %c832 = arith.constant 832 : index
    %c0_641 = arith.constant 0 : index
    %744 = vector.load %arg11[%c832, %c0_641] : memref<896x32xf32, #tpu.memory_space<vmem>>, vector<1x32xf32>
    %c864 = arith.constant 864 : index
    %c0_642 = arith.constant 0 : index
    %745 = vector.load %arg11[%c864, %c0_642] : memref<896x32xf32, #tpu.memory_space<vmem>>, vector<1x32xf32>
    %746 = arith.maximumf %744, %745 : vector<1x32xf32>
    %c225 = arith.constant 225 : index
    %c0_643 = arith.constant 0 : index
    %747 = vector.load %arg12[%c225, %c0_643] : memref<264x32xf32, #tpu.memory_space<vmem>>, vector<1x32xf32>
    tpu.vector_store %arg12[%c225, %c0_643], %746 {strides = array<i32>} : memref<264x32xf32, #tpu.memory_space<vmem>>, vector<1x32xf32>,
    %c834 = arith.constant 834 : index
    %c0_644 = arith.constant 0 : index
    %748 = vector.load %arg11[%c834, %c0_644] : memref<896x32xf32, #tpu.memory_space<vmem>>, vector<1x32xf32>
    %c866 = arith.constant 866 : index
    %c0_645 = arith.constant 0 : index
    %749 = vector.load %arg11[%c866, %c0_645] : memref<896x32xf32, #tpu.memory_space<vmem>>, vector<1x32xf32>
    %750 = arith.maximumf %748, %749 : vector<1x32xf32>
    %c226_646 = arith.constant 226 : index
    %c0_647 = arith.constant 0 : index
    %751 = vector.load %arg12[%c226_646, %c0_647] : memref<264x32xf32, #tpu.memory_space<vmem>>, vector<1x32xf32>
    tpu.vector_store %arg12[%c226_646, %c0_647], %750 {strides = array<i32>} : memref<264x32xf32, #tpu.memory_space<vmem>>, vector<1x32xf32>,
    %c836 = arith.constant 836 : index
    %c0_648 = arith.constant 0 : index
    %752 = vector.load %arg11[%c836, %c0_648] : memref<896x32xf32, #tpu.memory_space<vmem>>, vector<1x32xf32>
    %c868 = arith.constant 868 : index
    %c0_649 = arith.constant 0 : index
    %753 = vector.load %arg11[%c868, %c0_649] : memref<896x32xf32, #tpu.memory_space<vmem>>, vector<1x32xf32>
    %754 = arith.maximumf %752, %753 : vector<1x32xf32>
    %c227 = arith.constant 227 : index
    %c0_650 = arith.constant 0 : index
    %755 = vector.load %arg12[%c227, %c0_650] : memref<264x32xf32, #tpu.memory_space<vmem>>, vector<1x32xf32>
    tpu.vector_store %arg12[%c227, %c0_650], %754 {strides = array<i32>} : memref<264x32xf32, #tpu.memory_space<vmem>>, vector<1x32xf32>,
    %c838 = arith.constant 838 : index
    %c0_651 = arith.constant 0 : index
    %756 = vector.load %arg11[%c838, %c0_651] : memref<896x32xf32, #tpu.memory_space<vmem>>, vector<1x32xf32>
    %c870 = arith.constant 870 : index
    %c0_652 = arith.constant 0 : index
    %757 = vector.load %arg11[%c870, %c0_652] : memref<896x32xf32, #tpu.memory_space<vmem>>, vector<1x32xf32>
    %758 = arith.maximumf %756, %757 : vector<1x32xf32>
    %c228_653 = arith.constant 228 : index
    %c0_654 = arith.constant 0 : index
    %759 = vector.load %arg12[%c228_653, %c0_654] : memref<264x32xf32, #tpu.memory_space<vmem>>, vector<1x32xf32>
    tpu.vector_store %arg12[%c228_653, %c0_654], %758 {strides = array<i32>} : memref<264x32xf32, #tpu.memory_space<vmem>>, vector<1x32xf32>,
    %c840 = arith.constant 840 : index
    %c0_655 = arith.constant 0 : index
    %760 = vector.load %arg11[%c840, %c0_655] : memref<896x32xf32, #tpu.memory_space<vmem>>, vector<1x32xf32>
    %c872 = arith.constant 872 : index
    %c0_656 = arith.constant 0 : index
    %761 = vector.load %arg11[%c872, %c0_656] : memref<896x32xf32, #tpu.memory_space<vmem>>, vector<1x32xf32>
    %762 = arith.maximumf %760, %761 : vector<1x32xf32>
    %c229 = arith.constant 229 : index
    %c0_657 = arith.constant 0 : index
    %763 = vector.load %arg12[%c229, %c0_657] : memref<264x32xf32, #tpu.memory_space<vmem>>, vector<1x32xf32>
    tpu.vector_store %arg12[%c229, %c0_657], %762 {strides = array<i32>} : memref<264x32xf32, #tpu.memory_space<vmem>>, vector<1x32xf32>,
    %c842 = arith.constant 842 : index
    %c0_658 = arith.constant 0 : index
    %764 = vector.load %arg11[%c842, %c0_658] : memref<896x32xf32, #tpu.memory_space<vmem>>, vector<1x32xf32>
    %c874 = arith.constant 874 : index
    %c0_659 = arith.constant 0 : index
    %765 = vector.load %arg11[%c874, %c0_659] : memref<896x32xf32, #tpu.memory_space<vmem>>, vector<1x32xf32>
    %766 = arith.maximumf %764, %765 : vector<1x32xf32>
    %c230_660 = arith.constant 230 : index
    %c0_661 = arith.constant 0 : index
    %767 = vector.load %arg12[%c230_660, %c0_661] : memref<264x32xf32, #tpu.memory_space<vmem>>, vector<1x32xf32>
    tpu.vector_store %arg12[%c230_660, %c0_661], %766 {strides = array<i32>} : memref<264x32xf32, #tpu.memory_space<vmem>>, vector<1x32xf32>,
    %c844 = arith.constant 844 : index
    %c0_662 = arith.constant 0 : index
    %768 = vector.load %arg11[%c844, %c0_662] : memref<896x32xf32, #tpu.memory_space<vmem>>, vector<1x32xf32>
    %c876 = arith.constant 876 : index
    %c0_663 = arith.constant 0 : index
    %769 = vector.load %arg11[%c876, %c0_663] : memref<896x32xf32, #tpu.memory_space<vmem>>, vector<1x32xf32>
    %770 = arith.maximumf %768, %769 : vector<1x32xf32>
    %c231 = arith.constant 231 : index
    %c0_664 = arith.constant 0 : index
    %771 = vector.load %arg12[%c231, %c0_664] : memref<264x32xf32, #tpu.memory_space<vmem>>, vector<1x32xf32>
    tpu.vector_store %arg12[%c231, %c0_664], %770 {strides = array<i32>} : memref<264x32xf32, #tpu.memory_space<vmem>>, vector<1x32xf32>,
    %c846 = arith.constant 846 : index
    %c0_665 = arith.constant 0 : index
    %772 = vector.load %arg11[%c846, %c0_665] : memref<896x32xf32, #tpu.memory_space<vmem>>, vector<1x32xf32>
    %c878 = arith.constant 878 : index
    %c0_666 = arith.constant 0 : index
    %773 = vector.load %arg11[%c878, %c0_666] : memref<896x32xf32, #tpu.memory_space<vmem>>, vector<1x32xf32>
    %774 = arith.maximumf %772, %773 : vector<1x32xf32>
    %c232_667 = arith.constant 232 : index
    %c0_668 = arith.constant 0 : index
    %775 = vector.load %arg12[%c232_667, %c0_668] : memref<264x32xf32, #tpu.memory_space<vmem>>, vector<1x32xf32>
    tpu.vector_store %arg12[%c232_667, %c0_668], %774 {strides = array<i32>} : memref<264x32xf32, #tpu.memory_space<vmem>>, vector<1x32xf32>,
    %c848 = arith.constant 848 : index
    %c0_669 = arith.constant 0 : index
    %776 = vector.load %arg11[%c848, %c0_669] : memref<896x32xf32, #tpu.memory_space<vmem>>, vector<1x32xf32>
    %c880 = arith.constant 880 : index
    %c0_670 = arith.constant 0 : index
    %777 = vector.load %arg11[%c880, %c0_670] : memref<896x32xf32, #tpu.memory_space<vmem>>, vector<1x32xf32>
    %778 = arith.maximumf %776, %777 : vector<1x32xf32>
    %c233 = arith.constant 233 : index
    %c0_671 = arith.constant 0 : index
    %779 = vector.load %arg12[%c233, %c0_671] : memref<264x32xf32, #tpu.memory_space<vmem>>, vector<1x32xf32>
    tpu.vector_store %arg12[%c233, %c0_671], %778 {strides = array<i32>} : memref<264x32xf32, #tpu.memory_space<vmem>>, vector<1x32xf32>,
    %c850 = arith.constant 850 : index
    %c0_672 = arith.constant 0 : index
    %780 = vector.load %arg11[%c850, %c0_672] : memref<896x32xf32, #tpu.memory_space<vmem>>, vector<1x32xf32>
    %c882 = arith.constant 882 : index
    %c0_673 = arith.constant 0 : index
    %781 = vector.load %arg11[%c882, %c0_673] : memref<896x32xf32, #tpu.memory_space<vmem>>, vector<1x32xf32>
    %782 = arith.maximumf %780, %781 : vector<1x32xf32>
    %c234_674 = arith.constant 234 : index
    %c0_675 = arith.constant 0 : index
    %783 = vector.load %arg12[%c234_674, %c0_675] : memref<264x32xf32, #tpu.memory_space<vmem>>, vector<1x32xf32>
    tpu.vector_store %arg12[%c234_674, %c0_675], %782 {strides = array<i32>} : memref<264x32xf32, #tpu.memory_space<vmem>>, vector<1x32xf32>,
    %c852 = arith.constant 852 : index
    %c0_676 = arith.constant 0 : index
    %784 = vector.load %arg11[%c852, %c0_676] : memref<896x32xf32, #tpu.memory_space<vmem>>, vector<1x32xf32>
    %c884 = arith.constant 884 : index
    %c0_677 = arith.constant 0 : index
    %785 = vector.load %arg11[%c884, %c0_677] : memref<896x32xf32, #tpu.memory_space<vmem>>, vector<1x32xf32>
    %786 = arith.maximumf %784, %785 : vector<1x32xf32>
    %c235 = arith.constant 235 : index
    %c0_678 = arith.constant 0 : index
    %787 = vector.load %arg12[%c235, %c0_678] : memref<264x32xf32, #tpu.memory_space<vmem>>, vector<1x32xf32>
    tpu.vector_store %arg12[%c235, %c0_678], %786 {strides = array<i32>} : memref<264x32xf32, #tpu.memory_space<vmem>>, vector<1x32xf32>,
    %c854 = arith.constant 854 : index
    %c0_679 = arith.constant 0 : index
    %788 = vector.load %arg11[%c854, %c0_679] : memref<896x32xf32, #tpu.memory_space<vmem>>, vector<1x32xf32>
    %c886 = arith.constant 886 : index
    %c0_680 = arith.constant 0 : index
    %789 = vector.load %arg11[%c886, %c0_680] : memref<896x32xf32, #tpu.memory_space<vmem>>, vector<1x32xf32>
    %790 = arith.maximumf %788, %789 : vector<1x32xf32>
    %c236_681 = arith.constant 236 : index
    %c0_682 = arith.constant 0 : index
    %791 = vector.load %arg12[%c236_681, %c0_682] : memref<264x32xf32, #tpu.memory_space<vmem>>, vector<1x32xf32>
    tpu.vector_store %arg12[%c236_681, %c0_682], %790 {strides = array<i32>} : memref<264x32xf32, #tpu.memory_space<vmem>>, vector<1x32xf32>,
    %c856 = arith.constant 856 : index
    %c0_683 = arith.constant 0 : index
    %792 = vector.load %arg11[%c856, %c0_683] : memref<896x32xf32, #tpu.memory_space<vmem>>, vector<1x32xf32>
    %c888 = arith.constant 888 : index
    %c0_684 = arith.constant 0 : index
    %793 = vector.load %arg11[%c888, %c0_684] : memref<896x32xf32, #tpu.memory_space<vmem>>, vector<1x32xf32>
    %794 = arith.maximumf %792, %793 : vector<1x32xf32>
    %c237 = arith.constant 237 : index
    %c0_685 = arith.constant 0 : index
    %795 = vector.load %arg12[%c237, %c0_685] : memref<264x32xf32, #tpu.memory_space<vmem>>, vector<1x32xf32>
    tpu.vector_store %arg12[%c237, %c0_685], %794 {strides = array<i32>} : memref<264x32xf32, #tpu.memory_space<vmem>>, vector<1x32xf32>,
    %c858 = arith.constant 858 : index
    %c0_686 = arith.constant 0 : index
    %796 = vector.load %arg11[%c858, %c0_686] : memref<896x32xf32, #tpu.memory_space<vmem>>, vector<1x32xf32>
    %c890 = arith.constant 890 : index
    %c0_687 = arith.constant 0 : index
    %797 = vector.load %arg11[%c890, %c0_687] : memref<896x32xf32, #tpu.memory_space<vmem>>, vector<1x32xf32>
    %798 = arith.maximumf %796, %797 : vector<1x32xf32>
    %c238_688 = arith.constant 238 : index
    %c0_689 = arith.constant 0 : index
    %799 = vector.load %arg12[%c238_688, %c0_689] : memref<264x32xf32, #tpu.memory_space<vmem>>, vector<1x32xf32>
    tpu.vector_store %arg12[%c238_688, %c0_689], %798 {strides = array<i32>} : memref<264x32xf32, #tpu.memory_space<vmem>>, vector<1x32xf32>,
    %cst_690 = arith.constant 0.000000e+00 : f32
    %800 = vector.broadcast %cst_690 : f32 to vector<224x64xf32>
    %c0_691 = arith.constant 0 : index
    %c0_692 = arith.constant 0 : index
    %801 = vector.load %arg12[%c0_691, %c0_692] : memref<264x32xf32, #tpu.memory_space<vmem>>, vector<224x32xf32>
    %802 = arith.truncf %801 : vector<224x32xf32> to vector<224x32xbf16>
    %c0_693 = arith.constant 0 : index
    %c0_694 = arith.constant 0 : index
    %803 = vector.load %arg4[%c0_693, %c0_694] : memref<288x64xbf16, #tpu.memory_space<vmem>>, vector<32x64xbf16>
    %cst_695 = arith.constant dense<0.000000e+00> : vector<224x64xf32>
    %804 = tpu.matmul %802, %803, %cst_695 {dimension_numbers = #tpu.dot_dimension_numbers<[1], [0], [0], [1], [0, 0, 1, 1], [], []>} : vector<224x32xbf16>, vector<32x64xbf16>, vector<224x64xf32> -> vector<224x64xf32>
    %805 = arith.addf %800, %804 : vector<224x64xf32>
    %c1_696 = arith.constant 1 : index
    %c0_697 = arith.constant 0 : index
    %806 = vector.load %arg12[%c1_696, %c0_697] : memref<264x32xf32, #tpu.memory_space<vmem>>, vector<224x32xf32>
    %807 = arith.truncf %806 : vector<224x32xf32> to vector<224x32xbf16>
    %c32_698 = arith.constant 32 : index
    %c0_699 = arith.constant 0 : index
    %808 = vector.load %arg4[%c32_698, %c0_699] : memref<288x64xbf16, #tpu.memory_space<vmem>>, vector<32x64xbf16>
    %cst_700 = arith.constant dense<0.000000e+00> : vector<224x64xf32>
    %809 = tpu.matmul %807, %808, %cst_700 {dimension_numbers = #tpu.dot_dimension_numbers<[1], [0], [0], [1], [0, 0, 1, 1], [], []>} : vector<224x32xbf16>, vector<32x64xbf16>, vector<224x64xf32> -> vector<224x64xf32>
    %810 = arith.addf %805, %809 : vector<224x64xf32>
    %c2_701 = arith.constant 2 : index
    %c0_702 = arith.constant 0 : index
    %811 = vector.load %arg12[%c2_701, %c0_702] : memref<264x32xf32, #tpu.memory_space<vmem>>, vector<224x32xf32>
    %812 = arith.truncf %811 : vector<224x32xf32> to vector<224x32xbf16>
    %c64_703 = arith.constant 64 : index
    %c0_704 = arith.constant 0 : index
    %813 = vector.load %arg4[%c64_703, %c0_704] : memref<288x64xbf16, #tpu.memory_space<vmem>>, vector<32x64xbf16>
    %cst_705 = arith.constant dense<0.000000e+00> : vector<224x64xf32>
    %814 = tpu.matmul %812, %813, %cst_705 {dimension_numbers = #tpu.dot_dimension_numbers<[1], [0], [0], [1], [0, 0, 1, 1], [], []>} : vector<224x32xbf16>, vector<32x64xbf16>, vector<224x64xf32> -> vector<224x64xf32>
    %815 = arith.addf %810, %814 : vector<224x64xf32>
    %c16_706 = arith.constant 16 : index
    %c0_707 = arith.constant 0 : index
    %816 = vector.load %arg12[%c16_706, %c0_707] : memref<264x32xf32, #tpu.memory_space<vmem>>, vector<224x32xf32>
    %817 = arith.truncf %816 : vector<224x32xf32> to vector<224x32xbf16>
    %c96_708 = arith.constant 96 : index
    %c0_709 = arith.constant 0 : index
    %818 = vector.load %arg4[%c96_708, %c0_709] : memref<288x64xbf16, #tpu.memory_space<vmem>>, vector<32x64xbf16>
    %cst_710 = arith.constant dense<0.000000e+00> : vector<224x64xf32>
    %819 = tpu.matmul %817, %818, %cst_710 {dimension_numbers = #tpu.dot_dimension_numbers<[1], [0], [0], [1], [0, 0, 1, 1], [], []>} : vector<224x32xbf16>, vector<32x64xbf16>, vector<224x64xf32> -> vector<224x64xf32>
    %820 = arith.addf %815, %819 : vector<224x64xf32>
    %c17_711 = arith.constant 17 : index
    %c0_712 = arith.constant 0 : index
    %821 = vector.load %arg12[%c17_711, %c0_712] : memref<264x32xf32, #tpu.memory_space<vmem>>, vector<224x32xf32>
    %822 = arith.truncf %821 : vector<224x32xf32> to vector<224x32xbf16>
    %c128_713 = arith.constant 128 : index
    %c0_714 = arith.constant 0 : index
    %823 = vector.load %arg4[%c128_713, %c0_714] : memref<288x64xbf16, #tpu.memory_space<vmem>>, vector<32x64xbf16>
    %cst_715 = arith.constant dense<0.000000e+00> : vector<224x64xf32>
    %824 = tpu.matmul %822, %823, %cst_715 {dimension_numbers = #tpu.dot_dimension_numbers<[1], [0], [0], [1], [0, 0, 1, 1], [], []>} : vector<224x32xbf16>, vector<32x64xbf16>, vector<224x64xf32> -> vector<224x64xf32>
    %825 = arith.addf %820, %824 : vector<224x64xf32>
    %c18_716 = arith.constant 18 : index
    %c0_717 = arith.constant 0 : index
    %826 = vector.load %arg12[%c18_716, %c0_717] : memref<264x32xf32, #tpu.memory_space<vmem>>, vector<224x32xf32>
    %827 = arith.truncf %826 : vector<224x32xf32> to vector<224x32xbf16>
    %c160_718 = arith.constant 160 : index
    %c0_719 = arith.constant 0 : index
    %828 = vector.load %arg4[%c160_718, %c0_719] : memref<288x64xbf16, #tpu.memory_space<vmem>>, vector<32x64xbf16>
    %cst_720 = arith.constant dense<0.000000e+00> : vector<224x64xf32>
    %829 = tpu.matmul %827, %828, %cst_720 {dimension_numbers = #tpu.dot_dimension_numbers<[1], [0], [0], [1], [0, 0, 1, 1], [], []>} : vector<224x32xbf16>, vector<32x64xbf16>, vector<224x64xf32> -> vector<224x64xf32>
    %830 = arith.addf %825, %829 : vector<224x64xf32>
    %c32_721 = arith.constant 32 : index
    %c0_722 = arith.constant 0 : index
    %831 = vector.load %arg12[%c32_721, %c0_722] : memref<264x32xf32, #tpu.memory_space<vmem>>, vector<224x32xf32>
    %832 = arith.truncf %831 : vector<224x32xf32> to vector<224x32xbf16>
    %c192_723 = arith.constant 192 : index
    %c0_724 = arith.constant 0 : index
    %833 = vector.load %arg4[%c192_723, %c0_724] : memref<288x64xbf16, #tpu.memory_space<vmem>>, vector<32x64xbf16>
    %cst_725 = arith.constant dense<0.000000e+00> : vector<224x64xf32>
    %834 = tpu.matmul %832, %833, %cst_725 {dimension_numbers = #tpu.dot_dimension_numbers<[1], [0], [0], [1], [0, 0, 1, 1], [], []>} : vector<224x32xbf16>, vector<32x64xbf16>, vector<224x64xf32> -> vector<224x64xf32>
    %835 = arith.addf %830, %834 : vector<224x64xf32>
    %c33_726 = arith.constant 33 : index
    %c0_727 = arith.constant 0 : index
    %836 = vector.load %arg12[%c33_726, %c0_727] : memref<264x32xf32, #tpu.memory_space<vmem>>, vector<224x32xf32>
    %837 = arith.truncf %836 : vector<224x32xf32> to vector<224x32xbf16>
    %c224_728 = arith.constant 224 : index
    %c0_729 = arith.constant 0 : index
    %838 = vector.load %arg4[%c224_728, %c0_729] : memref<288x64xbf16, #tpu.memory_space<vmem>>, vector<32x64xbf16>
    %cst_730 = arith.constant dense<0.000000e+00> : vector<224x64xf32>
    %839 = tpu.matmul %837, %838, %cst_730 {dimension_numbers = #tpu.dot_dimension_numbers<[1], [0], [0], [1], [0, 0, 1, 1], [], []>} : vector<224x32xbf16>, vector<32x64xbf16>, vector<224x64xf32> -> vector<224x64xf32>
    %840 = arith.addf %835, %839 : vector<224x64xf32>
    %c34_731 = arith.constant 34 : index
    %c0_732 = arith.constant 0 : index
    %841 = vector.load %arg12[%c34_731, %c0_732] : memref<264x32xf32, #tpu.memory_space<vmem>>, vector<224x32xf32>
    %842 = arith.truncf %841 : vector<224x32xf32> to vector<224x32xbf16>
    %c256_733 = arith.constant 256 : index
    %c0_734 = arith.constant 0 : index
    %843 = vector.load %arg4[%c256_733, %c0_734] : memref<288x64xbf16, #tpu.memory_space<vmem>>, vector<32x64xbf16>
    %cst_735 = arith.constant dense<0.000000e+00> : vector<224x64xf32>
    %844 = tpu.matmul %842, %843, %cst_735 {dimension_numbers = #tpu.dot_dimension_numbers<[1], [0], [0], [1], [0, 0, 1, 1], [], []>} : vector<224x32xbf16>, vector<32x64xbf16>, vector<224x64xf32> -> vector<224x64xf32>
    %845 = arith.addf %840, %844 : vector<224x64xf32>
    %c0_736 = arith.constant 0 : index
    %c0_737 = arith.constant 0 : index
    %846 = vector.load %arg5[%c0_736, %c0_737] : memref<1x64xf32, #tpu.memory_space<vmem>>, vector<1x64xf32>
    %847 = vector.broadcast %846 : vector<1x64xf32> to vector<224x64xf32>
    %848 = arith.addf %845, %847 : vector<224x64xf32>
    %cst_738 = arith.constant 0.000000e+00 : f32
    %849 = vector.broadcast %cst_738 : f32 to vector<224x64xf32>
    %850 = arith.maximumf %848, %849 : vector<224x64xf32>
    %c0_739 = arith.constant 0 : index
    %c0_740 = arith.constant 0 : index
    %851 = vector.load %arg13[%c0_739, %c0_740] : memref<224x64xf32, #tpu.memory_space<vmem>>, vector<224x64xf32>
    tpu.vector_store %arg13[%c0_739, %c0_740], %850 {strides = array<i32>} : memref<224x64xf32, #tpu.memory_space<vmem>>, vector<224x64xf32>,
    %c0_741 = arith.constant 0 : index
    %c0_742 = arith.constant 0 : index
    %852 = vector.load %arg13[%c0_741, %c0_742] : memref<224x64xf32, #tpu.memory_space<vmem>>, vector<221x64xf32>
    %c1_743 = arith.constant 1 : index
    %c0_744 = arith.constant 0 : index
    %853 = vector.load %arg13[%c1_743, %c0_744] : memref<224x64xf32, #tpu.memory_space<vmem>>, vector<221x64xf32>
    %854 = arith.maximumf %852, %853 : vector<221x64xf32>
    %c0_745 = arith.constant 0 : index
    %c0_746 = arith.constant 0 : index
    %855 = vector.load %arg13[%c0_745, %c0_746] : memref<224x64xf32, #tpu.memory_space<vmem>>, vector<221x64xf32>
    tpu.vector_store %arg13[%c0_745, %c0_746], %854 {strides = array<i32>} : memref<224x64xf32, #tpu.memory_space<vmem>>, vector<221x64xf32>,
    %c0_747 = arith.constant 0 : index
    %c0_748 = arith.constant 0 : index
    %856 = vector.load %arg13[%c0_747, %c0_748] : memref<224x64xf32, #tpu.memory_space<vmem>>, vector<1x64xf32>
    %c16_749 = arith.constant 16 : index
    %c0_750 = arith.constant 0 : index
    %857 = vector.load %arg13[%c16_749, %c0_750] : memref<224x64xf32, #tpu.memory_space<vmem>>, vector<1x64xf32>
    %858 = arith.maximumf %856, %857 : vector<1x64xf32>
    %c0_751 = arith.constant 0 : index
    %c0_752 = arith.constant 0 : index
    %859 = vector.load %arg14[%c0_751, %c0_752] : memref<1x3136xf32, #tpu.memory_space<vmem>>, vector<1x64xf32>
    tpu.vector_store %arg14[%c0_751, %c0_752], %858 {strides = array<i32>} : memref<1x3136xf32, #tpu.memory_space<vmem>>, vector<1x64xf32>,
    %c2_753 = arith.constant 2 : index
    %c0_754 = arith.constant 0 : index
    %860 = vector.load %arg13[%c2_753, %c0_754] : memref<224x64xf32, #tpu.memory_space<vmem>>, vector<1x64xf32>
    %c18_755 = arith.constant 18 : index
    %c0_756 = arith.constant 0 : index
    %861 = vector.load %arg13[%c18_755, %c0_756] : memref<224x64xf32, #tpu.memory_space<vmem>>, vector<1x64xf32>
    %862 = arith.maximumf %860, %861 : vector<1x64xf32>
    %c0_757 = arith.constant 0 : index
    %c64_758 = arith.constant 64 : index
    %863 = vector.load %arg14[%c0_757, %c64_758] : memref<1x3136xf32, #tpu.memory_space<vmem>>, vector<1x64xf32>
    tpu.vector_store %arg14[%c0_757, %c64_758], %862 {strides = array<i32>} : memref<1x3136xf32, #tpu.memory_space<vmem>>, vector<1x64xf32>,
    %c4_759 = arith.constant 4 : index
    %c0_760 = arith.constant 0 : index
    %864 = vector.load %arg13[%c4_759, %c0_760] : memref<224x64xf32, #tpu.memory_space<vmem>>, vector<1x64xf32>
    %c20_761 = arith.constant 20 : index
    %c0_762 = arith.constant 0 : index
    %865 = vector.load %arg13[%c20_761, %c0_762] : memref<224x64xf32, #tpu.memory_space<vmem>>, vector<1x64xf32>
    %866 = arith.maximumf %864, %865 : vector<1x64xf32>
    %c0_763 = arith.constant 0 : index
    %c128_764 = arith.constant 128 : index
    %867 = vector.load %arg14[%c0_763, %c128_764] : memref<1x3136xf32, #tpu.memory_space<vmem>>, vector<1x64xf32>
    tpu.vector_store %arg14[%c0_763, %c128_764], %866 {strides = array<i32>} : memref<1x3136xf32, #tpu.memory_space<vmem>>, vector<1x64xf32>,
    %c6_765 = arith.constant 6 : index
    %c0_766 = arith.constant 0 : index
    %868 = vector.load %arg13[%c6_765, %c0_766] : memref<224x64xf32, #tpu.memory_space<vmem>>, vector<1x64xf32>
    %c22_767 = arith.constant 22 : index
    %c0_768 = arith.constant 0 : index
    %869 = vector.load %arg13[%c22_767, %c0_768] : memref<224x64xf32, #tpu.memory_space<vmem>>, vector<1x64xf32>
    %870 = arith.maximumf %868, %869 : vector<1x64xf32>
    %c0_769 = arith.constant 0 : index
    %c192_770 = arith.constant 192 : index
    %871 = vector.load %arg14[%c0_769, %c192_770] : memref<1x3136xf32, #tpu.memory_space<vmem>>, vector<1x64xf32>
    tpu.vector_store %arg14[%c0_769, %c192_770], %870 {strides = array<i32>} : memref<1x3136xf32, #tpu.memory_space<vmem>>, vector<1x64xf32>,
    %c8_771 = arith.constant 8 : index
    %c0_772 = arith.constant 0 : index
    %872 = vector.load %arg13[%c8_771, %c0_772] : memref<224x64xf32, #tpu.memory_space<vmem>>, vector<1x64xf32>
    %c24_773 = arith.constant 24 : index
    %c0_774 = arith.constant 0 : index
    %873 = vector.load %arg13[%c24_773, %c0_774] : memref<224x64xf32, #tpu.memory_space<vmem>>, vector<1x64xf32>
    %874 = arith.maximumf %872, %873 : vector<1x64xf32>
    %c0_775 = arith.constant 0 : index
    %c256_776 = arith.constant 256 : index
    %875 = vector.load %arg14[%c0_775, %c256_776] : memref<1x3136xf32, #tpu.memory_space<vmem>>, vector<1x64xf32>
    tpu.vector_store %arg14[%c0_775, %c256_776], %874 {strides = array<i32>} : memref<1x3136xf32, #tpu.memory_space<vmem>>, vector<1x64xf32>,
    %c10_777 = arith.constant 10 : index
    %c0_778 = arith.constant 0 : index
    %876 = vector.load %arg13[%c10_777, %c0_778] : memref<224x64xf32, #tpu.memory_space<vmem>>, vector<1x64xf32>
    %c26_779 = arith.constant 26 : index
    %c0_780 = arith.constant 0 : index
    %877 = vector.load %arg13[%c26_779, %c0_780] : memref<224x64xf32, #tpu.memory_space<vmem>>, vector<1x64xf32>
    %878 = arith.maximumf %876, %877 : vector<1x64xf32>
    %c0_781 = arith.constant 0 : index
    %c320_782 = arith.constant 320 : index
    %879 = vector.load %arg14[%c0_781, %c320_782] : memref<1x3136xf32, #tpu.memory_space<vmem>>, vector<1x64xf32>
    tpu.vector_store %arg14[%c0_781, %c320_782], %878 {strides = array<i32>} : memref<1x3136xf32, #tpu.memory_space<vmem>>, vector<1x64xf32>,
    %c12_783 = arith.constant 12 : index
    %c0_784 = arith.constant 0 : index
    %880 = vector.load %arg13[%c12_783, %c0_784] : memref<224x64xf32, #tpu.memory_space<vmem>>, vector<1x64xf32>
    %c28_785 = arith.constant 28 : index
    %c0_786 = arith.constant 0 : index
    %881 = vector.load %arg13[%c28_785, %c0_786] : memref<224x64xf32, #tpu.memory_space<vmem>>, vector<1x64xf32>
    %882 = arith.maximumf %880, %881 : vector<1x64xf32>
    %c0_787 = arith.constant 0 : index
    %c384_788 = arith.constant 384 : index
    %883 = vector.load %arg14[%c0_787, %c384_788] : memref<1x3136xf32, #tpu.memory_space<vmem>>, vector<1x64xf32>
    tpu.vector_store %arg14[%c0_787, %c384_788], %882 {strides = array<i32>} : memref<1x3136xf32, #tpu.memory_space<vmem>>, vector<1x64xf32>,
    %c32_789 = arith.constant 32 : index
    %c0_790 = arith.constant 0 : index
    %884 = vector.load %arg13[%c32_789, %c0_790] : memref<224x64xf32, #tpu.memory_space<vmem>>, vector<1x64xf32>
    %c48_791 = arith.constant 48 : index
    %c0_792 = arith.constant 0 : index
    %885 = vector.load %arg13[%c48_791, %c0_792] : memref<224x64xf32, #tpu.memory_space<vmem>>, vector<1x64xf32>
    %886 = arith.maximumf %884, %885 : vector<1x64xf32>
    %c0_793 = arith.constant 0 : index
    %c448_794 = arith.constant 448 : index
    %887 = vector.load %arg14[%c0_793, %c448_794] : memref<1x3136xf32, #tpu.memory_space<vmem>>, vector<1x64xf32>
    tpu.vector_store %arg14[%c0_793, %c448_794], %886 {strides = array<i32>} : memref<1x3136xf32, #tpu.memory_space<vmem>>, vector<1x64xf32>,
    %c34_795 = arith.constant 34 : index
    %c0_796 = arith.constant 0 : index
    %888 = vector.load %arg13[%c34_795, %c0_796] : memref<224x64xf32, #tpu.memory_space<vmem>>, vector<1x64xf32>
    %c50_797 = arith.constant 50 : index
    %c0_798 = arith.constant 0 : index
    %889 = vector.load %arg13[%c50_797, %c0_798] : memref<224x64xf32, #tpu.memory_space<vmem>>, vector<1x64xf32>
    %890 = arith.maximumf %888, %889 : vector<1x64xf32>
    %c0_799 = arith.constant 0 : index
    %c512_800 = arith.constant 512 : index
    %891 = vector.load %arg14[%c0_799, %c512_800] : memref<1x3136xf32, #tpu.memory_space<vmem>>, vector<1x64xf32>
    tpu.vector_store %arg14[%c0_799, %c512_800], %890 {strides = array<i32>} : memref<1x3136xf32, #tpu.memory_space<vmem>>, vector<1x64xf32>,
    %c36_801 = arith.constant 36 : index
    %c0_802 = arith.constant 0 : index
    %892 = vector.load %arg13[%c36_801, %c0_802] : memref<224x64xf32, #tpu.memory_space<vmem>>, vector<1x64xf32>
    %c52_803 = arith.constant 52 : index
    %c0_804 = arith.constant 0 : index
    %893 = vector.load %arg13[%c52_803, %c0_804] : memref<224x64xf32, #tpu.memory_space<vmem>>, vector<1x64xf32>
    %894 = arith.maximumf %892, %893 : vector<1x64xf32>
    %c0_805 = arith.constant 0 : index
    %c576_806 = arith.constant 576 : index
    %895 = vector.load %arg14[%c0_805, %c576_806] : memref<1x3136xf32, #tpu.memory_space<vmem>>, vector<1x64xf32>
    tpu.vector_store %arg14[%c0_805, %c576_806], %894 {strides = array<i32>} : memref<1x3136xf32, #tpu.memory_space<vmem>>, vector<1x64xf32>,
    %c38_807 = arith.constant 38 : index
    %c0_808 = arith.constant 0 : index
    %896 = vector.load %arg13[%c38_807, %c0_808] : memref<224x64xf32, #tpu.memory_space<vmem>>, vector<1x64xf32>
    %c54_809 = arith.constant 54 : index
    %c0_810 = arith.constant 0 : index
    %897 = vector.load %arg13[%c54_809, %c0_810] : memref<224x64xf32, #tpu.memory_space<vmem>>, vector<1x64xf32>
    %898 = arith.maximumf %896, %897 : vector<1x64xf32>
    %c0_811 = arith.constant 0 : index
    %c640_812 = arith.constant 640 : index
    %899 = vector.load %arg14[%c0_811, %c640_812] : memref<1x3136xf32, #tpu.memory_space<vmem>>, vector<1x64xf32>
    tpu.vector_store %arg14[%c0_811, %c640_812], %898 {strides = array<i32>} : memref<1x3136xf32, #tpu.memory_space<vmem>>, vector<1x64xf32>,
    %c40_813 = arith.constant 40 : index
    %c0_814 = arith.constant 0 : index
    %900 = vector.load %arg13[%c40_813, %c0_814] : memref<224x64xf32, #tpu.memory_space<vmem>>, vector<1x64xf32>
    %c56_815 = arith.constant 56 : index
    %c0_816 = arith.constant 0 : index
    %901 = vector.load %arg13[%c56_815, %c0_816] : memref<224x64xf32, #tpu.memory_space<vmem>>, vector<1x64xf32>
    %902 = arith.maximumf %900, %901 : vector<1x64xf32>
    %c0_817 = arith.constant 0 : index
    %c704_818 = arith.constant 704 : index
    %903 = vector.load %arg14[%c0_817, %c704_818] : memref<1x3136xf32, #tpu.memory_space<vmem>>, vector<1x64xf32>
    tpu.vector_store %arg14[%c0_817, %c704_818], %902 {strides = array<i32>} : memref<1x3136xf32, #tpu.memory_space<vmem>>, vector<1x64xf32>,
    %c42_819 = arith.constant 42 : index
    %c0_820 = arith.constant 0 : index
    %904 = vector.load %arg13[%c42_819, %c0_820] : memref<224x64xf32, #tpu.memory_space<vmem>>, vector<1x64xf32>
    %c58_821 = arith.constant 58 : index
    %c0_822 = arith.constant 0 : index
    %905 = vector.load %arg13[%c58_821, %c0_822] : memref<224x64xf32, #tpu.memory_space<vmem>>, vector<1x64xf32>
    %906 = arith.maximumf %904, %905 : vector<1x64xf32>
    %c0_823 = arith.constant 0 : index
    %c768_824 = arith.constant 768 : index
    %907 = vector.load %arg14[%c0_823, %c768_824] : memref<1x3136xf32, #tpu.memory_space<vmem>>, vector<1x64xf32>
    tpu.vector_store %arg14[%c0_823, %c768_824], %906 {strides = array<i32>} : memref<1x3136xf32, #tpu.memory_space<vmem>>, vector<1x64xf32>,
    %c44_825 = arith.constant 44 : index
    %c0_826 = arith.constant 0 : index
    %908 = vector.load %arg13[%c44_825, %c0_826] : memref<224x64xf32, #tpu.memory_space<vmem>>, vector<1x64xf32>
    %c60_827 = arith.constant 60 : index
    %c0_828 = arith.constant 0 : index
    %909 = vector.load %arg13[%c60_827, %c0_828] : memref<224x64xf32, #tpu.memory_space<vmem>>, vector<1x64xf32>
    %910 = arith.maximumf %908, %909 : vector<1x64xf32>
    %c0_829 = arith.constant 0 : index
    %c832_830 = arith.constant 832 : index
    %911 = vector.load %arg14[%c0_829, %c832_830] : memref<1x3136xf32, #tpu.memory_space<vmem>>, vector<1x64xf32>
    tpu.vector_store %arg14[%c0_829, %c832_830], %910 {strides = array<i32>} : memref<1x3136xf32, #tpu.memory_space<vmem>>, vector<1x64xf32>,
    %c64_831 = arith.constant 64 : index
    %c0_832 = arith.constant 0 : index
    %912 = vector.load %arg13[%c64_831, %c0_832] : memref<224x64xf32, #tpu.memory_space<vmem>>, vector<1x64xf32>
    %c80_833 = arith.constant 80 : index
    %c0_834 = arith.constant 0 : index
    %913 = vector.load %arg13[%c80_833, %c0_834] : memref<224x64xf32, #tpu.memory_space<vmem>>, vector<1x64xf32>
    %914 = arith.maximumf %912, %913 : vector<1x64xf32>
    %c0_835 = arith.constant 0 : index
    %c896 = arith.constant 896 : index
    %915 = vector.load %arg14[%c0_835, %c896] : memref<1x3136xf32, #tpu.memory_space<vmem>>, vector<1x64xf32>
    tpu.vector_store %arg14[%c0_835, %c896], %914 {strides = array<i32>} : memref<1x3136xf32, #tpu.memory_space<vmem>>, vector<1x64xf32>,
    %c66_836 = arith.constant 66 : index
    %c0_837 = arith.constant 0 : index
    %916 = vector.load %arg13[%c66_836, %c0_837] : memref<224x64xf32, #tpu.memory_space<vmem>>, vector<1x64xf32>
    %c82_838 = arith.constant 82 : index
    %c0_839 = arith.constant 0 : index
    %917 = vector.load %arg13[%c82_838, %c0_839] : memref<224x64xf32, #tpu.memory_space<vmem>>, vector<1x64xf32>
    %918 = arith.maximumf %916, %917 : vector<1x64xf32>
    %c0_840 = arith.constant 0 : index
    %c960 = arith.constant 960 : index
    %919 = vector.load %arg14[%c0_840, %c960] : memref<1x3136xf32, #tpu.memory_space<vmem>>, vector<1x64xf32>
    tpu.vector_store %arg14[%c0_840, %c960], %918 {strides = array<i32>} : memref<1x3136xf32, #tpu.memory_space<vmem>>, vector<1x64xf32>,
    %c68_841 = arith.constant 68 : index
    %c0_842 = arith.constant 0 : index
    %920 = vector.load %arg13[%c68_841, %c0_842] : memref<224x64xf32, #tpu.memory_space<vmem>>, vector<1x64xf32>
    %c84_843 = arith.constant 84 : index
    %c0_844 = arith.constant 0 : index
    %921 = vector.load %arg13[%c84_843, %c0_844] : memref<224x64xf32, #tpu.memory_space<vmem>>, vector<1x64xf32>
    %922 = arith.maximumf %920, %921 : vector<1x64xf32>
    %c0_845 = arith.constant 0 : index
    %c1024 = arith.constant 1024 : index
    %923 = vector.load %arg14[%c0_845, %c1024] : memref<1x3136xf32, #tpu.memory_space<vmem>>, vector<1x64xf32>
    tpu.vector_store %arg14[%c0_845, %c1024], %922 {strides = array<i32>} : memref<1x3136xf32, #tpu.memory_space<vmem>>, vector<1x64xf32>,
    %c70_846 = arith.constant 70 : index
    %c0_847 = arith.constant 0 : index
    %924 = vector.load %arg13[%c70_846, %c0_847] : memref<224x64xf32, #tpu.memory_space<vmem>>, vector<1x64xf32>
    %c86_848 = arith.constant 86 : index
    %c0_849 = arith.constant 0 : index
    %925 = vector.load %arg13[%c86_848, %c0_849] : memref<224x64xf32, #tpu.memory_space<vmem>>, vector<1x64xf32>
    %926 = arith.maximumf %924, %925 : vector<1x64xf32>
    %c0_850 = arith.constant 0 : index
    %c1088 = arith.constant 1088 : index
    %927 = vector.load %arg14[%c0_850, %c1088] : memref<1x3136xf32, #tpu.memory_space<vmem>>, vector<1x64xf32>
    tpu.vector_store %arg14[%c0_850, %c1088], %926 {strides = array<i32>} : memref<1x3136xf32, #tpu.memory_space<vmem>>, vector<1x64xf32>,
    %c72_851 = arith.constant 72 : index
    %c0_852 = arith.constant 0 : index
    %928 = vector.load %arg13[%c72_851, %c0_852] : memref<224x64xf32, #tpu.memory_space<vmem>>, vector<1x64xf32>
    %c88_853 = arith.constant 88 : index
    %c0_854 = arith.constant 0 : index
    %929 = vector.load %arg13[%c88_853, %c0_854] : memref<224x64xf32, #tpu.memory_space<vmem>>, vector<1x64xf32>
    %930 = arith.maximumf %928, %929 : vector<1x64xf32>
    %c0_855 = arith.constant 0 : index
    %c1152 = arith.constant 1152 : index
    %931 = vector.load %arg14[%c0_855, %c1152] : memref<1x3136xf32, #tpu.memory_space<vmem>>, vector<1x64xf32>
    tpu.vector_store %arg14[%c0_855, %c1152], %930 {strides = array<i32>} : memref<1x3136xf32, #tpu.memory_space<vmem>>, vector<1x64xf32>,
    %c74_856 = arith.constant 74 : index
    %c0_857 = arith.constant 0 : index
    %932 = vector.load %arg13[%c74_856, %c0_857] : memref<224x64xf32, #tpu.memory_space<vmem>>, vector<1x64xf32>
    %c90_858 = arith.constant 90 : index
    %c0_859 = arith.constant 0 : index
    %933 = vector.load %arg13[%c90_858, %c0_859] : memref<224x64xf32, #tpu.memory_space<vmem>>, vector<1x64xf32>
    %934 = arith.maximumf %932, %933 : vector<1x64xf32>
    %c0_860 = arith.constant 0 : index
    %c1216 = arith.constant 1216 : index
    %935 = vector.load %arg14[%c0_860, %c1216] : memref<1x3136xf32, #tpu.memory_space<vmem>>, vector<1x64xf32>
    tpu.vector_store %arg14[%c0_860, %c1216], %934 {strides = array<i32>} : memref<1x3136xf32, #tpu.memory_space<vmem>>, vector<1x64xf32>,
    %c76_861 = arith.constant 76 : index
    %c0_862 = arith.constant 0 : index
    %936 = vector.load %arg13[%c76_861, %c0_862] : memref<224x64xf32, #tpu.memory_space<vmem>>, vector<1x64xf32>
    %c92_863 = arith.constant 92 : index
    %c0_864 = arith.constant 0 : index
    %937 = vector.load %arg13[%c92_863, %c0_864] : memref<224x64xf32, #tpu.memory_space<vmem>>, vector<1x64xf32>
    %938 = arith.maximumf %936, %937 : vector<1x64xf32>
    %c0_865 = arith.constant 0 : index
    %c1280 = arith.constant 1280 : index
    %939 = vector.load %arg14[%c0_865, %c1280] : memref<1x3136xf32, #tpu.memory_space<vmem>>, vector<1x64xf32>
    tpu.vector_store %arg14[%c0_865, %c1280], %938 {strides = array<i32>} : memref<1x3136xf32, #tpu.memory_space<vmem>>, vector<1x64xf32>,
    %c96_866 = arith.constant 96 : index
    %c0_867 = arith.constant 0 : index
    %940 = vector.load %arg13[%c96_866, %c0_867] : memref<224x64xf32, #tpu.memory_space<vmem>>, vector<1x64xf32>
    %c112_868 = arith.constant 112 : index
    %c0_869 = arith.constant 0 : index
    %941 = vector.load %arg13[%c112_868, %c0_869] : memref<224x64xf32, #tpu.memory_space<vmem>>, vector<1x64xf32>
    %942 = arith.maximumf %940, %941 : vector<1x64xf32>
    %c0_870 = arith.constant 0 : index
    %c1344 = arith.constant 1344 : index
    %943 = vector.load %arg14[%c0_870, %c1344] : memref<1x3136xf32, #tpu.memory_space<vmem>>, vector<1x64xf32>
    tpu.vector_store %arg14[%c0_870, %c1344], %942 {strides = array<i32>} : memref<1x3136xf32, #tpu.memory_space<vmem>>, vector<1x64xf32>,
    %c98_871 = arith.constant 98 : index
    %c0_872 = arith.constant 0 : index
    %944 = vector.load %arg13[%c98_871, %c0_872] : memref<224x64xf32, #tpu.memory_space<vmem>>, vector<1x64xf32>
    %c114_873 = arith.constant 114 : index
    %c0_874 = arith.constant 0 : index
    %945 = vector.load %arg13[%c114_873, %c0_874] : memref<224x64xf32, #tpu.memory_space<vmem>>, vector<1x64xf32>
    %946 = arith.maximumf %944, %945 : vector<1x64xf32>
    %c0_875 = arith.constant 0 : index
    %c1408 = arith.constant 1408 : index
    %947 = vector.load %arg14[%c0_875, %c1408] : memref<1x3136xf32, #tpu.memory_space<vmem>>, vector<1x64xf32>
    tpu.vector_store %arg14[%c0_875, %c1408], %946 {strides = array<i32>} : memref<1x3136xf32, #tpu.memory_space<vmem>>, vector<1x64xf32>,
    %c100_876 = arith.constant 100 : index
    %c0_877 = arith.constant 0 : index
    %948 = vector.load %arg13[%c100_876, %c0_877] : memref<224x64xf32, #tpu.memory_space<vmem>>, vector<1x64xf32>
    %c116_878 = arith.constant 116 : index
    %c0_879 = arith.constant 0 : index
    %949 = vector.load %arg13[%c116_878, %c0_879] : memref<224x64xf32, #tpu.memory_space<vmem>>, vector<1x64xf32>
    %950 = arith.maximumf %948, %949 : vector<1x64xf32>
    %c0_880 = arith.constant 0 : index
    %c1472 = arith.constant 1472 : index
    %951 = vector.load %arg14[%c0_880, %c1472] : memref<1x3136xf32, #tpu.memory_space<vmem>>, vector<1x64xf32>
    tpu.vector_store %arg14[%c0_880, %c1472], %950 {strides = array<i32>} : memref<1x3136xf32, #tpu.memory_space<vmem>>, vector<1x64xf32>,
    %c102_881 = arith.constant 102 : index
    %c0_882 = arith.constant 0 : index
    %952 = vector.load %arg13[%c102_881, %c0_882] : memref<224x64xf32, #tpu.memory_space<vmem>>, vector<1x64xf32>
    %c118_883 = arith.constant 118 : index
    %c0_884 = arith.constant 0 : index
    %953 = vector.load %arg13[%c118_883, %c0_884] : memref<224x64xf32, #tpu.memory_space<vmem>>, vector<1x64xf32>
    %954 = arith.maximumf %952, %953 : vector<1x64xf32>
    %c0_885 = arith.constant 0 : index
    %c1536 = arith.constant 1536 : index
    %955 = vector.load %arg14[%c0_885, %c1536] : memref<1x3136xf32, #tpu.memory_space<vmem>>, vector<1x64xf32>
    tpu.vector_store %arg14[%c0_885, %c1536], %954 {strides = array<i32>} : memref<1x3136xf32, #tpu.memory_space<vmem>>, vector<1x64xf32>,
    %c104_886 = arith.constant 104 : index
    %c0_887 = arith.constant 0 : index
    %956 = vector.load %arg13[%c104_886, %c0_887] : memref<224x64xf32, #tpu.memory_space<vmem>>, vector<1x64xf32>
    %c120_888 = arith.constant 120 : index
    %c0_889 = arith.constant 0 : index
    %957 = vector.load %arg13[%c120_888, %c0_889] : memref<224x64xf32, #tpu.memory_space<vmem>>, vector<1x64xf32>
    %958 = arith.maximumf %956, %957 : vector<1x64xf32>
    %c0_890 = arith.constant 0 : index
    %c1600 = arith.constant 1600 : index
    %959 = vector.load %arg14[%c0_890, %c1600] : memref<1x3136xf32, #tpu.memory_space<vmem>>, vector<1x64xf32>
    tpu.vector_store %arg14[%c0_890, %c1600], %958 {strides = array<i32>} : memref<1x3136xf32, #tpu.memory_space<vmem>>, vector<1x64xf32>,
    %c106_891 = arith.constant 106 : index
    %c0_892 = arith.constant 0 : index
    %960 = vector.load %arg13[%c106_891, %c0_892] : memref<224x64xf32, #tpu.memory_space<vmem>>, vector<1x64xf32>
    %c122_893 = arith.constant 122 : index
    %c0_894 = arith.constant 0 : index
    %961 = vector.load %arg13[%c122_893, %c0_894] : memref<224x64xf32, #tpu.memory_space<vmem>>, vector<1x64xf32>
    %962 = arith.maximumf %960, %961 : vector<1x64xf32>
    %c0_895 = arith.constant 0 : index
    %c1664 = arith.constant 1664 : index
    %963 = vector.load %arg14[%c0_895, %c1664] : memref<1x3136xf32, #tpu.memory_space<vmem>>, vector<1x64xf32>
    tpu.vector_store %arg14[%c0_895, %c1664], %962 {strides = array<i32>} : memref<1x3136xf32, #tpu.memory_space<vmem>>, vector<1x64xf32>,
    %c108_896 = arith.constant 108 : index
    %c0_897 = arith.constant 0 : index
    %964 = vector.load %arg13[%c108_896, %c0_897] : memref<224x64xf32, #tpu.memory_space<vmem>>, vector<1x64xf32>
    %c124_898 = arith.constant 124 : index
    %c0_899 = arith.constant 0 : index
    %965 = vector.load %arg13[%c124_898, %c0_899] : memref<224x64xf32, #tpu.memory_space<vmem>>, vector<1x64xf32>
    %966 = arith.maximumf %964, %965 : vector<1x64xf32>
    %c0_900 = arith.constant 0 : index
    %c1728 = arith.constant 1728 : index
    %967 = vector.load %arg14[%c0_900, %c1728] : memref<1x3136xf32, #tpu.memory_space<vmem>>, vector<1x64xf32>
    tpu.vector_store %arg14[%c0_900, %c1728], %966 {strides = array<i32>} : memref<1x3136xf32, #tpu.memory_space<vmem>>, vector<1x64xf32>,
    %c128_901 = arith.constant 128 : index
    %c0_902 = arith.constant 0 : index
    %968 = vector.load %arg13[%c128_901, %c0_902] : memref<224x64xf32, #tpu.memory_space<vmem>>, vector<1x64xf32>
    %c144_903 = arith.constant 144 : index
    %c0_904 = arith.constant 0 : index
    %969 = vector.load %arg13[%c144_903, %c0_904] : memref<224x64xf32, #tpu.memory_space<vmem>>, vector<1x64xf32>
    %970 = arith.maximumf %968, %969 : vector<1x64xf32>
    %c0_905 = arith.constant 0 : index
    %c1792 = arith.constant 1792 : index
    %971 = vector.load %arg14[%c0_905, %c1792] : memref<1x3136xf32, #tpu.memory_space<vmem>>, vector<1x64xf32>
    tpu.vector_store %arg14[%c0_905, %c1792], %970 {strides = array<i32>} : memref<1x3136xf32, #tpu.memory_space<vmem>>, vector<1x64xf32>,
    %c130_906 = arith.constant 130 : index
    %c0_907 = arith.constant 0 : index
    %972 = vector.load %arg13[%c130_906, %c0_907] : memref<224x64xf32, #tpu.memory_space<vmem>>, vector<1x64xf32>
    %c146_908 = arith.constant 146 : index
    %c0_909 = arith.constant 0 : index
    %973 = vector.load %arg13[%c146_908, %c0_909] : memref<224x64xf32, #tpu.memory_space<vmem>>, vector<1x64xf32>
    %974 = arith.maximumf %972, %973 : vector<1x64xf32>
    %c0_910 = arith.constant 0 : index
    %c1856 = arith.constant 1856 : index
    %975 = vector.load %arg14[%c0_910, %c1856] : memref<1x3136xf32, #tpu.memory_space<vmem>>, vector<1x64xf32>
    tpu.vector_store %arg14[%c0_910, %c1856], %974 {strides = array<i32>} : memref<1x3136xf32, #tpu.memory_space<vmem>>, vector<1x64xf32>,
    %c132_911 = arith.constant 132 : index
    %c0_912 = arith.constant 0 : index
    %976 = vector.load %arg13[%c132_911, %c0_912] : memref<224x64xf32, #tpu.memory_space<vmem>>, vector<1x64xf32>
    %c148_913 = arith.constant 148 : index
    %c0_914 = arith.constant 0 : index
    %977 = vector.load %arg13[%c148_913, %c0_914] : memref<224x64xf32, #tpu.memory_space<vmem>>, vector<1x64xf32>
    %978 = arith.maximumf %976, %977 : vector<1x64xf32>
    %c0_915 = arith.constant 0 : index
    %c1920 = arith.constant 1920 : index
    %979 = vector.load %arg14[%c0_915, %c1920] : memref<1x3136xf32, #tpu.memory_space<vmem>>, vector<1x64xf32>
    tpu.vector_store %arg14[%c0_915, %c1920], %978 {strides = array<i32>} : memref<1x3136xf32, #tpu.memory_space<vmem>>, vector<1x64xf32>,
    %c134_916 = arith.constant 134 : index
    %c0_917 = arith.constant 0 : index
    %980 = vector.load %arg13[%c134_916, %c0_917] : memref<224x64xf32, #tpu.memory_space<vmem>>, vector<1x64xf32>
    %c150_918 = arith.constant 150 : index
    %c0_919 = arith.constant 0 : index
    %981 = vector.load %arg13[%c150_918, %c0_919] : memref<224x64xf32, #tpu.memory_space<vmem>>, vector<1x64xf32>
    %982 = arith.maximumf %980, %981 : vector<1x64xf32>
    %c0_920 = arith.constant 0 : index
    %c1984 = arith.constant 1984 : index
    %983 = vector.load %arg14[%c0_920, %c1984] : memref<1x3136xf32, #tpu.memory_space<vmem>>, vector<1x64xf32>
    tpu.vector_store %arg14[%c0_920, %c1984], %982 {strides = array<i32>} : memref<1x3136xf32, #tpu.memory_space<vmem>>, vector<1x64xf32>,
    %c136_921 = arith.constant 136 : index
    %c0_922 = arith.constant 0 : index
    %984 = vector.load %arg13[%c136_921, %c0_922] : memref<224x64xf32, #tpu.memory_space<vmem>>, vector<1x64xf32>
    %c152_923 = arith.constant 152 : index
    %c0_924 = arith.constant 0 : index
    %985 = vector.load %arg13[%c152_923, %c0_924] : memref<224x64xf32, #tpu.memory_space<vmem>>, vector<1x64xf32>
    %986 = arith.maximumf %984, %985 : vector<1x64xf32>
    %c0_925 = arith.constant 0 : index
    %c2048 = arith.constant 2048 : index
    %987 = vector.load %arg14[%c0_925, %c2048] : memref<1x3136xf32, #tpu.memory_space<vmem>>, vector<1x64xf32>
    tpu.vector_store %arg14[%c0_925, %c2048], %986 {strides = array<i32>} : memref<1x3136xf32, #tpu.memory_space<vmem>>, vector<1x64xf32>,
    %c138_926 = arith.constant 138 : index
    %c0_927 = arith.constant 0 : index
    %988 = vector.load %arg13[%c138_926, %c0_927] : memref<224x64xf32, #tpu.memory_space<vmem>>, vector<1x64xf32>
    %c154_928 = arith.constant 154 : index
    %c0_929 = arith.constant 0 : index
    %989 = vector.load %arg13[%c154_928, %c0_929] : memref<224x64xf32, #tpu.memory_space<vmem>>, vector<1x64xf32>
    %990 = arith.maximumf %988, %989 : vector<1x64xf32>
    %c0_930 = arith.constant 0 : index
    %c2112 = arith.constant 2112 : index
    %991 = vector.load %arg14[%c0_930, %c2112] : memref<1x3136xf32, #tpu.memory_space<vmem>>, vector<1x64xf32>
    tpu.vector_store %arg14[%c0_930, %c2112], %990 {strides = array<i32>} : memref<1x3136xf32, #tpu.memory_space<vmem>>, vector<1x64xf32>,
    %c140_931 = arith.constant 140 : index
    %c0_932 = arith.constant 0 : index
    %992 = vector.load %arg13[%c140_931, %c0_932] : memref<224x64xf32, #tpu.memory_space<vmem>>, vector<1x64xf32>
    %c156_933 = arith.constant 156 : index
    %c0_934 = arith.constant 0 : index
    %993 = vector.load %arg13[%c156_933, %c0_934] : memref<224x64xf32, #tpu.memory_space<vmem>>, vector<1x64xf32>
    %994 = arith.maximumf %992, %993 : vector<1x64xf32>
    %c0_935 = arith.constant 0 : index
    %c2176 = arith.constant 2176 : index
    %995 = vector.load %arg14[%c0_935, %c2176] : memref<1x3136xf32, #tpu.memory_space<vmem>>, vector<1x64xf32>
    tpu.vector_store %arg14[%c0_935, %c2176], %994 {strides = array<i32>} : memref<1x3136xf32, #tpu.memory_space<vmem>>, vector<1x64xf32>,
    %c160_936 = arith.constant 160 : index
    %c0_937 = arith.constant 0 : index
    %996 = vector.load %arg13[%c160_936, %c0_937] : memref<224x64xf32, #tpu.memory_space<vmem>>, vector<1x64xf32>
    %c176_938 = arith.constant 176 : index
    %c0_939 = arith.constant 0 : index
    %997 = vector.load %arg13[%c176_938, %c0_939] : memref<224x64xf32, #tpu.memory_space<vmem>>, vector<1x64xf32>
    %998 = arith.maximumf %996, %997 : vector<1x64xf32>
    %c0_940 = arith.constant 0 : index
    %c2240 = arith.constant 2240 : index
    %999 = vector.load %arg14[%c0_940, %c2240] : memref<1x3136xf32, #tpu.memory_space<vmem>>, vector<1x64xf32>
    tpu.vector_store %arg14[%c0_940, %c2240], %998 {strides = array<i32>} : memref<1x3136xf32, #tpu.memory_space<vmem>>, vector<1x64xf32>,
    %c162_941 = arith.constant 162 : index
    %c0_942 = arith.constant 0 : index
    %1000 = vector.load %arg13[%c162_941, %c0_942] : memref<224x64xf32, #tpu.memory_space<vmem>>, vector<1x64xf32>
    %c178_943 = arith.constant 178 : index
    %c0_944 = arith.constant 0 : index
    %1001 = vector.load %arg13[%c178_943, %c0_944] : memref<224x64xf32, #tpu.memory_space<vmem>>, vector<1x64xf32>
    %1002 = arith.maximumf %1000, %1001 : vector<1x64xf32>
    %c0_945 = arith.constant 0 : index
    %c2304 = arith.constant 2304 : index
    %1003 = vector.load %arg14[%c0_945, %c2304] : memref<1x3136xf32, #tpu.memory_space<vmem>>, vector<1x64xf32>
    tpu.vector_store %arg14[%c0_945, %c2304], %1002 {strides = array<i32>} : memref<1x3136xf32, #tpu.memory_space<vmem>>, vector<1x64xf32>,
    %c164_946 = arith.constant 164 : index
    %c0_947 = arith.constant 0 : index
    %1004 = vector.load %arg13[%c164_946, %c0_947] : memref<224x64xf32, #tpu.memory_space<vmem>>, vector<1x64xf32>
    %c180_948 = arith.constant 180 : index
    %c0_949 = arith.constant 0 : index
    %1005 = vector.load %arg13[%c180_948, %c0_949] : memref<224x64xf32, #tpu.memory_space<vmem>>, vector<1x64xf32>
    %1006 = arith.maximumf %1004, %1005 : vector<1x64xf32>
    %c0_950 = arith.constant 0 : index
    %c2368 = arith.constant 2368 : index
    %1007 = vector.load %arg14[%c0_950, %c2368] : memref<1x3136xf32, #tpu.memory_space<vmem>>, vector<1x64xf32>
    tpu.vector_store %arg14[%c0_950, %c2368], %1006 {strides = array<i32>} : memref<1x3136xf32, #tpu.memory_space<vmem>>, vector<1x64xf32>,
    %c166_951 = arith.constant 166 : index
    %c0_952 = arith.constant 0 : index
    %1008 = vector.load %arg13[%c166_951, %c0_952] : memref<224x64xf32, #tpu.memory_space<vmem>>, vector<1x64xf32>
    %c182_953 = arith.constant 182 : index
    %c0_954 = arith.constant 0 : index
    %1009 = vector.load %arg13[%c182_953, %c0_954] : memref<224x64xf32, #tpu.memory_space<vmem>>, vector<1x64xf32>
    %1010 = arith.maximumf %1008, %1009 : vector<1x64xf32>
    %c0_955 = arith.constant 0 : index
    %c2432 = arith.constant 2432 : index
    %1011 = vector.load %arg14[%c0_955, %c2432] : memref<1x3136xf32, #tpu.memory_space<vmem>>, vector<1x64xf32>
    tpu.vector_store %arg14[%c0_955, %c2432], %1010 {strides = array<i32>} : memref<1x3136xf32, #tpu.memory_space<vmem>>, vector<1x64xf32>,
    %c168_956 = arith.constant 168 : index
    %c0_957 = arith.constant 0 : index
    %1012 = vector.load %arg13[%c168_956, %c0_957] : memref<224x64xf32, #tpu.memory_space<vmem>>, vector<1x64xf32>
    %c184_958 = arith.constant 184 : index
    %c0_959 = arith.constant 0 : index
    %1013 = vector.load %arg13[%c184_958, %c0_959] : memref<224x64xf32, #tpu.memory_space<vmem>>, vector<1x64xf32>
    %1014 = arith.maximumf %1012, %1013 : vector<1x64xf32>
    %c0_960 = arith.constant 0 : index
    %c2496 = arith.constant 2496 : index
    %1015 = vector.load %arg14[%c0_960, %c2496] : memref<1x3136xf32, #tpu.memory_space<vmem>>, vector<1x64xf32>
    tpu.vector_store %arg14[%c0_960, %c2496], %1014 {strides = array<i32>} : memref<1x3136xf32, #tpu.memory_space<vmem>>, vector<1x64xf32>,
    %c170_961 = arith.constant 170 : index
    %c0_962 = arith.constant 0 : index
    %1016 = vector.load %arg13[%c170_961, %c0_962] : memref<224x64xf32, #tpu.memory_space<vmem>>, vector<1x64xf32>
    %c186_963 = arith.constant 186 : index
    %c0_964 = arith.constant 0 : index
    %1017 = vector.load %arg13[%c186_963, %c0_964] : memref<224x64xf32, #tpu.memory_space<vmem>>, vector<1x64xf32>
    %1018 = arith.maximumf %1016, %1017 : vector<1x64xf32>
    %c0_965 = arith.constant 0 : index
    %c2560 = arith.constant 2560 : index
    %1019 = vector.load %arg14[%c0_965, %c2560] : memref<1x3136xf32, #tpu.memory_space<vmem>>, vector<1x64xf32>
    tpu.vector_store %arg14[%c0_965, %c2560], %1018 {strides = array<i32>} : memref<1x3136xf32, #tpu.memory_space<vmem>>, vector<1x64xf32>,
    %c172_966 = arith.constant 172 : index
    %c0_967 = arith.constant 0 : index
    %1020 = vector.load %arg13[%c172_966, %c0_967] : memref<224x64xf32, #tpu.memory_space<vmem>>, vector<1x64xf32>
    %c188_968 = arith.constant 188 : index
    %c0_969 = arith.constant 0 : index
    %1021 = vector.load %arg13[%c188_968, %c0_969] : memref<224x64xf32, #tpu.memory_space<vmem>>, vector<1x64xf32>
    %1022 = arith.maximumf %1020, %1021 : vector<1x64xf32>
    %c0_970 = arith.constant 0 : index
    %c2624 = arith.constant 2624 : index
    %1023 = vector.load %arg14[%c0_970, %c2624] : memref<1x3136xf32, #tpu.memory_space<vmem>>, vector<1x64xf32>
    tpu.vector_store %arg14[%c0_970, %c2624], %1022 {strides = array<i32>} : memref<1x3136xf32, #tpu.memory_space<vmem>>, vector<1x64xf32>,
    %c192_971 = arith.constant 192 : index
    %c0_972 = arith.constant 0 : index
    %1024 = vector.load %arg13[%c192_971, %c0_972] : memref<224x64xf32, #tpu.memory_space<vmem>>, vector<1x64xf32>
    %c208_973 = arith.constant 208 : index
    %c0_974 = arith.constant 0 : index
    %1025 = vector.load %arg13[%c208_973, %c0_974] : memref<224x64xf32, #tpu.memory_space<vmem>>, vector<1x64xf32>
    %1026 = arith.maximumf %1024, %1025 : vector<1x64xf32>
    %c0_975 = arith.constant 0 : index
    %c2688 = arith.constant 2688 : index
    %1027 = vector.load %arg14[%c0_975, %c2688] : memref<1x3136xf32, #tpu.memory_space<vmem>>, vector<1x64xf32>
    tpu.vector_store %arg14[%c0_975, %c2688], %1026 {strides = array<i32>} : memref<1x3136xf32, #tpu.memory_space<vmem>>, vector<1x64xf32>,
    %c194_976 = arith.constant 194 : index
    %c0_977 = arith.constant 0 : index
    %1028 = vector.load %arg13[%c194_976, %c0_977] : memref<224x64xf32, #tpu.memory_space<vmem>>, vector<1x64xf32>
    %c210_978 = arith.constant 210 : index
    %c0_979 = arith.constant 0 : index
    %1029 = vector.load %arg13[%c210_978, %c0_979] : memref<224x64xf32, #tpu.memory_space<vmem>>, vector<1x64xf32>
    %1030 = arith.maximumf %1028, %1029 : vector<1x64xf32>
    %c0_980 = arith.constant 0 : index
    %c2752 = arith.constant 2752 : index
    %1031 = vector.load %arg14[%c0_980, %c2752] : memref<1x3136xf32, #tpu.memory_space<vmem>>, vector<1x64xf32>
    tpu.vector_store %arg14[%c0_980, %c2752], %1030 {strides = array<i32>} : memref<1x3136xf32, #tpu.memory_space<vmem>>, vector<1x64xf32>,
    %c196_981 = arith.constant 196 : index
    %c0_982 = arith.constant 0 : index
    %1032 = vector.load %arg13[%c196_981, %c0_982] : memref<224x64xf32, #tpu.memory_space<vmem>>, vector<1x64xf32>
    %c212_983 = arith.constant 212 : index
    %c0_984 = arith.constant 0 : index
    %1033 = vector.load %arg13[%c212_983, %c0_984] : memref<224x64xf32, #tpu.memory_space<vmem>>, vector<1x64xf32>
    %1034 = arith.maximumf %1032, %1033 : vector<1x64xf32>
    %c0_985 = arith.constant 0 : index
    %c2816 = arith.constant 2816 : index
    %1035 = vector.load %arg14[%c0_985, %c2816] : memref<1x3136xf32, #tpu.memory_space<vmem>>, vector<1x64xf32>
    tpu.vector_store %arg14[%c0_985, %c2816], %1034 {strides = array<i32>} : memref<1x3136xf32, #tpu.memory_space<vmem>>, vector<1x64xf32>,
    %c198_986 = arith.constant 198 : index
    %c0_987 = arith.constant 0 : index
    %1036 = vector.load %arg13[%c198_986, %c0_987] : memref<224x64xf32, #tpu.memory_space<vmem>>, vector<1x64xf32>
    %c214_988 = arith.constant 214 : index
    %c0_989 = arith.constant 0 : index
    %1037 = vector.load %arg13[%c214_988, %c0_989] : memref<224x64xf32, #tpu.memory_space<vmem>>, vector<1x64xf32>
    %1038 = arith.maximumf %1036, %1037 : vector<1x64xf32>
    %c0_990 = arith.constant 0 : index
    %c2880 = arith.constant 2880 : index
    %1039 = vector.load %arg14[%c0_990, %c2880] : memref<1x3136xf32, #tpu.memory_space<vmem>>, vector<1x64xf32>
    tpu.vector_store %arg14[%c0_990, %c2880], %1038 {strides = array<i32>} : memref<1x3136xf32, #tpu.memory_space<vmem>>, vector<1x64xf32>,
    %c200_991 = arith.constant 200 : index
    %c0_992 = arith.constant 0 : index
    %1040 = vector.load %arg13[%c200_991, %c0_992] : memref<224x64xf32, #tpu.memory_space<vmem>>, vector<1x64xf32>
    %c216_993 = arith.constant 216 : index
    %c0_994 = arith.constant 0 : index
    %1041 = vector.load %arg13[%c216_993, %c0_994] : memref<224x64xf32, #tpu.memory_space<vmem>>, vector<1x64xf32>
    %1042 = arith.maximumf %1040, %1041 : vector<1x64xf32>
    %c0_995 = arith.constant 0 : index
    %c2944 = arith.constant 2944 : index
    %1043 = vector.load %arg14[%c0_995, %c2944] : memref<1x3136xf32, #tpu.memory_space<vmem>>, vector<1x64xf32>
    tpu.vector_store %arg14[%c0_995, %c2944], %1042 {strides = array<i32>} : memref<1x3136xf32, #tpu.memory_space<vmem>>, vector<1x64xf32>,
    %c202_996 = arith.constant 202 : index
    %c0_997 = arith.constant 0 : index
    %1044 = vector.load %arg13[%c202_996, %c0_997] : memref<224x64xf32, #tpu.memory_space<vmem>>, vector<1x64xf32>
    %c218_998 = arith.constant 218 : index
    %c0_999 = arith.constant 0 : index
    %1045 = vector.load %arg13[%c218_998, %c0_999] : memref<224x64xf32, #tpu.memory_space<vmem>>, vector<1x64xf32>
    %1046 = arith.maximumf %1044, %1045 : vector<1x64xf32>
    %c0_1000 = arith.constant 0 : index
    %c3008 = arith.constant 3008 : index
    %1047 = vector.load %arg14[%c0_1000, %c3008] : memref<1x3136xf32, #tpu.memory_space<vmem>>, vector<1x64xf32>
    tpu.vector_store %arg14[%c0_1000, %c3008], %1046 {strides = array<i32>} : memref<1x3136xf32, #tpu.memory_space<vmem>>, vector<1x64xf32>,
    %c204_1001 = arith.constant 204 : index
    %c0_1002 = arith.constant 0 : index
    %1048 = vector.load %arg13[%c204_1001, %c0_1002] : memref<224x64xf32, #tpu.memory_space<vmem>>, vector<1x64xf32>
    %c220_1003 = arith.constant 220 : index
    %c0_1004 = arith.constant 0 : index
    %1049 = vector.load %arg13[%c220_1003, %c0_1004] : memref<224x64xf32, #tpu.memory_space<vmem>>, vector<1x64xf32>
    %1050 = arith.maximumf %1048, %1049 : vector<1x64xf32>
    %c0_1005 = arith.constant 0 : index
    %c3072 = arith.constant 3072 : index
    %1051 = vector.load %arg14[%c0_1005, %c3072] : memref<1x3136xf32, #tpu.memory_space<vmem>>, vector<1x64xf32>
    tpu.vector_store %arg14[%c0_1005, %c3072], %1050 {strides = array<i32>} : memref<1x3136xf32, #tpu.memory_space<vmem>>, vector<1x64xf32>,
    %c0_1006 = arith.constant 0 : index
    %c0_1007 = arith.constant 0 : index
    %1052 = vector.load %arg14[%c0_1006, %c0_1007] : memref<1x3136xf32, #tpu.memory_space<vmem>>, vector<1x3136xf32>
    %1053 = arith.truncf %1052 : vector<1x3136xf32> to vector<1x3136xbf16>
    %c0_1008 = arith.constant 0 : index
    %c0_1009 = arith.constant 0 : index
    %1054 = vector.load %arg6[%c0_1008, %c0_1009] : memref<3136x128xbf16, #tpu.memory_space<vmem>>, vector<3136x128xbf16>
    %cst_1010 = arith.constant dense<0.000000e+00> : vector<1x128xf32>
    %1055 = tpu.matmul %1053, %1054, %cst_1010 {dimension_numbers = #tpu.dot_dimension_numbers<[1], [0], [0], [1], [0, 0, 1, 1], [], []>} : vector<1x3136xbf16>, vector<3136x128xbf16>, vector<1x128xf32> -> vector<1x128xf32>
    %c0_1011 = arith.constant 0 : index
    %c0_1012 = arith.constant 0 : index
    %1056 = vector.load %arg7[%c0_1011, %c0_1012] : memref<1x128xf32, #tpu.memory_space<vmem>>, vector<1x128xf32>
    %1057 = arith.addf %1055, %1056 : vector<1x128xf32>
    %cst_1013 = arith.constant 0.000000e+00 : f32
    %1058 = vector.broadcast %cst_1013 : f32 to vector<1x128xf32>
    %1059 = arith.maximumf %1057, %1058 : vector<1x128xf32>
    %1060 = arith.truncf %1059 : vector<1x128xf32> to vector<1x128xbf16>
    %c0_1014 = arith.constant 0 : index
    %c0_1015 = arith.constant 0 : index
    %1061 = vector.load %arg8[%c0_1014, %c0_1015] : memref<128x128xbf16, #tpu.memory_space<vmem>>, vector<128x128xbf16>
    %cst_1016 = arith.constant dense<0.000000e+00> : vector<1x128xf32>
    %1062 = tpu.matmul %1060, %1061, %cst_1016 {dimension_numbers = #tpu.dot_dimension_numbers<[1], [0], [0], [1], [0, 0, 1, 1], [], []>} : vector<1x128xbf16>, vector<128x128xbf16>, vector<1x128xf32> -> vector<1x128xf32>
    %c0_1017 = arith.constant 0 : index
    %c0_1018 = arith.constant 0 : index
    %1063 = vector.load %arg9[%c0_1017, %c0_1018] : memref<1x128xf32, #tpu.memory_space<vmem>>, vector<1x128xf32>
    %1064 = arith.addf %1062, %1063 : vector<1x128xf32>
    %c0_1019 = arith.constant 0 : index
    %c0_1020 = arith.constant 0 : index
    %c0_1021 = arith.constant 0 : index
    %1065 = vector.load %arg10[%c0_1019, %c0_1020, %c0_1021] : memref<1x1x128xf32, #tpu.memory_space<vmem>>, vector<1x1x128xf32>
    %1066 = vector.shape_cast %1065 : vector<1x1x128xf32> to vector<1x128xf32>
    %1067 = vector.shape_cast %1064 : vector<1x128xf32> to vector<1x1x128xf32>
    tpu.vector_store %arg10[%c0_1019, %c0_1020, %c0_1021], %1067 {strides = array<i32>} : memref<1x1x128xf32, #tpu.memory_space<vmem>>, vector<1x1x128xf32>,
    return
  }
  func.func @transform_0(%arg0: i32) -> (i32, i32, i32) {
    %c0_i32 = arith.constant 0 : i32
    %c0_i32_0 = arith.constant 0 : i32
    %c0_i32_1 = arith.constant 0 : i32
    return %arg0, %c0_i32, %c0_i32_0 : i32, i32, i32
  }
  func.func @transform_1(%arg0: i32) -> (i32, i32) {
    %c0_i32 = arith.constant 0 : i32
    %c0_i32_0 = arith.constant 0 : i32
    %c0_i32_1 = arith.constant 0 : i32
    return %c0_i32, %c0_i32_0 : i32, i32
  }
  func.func @transform_2(%arg0: i32) -> (i32, i32) {
    %c0_i32 = arith.constant 0 : i32
    %c0_i32_0 = arith.constant 0 : i32
    %c0_i32_1 = arith.constant 0 : i32
    return %c0_i32, %c0_i32_0 : i32, i32
  }
  func.func @transform_3(%arg0: i32) -> (i32, i32) {
    %c0_i32 = arith.constant 0 : i32
    %c0_i32_0 = arith.constant 0 : i32
    %c0_i32_1 = arith.constant 0 : i32
    return %c0_i32, %c0_i32_0 : i32, i32
  }
  func.func @transform_4(%arg0: i32) -> (i32, i32) {
    %c0_i32 = arith.constant 0 : i32
    %c0_i32_0 = arith.constant 0 : i32
    %c0_i32_1 = arith.constant 0 : i32
    return %c0_i32, %c0_i32_0 : i32, i32
  }
  func.func @transform_5(%arg0: i32) -> (i32, i32) {
    %c0_i32 = arith.constant 0 : i32
    %c0_i32_0 = arith.constant 0 : i32
    %c0_i32_1 = arith.constant 0 : i32
    return %c0_i32, %c0_i32_0 : i32, i32
  }
  func.func @transform_6(%arg0: i32) -> (i32, i32) {
    %c0_i32 = arith.constant 0 : i32
    %c0_i32_0 = arith.constant 0 : i32
    %c0_i32_1 = arith.constant 0 : i32
    return %c0_i32, %c0_i32_0 : i32, i32
  }
  func.func @transform_7(%arg0: i32) -> (i32, i32) {
    %c0_i32 = arith.constant 0 : i32
    %c0_i32_0 = arith.constant 0 : i32
    %c0_i32_1 = arith.constant 0 : i32
    return %c0_i32, %c0_i32_0 : i32, i32
  }
  func.func @transform_8(%arg0: i32) -> (i32, i32) {
    %c0_i32 = arith.constant 0 : i32
    %c0_i32_0 = arith.constant 0 : i32
    %c0_i32_1 = arith.constant 0 : i32
    return %c0_i32, %c0_i32_0 : i32, i32
  }
  func.func @transform_9(%arg0: i32) -> (i32, i32, i32) {
    %c0_i32 = arith.constant 0 : i32
    %c0_i32_0 = arith.constant 0 : i32
    %c0_i32_1 = arith.constant 0 : i32
    return %arg0, %c0_i32, %c0_i32_0 : i32, i32, i32
  }
}

</mosaic_0001>

<bundles_post_ra>
// kernel: kmnist_forward.1
= control target key start
LH: loop header
LB: loop body
LE: loop exit
PB: predicated region body
PF: predicated region fallthrough
CT: control target
= control target key end

     0   :  { %14 = vsyncpa [#allocation7], 0  ;;  %s12805_s0 = inlined_call_operand.vmem [shape: bf16[2,896,16], index: 0, kind: input, shape index: {}]   ;;  %s12806_s1 = inlined_call_operand.vmem [shape: bf16[16,32], index: 1, kind: input, shape index: {}]   ;;  %s12807_s2 = inlined_call_operand.vmem [shape: f32[1,32], index: 2, kind: input, shape index: {}]   ;;  %s12808_s3 = inlined_call_operand.vmem [shape: bf16[288,64], index: 3, kind: input, shape index: {}]   ;;  %s12809_s4 = inlined_call_operand.vmem [shape: f32[1,64], index: 4, kind: input, shape index: {}]   ;;  %s12810_s5 = inlined_call_operand.vmem [shape: bf16[3136,128], index: 5, kind: input, shape index: {}]   ;;  %s12811_s6 = inlined_call_operand.vmem [shape: f32[1,128], index: 6, kind: input, shape index: {}]   ;;  %s12812_s7 = inlined_call_operand.vmem [shape: bf16[128,128], index: 7, kind: input, shape index: {}]   ;;  %s12813_s8 = inlined_call_operand.vmem [shape: f32[1,128], index: 8, kind: input, shape index: {}]   ;;  %s12814_s9 = inlined_call_operand.hbm [shape: f32[2,1,128], index: 9, kind: output, shape index: {}]  }
   0x1   :  { %16 = vsyncpa [#allocation7 + $0x1], 0  ;;  %s10604_s30 = smov 0   ;;  %s10606_s10 = smov 0  }
   0x2   :  { %s10608_s11 = smov 0   ;;  %s10610_s12 = smov 0  }
   0x3 LB: > { %s10625_s13 = sadd.s32 4294967295, %s10547_s12   ;;  %s8547_s14 = sadd.s32 4294967294, %s10547_s12   ;;  %s10547_s12 = sphi %s10610_s12, %s12824_s12   ;;  %s10543_s11 = sphi %s10608_s11, %s12823_s11   ;;  %s10539_s10 = sphi %s10606_s10, %s12822_s10   ;;  %s10535_s30 = sphi %s10604_s30, %s12821_s30  }
   0x4   : > { %s10629_s15 = sadd.s32 1, %s10547_s12   ;;  %s223_s16 = sadd.s32 1, %s10543_s11 }
   0x5   : > { %s220_s17 = ssub.s32 %s10547_s12, %s10629_s15  ;;  %p233_p0 = scmp.ne.s32.totalorder %s10543_s11, %s10539_s10 }
   0x6   : > { %p221_p1 = scmp.eq.s32.totalorder %s220_s17, 0  ;;  %p234_p2 = scmp.eq.s32.totalorder %s10625_s13, 1 }
   0x7   : > { %p239_p3 = scmp.ne.s32.totalorder %s10539_s10, %s10535_s30  ;;  %p240_p4 = scmp.eq.s32.totalorder %s8547_s14, 1 }
   0x8   : > { %s10640_s18 = scalar_select %p221_p1, %s10543_s11, %s223_s16  }
   0x9   : > { %p10642_p5 = por %p234_p2, %p233_p0  ;;  %p10646_p6 = por %p240_p4, %p239_p3 }
   0xa   : > { %p8550_p7 = scmp.ge.s32.totalorder %s10547_s12, 1  ;;  %p290_p8 = scmp.lt.s32.totalorder %s10547_s12, 3 }
   0xc   : > { %p291_p9 = pnand %p8550_p7, %p290_p8 }
   0xd   : > { %v10203_v0 = vld [vmem:[%s12806_s1] sm:$0xff] (!%p291_p9)   ;;  %p325_p10 = scmp.lt.s32.totalorder (!%p291_p9), %s10625_s13, 1  ;;  %vm738_vm0 = vcmask (!%p291_p9), 130048   ;;  %vm1500_vm1 = vcmask (!%p291_p9), 261120   ;;  %v10549_v36 = vmov (!%p291_p9), 0.0   ;;  %v10260_v39 = vld [vmem:[%s12808_s3 + $0x10] sm:$0xff] (!%p291_p9)  }
   0xe   : > { %294 = sbr.rel (%p291_p9) target bundleno = 2112 (0x840), region = 56  ;;  %9499 = vmatprep.subr.bf16.mxu0 (!%p291_p9), %v10203_v0  ;;  %9933 = vmatprep.subr.bf16.mxu1 (!%p291_p9), %v10203_v0  ;;  %2062 = vst.msk [vmem:[#allocation3] sm:$0xff] (!%p291_p9), %vm1500_vm1, %v10549_v36  ;;  %2063 = vst.msk [vmem:[#allocation3 + $0x8] sm:$0xff] (!%p291_p9), %vm1500_vm1, %v10549_v36  ;;  %v10261_v42 = vld [vmem:[%s12808_s3 + $0x18] sm:$0xff] (!%p291_p9)   ;;  %v10850_v63 = vld [vmem:[%s12807_s2] ss:$0 sm:$0xff] (!%p291_p9) }
   0xf   : > { %9500 = vmatpush3.bf16.msra.mxu0 (!%p291_p9), %v10203_v0  ;;  %9934 = vmatpush3.bf16.msra.mxu1 (!%p291_p9), %v10203_v0  ;;  %2064 = vst.msk [vmem:[#allocation3 + $0x10] sm:$0xff] (!%p291_p9), %vm1500_vm1, %v10549_v36  ;;  %2065 = vst.msk [vmem:[#allocation3 + $0x18] sm:$0xff] (!%p291_p9), %vm1500_vm1, %v10549_v36  ;;  %vm2098_vm2 = vcmask (!%p291_p9), 253952   ;;  %vm2060_vm3 = vcmask (!%p291_p9), 256000   ;;  %vm5344_vm4 = vcmask (!%p291_p9), 523264   ;;  %s10551_s22 = smov (!%p291_p9), 64  }
  0x10   : > { %2066 = vst.msk [vmem:[#allocation3 + $0x20] sm:$0xff] (!%p291_p9), %vm1500_vm1, %v10549_v36  ;;  %2067 = vst.msk [vmem:[#allocation3 + $0x28] sm:$0xff] (!%p291_p9), %vm1500_vm1, %v10549_v36  ;;  %9613 = vmatprep.subr.bf16.mxu1 (!%p291_p9), %v10260_v39  ;;  %vm5484_vm6 = vcmask (!%p291_p9), 520192   ;;  %vm10552_vm10 = vmmov (!%p291_p9), 0   ;;  %s9017_s21 = sshll.u32 (!%p291_p9), %s10625_s13, 4  ;;  %s10553_s29 = smov (!%p291_p9), [#allocation6]  }
  0x11   : > { %2068 = vst.msk [vmem:[#allocation3 + $0x30] sm:$0xff] (!%p291_p9), %vm1500_vm1, %v10549_v36  ;;  %2069 = vst.msk [vmem:[#allocation3 + $0x38] sm:$0xff] (!%p291_p9), %vm1500_vm1, %v10549_v36  ;;  %s10489_s14 = sshll.u32 (!%p291_p9), %s10553_s29, 4  ;;  %s10490_s14 = int_to_ptr.vmem [resolvable:$false] %s10489_s14 }
  0x12   : > { %2070 = vst.msk [vmem:[#allocation3 + $0x40] sm:$0xff] (!%p291_p9), %vm1500_vm1, %v10549_v36  ;;  %2071 = vst.msk [vmem:[#allocation3 + $0x48] sm:$0xff] (!%p291_p9), %vm1500_vm1, %v10549_v36  ;;  %s10491_s16 = scalar_lea.vmem (!%p291_p9), %s10490_s14, 32 }
  0x13   : > { %2072 = vst.msk [vmem:[#allocation3 + $0x50] sm:$0xff] (!%p291_p9), %vm1500_vm1, %v10549_v36  ;;  %2073 = vst.msk [vmem:[#allocation3 + $0x58] sm:$0xff] (!%p291_p9), %vm1500_vm1, %v10549_v36 }
  0x14   : > { %2074 = vst.msk [vmem:[#allocation3 + $0x60] sm:$0xff] (!%p291_p9), %vm1500_vm1, %v10549_v36  ;;  %2075 = vst.msk [vmem:[#allocation3 + $0x68] sm:$0xff] (!%p291_p9), %vm1500_vm1, %v10549_v36 }
  0x15   : > { %s326_s23 = scalar_select %p325_p10, %s10625_s13, 1  ;;  %2076 = vst.msk [vmem:[#allocation3 + $0x70] sm:$0xff] %vm1500_vm1, %v10549_v36  ;;  %2077 = vst.msk [vmem:[#allocation3 + $0x78] sm:$0xff] %vm1500_vm1, %v10549_v36  ;;  %v2926_v43 = vld [vmem:[#allocation3 + $0x1] sm:$0xff] }
  0x16   : > { %2078 = vst.msk [vmem:[#allocation3 + $0x80] sm:$0xff] %vm1500_vm1, %v10549_v36  ;;  %2079 = vst.msk [vmem:[#allocation3 + $0x88] sm:$0xff] %vm1500_vm1, %v10549_v36  ;;  %v2927_v44 = vld [vmem:[#allocation3 + $0x9] sm:$0xff] }
  0x17   : > { %s10159_s24 = smul.u32 448, %s326_s23  ;;  %2080 = vst.msk [vmem:[#allocation3 + $0x90] sm:$0xff] %vm1500_vm1, %v10549_v36  ;;  %2081 = vst.msk [vmem:[#allocation3 + $0x98] sm:$0xff] %vm1500_vm1, %v10549_v36  ;;  %v2954_v45 = vpack.c.bf16 %v2927_v44, %v2926_v43 }
  0x18   : > { %2082 = vst.msk [vmem:[#allocation3 + $0xa0] sm:$0xff] %vm1500_vm1, %v10549_v36  ;;  %2083 = vst.msk [vmem:[#allocation3 + $0xa8] sm:$0xff] %vm1500_vm1, %v10549_v36 }
  0x19   : > { %s10660_s27 = scalar_lea.vmem %s12805_s0, %s10159_s24  ;;  %2084 = vst.msk [vmem:[#allocation3 + $0xb0] sm:$0xff] %vm1500_vm1, %v10549_v36  ;;  %2085 = vst.msk [vmem:[#allocation3 + $0xb8] sm:$0xff] %vm1500_vm1, %v10549_v36 }
  0x1a   : > { %v10204_v1 = vld [vmem:[%s10660_s27] sm:$0xff]   ;;  %v10205_v2 = vld [vmem:[%s10660_s27 + $0x8] sm:$0xff]   ;;  %v10206_v3 = vld [vmem:[%s10660_s27 + $0x10] sm:$0xff]   ;;  %2086 = vst.msk [vmem:[#allocation3 + $0xc0] sm:$0xff] %vm1500_vm1, %v10549_v36 }
  0x1b   : > { %9501 = vmatprep.mubr.msk.bf16.mxu0 %vm738_vm0, %v10204_v1  ;;  %v10207_v4 = vld [vmem:[%s10660_s27 + $0x18] sm:$0xff]   ;;  %v10208_v5 = vld [vmem:[%s10660_s27 + $0x20] sm:$0xff]   ;;  %v10209_v6 = vld [vmem:[%s10660_s27 + $0x28] sm:$0xff]   ;;  %2087 = vst.msk [vmem:[#allocation3 + $0xc8] sm:$0xff] %vm1500_vm1, %v10549_v36 }
  0x1c   : > { %9502 = vmatmul.mubr.msk.bf16.vlgmr.msra.gmra.mrb[0].mxu0 %vm738_vm0, %v10205_v2  ;;  %v10210_v7 = vld [vmem:[%s10660_s27 + $0x30] sm:$0xff]   ;;  %v10211_v8 = vld [vmem:[%s10660_s27 + $0x38] sm:$0xff]   ;;  %v10212_v9 = vld [vmem:[%s10660_s27 + $0x40] sm:$0xff]   ;;  %2088 = vst.msk [vmem:[#allocation3 + $0xd0] sm:$0xff] %vm1500_vm1, %v10549_v36 }
  0x1d   : > { %9505 = vmatprep.mubr.msk.bf16.mxu0 %vm738_vm0, %v10206_v3  ;;  %v10213_v10 = vld [vmem:[%s10660_s27 + $0x48] sm:$0xff]   ;;  %v10214_v11 = vld [vmem:[%s10660_s27 + $0x50] sm:$0xff]   ;;  %v10215_v12 = vld [vmem:[%s10660_s27 + $0x58] sm:$0xff]   ;;  %2089 = vst.msk [vmem:[#allocation3 + $0xd8] sm:$0xff] %vm1500_vm1, %v10549_v36 }
  0x1e   : > { %v10216_v13 = vld [vmem:[%s10660_s27 + $0x60] sm:$0xff]   ;;  %v10217_v14 = vld [vmem:[%s10660_s27 + $0x68] sm:$0xff]   ;;  %v10218_v15 = vld [vmem:[%s10660_s27 + $0x70] sm:$0xff]   ;;  %2090 = vst.msk [vmem:[#allocation3 + $0xe0] sm:$0xff] %vm1500_vm1, %v10549_v36 }
  0x1f   : > { %v10219_v16 = vld [vmem:[%s10660_s27 + $0x78] sm:$0xff]   ;;  %v10220_v17 = vld [vmem:[%s10660_s27 + $0x80] sm:$0xff]   ;;  %v10221_v18 = vld [vmem:[%s10660_s27 + $0x88] sm:$0xff]   ;;  %2091 = vst.msk [vmem:[#allocation3 + $0xe8] sm:$0xff] %vm1500_vm1, %v10549_v36 }
  0x20   : > { %v10222_v19 = vld [vmem:[%s10660_s27 + $0x90] sm:$0xff]   ;;  %v10223_v20 = vld [vmem:[%s10660_s27 + $0x98] sm:$0xff]   ;;  %v10224_v21 = vld [vmem:[%s10660_s27 + $0xa0] sm:$0xff]   ;;  %2092 = vst.msk [vmem:[#allocation3 + $0xf0] sm:$0xff] %vm1500_vm1, %v10549_v36 }
  0x21   : > { %v10257_v22 = vld [vmem:[%s10660_s27 + $0x1b0] sm:$0xff]   ;;  %v10225_v23 = vld [vmem:[%s10660_s27 + $0xa8] sm:$0xff]   ;;  %v10259_v25 = vld [vmem:[%s10660_s27 + $0x1b8] sm:$0xff]   ;;  %2093 = vst.msk [vmem:[#allocation3 + $0xf8] sm:$0xff] %vm1500_vm1, %v10549_v36 }
  0x22   : > { %v10226_v24 = vld [vmem:[%s10660_s27 + $0xb0] sm:$0xff]   ;;  %9609 = vmatprep.mubr.msk.bf16.mxu1 %vm738_vm0, %v10257_v22  ;;  %v10227_v26 = vld [vmem:[%s10660_s27 + $0xb8] sm:$0xff]   ;;  %v10228_v27 = vld [vmem:[%s10660_s27 + $0xc0] sm:$0xff]   ;;  %2094 = vst.msk [vmem:[#allocation3 + $0x100] sm:$0xff] %vm1500_vm1, %v10549_v36 }
  0x23   : > { %9610 = vmatmul.mubr.msk.bf16.vlgmr.msra.gmra.mrb[0].mxu1 %vm738_vm0, %v10259_v25  ;;  %v10229_v28 = vld [vmem:[%s10660_s27 + $0xc8] sm:$0xff]   ;;  %v10230_v29 = vld [vmem:[%s10660_s27 + $0xd0] sm:$0xff]   ;;  %v10231_v30 = vld [vmem:[%s10660_s27 + $0xd8] sm:$0xff]  }
  0x24   : > { %9506 = vmatmul.mubr.msk.bf16.gmra.mrb[4].mxu0 %vm738_vm0, %v10207_v4  ;;  %v10232_v31 = vld [vmem:[%s10660_s27 + $0xe0] sm:$0xff]   ;;  %v10233_v32 = vld [vmem:[%s10660_s27 + $0xe8] sm:$0xff]   ;;  %v10234_v33 = vld [vmem:[%s10660_s27 + $0xf0] sm:$0xff]   ;;  %9614 = vmatpush3.bf16.msra.mxu1 %v10260_v39 }
  0x25   : > { %9509 = vmatprep.mubr.msk.bf16.mxu0 %vm738_vm0, %v10208_v5  ;;  %v10235_v34 = vld [vmem:[%s10660_s27 + $0xf8] sm:$0xff]   ;;  %v10236_v35 = vld [vmem:[%s10660_s27 + $0x100] sm:$0xff]   ;;  %v10237_v37 = vld [vmem:[%s10660_s27 + $0x108] sm:$0xff]   ;;  %9615 = vmatprep.subr.bf16.mxu1 %v10261_v42 }
  0x26   : > { %v10238_v38 = vld [vmem:[%s10660_s27 + $0x110] sm:$0xff]   ;;  %v10239_v40 = vld [vmem:[%s10660_s27 + $0x118] sm:$0xff]   ;;  %v10240_v41 = vld [vmem:[%s10660_s27 + $0x120] sm:$0xff]   ;;  %9617 = vmatprep.mubr.msk.bf16.mxu1 %vm1500_vm1, %v2954_v45 }
  0x27   : > { %v10241_v46 = vld [vmem:[%s10660_s27 + $0x128] sm:$0xff]   ;;  %v10242_v47 = vld [vmem:[%s10660_s27 + $0x130] sm:$0xff]   ;;  %v10243_v48 = vld [vmem:[%s10660_s27 + $0x138] sm:$0xff]  }
  0x28   : > { %9616 = vmatpush3.bf16.msra.mxu1 %v10261_v42  ;;  %v10244_v49 = vld [vmem:[%s10660_s27 + $0x140] sm:$0xff]   ;;  %v10245_v50 = vld [vmem:[%s10660_s27 + $0x148] sm:$0xff]   ;;  %v10246_v51 = vld [vmem:[%s10660_s27 + $0x150] sm:$0xff]  }
  0x29   : > { %v10247_v52 = vld [vmem:[%s10660_s27 + $0x158] sm:$0xff]   ;;  %v10248_v53 = vld [vmem:[%s10660_s27 + $0x160] sm:$0xff]   ;;  %v10249_v54 = vld [vmem:[%s10660_s27 + $0x168] sm:$0xff]  }
  0x2a   : > { %v10250_v55 = vld [vmem:[%s10660_s27 + $0x170] sm:$0xff]   ;;  %v10251_v56 = vld [vmem:[%s10660_s27 + $0x178] sm:$0xff]   ;;  %v10252_v57 = vld [vmem:[%s10660_s27 + $0x180] sm:$0xff]  }
  0x2b   : > { %v10253_v58 = vld [vmem:[%s10660_s27 + $0x188] sm:$0xff]   ;;  %v10254_v59 = vld [vmem:[%s10660_s27 + $0x190] sm:$0xff]   ;;  %v10255_v60 = vld [vmem:[%s10660_s27 + $0x198] sm:$0xff]  }
  0x2c   : > { %9510 = vmatmul.mubr.msk.bf16.gmra.mrb[8].mxu0 %vm738_vm0, %v10209_v6  ;;  %v10256_v61 = vld [vmem:[%s10660_s27 + $0x1a0] sm:$0xff]   ;;  %v10258_v62 = vld [vmem:[%s10660_s27 + $0x1a8] sm:$0xff]   ;;  %s12763_s27 = scalar_lea.hbm %s12814_s9, %s9017_s21 }
  0x2d   : > { %9513 = vmatprep.mubr.msk.bf16.mxu0 %vm738_vm0, %v10210_v7 }
  0x34   : > { %9514 = vmatmul.mubr.msk.bf16.gmra.mrb[12].mxu0 %vm738_vm0, %v10211_v8 }
  0x35   : > { %9517 = vmatprep.mubr.msk.bf16.mxu0 %vm738_vm0, %v10212_v9 }
  0x3c   : > { %9518 = vmatmul.mubr.msk.bf16.gmra.mrb[16].mxu0 %vm738_vm0, %v10213_v10 }
  0x3d   : > { %9521 = vmatprep.mubr.msk.bf16.mxu0 %vm738_vm0, %v10214_v11 }
  0x44   : > { %9522 = vmatmul.mubr.msk.bf16.gmra.mrb[20].mxu0 %vm738_vm0, %v10215_v12 }
  0x45   : > { %9525 = vmatprep.mubr.msk.bf16.mxu0 %vm738_vm0, %v10216_v13 }
  0x4c   : > { %9526 = vmatmul.mubr.msk.bf16.gmra.mrb[24].mxu0 %vm738_vm0, %v10217_v14 }
  0x4d   : > { %9529 = vmatprep.mubr.msk.bf16.mxu0 %vm738_vm0, %v10218_v15 }
  0x54   : > { %9530 = vmatmul.mubr.msk.bf16.gmra.mrb[28].mxu0 %vm738_vm0, %v10219_v16 }
  0x55   : > { %9533 = vmatprep.mubr.msk.bf16.mxu0 %vm738_vm0, %v10220_v17 }
  0x5c   : > { %9534 = vmatmul.mubr.msk.bf16.gmra.mrb[32].mxu0 %vm738_vm0, %v10221_v18 }
  0x5d   : > { %9537 = vmatprep.mubr.msk.bf16.mxu0 %vm738_vm0, %v10222_v19 }
  0x64   : > { %9538 = vmatmul.mubr.msk.bf16.gmra.mrb[36].mxu0 %vm738_vm0, %v10223_v20 }
  0x65   : > { %9541 = vmatprep.mubr.msk.bf16.mxu0 %vm738_vm0, %v10224_v21 }
  0x6c   : > { %9542 = vmatmul.mubr.msk.bf16.gmra.mrb[40].mxu0 %vm738_vm0, %v10225_v23 }
  0x6d   : > { %9545 = vmatprep.mubr.msk.bf16.mxu0 %vm738_vm0, %v10226_v24 }
  0x74   : > { %9546 = vmatmul.mubr.msk.bf16.gmra.mrb[44].mxu0 %vm738_vm0, %v10227_v26 }
  0x75   : > { %9549 = vmatprep.mubr.msk.bf16.mxu0 %vm738_vm0, %v10228_v27 }
  0x7c   : > { %9550 = vmatmul.mubr.msk.bf16.gmra.mrb[48].mxu0 %vm738_vm0, %v10229_v28 }
  0x7d   : > { %9553 = vmatprep.mubr.msk.bf16.mxu0 %vm738_vm0, %v10230_v29 }
  0x84   : > { %9554 = vmatmul.mubr.msk.bf16.gmra.mrb[52].mxu0 %vm738_vm0, %v10231_v30 }
  0x85   : > { %9557 = vmatprep.mubr.msk.bf16.mxu0 %vm738_vm0, %v10232_v31 }
  0x8c   : > { %9558 = vmatmul.mubr.msk.bf16.gmra.mrb[56].mxu0 %vm738_vm0, %v10233_v32 }
  0x8d   : > { %9561 = vmatprep.mubr.msk.bf16.mxu0 %vm738_vm0, %v10234_v33 }
  0x94   : > { %9562 = vmatmul.mubr.msk.bf16.gmra.mrb[60].mxu0 %vm738_vm0, %v10235_v34 }
  0x95   : > { %9565 = vmatprep.mubr.msk.bf16.mxu0 %vm738_vm0, %v10236_v35 }
  0x9c   : > { %9566 = vmatmul.mubr.msk.bf16.gmra.mrb[64].mxu0 %vm738_vm0, %v10237_v37 }
  0x9d   : > { %9569 = vmatprep.mubr.msk.bf16.mxu0 %vm738_vm0, %v10238_v38 }
  0xa4   : > { %9570 = vmatmul.mubr.msk.bf16.gmra.mrb[68].mxu0 %vm738_vm0, %v10239_v40 }
  0xa5   : > { %9573 = vmatprep.mubr.msk.bf16.mxu0 %vm738_vm0, %v10240_v41 }
  0xac   : > { %9574 = vmatmul.mubr.msk.bf16.gmra.mrb[72].mxu0 %vm738_vm0, %v10241_v46 }
  0xad   : > { %9577 = vmatprep.mubr.msk.bf16.mxu0 %vm738_vm0, %v10242_v47 }
  0xb4   : > { %9578 = vmatmul.mubr.msk.bf16.gmra.mrb[76].mxu0 %vm738_vm0, %v10243_v48 }
  0xb5   : > { %9581 = vmatprep.mubr.msk.bf16.mxu0 %vm738_vm0, %v10244_v49 }
  0xbc   : > { %9582 = vmatmul.mubr.msk.bf16.gmra.mrb[80].mxu0 %vm738_vm0, %v10245_v50 }
  0xbd   : > { %9585 = vmatprep.mubr.msk.bf16.mxu0 %vm738_vm0, %v10246_v51 }
  0xc4   : > { %9586 = vmatmul.mubr.msk.bf16.gmra.mrb[84].mxu0 %vm738_vm0, %v10247_v52 }
  0xc5   : > { %9589 = vmatprep.mubr.msk.bf16.mxu0 %vm738_vm0, %v10248_v53 }
  0xcc   : > { %9590 = vmatmul.mubr.msk.bf16.gmra.mrb[88].mxu0 %vm738_vm0, %v10249_v54 }
  0xcd   : > { %9593 = vmatprep.mubr.msk.bf16.mxu0 %vm738_vm0, %v10250_v55 }
  0xd4   : > { %9594 = vmatmul.mubr.msk.bf16.gmra.mrb[92].mxu0 %vm738_vm0, %v10251_v56 }
  0xd5   : > { %9597 = vmatprep.mubr.msk.bf16.mxu0 %vm738_vm0, %v10252_v57 }
  0xdc   : > { %9598 = vmatmul.mubr.msk.bf16.gmra.mrb[96].mxu0 %vm738_vm0, %v10253_v58 }
  0xdd   : > { %9601 = vmatprep.mubr.msk.bf16.mxu0 %vm738_vm0, %v10254_v59 }
  0xe4   : > { %9602 = vmatmul.mubr.msk.bf16.gmra.mrb[100].mxu0 %vm738_vm0, %v10255_v60 }
  0xe5   : > { %9605 = vmatprep.mubr.msk.bf16.mxu0 %vm738_vm0, %v10256_v61 }
  0xec   : > { %9606 = vmatmul.mubr.msk.bf16.gmra.mrb[104].mxu0 %vm738_vm0, %v10258_v62 }
  0xef   : > { %v9503_v0 = vpop.f32.mrb[0].mxu0 }
  0xf0   : > { %v950_v1 = vadd.f32 %v9503_v0, %v10850_v63  ;;  %v941_v2 = vpop.f32.mrb[1].mxu0 }
  0xf1   : > { %v942_v3 = vadd.f32 %v10850_v63, %v941_v2  ;;  %v9504_v4 = vpop.f32.mrb[2].mxu0 }
  0xf2   : > { %v1390_v5 = vmax.f32 %v950_v1, 0.0  ;;  %v953_v6 = vadd.f32 %v9504_v4, %v10850_v63  ;;  %v944_v7 = vpop.f32.mrb[3].mxu0 }
  0xf3   : > { %v1388_v8 = vmax.f32 %v942_v3, 0.0  ;;  %v945_v9 = vadd.f32 %v10850_v63, %v944_v7 }
  0xf4   : > { %1503 = vst.msk [vmem:[#allocation2 + $0x10] sm:$0xff] %vm1500_vm1, %v1390_v5  ;;  %v1391_v10 = vmax.f32 %v953_v6, 0.0 }
  0xf5   : > { %1501 = vst.msk [vmem:[#allocation2] sm:$0xff] %vm1500_vm1, %v1388_v8  ;;  %v1389_v11 = vmax.f32 %v945_v9, 0.0 }
  0xf6   : > { %1504 = vst.msk [vmem:[#allocation2 + $0x18] sm:$0xff] %vm1500_vm1, %v1391_v10 }
  0xf7   : > { %1502 = vst.msk [vmem:[#allocation2 + $0x8] sm:$0xff] %vm1500_vm1, %v1389_v11  ;;  %v9507_v12 = vpop.f32.mrb[4].mxu0 }
  0xf8   : > { %v966_v13 = vadd.f32 %v9507_v12, %v10850_v63  ;;  %v957_v14 = vpop.f32.mrb[5].mxu0 }
  0xf9   : > { %v958_v15 = vadd.f32 %v10850_v63, %v957_v14  ;;  %v9508_v16 = vpop.f32.mrb[6].mxu0 }
  0xfa   : > { %v1394_v17 = vmax.f32 %v966_v13, 0.0  ;;  %v969_v18 = vadd.f32 %v9508_v16, %v10850_v63  ;;  %v960_v19 = vpop.f32.mrb[7].mxu0 }
  0xfb   : > { %v1392_v20 = vmax.f32 %v958_v15, 0.0  ;;  %v961_v21 = vadd.f32 %v10850_v63, %v960_v19  ;;  %v1615_v23 = vld [vmem:[#allocation2 + $0x10] sm:$0xff] }
  0xfc   : > { %1507 = vst.msk [vmem:[#allocation2 + $0x30] sm:$0xff] %vm1500_vm1, %v1394_v17  ;;  %v1395_v22 = vmax.f32 %v969_v18, 0.0  ;;  %v1613_v25 = vld [vmem:[#allocation2] sm:$0xff] }
  0xfd   : > { %v1727_v24 = vld [vmem:[#allocation2 + $0x11] sm:$0xff]  ;;  %1505 = vst.msk [vmem:[#allocation2 + $0x20] sm:$0xff] %vm1500_vm1, %v1392_v20  ;;  %v1393_v26 = vmax.f32 %v961_v21, 0.0 }
  0xfe   : > { %v1839_v27 = vmax.f32 %v1615_v23, %v1727_v24  ;;  %v1614_v28 = vld [vmem:[#allocation2 + $0x8] sm:$0xff]  ;;  %1508 = vst.msk [vmem:[#allocation2 + $0x38] sm:$0xff] %vm1500_vm1, %v1395_v22  ;;  %v1616_v44 = vld [vmem:[#allocation2 + $0x18] sm:$0xff] }
  0xff   : > { %v1725_v29 = vld [vmem:[#allocation2 + $0x1] sm:$0xff]  ;;  %v1726_v30 = vld [vmem:[#allocation2 + $0x9] sm:$0xff]  ;;  %1506 = vst.msk [vmem:[#allocation2 + $0x28] sm:$0xff] %vm1500_vm1, %v1393_v26  ;;  %v9511_v33 = vpop.f32.mrb[8].mxu0 }
 0x100   : > { %v1837_v31 = vmax.f32 %v1613_v25, %v1725_v29  ;;  %v1838_v32 = vmax.f32 %v1614_v28, %v1726_v30  ;;  %1951 = vst.msk [vmem:[#allocation2 + $0x10] sm:$0xff] %vm1500_vm1, %v1839_v27  ;;  %v982_v34 = vadd.f32 %v9511_v33, %v10850_v63  ;;  %v973_v35 = vpop.f32.mrb[9].mxu0 }
 0x101   : > { %v974_v37 = vadd.f32 %v10850_v63, %v973_v35  ;;  %v9512_v38 = vpop.f32.mrb[10].mxu0 }
 0x102   : > { %1949 = vst.msk [vmem:[#allocation2] sm:$0xff] %vm1500_vm1, %v1837_v31  ;;  %1950 = vst.msk [vmem:[#allocation2 + $0x8] sm:$0xff] %vm1500_vm1, %v1838_v32  ;;  %v1398_v39 = vmax.f32 %v982_v34, 0.0  ;;  %v985_v40 = vadd.f32 %v9512_v38, %v10850_v63  ;;  %v976_v41 = vpop.f32.mrb[11].mxu0 }
 0x103   : > { %v1396_v42 = vmax.f32 %v974_v37, 0.0  ;;  %v977_v43 = vadd.f32 %v10850_v63, %v976_v41  ;;  %v1619_v47 = vld [vmem:[#allocation2 + $0x30] sm:$0xff] }
 0x104   : > { %v1728_v45 = vld [vmem:[#allocation2 + $0x19] sm:$0xff]  ;;  %1511 = vst.msk [vmem:[#allocation2 + $0x50] sm:$0xff] %vm1500_vm1, %v1398_v39  ;;  %v1399_v46 = vmax.f32 %v985_v40, 0.0 }
 0x105   : > { %v1840_v48 = vmax.f32 %v1616_v44, %v1728_v45  ;;  %v1731_v49 = vld [vmem:[#allocation2 + $0x31] sm:$0xff]  ;;  %v1617_v50 = vld [vmem:[#allocation2 + $0x20] sm:$0xff]  ;;  %1509 = vst.msk [vmem:[#allocation2 + $0x40] sm:$0xff] %vm1500_vm1, %v1396_v42  ;;  %v1397_v51 = vmax.f32 %v977_v43, 0.0 }
 0x106   : > { %v1843_v52 = vmax.f32 %v1619_v47, %v1731_v49  ;;  %v1618_v53 = vld [vmem:[#allocation2 + $0x28] sm:$0xff]  ;;  %1512 = vst.msk [vmem:[#allocation2 + $0x58] sm:$0xff] %vm1500_vm1, %v1399_v46  ;;  %v1620_v3 = vld [vmem:[#allocation2 + $0x38] sm:$0xff] }
 0x107   : > { %v1729_v54 = vld [vmem:[#allocation2 + $0x21] sm:$0xff]  ;;  %v1730_v55 = vld [vmem:[#allocation2 + $0x29] sm:$0xff]  ;;  %1952 = vst.msk [vmem:[#allocation2 + $0x18] sm:$0xff] %vm1500_vm1, %v1840_v48  ;;  %1510 = vst.msk [vmem:[#allocation2 + $0x48] sm:$0xff] %vm1500_vm1, %v1397_v51  ;;  %v9515_v58 = vpop.f32.mrb[12].mxu0 }
 0x108   : > { %v1841_v56 = vmax.f32 %v1617_v50, %v1729_v54  ;;  %v1842_v57 = vmax.f32 %v1618_v53, %v1730_v55  ;;  %1955 = vst.msk [vmem:[#allocation2 + $0x30] sm:$0xff] %vm1500_vm1, %v1843_v52  ;;  %v998_v59 = vadd.f32 %v9515_v58, %v10850_v63  ;;  %v989_v60 = vpop.f32.mrb[13].mxu0  ;;  %v2128_v12 = vld [vmem:[#allocation2 + $0x10] sm:$0x1]  ;;  %v2132_v13 = vld [vmem:[#allocation2 + $0x12] sm:$0x1] }
 0x109   : > { %v990_v62 = vadd.f32 %v10850_v63, %v989_v60  ;;  %v9516_v0 = vpop.f32.mrb[14].mxu0  ;;  %v2112_v14 = vld [vmem:[#allocation2 + $0x8] sm:$0x1]  ;;  %v2116_v15 = vld [vmem:[#allocation2 + $0xa] sm:$0x1] }
 0x10a   : > { %1953 = vst.msk [vmem:[#allocation2 + $0x20] sm:$0xff] %vm1500_vm1, %v1841_v56  ;;  %1954 = vst.msk [vmem:[#allocation2 + $0x28] sm:$0xff] %vm1500_vm1, %v1842_v57  ;;  %v1402_v61 = vmax.f32 %v998_v59, 0.0  ;;  %v1001_v1 = vadd.f32 %v9516_v0, %v10850_v63  ;;  %v992_v2 = vpop.f32.mrb[15].mxu0  ;;  %v2120_v16 = vld [vmem:[#allocation2 + $0xc] sm:$0x1] }
 0x10b   : > { %v1400_v5 = vmax.f32 %v990_v62, 0.0  ;;  %v993_v6 = vadd.f32 %v10850_v63, %v992_v2  ;;  %v1623_v7 = vld [vmem:[#allocation2 + $0x50] sm:$0xff]  ;;  %v2124_v22 = vld [vmem:[#allocation2 + $0xe] sm:$0x1]  ;;  %v2095_v26 = vld [vmem:[#allocation2] sm:$0x1] }
 0x10c   : > { %v1732_v4 = vld [vmem:[#allocation2 + $0x39] sm:$0xff]  ;;  %1515 = vst.msk [vmem:[#allocation2 + $0x70] sm:$0xff] %vm1500_vm1, %v1402_v61  ;;  %v1403_v11 = vmax.f32 %v1001_v1, 0.0  ;;  %v2100_v33 = vld [vmem:[#allocation2 + $0x2] sm:$0x1] }
 0x10d   : > { %v1844_v8 = vmax.f32 %v1620_v3, %v1732_v4  ;;  %v1735_v9 = vld [vmem:[#allocation2 + $0x51] sm:$0xff]  ;;  %v1621_v10 = vld [vmem:[#allocation2 + $0x40] sm:$0xff]  ;;  %1513 = vst.msk [vmem:[#allocation2 + $0x60] sm:$0xff] %vm1500_vm1, %v1400_v5  ;;  %v1401_v21 = vmax.f32 %v993_v6, 0.0 }
 0x10e   : > { %v1847_v17 = vmax.f32 %v1623_v7, %v1735_v9  ;;  %v1622_v18 = vld [vmem:[#allocation2 + $0x48] sm:$0xff]  ;;  %1516 = vst.msk [vmem:[#allocation2 + $0x78] sm:$0xff] %vm1500_vm1, %v1403_v11  ;;  %v2104_v34 = vld [vmem:[#allocation2 + $0x4] sm:$0x1]  ;;  %v2108_v44 = vld [vmem:[#allocation2 + $0x6] sm:$0x1] }
 0x10f   : > { %v1733_v19 = vld [vmem:[#allocation2 + $0x41] sm:$0xff]  ;;  %v1734_v20 = vld [vmem:[#allocation2 + $0x49] sm:$0xff]  ;;  %1956 = vst.msk [vmem:[#allocation2 + $0x38] sm:$0xff] %vm1500_vm1, %v1844_v8  ;;  %v9519_v25 = vpop.f32.mrb[16].mxu0  ;;  %v2133_v28 = vld [vmem:[#allocation2 + $0x32] sm:$0x1] }
 0x110   : > { %v1845_v23 = vmax.f32 %v1621_v10, %v1733_v19  ;;  %v1846_v24 = vmax.f32 %v1622_v18, %v1734_v20  ;;  %v2129_v27 = vld [vmem:[#allocation2 + $0x30] sm:$0x1]  ;;  %1959 = vst.msk [vmem:[#allocation2 + $0x50] sm:$0xff] %vm1500_vm1, %v1847_v17  ;;  %1514 = vst.msk [vmem:[#allocation2 + $0x68] sm:$0xff] %vm1500_vm1, %v1401_v21  ;;  %v1014_v32 = vadd.f32 %v9519_v25, %v10850_v63  ;;  %v1005_v42 = vpop.f32.mrb[17].mxu0  ;;  %v1624_v59 = vld [vmem:[#allocation2 + $0x58] sm:$0xff] }
 0x111   : > { %v2113_v29 = vld [vmem:[#allocation2 + $0x28] sm:$0x1]  ;;  %v2117_v30 = vld [vmem:[#allocation2 + $0x2a] sm:$0x1]  ;;  %v2121_v31 = vld [vmem:[#allocation2 + $0x2c] sm:$0x1]  ;;  %v2130_v35 = vmax.f32 %v2128_v12, %v2129_v27  ;;  %v2134_v37 = vmax.f32 %v2132_v13, %v2133_v28  ;;  %v1006_v48 = vadd.f32 %v10850_v63, %v1005_v42 }
 0x112   : > { %v2114_v38 = vmax.f32 %v2112_v14, %v2113_v29  ;;  %v2118_v39 = vmax.f32 %v2116_v15, %v2117_v30  ;;  %v2122_v40 = vmax.f32 %v2120_v16, %v2121_v31  ;;  %v2125_v41 = vld [vmem:[#allocation2 + $0x2e] sm:$0x1]  ;;  %1957 = vst.msk [vmem:[#allocation2 + $0x40] sm:$0xff] %vm1500_vm1, %v1845_v23  ;;  %1958 = vst.msk [vmem:[#allocation2 + $0x48] sm:$0xff] %vm1500_vm1, %v1846_v24  ;;  %v2096_v43 = vld [vmem:[#allocation2 + $0x20] sm:$0x1] }
 0x113   : > { %v2136_v45 = vld [vmem:[#allocation2 + $0x14] sm:$0x1]  ;;  %v2126_v46 = vmax.f32 %v2124_v22, %v2125_v41  ;;  %v1406_v47 = vmax.f32 %v1014_v32, 0.0  ;;  %v9520_v49 = vpop.f32.mrb[18].mxu0  ;;  %v2097_v50 = vmax.f32 %v2095_v26, %v2096_v43  ;;  %v2101_v51 = vld [vmem:[#allocation2 + $0x22] sm:$0x1] }
 0x114   : > { %v2105_v52 = vld [vmem:[#allocation2 + $0x24] sm:$0x1]  ;;  %2131 = vst.msk [vmem:[#allocation3 + $0x19] sm:$0x1] %vm2098_vm2, %v2130_v35  ;;  %2135 = vst.msk [vmem:[#allocation3 + $0x1a] sm:$0x1] %vm2098_vm2, %v2134_v37  ;;  %v1017_v53 = vadd.f32 %v9520_v49, %v10850_v63  ;;  %v2102_v55 = vmax.f32 %v2100_v33, %v2101_v51 }
 0x115   : > { %v1008_v54 = vpop.f32.mrb[19].mxu0  ;;  %v2106_v56 = vmax.f32 %v2104_v34, %v2105_v52  ;;  %v2109_v57 = vld [vmem:[#allocation2 + $0x26] sm:$0x1]  ;;  %2115 = vst.msk [vmem:[#allocation3 + $0x15] sm:$0x1] %vm2098_vm2, %v2114_v38  ;;  %v1404_v60 = vmax.f32 %v1006_v48, 0.0 }
 0x116   : > { %2119 = vst.msk [vmem:[#allocation3 + $0x16] sm:$0x1] %vm2098_vm2, %v2118_v39  ;;  %2123 = vst.msk [vmem:[#allocation3 + $0x17] sm:$0x1] %vm2098_vm2, %v2122_v40  ;;  %v2137_v58 = vld [vmem:[#allocation2 + $0x34] sm:$0x1]  ;;  %v1009_v61 = vadd.f32 %v10850_v63, %v1008_v54  ;;  %v2110_v62 = vmax.f32 %v2108_v44, %v2109_v57 }
 0x117   : > { %1519 = vst.msk [vmem:[#allocation2 + $0x90] sm:$0xff] %vm1500_vm1, %v1406_v47  ;;  %v2138_v0 = vmax.f32 %v2136_v45, %v2137_v58  ;;  %v2140_v1 = vld [vmem:[#allocation2 + $0x16] sm:$0x1]  ;;  %v1736_v4 = vld [vmem:[#allocation2 + $0x59] sm:$0xff]  ;;  %v1407_v5 = vmax.f32 %v1017_v53, 0.0  ;;  %1517 = vst.msk [vmem:[#allocation2 + $0x80] sm:$0xff] %vm1500_vm1, %v1404_v60 }
 0x118   : > { %2099 = vst.msk [vmem:[#allocation3 + $0x11] sm:$0x1] %vm2098_vm2, %v2097_v50  ;;  %2127 = vst.msk [vmem:[#allocation3 + $0x18] sm:$0x1] %vm2098_vm2, %v2126_v46  ;;  %v2141_v2 = vld [vmem:[#allocation2 + $0x36] sm:$0x1]  ;;  %v1848_v8 = vmax.f32 %v1624_v59, %v1736_v4 }
 0x119   : > { %v1627_v3 = vld [vmem:[#allocation2 + $0x70] sm:$0xff]  ;;  %2103 = vst.msk [vmem:[#allocation3 + $0x12] sm:$0x1] %vm2098_vm2, %v2102_v55  ;;  %2107 = vst.msk [vmem:[#allocation3 + $0x13] sm:$0x1] %vm2098_vm2, %v2106_v56  ;;  %v2142_v6 = vmax.f32 %v2140_v1, %v2141_v2  ;;  %v1625_v10 = vld [vmem:[#allocation2 + $0x60] sm:$0xff] }
 0x11a   : > { %v2144_v7 = vld [vmem:[#allocation2 + $0x18] sm:$0x1]  ;;  %v1405_v11 = vmax.f32 %v1009_v61, 0.0  ;;  %2111 = vst.msk [vmem:[#allocation3 + $0x14] sm:$0x1] %vm2098_vm2, %v2110_v62  ;;  %v1626_v14 = vld [vmem:[#allocation2 + $0x68] sm:$0xff] }
 0x11b   : > { %v1739_v9 = vld [vmem:[#allocation2 + $0x71] sm:$0xff]  ;;  %2139 = vst.msk [vmem:[#allocation3 + $0x1b] sm:$0x1] %vm2098_vm2, %v2138_v0  ;;  %v1737_v15 = vld [vmem:[#allocation2 + $0x61] sm:$0xff]  ;;  %v1738_v16 = vld [vmem:[#allocation2 + $0x69] sm:$0xff]  ;;  %v9523_v17 = vpop.f32.mrb[20].mxu0 }
 0x11c   : > { %v2145_v12 = vld [vmem:[#allocation2 + $0x38] sm:$0x1]  ;;  %v1851_v13 = vmax.f32 %v1627_v3, %v1739_v9  ;;  %1520 = vst.msk [vmem:[#allocation2 + $0x98] sm:$0xff] %vm1500_vm1, %v1407_v5  ;;  %1960 = vst.msk [vmem:[#allocation2 + $0x58] sm:$0xff] %vm1500_vm1, %v1848_v8  ;;  %v1849_v19 = vmax.f32 %v1625_v10, %v1737_v15  ;;  %v1850_v20 = vmax.f32 %v1626_v14, %v1738_v16  ;;  %v1021_v22 = vpop.f32.mrb[21].mxu0 }
 0x11d   : > { %2143 = vst.msk [vmem:[#allocation3 + $0x1c] sm:$0x1] %vm2098_vm2, %v2142_v6  ;;  %v2146_v18 = vmax.f32 %v2144_v7, %v2145_v12  ;;  %v1030_v21 = vadd.f32 %v9523_v17, %v10850_v63  ;;  %v2148_v23 = vld [vmem:[#allocation2 + $0x1a] sm:$0x1]  ;;  %v1022_v26 = vadd.f32 %v10850_v63, %v1021_v22  ;;  %v9524_v27 = vpop.f32.mrb[22].mxu0 }
 0x11e   : > { %1518 = vst.msk [vmem:[#allocation2 + $0x88] sm:$0xff] %vm1500_vm1, %v1405_v11  ;;  %1963 = vst.msk [vmem:[#allocation2 + $0x70] sm:$0xff] %vm1500_vm1, %v1851_v13  ;;  %v2149_v24 = vld [vmem:[#allocation2 + $0x3a] sm:$0x1]  ;;  %v1033_v29 = vadd.f32 %v9524_v27, %v10850_v63  ;;  %v1024_v30 = vpop.f32.mrb[23].mxu0  ;;  %v1631_v34 = vld [vmem:[#allocation2 + $0x90] sm:$0xff] }
 0x11f   : > { %2147 = vst.msk [vmem:[#allocation3 + $0x1d] sm:$0x1] %vm2098_vm2, %v2146_v18  ;;  %v1410_v25 = vmax.f32 %v1030_v21, 0.0  ;;  %v2150_v28 = vmax.f32 %v2148_v23, %v2149_v24  ;;  %v1408_v31 = vmax.f32 %v1022_v26, 0.0  ;;  %v1025_v32 = vadd.f32 %v10850_v63, %v1024_v30  ;;  %v1628_v33 = vld [vmem:[#allocation2 + $0x78] sm:$0xff]  ;;  %v1629_v40 = vld [vmem:[#allocation2 + $0x80] sm:$0xff] }
 0x120   : > { %1961 = vst.msk [vmem:[#allocation2 + $0x60] sm:$0xff] %vm1500_vm1, %v1849_v19  ;;  %1962 = vst.msk [vmem:[#allocation2 + $0x68] sm:$0xff] %vm1500_vm1, %v1850_v20  ;;  %v1740_v35 = vld [vmem:[#allocation2 + $0x79] sm:$0xff]  ;;  %v1411_v37 = vmax.f32 %v1033_v29, 0.0  ;;  %v2184_v42 = vld [vmem:[#allocation2 + $0x50] sm:$0x1] }
 0x121   : > { %1523 = vst.msk [vmem:[#allocation2 + $0xb0] sm:$0xff] %vm1500_vm1, %v1410_v25  ;;  %v1852_v38 = vmax.f32 %v1628_v33, %v1740_v35  ;;  %1521 = vst.msk [vmem:[#allocation2 + $0xa0] sm:$0xff] %vm1500_vm1, %v1408_v31  ;;  %v1409_v41 = vmax.f32 %v1025_v32, 0.0  ;;  %v2188_v43 = vld [vmem:[#allocation2 + $0x52] sm:$0x1]  ;;  %v9527_v51 = vpop.f32.mrb[24].mxu0 }
 0x122   : > { %2151 = vst.msk [vmem:[#allocation3 + $0x1e] sm:$0x1] %vm2098_vm2, %v2150_v28  ;;  %v2168_v44 = vld [vmem:[#allocation2 + $0x48] sm:$0x1]  ;;  %v2172_v45 = vld [vmem:[#allocation2 + $0x4a] sm:$0x1]  ;;  %v1046_v55 = vadd.f32 %v9527_v51, %v10850_v63 }
 0x123   : > { %v1743_v39 = vld [vmem:[#allocation2 + $0x91] sm:$0xff]  ;;  %v2176_v46 = vld [vmem:[#allocation2 + $0x4c] sm:$0x1]  ;;  %1524 = vst.msk [vmem:[#allocation2 + $0xb8] sm:$0xff] %vm1500_vm1, %v1411_v37  ;;  %v2180_v52 = vld [vmem:[#allocation2 + $0x4e] sm:$0x1] }
 0x124   : > { %v1855_v47 = vmax.f32 %v1631_v34, %v1743_v39  ;;  %1964 = vst.msk [vmem:[#allocation2 + $0x78] sm:$0xff] %vm1500_vm1, %v1852_v38  ;;  %1522 = vst.msk [vmem:[#allocation2 + $0xa8] sm:$0xff] %vm1500_vm1, %v1409_v41  ;;  %v1037_v56 = vpop.f32.mrb[25].mxu0  ;;  %v2152_v57 = vld [vmem:[#allocation2 + $0x40] sm:$0x1]  ;;  %v2928_v1 = vld [vmem:[#allocation3 + $0x11] sm:$0xff] }
 0x125   : > { %v1630_v48 = vld [vmem:[#allocation2 + $0x88] sm:$0xff]  ;;  %v2185_v58 = vld [vmem:[#allocation2 + $0x70] sm:$0x1]  ;;  %v2189_v59 = vld [vmem:[#allocation2 + $0x72] sm:$0x1]  ;;  %v1038_v0 = vadd.f32 %v10850_v63, %v1037_v56  ;;  %v1414_v6 = vmax.f32 %v1046_v55, 0.0 }
 0x126   : > { %v1741_v49 = vld [vmem:[#allocation2 + $0x81] sm:$0xff]  ;;  %v1742_v50 = vld [vmem:[#allocation2 + $0x89] sm:$0xff]  ;;  %v2186_v3 = vmax.f32 %v2184_v42, %v2185_v58  ;;  %v2190_v4 = vmax.f32 %v2188_v43, %v2189_v59  ;;  %v9528_v7 = vpop.f32.mrb[26].mxu0  ;;  %v2192_v14 = vld [vmem:[#allocation2 + $0x54] sm:$0x1] }
 0x127   : > { %v1853_v53 = vmax.f32 %v1629_v40, %v1741_v49  ;;  %v1854_v54 = vmax.f32 %v1630_v48, %v1742_v50  ;;  %v2169_v60 = vld [vmem:[#allocation2 + $0x68] sm:$0x1]  ;;  %v2173_v61 = vld [vmem:[#allocation2 + $0x6a] sm:$0x1]  ;;  %v2177_v62 = vld [vmem:[#allocation2 + $0x6c] sm:$0x1]  ;;  %v1049_v17 = vadd.f32 %v9528_v7, %v10850_v63 }
 0x128   : > { %1967 = vst.msk [vmem:[#allocation2 + $0x90] sm:$0xff] %vm1500_vm1, %v1855_v47  ;;  %v2156_v2 = vld [vmem:[#allocation2 + $0x42] sm:$0x1]  ;;  %v2181_v5 = vld [vmem:[#allocation2 + $0x6e] sm:$0x1]  ;;  %v2170_v11 = vmax.f32 %v2168_v44, %v2169_v60  ;;  %v2174_v12 = vmax.f32 %v2172_v45, %v2173_v61  ;;  %v2178_v13 = vmax.f32 %v2176_v46, %v2177_v62  ;;  %v1632_v15 = vld [vmem:[#allocation2 + $0x98] sm:$0xff] }
 0x129   : > { %1965 = vst.msk [vmem:[#allocation2 + $0x80] sm:$0xff] %vm1500_vm1, %v1853_v53  ;;  %1966 = vst.msk [vmem:[#allocation2 + $0x88] sm:$0xff] %vm1500_vm1, %v1854_v54  ;;  %v2153_v8 = vld [vmem:[#allocation2 + $0x60] sm:$0x1]  ;;  %v2160_v9 = vld [vmem:[#allocation2 + $0x44] sm:$0x1]  ;;  %v2182_v22 = vmax.f32 %v2180_v52, %v2181_v5 }
 0x12a   : > { %v2164_v10 = vld [vmem:[#allocation2 + $0x46] sm:$0x1]  ;;  %v1412_v16 = vmax.f32 %v1038_v0, 0.0  ;;  %v1040_v18 = vpop.f32.mrb[27].mxu0  ;;  %v2929_v19 = vld [vmem:[#allocation3 + $0x19] sm:$0xff]  ;;  %v2154_v20 = vmax.f32 %v2152_v57, %v2153_v8  ;;  %1527 = vst.msk [vmem:[#allocation2 + $0xd0] sm:$0xff] %vm1500_vm1, %v1414_v6 }
 0x12b   : > { %v2157_v21 = vld [vmem:[#allocation2 + $0x62] sm:$0x1]  ;;  %2187 = vst.msk [vmem:[#allocation3 + $0x29] sm:$0x1] %vm2098_vm2, %v2186_v3  ;;  %2191 = vst.msk [vmem:[#allocation3 + $0x2a] sm:$0x1] %vm2098_vm2, %v2190_v4  ;;  %v1041_v23 = vadd.f32 %v10850_v63, %v1040_v18  ;;  %v2955_v24 = vpack.c.bf16 %v2929_v19, %v2928_v1 }
 0x12c   : > { %v2158_v25 = vmax.f32 %v2156_v2, %v2157_v21  ;;  %v2161_v26 = vld [vmem:[#allocation2 + $0x64] sm:$0x1]  ;;  %v2165_v27 = vld [vmem:[#allocation2 + $0x66] sm:$0x1]  ;;  %2171 = vst.msk [vmem:[#allocation3 + $0x25] sm:$0x1] %vm2098_vm2, %v2170_v11 }
 0x12d   : > { %2175 = vst.msk [vmem:[#allocation3 + $0x26] sm:$0x1] %vm2098_vm2, %v2174_v12  ;;  %2179 = vst.msk [vmem:[#allocation3 + $0x27] sm:$0x1] %vm2098_vm2, %v2178_v13  ;;  %v2193_v28 = vld [vmem:[#allocation2 + $0x74] sm:$0x1]  ;;  %v2162_v33 = vmax.f32 %v2160_v9, %v2161_v26  ;;  %v2166_v34 = vmax.f32 %v2164_v10, %v2165_v27  ;;  %9618 = vmatmul.mubr.msk.bf16.vlgmr.msra.gmra.mrb[4].mxu1 %vm1500_vm1, %v2955_v24 }
 0x12e   : > { %v1635_v29 = vld [vmem:[#allocation2 + $0xb0] sm:$0xff]  ;;  %v1744_v30 = vld [vmem:[#allocation2 + $0x99] sm:$0xff]  ;;  %1525 = vst.msk [vmem:[#allocation2 + $0xc0] sm:$0xff] %vm1500_vm1, %v1412_v16  ;;  %v1415_v32 = vmax.f32 %v1049_v17, 0.0  ;;  %v2194_v35 = vmax.f32 %v2192_v14, %v2193_v28  ;;  %v1413_v39 = vmax.f32 %v1041_v23, 0.0  ;;  %v1634_v43 = vld [vmem:[#allocation2 + $0xa8] sm:$0xff] }
 0x12f   : > { %v1633_v31 = vld [vmem:[#allocation2 + $0xa0] sm:$0xff]  ;;  %2155 = vst.msk [vmem:[#allocation3 + $0x21] sm:$0x1] %vm2098_vm2, %v2154_v20  ;;  %2183 = vst.msk [vmem:[#allocation3 + $0x28] sm:$0x1] %vm2098_vm2, %v2182_v22  ;;  %v1856_v37 = vmax.f32 %v1632_v15, %v1744_v30  ;;  %v1747_v38 = vld [vmem:[#allocation2 + $0xb1] sm:$0xff] }
 0x130   : > { %2159 = vst.msk [vmem:[#allocation3 + $0x22] sm:$0x1] %vm2098_vm2, %v2158_v25  ;;  %v2196_v40 = vld [vmem:[#allocation2 + $0x56] sm:$0x1]  ;;  %v1859_v42 = vmax.f32 %v1635_v29, %v1747_v38  ;;  %v1745_v44 = vld [vmem:[#allocation2 + $0xa1] sm:$0xff]  ;;  %v1746_v45 = vld [vmem:[#allocation2 + $0xa9] sm:$0xff] }
 0x131   : > { %v2197_v41 = vld [vmem:[#allocation2 + $0x76] sm:$0x1]  ;;  %1528 = vst.msk [vmem:[#allocation2 + $0xd8] sm:$0xff] %vm1500_vm1, %v1415_v32  ;;  %v9531_v46 = vpop.f32.mrb[28].mxu0  ;;  %1968 = vst.msk [vmem:[#allocation2 + $0x98] sm:$0xff] %vm1500_vm1, %v1856_v37  ;;  %v1857_v48 = vmax.f32 %v1633_v31, %v1745_v44  ;;  %v1858_v49 = vmax.f32 %v1634_v43, %v1746_v45  ;;  %v1636_v0 = vld [vmem:[#allocation2 + $0xb8] sm:$0xff] }
 0x132   : > { %2163 = vst.msk [vmem:[#allocation3 + $0x23] sm:$0x1] %vm2098_vm2, %v2162_v33  ;;  %2167 = vst.msk [vmem:[#allocation3 + $0x24] sm:$0x1] %vm2098_vm2, %v2166_v34  ;;  %v2198_v47 = vmax.f32 %v2196_v40, %v2197_v41  ;;  %v1062_v50 = vadd.f32 %v9531_v46, %v10850_v63  ;;  %v1053_v51 = vpop.f32.mrb[29].mxu0  ;;  %v1639_v6 = vld [vmem:[#allocation2 + $0xd0] sm:$0xff] }
 0x133   : > { %2195 = vst.msk [vmem:[#allocation3 + $0x2b] sm:$0x1] %vm2098_vm2, %v2194_v35  ;;  %v2200_v52 = vld [vmem:[#allocation2 + $0x58] sm:$0x1]  ;;  %v1054_v54 = vadd.f32 %v10850_v63, %v1053_v51  ;;  %v9532_v57 = vpop.f32.mrb[30].mxu0 }
 0x134   : > { %1526 = vst.msk [vmem:[#allocation2 + $0xc8] sm:$0xff] %vm1500_vm1, %v1413_v39  ;;  %v2201_v53 = vld [vmem:[#allocation2 + $0x78] sm:$0x1]  ;;  %1971 = vst.msk [vmem:[#allocation2 + $0xb0] sm:$0xff] %vm1500_vm1, %v1859_v42  ;;  %v1418_v56 = vmax.f32 %v1062_v50, 0.0  ;;  %v1065_v59 = vadd.f32 %v9532_v57, %v10850_v63  ;;  %v1056_v60 = vpop.f32.mrb[31].mxu0 }
 0x135   : > { %2199 = vst.msk [vmem:[#allocation3 + $0x2c] sm:$0x1] %vm2098_vm2, %v2198_v47  ;;  %v2202_v55 = vmax.f32 %v2200_v52, %v2201_v53  ;;  %v1416_v58 = vmax.f32 %v1054_v54, 0.0  ;;  %v2204_v61 = vld [vmem:[#allocation2 + $0x5a] sm:$0x1]  ;;  %v1057_v2 = vadd.f32 %v10850_v63, %v1056_v60  ;;  %v1637_v8 = vld [vmem:[#allocation2 + $0xc0] sm:$0xff] }
 0x136   : > { %1969 = vst.msk [vmem:[#allocation2 + $0xa0] sm:$0xff] %vm1500_vm1, %v1857_v48  ;;  %1970 = vst.msk [vmem:[#allocation2 + $0xa8] sm:$0xff] %vm1500_vm1, %v1858_v49  ;;  %v2205_v62 = vld [vmem:[#allocation2 + $0x7a] sm:$0x1]  ;;  %v1419_v5 = vmax.f32 %v1065_v59, 0.0  ;;  %v9535_v17 = vpop.f32.mrb[32].mxu0 }
 0x137   : > { %2203 = vst.msk [vmem:[#allocation3 + $0x2d] sm:$0x1] %vm2098_vm2, %v2202_v55  ;;  %v1748_v1 = vld [vmem:[#allocation2 + $0xb9] sm:$0xff]  ;;  %v2206_v3 = vmax.f32 %v2204_v61, %v2205_v62  ;;  %v1417_v9 = vmax.f32 %v1057_v2, 0.0  ;;  %v2224_v10 = vld [vmem:[#allocation2 + $0x88] sm:$0x1]  ;;  %v1078_v21 = vadd.f32 %v9535_v17, %v10850_v63 }
 0x138   : > { %1531 = vst.msk [vmem:[#allocation2 + $0xf0] sm:$0xff] %vm1500_vm1, %v1418_v56  ;;  %v1860_v4 = vmax.f32 %v1636_v0, %v1748_v1  ;;  %1529 = vst.msk [vmem:[#allocation2 + $0xe0] sm:$0xff] %vm1500_vm1, %v1416_v58  ;;  %v1751_v7 = vld [vmem:[#allocation2 + $0xd1] sm:$0xff]  ;;  %v2228_v11 = vld [vmem:[#allocation2 + $0x8a] sm:$0x1]  ;;  %v1069_v22 = vpop.f32.mrb[33].mxu0 }
 0x139   : > { %2207 = vst.msk [vmem:[#allocation3 + $0x2e] sm:$0x1] %vm2098_vm2, %v2206_v3  ;;  %v2232_v12 = vld [vmem:[#allocation2 + $0x8c] sm:$0x1]  ;;  %v1863_v13 = vmax.f32 %v1639_v6, %v1751_v7  ;;  %v2236_v18 = vld [vmem:[#allocation2 + $0x8e] sm:$0x1]  ;;  %v1070_v27 = vadd.f32 %v10850_v63, %v1069_v22 }
 0x13a   : > { %1972 = vst.msk [vmem:[#allocation2 + $0xb8] sm:$0xff] %vm1500_vm1, %v1860_v4  ;;  %1532 = vst.msk [vmem:[#allocation2 + $0xf8] sm:$0xff] %vm1500_vm1, %v1419_v5  ;;  %v2208_v23 = vld [vmem:[#allocation2 + $0x80] sm:$0x1]  ;;  %v2212_v28 = vld [vmem:[#allocation2 + $0x82] sm:$0x1] }
 0x13b   : > { %v1638_v14 = vld [vmem:[#allocation2 + $0xc8] sm:$0xff]  ;;  %1530 = vst.msk [vmem:[#allocation2 + $0xe8] sm:$0xff] %vm1500_vm1, %v1417_v9  ;;  %v1640_v30 = vld [vmem:[#allocation2 + $0xd8] sm:$0xff]  ;;  %v1422_v31 = vmax.f32 %v1078_v21, 0.0  ;;  %v9536_v32 = vpop.f32.mrb[34].mxu0  ;;  %v1420_v39 = vmax.f32 %v1070_v27, 0.0 }
 0x13c   : > { %v1749_v15 = vld [vmem:[#allocation2 + $0xc1] sm:$0xff]  ;;  %v1750_v16 = vld [vmem:[#allocation2 + $0xc9] sm:$0xff]  ;;  %v1081_v40 = vadd.f32 %v9536_v32, %v10850_v63  ;;  %v1072_v41 = vpop.f32.mrb[35].mxu0  ;;  %v2248_v17 = vld [vmem:[#allocation2 + $0x94] sm:$0x1] }
 0x13d   : > { %v1861_v19 = vmax.f32 %v1637_v8, %v1749_v15  ;;  %v1862_v20 = vmax.f32 %v1638_v14, %v1750_v16  ;;  %v2225_v24 = vld [vmem:[#allocation2 + $0xa8] sm:$0x1]  ;;  %v2229_v25 = vld [vmem:[#allocation2 + $0xaa] sm:$0x1]  ;;  %v2233_v26 = vld [vmem:[#allocation2 + $0xac] sm:$0x1]  ;;  %v1073_v48 = vadd.f32 %v10850_v63, %v1072_v41 }
 0x13e   : > { %1975 = vst.msk [vmem:[#allocation2 + $0xd0] sm:$0xff] %vm1500_vm1, %v1863_v13  ;;  %v2237_v29 = vld [vmem:[#allocation2 + $0xae] sm:$0x1]  ;;  %v2209_v33 = vld [vmem:[#allocation2 + $0xa0] sm:$0x1]  ;;  %v2226_v35 = vmax.f32 %v2224_v10, %v2225_v24  ;;  %v2230_v37 = vmax.f32 %v2228_v11, %v2229_v25  ;;  %v2234_v38 = vmax.f32 %v2232_v12, %v2233_v26  ;;  %v2930_v42 = vld [vmem:[#allocation3 + $0x21] sm:$0xff] }
 0x13f   : > { %1973 = vst.msk [vmem:[#allocation2 + $0xc0] sm:$0xff] %vm1500_vm1, %v1861_v19  ;;  %1974 = vst.msk [vmem:[#allocation2 + $0xc8] sm:$0xff] %vm1500_vm1, %v1862_v20  ;;  %v2216_v34 = vld [vmem:[#allocation2 + $0x84] sm:$0x1]  ;;  %v2210_v43 = vmax.f32 %v2208_v23, %v2209_v33  ;;  %v2213_v44 = vld [vmem:[#allocation2 + $0xa2] sm:$0x1]  ;;  %v2238_v46 = vmax.f32 %v2236_v18, %v2237_v29 }
 0x140   : > { %v2220_v45 = vld [vmem:[#allocation2 + $0x86] sm:$0x1]  ;;  %v1752_v47 = vld [vmem:[#allocation2 + $0xd9] sm:$0xff]  ;;  %1535 = vst.msk [vmem:[#allocation2 + $0x110] sm:$0xff] %vm1500_vm1, %v1422_v31  ;;  %v2214_v49 = vmax.f32 %v2212_v28, %v2213_v44  ;;  %v2217_v50 = vld [vmem:[#allocation2 + $0xa4] sm:$0x1] }
 0x141   : > { %2227 = vst.msk [vmem:[#allocation3 + $0x35] sm:$0x1] %vm2098_vm2, %v2226_v35  ;;  %2231 = vst.msk [vmem:[#allocation3 + $0x36] sm:$0x1] %vm2098_vm2, %v2230_v37  ;;  %v2240_v51 = vld [vmem:[#allocation2 + $0x90] sm:$0x1]  ;;  %v1864_v52 = vmax.f32 %v1640_v30, %v1752_v47  ;;  %v2218_v55 = vmax.f32 %v2216_v34, %v2217_v50 }
 0x142   : > { %2235 = vst.msk [vmem:[#allocation3 + $0x37] sm:$0x1] %vm2098_vm2, %v2234_v38  ;;  %v1423_v53 = vmax.f32 %v1081_v40, 0.0  ;;  %v2931_v54 = vld [vmem:[#allocation3 + $0x29] sm:$0xff]  ;;  %2211 = vst.msk [vmem:[#allocation3 + $0x31] sm:$0x1] %vm2098_vm2, %v2210_v43 }
 0x143   : > { %1533 = vst.msk [vmem:[#allocation2 + $0x100] sm:$0xff] %vm1500_vm1, %v1420_v39  ;;  %v2221_v56 = vld [vmem:[#allocation2 + $0xa6] sm:$0x1]  ;;  %v2241_v57 = vld [vmem:[#allocation2 + $0xb0] sm:$0x1]  ;;  %v1755_v59 = vld [vmem:[#allocation2 + $0xf1] sm:$0xff]  ;;  %v2956_v62 = vpack.c.bf16 %v2931_v54, %v2930_v42 }
 0x144   : > { %2239 = vst.msk [vmem:[#allocation3 + $0x38] sm:$0x1] %vm2098_vm2, %v2238_v46  ;;  %v1643_v58 = vld [vmem:[#allocation2 + $0xf0] sm:$0xff]  ;;  %v1641_v60 = vld [vmem:[#allocation2 + $0xe0] sm:$0xff]  ;;  %v1421_v61 = vmax.f32 %v1073_v48, 0.0  ;;  %v2222_v0 = vmax.f32 %v2220_v45, %v2221_v56  ;;  %v2242_v1 = vmax.f32 %v2240_v51, %v2241_v57  ;;  %v1642_v3 = vld [vmem:[#allocation2 + $0xe8] sm:$0xff] }
 0x145   : > { %2215 = vst.msk [vmem:[#allocation3 + $0x32] sm:$0x1] %vm2098_vm2, %v2214_v49  ;;  %v1867_v2 = vmax.f32 %v1643_v58, %v1755_v59  ;;  %v1753_v4 = vld [vmem:[#allocation2 + $0xe1] sm:$0xff]  ;;  %v1754_v5 = vld [vmem:[#allocation2 + $0xe9] sm:$0xff]  ;;  %v9539_v6 = vpop.f32.mrb[36].mxu0  ;;  %9621 = vmatprep.mubr.msk.bf16.mxu1 %vm1500_vm1, %v2956_v62  ;;  %v1644_v19 = vld [vmem:[#allocation2 + $0xf8] sm:$0xff] }
 0x146   : > { %1976 = vst.msk [vmem:[#allocation2 + $0xd8] sm:$0xff] %vm1500_vm1, %v1864_v52  ;;  %1536 = vst.msk [vmem:[#allocation2 + $0x118] sm:$0xff] %vm1500_vm1, %v1423_v53  ;;  %v1865_v7 = vmax.f32 %v1641_v60, %v1753_v4  ;;  %v1866_v8 = vmax.f32 %v1642_v3, %v1754_v5  ;;  %v1094_v9 = vadd.f32 %v9539_v6, %v10850_v63  ;;  %v1085_v10 = vpop.f32.mrb[37].mxu0  ;;  %v2244_v11 = vld [vmem:[#allocation2 + $0x92] sm:$0x1] }
 0x147   : > { %2219 = vst.msk [vmem:[#allocation3 + $0x33] sm:$0x1] %vm2098_vm2, %v2218_v55  ;;  %2223 = vst.msk [vmem:[#allocation3 + $0x34] sm:$0x1] %vm2098_vm2, %v2222_v0  ;;  %v2245_v12 = vld [vmem:[#allocation2 + $0xb2] sm:$0x1]  ;;  %v1086_v13 = vadd.f32 %v10850_v63, %v1085_v10 }
 0x148   : > { %1534 = vst.msk [vmem:[#allocation2 + $0x108] sm:$0xff] %vm1500_vm1, %v1421_v61  ;;  %1979 = vst.msk [vmem:[#allocation2 + $0xf0] sm:$0xff] %vm1500_vm1, %v1867_v2  ;;  %v2246_v14 = vmax.f32 %v2244_v11, %v2245_v12  ;;  %v1426_v15 = vmax.f32 %v1094_v9, 0.0  ;;  %v9540_v16 = vpop.f32.mrb[38].mxu0  ;;  %v2249_v18 = vld [vmem:[#allocation2 + $0xb4] sm:$0x1] }
 0x149   : > { %2243 = vst.msk [vmem:[#allocation3 + $0x39] sm:$0x1] %vm2098_vm2, %v2242_v1  ;;  %v1424_v20 = vmax.f32 %v1086_v13, 0.0  ;;  %v1097_v21 = vadd.f32 %v9540_v16, %v10850_v63  ;;  %v1088_v22 = vpop.f32.mrb[39].mxu0  ;;  %v2250_v23 = vmax.f32 %v2248_v17, %v2249_v18  ;;  %v2252_v26 = vld [vmem:[#allocation2 + $0x96] sm:$0x1] }
 0x14a   : > { %1977 = vst.msk [vmem:[#allocation2 + $0xe0] sm:$0xff] %vm1500_vm1, %v1865_v7  ;;  %1978 = vst.msk [vmem:[#allocation2 + $0xe8] sm:$0xff] %vm1500_vm1, %v1866_v8  ;;  %v1756_v24 = vld [vmem:[#allocation2 + $0xf9] sm:$0xff]  ;;  %v1089_v25 = vadd.f32 %v10850_v63, %v1088_v22  ;;  %v2253_v27 = vld [vmem:[#allocation2 + $0xb6] sm:$0x1]  ;;  %v9543_v47 = vpop.f32.mrb[40].mxu0 }
 0x14b   : > { %2247 = vst.msk [vmem:[#allocation3 + $0x3a] sm:$0x1] %vm2098_vm2, %v2246_v14  ;;  %v1647_v28 = vld [vmem:[#allocation2 + $0x110] sm:$0xff]  ;;  %v1868_v29 = vmax.f32 %v1644_v19, %v1756_v24  ;;  %v1427_v30 = vmax.f32 %v1097_v21, 0.0  ;;  %2251 = vst.msk [vmem:[#allocation3 + $0x3b] sm:$0x1] %vm2098_vm2, %v2250_v23  ;;  %v2254_v31 = vmax.f32 %v2252_v26, %v2253_v27  ;;  %v1110_v51 = vadd.f32 %v9543_v47, %v10850_v63 }
 0x14c   : > { %1539 = vst.msk [vmem:[#allocation2 + $0x130] sm:$0xff] %vm1500_vm1, %v1426_v15  ;;  %1537 = vst.msk [vmem:[#allocation2 + $0x120] sm:$0xff] %vm1500_vm1, %v1424_v20  ;;  %v2256_v32 = vld [vmem:[#allocation2 + $0x98] sm:$0x1]  ;;  %v1645_v35 = vld [vmem:[#allocation2 + $0x100] sm:$0xff]  ;;  %v1425_v37 = vmax.f32 %v1089_v25, 0.0 }
 0x14d   : > { %v2257_v33 = vld [vmem:[#allocation2 + $0xb8] sm:$0x1]  ;;  %v2260_v39 = vld [vmem:[#allocation2 + $0x9a] sm:$0x1]  ;;  %v2280_v40 = vld [vmem:[#allocation2 + $0xc8] sm:$0x1] }
 0x14e   : > { %v1759_v34 = vld [vmem:[#allocation2 + $0x111] sm:$0xff]  ;;  %v2258_v38 = vmax.f32 %v2256_v32, %v2257_v33  ;;  %v2284_v41 = vld [vmem:[#allocation2 + $0xca] sm:$0x1]  ;;  %v2288_v42 = vld [vmem:[#allocation2 + $0xcc] sm:$0x1]  ;;  %1980 = vst.msk [vmem:[#allocation2 + $0xf8] sm:$0xff] %vm1500_vm1, %v1868_v29 }
 0x14f   : > { %v1871_v43 = vmax.f32 %v1647_v28, %v1759_v34  ;;  %v1646_v44 = vld [vmem:[#allocation2 + $0x108] sm:$0xff]  ;;  %1540 = vst.msk [vmem:[#allocation2 + $0x138] sm:$0xff] %vm1500_vm1, %v1427_v30  ;;  %1538 = vst.msk [vmem:[#allocation2 + $0x128] sm:$0xff] %vm1500_vm1, %v1425_v37  ;;  %v1101_v52 = vpop.f32.mrb[41].mxu0  ;;  %v2261_v53 = vld [vmem:[#allocation2 + $0xba] sm:$0x1] }
 0x150   : > { %v1757_v45 = vld [vmem:[#allocation2 + $0x101] sm:$0xff]  ;;  %v1758_v46 = vld [vmem:[#allocation2 + $0x109] sm:$0xff]  ;;  %2255 = vst.msk [vmem:[#allocation3 + $0x3c] sm:$0x1] %vm2098_vm2, %v2254_v31  ;;  %2259 = vst.msk [vmem:[#allocation3 + $0x3d] sm:$0x1] %vm2098_vm2, %v2258_v38  ;;  %v1102_v58 = vadd.f32 %v10850_v63, %v1101_v52  ;;  %v2262_v59 = vmax.f32 %v2260_v39, %v2261_v53 }
 0x151   : > { %v2292_v48 = vld [vmem:[#allocation2 + $0xce] sm:$0x1]  ;;  %v1869_v49 = vmax.f32 %v1645_v35, %v1757_v45  ;;  %v1870_v50 = vmax.f32 %v1646_v44, %v1758_v46  ;;  %v2264_v54 = vld [vmem:[#allocation2 + $0xc0] sm:$0x1]  ;;  %v2281_v55 = vld [vmem:[#allocation2 + $0xe8] sm:$0x1] }
 0x152   : > { %v2285_v56 = vld [vmem:[#allocation2 + $0xea] sm:$0x1]  ;;  %v2289_v57 = vld [vmem:[#allocation2 + $0xec] sm:$0x1]  ;;  %1983 = vst.msk [vmem:[#allocation2 + $0x110] sm:$0xff] %vm1500_vm1, %v1871_v43  ;;  %v1430_v61 = vmax.f32 %v1110_v51, 0.0  ;;  %v2282_v1 = vmax.f32 %v2280_v40, %v2281_v55 }
 0x153   : > { %v2293_v60 = vld [vmem:[#allocation2 + $0xee] sm:$0x1]  ;;  %1981 = vst.msk [vmem:[#allocation2 + $0x100] sm:$0xff] %vm1500_vm1, %v1869_v49  ;;  %1982 = vst.msk [vmem:[#allocation2 + $0x108] sm:$0xff] %vm1500_vm1, %v1870_v50  ;;  %v9544_v62 = vpop.f32.mrb[42].mxu0  ;;  %v2286_v2 = vmax.f32 %v2284_v41, %v2285_v56  ;;  %v2290_v3 = vmax.f32 %v2288_v42, %v2289_v57  ;;  %v1648_v4 = vld [vmem:[#allocation2 + $0x118] sm:$0xff] }
 0x154   : > { %v2265_v0 = vld [vmem:[#allocation2 + $0xe0] sm:$0x1]  ;;  %v1428_v5 = vmax.f32 %v1102_v58, 0.0  ;;  %v1113_v6 = vadd.f32 %v9544_v62, %v10850_v63  ;;  %v1104_v7 = vpop.f32.mrb[43].mxu0  ;;  %2263 = vst.msk [vmem:[#allocation3 + $0x3e] sm:$0x1] %vm2098_vm2, %v2262_v59  ;;  %v2294_v9 = vmax.f32 %v2292_v48, %v2293_v60 }
 0x155   : > { %v2266_v8 = vmax.f32 %v2264_v54, %v2265_v0  ;;  %v1760_v10 = vld [vmem:[#allocation2 + $0x119] sm:$0xff]  ;;  %1543 = vst.msk [vmem:[#allocation2 + $0x150] sm:$0xff] %vm1500_vm1, %v1430_v61  ;;  %v1105_v11 = vadd.f32 %v10850_v63, %v1104_v7  ;;  %v2268_v12 = vld [vmem:[#allocation2 + $0xc2] sm:$0x1]  ;;  %v2272_v17 = vld [vmem:[#allocation2 + $0xc4] sm:$0x1] }
 0x156   : > { %v2269_v13 = vld [vmem:[#allocation2 + $0xe2] sm:$0x1]  ;;  %2283 = vst.msk [vmem:[#allocation3 + $0x45] sm:$0x1] %vm2098_vm2, %v2282_v1  ;;  %2287 = vst.msk [vmem:[#allocation3 + $0x46] sm:$0x1] %vm2098_vm2, %v2286_v2  ;;  %v1872_v14 = vmax.f32 %v1648_v4, %v1760_v10 }
 0x157   : > { %2291 = vst.msk [vmem:[#allocation3 + $0x47] sm:$0x1] %vm2098_vm2, %v2290_v3  ;;  %v1431_v15 = vmax.f32 %v1113_v6, 0.0  ;;  %2267 = vst.msk [vmem:[#allocation3 + $0x41] sm:$0x1] %vm2098_vm2, %v2266_v8  ;;  %v2270_v16 = vmax.f32 %v2268_v12, %v2269_v13  ;;  %v1651_v63 = vld [vmem:[#allocation2 + $0x130] sm:$0xff] }
 0x158   : > { %1541 = vst.msk [vmem:[#allocation2 + $0x140] sm:$0xff] %vm1500_vm1, %v1428_v5  ;;  %v2273_v18 = vld [vmem:[#allocation2 + $0xe4] sm:$0x1]  ;;  %v1763_v19 = vld [vmem:[#allocation2 + $0x131] sm:$0xff]  ;;  %v1429_v21 = vmax.f32 %v1105_v11, 0.0  ;;  %1984 = vst.msk [vmem:[#allocation2 + $0x118] sm:$0xff] %vm1500_vm1, %v1872_v14 }
 0x159   : > { %2295 = vst.msk [vmem:[#allocation3 + $0x48] sm:$0x1] %vm2098_vm2, %v2294_v9  ;;  %v1649_v20 = vld [vmem:[#allocation2 + $0x120] sm:$0xff]  ;;  %v2274_v22 = vmax.f32 %v2272_v17, %v2273_v18  ;;  %v1875_v23 = vmax.f32 %v1651_v63, %v1763_v19  ;;  %v1650_v24 = vld [vmem:[#allocation2 + $0x128] sm:$0xff]  ;;  %v9547_v27 = vpop.f32.mrb[44].mxu0  ;;  %v2932_v38 = vld [vmem:[#allocation3 + $0x31] sm:$0xff] }
 0x15a   : > { %v1761_v25 = vld [vmem:[#allocation2 + $0x121] sm:$0xff]  ;;  %v1762_v26 = vld [vmem:[#allocation2 + $0x129] sm:$0xff]  ;;  %1544 = vst.msk [vmem:[#allocation2 + $0x158] sm:$0xff] %vm1500_vm1, %v1431_v15  ;;  %1542 = vst.msk [vmem:[#allocation2 + $0x148] sm:$0xff] %vm1500_vm1, %v1429_v21  ;;  %v1117_v32 = vpop.f32.mrb[45].mxu0 }
 0x15b   : > { %2271 = vst.msk [vmem:[#allocation3 + $0x42] sm:$0x1] %vm2098_vm2, %v2270_v16  ;;  %v1873_v28 = vmax.f32 %v1649_v20, %v1761_v25  ;;  %v1874_v29 = vmax.f32 %v1650_v24, %v1762_v26  ;;  %v11029_v30 = vld [vmem:[%s12807_s2] ss:$0 sm:$0xff]  ;;  %2275 = vst.msk [vmem:[#allocation3 + $0x43] sm:$0x1] %vm2098_vm2, %v2274_v22 }
 0x15c   : > { %v1126_v31 = vadd.f32 %v11029_v30, %v9547_v27  ;;  %v2276_v33 = vld [vmem:[#allocation2 + $0xc6] sm:$0x1]  ;;  %1987 = vst.msk [vmem:[#allocation2 + $0x130] sm:$0xff] %vm1500_vm1, %v1875_v23  ;;  %v1118_v35 = vadd.f32 %v11029_v30, %v1117_v32  ;;  %v2933_v39 = vld [vmem:[#allocation3 + $0x39] sm:$0xff]  ;;  %v9548_v41 = vpop.f32.mrb[46].mxu0  ;;  %v1655_v50 = vld [vmem:[#allocation2 + $0x150] sm:$0xff] }
 0x15d   : > { %v2277_v34 = vld [vmem:[#allocation2 + $0xe6] sm:$0x1]  ;;  %1985 = vst.msk [vmem:[#allocation2 + $0x120] sm:$0xff] %vm1500_vm1, %v1873_v28  ;;  %1986 = vst.msk [vmem:[#allocation2 + $0x128] sm:$0xff] %vm1500_vm1, %v1874_v29  ;;  %v2957_v43 = vpack.c.bf16 %v2933_v39, %v2932_v38  ;;  %v1129_v45 = vadd.f32 %v11029_v30, %v9548_v41  ;;  %v1120_v46 = vpop.f32.mrb[47].mxu0  ;;  %v1652_v49 = vld [vmem:[#allocation2 + $0x138] sm:$0xff] }
 0x15e   : > { %v2278_v37 = vmax.f32 %v2276_v33, %v2277_v34  ;;  %v1434_v40 = vmax.f32 %v1126_v31, 0.0  ;;  %v10262_v42 = vld [vmem:[%s12808_s3] sm:$0xff]   ;;  %v1432_v44 = vmax.f32 %v1118_v35, 0.0  ;;  %v2296_v47 = vld [vmem:[#allocation2 + $0xd0] sm:$0x1]  ;;  %v1121_v52 = vadd.f32 %v11029_v30, %v1120_v46  ;;  %v9551_v8 = vpop.f32.mrb[48].mxu0 }
 0x15f   : > { %v2297_v48 = vld [vmem:[#allocation2 + $0xf0] sm:$0x1]  ;;  %v1764_v51 = vld [vmem:[#allocation2 + $0x139] sm:$0xff]  ;;  %9645 = vmatprep.subr.bf16.mxu1 %v10262_v42  ;;  %9622 = vmatmul.mubr.msk.bf16.gmra.mrb[8].mxu1 %vm1500_vm1, %v2957_v43  ;;  %v1435_v56 = vmax.f32 %v1129_v45, 0.0  ;;  %v2300_v57 = vld [vmem:[#allocation2 + $0xd2] sm:$0x1]  ;;  %v1142_v12 = vadd.f32 %v11029_v30, %v9551_v8 }
 0x160   : > { %2279 = vst.msk [vmem:[#allocation3 + $0x44] sm:$0x1] %vm2098_vm2, %v2278_v37  ;;  %v2298_v53 = vmax.f32 %v2296_v47, %v2297_v48  ;;  %v1876_v54 = vmax.f32 %v1652_v49, %v1764_v51  ;;  %v1653_v55 = vld [vmem:[#allocation2 + $0x140] sm:$0xff]  ;;  %v2301_v58 = vld [vmem:[#allocation2 + $0xf2] sm:$0x1]  ;;  %v1433_v60 = vmax.f32 %v1121_v52, 0.0  ;;  %9646 = vmatpush3.bf16.msra.mxu1 %v10262_v42 }
 0x161   : > { %1547 = vst.msk [vmem:[#allocation2 + $0x170] sm:$0xff] %vm1500_vm1, %v1434_v40  ;;  %1545 = vst.msk [vmem:[#allocation2 + $0x160] sm:$0xff] %vm1500_vm1, %v1432_v44  ;;  %v1767_v59 = vld [vmem:[#allocation2 + $0x151] sm:$0xff]  ;;  %v2302_v61 = vmax.f32 %v2300_v57, %v2301_v58  ;;  %v2336_v1 = vld [vmem:[#allocation2 + $0x108] sm:$0x1]  ;;  %v1133_v13 = vpop.f32.mrb[49].mxu0 }
 0x162   : > { %2299 = vst.msk [vmem:[#allocation3 + $0x49] sm:$0x1] %vm2098_vm2, %v2298_v53  ;;  %v2304_v62 = vld [vmem:[#allocation2 + $0xd4] sm:$0x1]  ;;  %v2340_v2 = vld [vmem:[#allocation2 + $0x10a] sm:$0x1]  ;;  %v1879_v4 = vmax.f32 %v1655_v50, %v1767_v59  ;;  %v1134_v63 = vadd.f32 %v11029_v30, %v1133_v13 }
 0x163   : > { %v2305_v0 = vld [vmem:[#allocation2 + $0xf4] sm:$0x1]  ;;  %v2344_v3 = vld [vmem:[#allocation2 + $0x10c] sm:$0x1]  ;;  %1988 = vst.msk [vmem:[#allocation2 + $0x138] sm:$0xff] %vm1500_vm1, %v1876_v54  ;;  %v1765_v6 = vld [vmem:[#allocation2 + $0x141] sm:$0xff] }
 0x164   : > { %v1654_v5 = vld [vmem:[#allocation2 + $0x148] sm:$0xff]  ;;  %1548 = vst.msk [vmem:[#allocation2 + $0x178] sm:$0xff] %vm1500_vm1, %v1435_v56  ;;  %v2306_v9 = vmax.f32 %v2304_v62, %v2305_v0  ;;  %v1877_v10 = vmax.f32 %v1653_v55, %v1765_v6  ;;  %1546 = vst.msk [vmem:[#allocation2 + $0x168] sm:$0xff] %vm1500_vm1, %v1433_v60  ;;  %v2308_v14 = vld [vmem:[#allocation2 + $0xd6] sm:$0x1]  ;;  %v1438_v22 = vmax.f32 %v1142_v12, 0.0 }
 0x165   : > { %v1766_v7 = vld [vmem:[#allocation2 + $0x149] sm:$0xff]  ;;  %2303 = vst.msk [vmem:[#allocation3 + $0x4a] sm:$0x1] %vm2098_vm2, %v2302_v61  ;;  %v2309_v15 = vld [vmem:[#allocation2 + $0xf6] sm:$0x1]  ;;  %v9552_v23 = vpop.f32.mrb[50].mxu0 }
 0x166   : > { %v1878_v11 = vmax.f32 %v1654_v5, %v1766_v7  ;;  %v2337_v16 = vld [vmem:[#allocation2 + $0x128] sm:$0x1]  ;;  %v2341_v17 = vld [vmem:[#allocation2 + $0x12a] sm:$0x1]  ;;  %v2345_v18 = vld [vmem:[#allocation2 + $0x12c] sm:$0x1]  ;;  %v2310_v19 = vmax.f32 %v2308_v14, %v2309_v15  ;;  %v1145_v28 = vadd.f32 %v11029_v30, %v9552_v23 }
 0x167   : > { %1991 = vst.msk [vmem:[#allocation2 + $0x150] sm:$0xff] %vm1500_vm1, %v1879_v4  ;;  %v2348_v20 = vld [vmem:[#allocation2 + $0x10e] sm:$0x1]  ;;  %1989 = vst.msk [vmem:[#allocation2 + $0x140] sm:$0xff] %vm1500_vm1, %v1877_v10  ;;  %v2338_v24 = vmax.f32 %v2336_v1, %v2337_v16  ;;  %v2342_v25 = vmax.f32 %v2340_v2, %v2341_v17  ;;  %v2346_v26 = vmax.f32 %v2344_v3, %v2345_v18  ;;  %v1436_v27 = vmax.f32 %v1134_v63, 0.0  ;;  %v1136_v29 = vpop.f32.mrb[51].mxu0 }
 0x168   : > { %2307 = vst.msk [vmem:[#allocation3 + $0x4b] sm:$0x1] %vm2098_vm2, %v2306_v9  ;;  %v2349_v21 = vld [vmem:[#allocation2 + $0x12e] sm:$0x1]  ;;  %2311 = vst.msk [vmem:[#allocation3 + $0x4c] sm:$0x1] %vm2098_vm2, %v2310_v19  ;;  %v1137_v38 = vadd.f32 %v11029_v30, %v1136_v29 }
 0x169   : > { %1990 = vst.msk [vmem:[#allocation2 + $0x148] sm:$0xff] %vm1500_vm1, %v1878_v11  ;;  %v2312_v31 = vld [vmem:[#allocation2 + $0xd8] sm:$0x1]  ;;  %v2350_v33 = vmax.f32 %v2348_v20, %v2349_v21  ;;  %v1659_v35 = vld [vmem:[#allocation2 + $0x170] sm:$0xff]  ;;  %v1768_v37 = vld [vmem:[#allocation2 + $0x159] sm:$0xff]  ;;  %v9611_v40 = vpop.f32.mrb[0].mxu1 }
 0x16a   : > { %v2313_v32 = vld [vmem:[#allocation2 + $0xf8] sm:$0x1]  ;;  %1551 = vst.msk [vmem:[#allocation2 + $0x190] sm:$0xff] %vm1500_vm1, %v1438_v22  ;;  %v1657_v42 = vld [vmem:[#allocation2 + $0x160] sm:$0xff]  ;;  %1549 = vst.msk [vmem:[#allocation2 + $0x180] sm:$0xff] %vm1500_vm1, %v1436_v27  ;;  %v1439_v43 = vmax.f32 %v1145_v28, 0.0  ;;  %v1382_v46 = vadd.f32 %v11029_v30, %v9611_v40 }
 0x16b   : > { %v1656_v34 = vld [vmem:[#allocation2 + $0x158] sm:$0xff]  ;;  %v2314_v39 = vmax.f32 %v2312_v31, %v2313_v32  ;;  %2339 = vst.msk [vmem:[#allocation3 + $0x55] sm:$0x1] %vm2098_vm2, %v2338_v24  ;;  %2343 = vst.msk [vmem:[#allocation3 + $0x56] sm:$0x1] %vm2098_vm2, %v2342_v25  ;;  %v1373_v47 = vpop.f32.mrb[1].mxu1 }
 0x16c   : > { %2347 = vst.msk [vmem:[#allocation3 + $0x57] sm:$0x1] %vm2098_vm2, %v2346_v26  ;;  %v1880_v41 = vmax.f32 %v1656_v34, %v1768_v37  ;;  %v2316_v44 = vld [vmem:[#allocation2 + $0xda] sm:$0x1]  ;;  %2351 = vst.msk [vmem:[#allocation3 + $0x58] sm:$0x1] %vm2098_vm2, %v2350_v33  ;;  %v1374_v53 = vadd.f32 %v11029_v30, %v1373_v47 }
 0x16d   : > { %v2317_v45 = vld [vmem:[#allocation2 + $0xfa] sm:$0x1]  ;;  %v1771_v48 = vld [vmem:[#allocation2 + $0x171] sm:$0xff]  ;;  %v1437_v49 = vmax.f32 %v1137_v38, 0.0  ;;  %2315 = vst.msk [vmem:[#allocation3 + $0x4d] sm:$0x1] %vm2098_vm2, %v2314_v39 }
 0x16e   : > { %v2318_v50 = vmax.f32 %v2316_v44, %v2317_v45  ;;  %v2320_v51 = vld [vmem:[#allocation2 + $0x100] sm:$0x1]  ;;  %1992 = vst.msk [vmem:[#allocation2 + $0x158] sm:$0xff] %vm1500_vm1, %v1880_v41  ;;  %v1883_v54 = vmax.f32 %v1659_v35, %v1771_v48  ;;  %v1658_v55 = vld [vmem:[#allocation2 + $0x168] sm:$0xff]  ;;  %1552 = vst.msk [vmem:[#allocation2 + $0x198] sm:$0xff] %vm1500_vm1, %v1439_v43  ;;  %v9555_v58 = vpop.f32.mrb[52].mxu0 }
 0x16f   : > { %v2321_v52 = vld [vmem:[#allocation2 + $0x120] sm:$0x1]  ;;  %v1769_v56 = vld [vmem:[#allocation2 + $0x161] sm:$0xff]  ;;  %v1770_v57 = vld [vmem:[#allocation2 + $0x169] sm:$0xff]  ;;  %v1498_v60 = vmax.f32 %v1382_v46, 0.0  ;;  %1550 = vst.msk [vmem:[#allocation2 + $0x188] sm:$0xff] %vm1500_vm1, %v1437_v49  ;;  %v1158_v0 = vadd.f32 %v11029_v30, %v9555_v58 }
 0x170   : > { %v2322_v59 = vmax.f32 %v2320_v51, %v2321_v52  ;;  %v1881_v61 = vmax.f32 %v1657_v42, %v1769_v56  ;;  %v1882_v62 = vmax.f32 %v1658_v55, %v1770_v57  ;;  %2319 = vst.msk [vmem:[#allocation3 + $0x4e] sm:$0x1] %vm2098_vm2, %v2318_v50  ;;  %v1149_v1 = vpop.f32.mrb[53].mxu0  ;;  %v2324_v2 = vld [vmem:[#allocation2 + $0x102] sm:$0x1]  ;;  %v1496_v4 = vmax.f32 %v1374_v53, 0.0 }
 0x171   : > { %v2325_v3 = vld [vmem:[#allocation2 + $0x122] sm:$0x1]  ;;  %1995 = vst.msk [vmem:[#allocation2 + $0x170] sm:$0xff] %vm1500_vm1, %v1883_v54  ;;  %v1150_v5 = vadd.f32 %v11029_v30, %v1149_v1  ;;  %1611 = vst.msk [vmem:[#allocation2 + $0x370] sm:$0xff] %vm1500_vm1, %v1498_v60  ;;  %v1442_v7 = vmax.f32 %v1158_v0, 0.0  ;;  %v9556_v8 = vpop.f32.mrb[54].mxu0 }
 0x172   : > { %2323 = vst.msk [vmem:[#allocation3 + $0x51] sm:$0x1] %vm2098_vm2, %v2322_v59  ;;  %v2326_v6 = vmax.f32 %v2324_v2, %v2325_v3  ;;  %v2328_v9 = vld [vmem:[#allocation2 + $0x104] sm:$0x1]  ;;  %v1161_v11 = vadd.f32 %v11029_v30, %v9556_v8  ;;  %v1152_v12 = vpop.f32.mrb[55].mxu0  ;;  %v9612_v14 = vpop.f32.mrb[2].mxu1 }
 0x173   : > { %1993 = vst.msk [vmem:[#allocation2 + $0x160] sm:$0xff] %vm1500_vm1, %v1881_v61  ;;  %1994 = vst.msk [vmem:[#allocation2 + $0x168] sm:$0xff] %vm1500_vm1, %v1882_v62  ;;  %v1440_v10 = vmax.f32 %v1150_v5, 0.0  ;;  %v2329_v13 = vld [vmem:[#allocation2 + $0x124] sm:$0x1]  ;;  %v1660_v15 = vld [vmem:[#allocation2 + $0x178] sm:$0xff]  ;;  %v1153_v17 = vadd.f32 %v11029_v30, %v1152_v12  ;;  %v1385_v19 = vadd.f32 %v11029_v30, %v9612_v14 }
 0x174   : > { %1609 = vst.msk [vmem:[#allocation2 + $0x360] sm:$0xff] %vm1500_vm1, %v1496_v4  ;;  %v1772_v16 = vld [vmem:[#allocation2 + $0x179] sm:$0xff]  ;;  %1555 = vst.msk [vmem:[#allocation2 + $0x1b0] sm:$0xff] %vm1500_vm1, %v1442_v7  ;;  %v2330_v18 = vmax.f32 %v2328_v9, %v2329_v13  ;;  %v2332_v63 = vld [vmem:[#allocation2 + $0x106] sm:$0x1]  ;;  %v1376_v20 = vpop.f32.mrb[3].mxu1 }
 0x175   : > { %2327 = vst.msk [vmem:[#allocation3 + $0x52] sm:$0x1] %vm2098_vm2, %v2326_v6  ;;  %v1663_v21 = vld [vmem:[#allocation2 + $0x190] sm:$0xff]  ;;  %v1884_v22 = vmax.f32 %v1660_v15, %v1772_v16  ;;  %v1443_v23 = vmax.f32 %v1161_v11, 0.0  ;;  %v2333_v24 = vld [vmem:[#allocation2 + $0x126] sm:$0x1]  ;;  %v1377_v26 = vadd.f32 %v11029_v30, %v1376_v20 }
 0x176   : > { %1553 = vst.msk [vmem:[#allocation2 + $0x1a0] sm:$0xff] %vm1500_vm1, %v1440_v10  ;;  %v2352_v25 = vld [vmem:[#allocation2 + $0x110] sm:$0x1]  ;;  %v1775_v27 = vld [vmem:[#allocation2 + $0x191] sm:$0xff]  ;;  %v1661_v28 = vld [vmem:[#allocation2 + $0x180] sm:$0xff]  ;;  %v1441_v31 = vmax.f32 %v1153_v17, 0.0  ;;  %v2334_v32 = vmax.f32 %v2332_v63, %v2333_v24 }
 0x177   : > { %v2934_v29 = vld [vmem:[#allocation3 + $0x41] sm:$0xff]  ;;  %2331 = vst.msk [vmem:[#allocation3 + $0x53] sm:$0x1] %vm2098_vm2, %v2330_v18  ;;  %v2353_v33 = vld [vmem:[#allocation2 + $0x130] sm:$0x1]  ;;  %v1499_v34 = vmax.f32 %v1385_v19, 0.0  ;;  %v1887_v39 = vmax.f32 %v1663_v21, %v1775_v27 }
 0x178   : > { %v2392_v35 = vld [vmem:[#allocation2 + $0x148] sm:$0x1]  ;;  %v2396_v37 = vld [vmem:[#allocation2 + $0x14a] sm:$0x1]  ;;  %v2400_v38 = vld [vmem:[#allocation2 + $0x14c] sm:$0x1]  ;;  %v2354_v44 = vmax.f32 %v2352_v25, %v2353_v33 }
 0x179   : > { %1996 = vst.msk [vmem:[#allocation2 + $0x178] sm:$0xff] %vm1500_vm1, %v1884_v22  ;;  %v1662_v40 = vld [vmem:[#allocation2 + $0x188] sm:$0xff]  ;;  %1556 = vst.msk [vmem:[#allocation2 + $0x1b8] sm:$0xff] %vm1500_vm1, %v1443_v23  ;;  %v9559_v43 = vpop.f32.mrb[56].mxu0  ;;  %v1497_v45 = vmax.f32 %v1377_v26, 0.0  ;;  %v1664_v9 = vld [vmem:[#allocation2 + $0x198] sm:$0xff] }
 0x17a   : > { %v1773_v41 = vld [vmem:[#allocation2 + $0x181] sm:$0xff]  ;;  %v1774_v42 = vld [vmem:[#allocation2 + $0x189] sm:$0xff]  ;;  %1554 = vst.msk [vmem:[#allocation2 + $0x1a8] sm:$0xff] %vm1500_vm1, %v1441_v31  ;;  %v1174_v49 = vadd.f32 %v11029_v30, %v9559_v43  ;;  %v1165_v50 = vpop.f32.mrb[57].mxu0  ;;  %v2356_v51 = vld [vmem:[#allocation2 + $0x112] sm:$0x1] }
 0x17b   : > { %v1885_v46 = vmax.f32 %v1661_v28, %v1773_v41  ;;  %v1886_v47 = vmax.f32 %v1662_v40, %v1774_v42  ;;  %v2935_v48 = vld [vmem:[#allocation3 + $0x49] sm:$0xff]  ;;  %2335 = vst.msk [vmem:[#allocation3 + $0x54] sm:$0x1] %vm2098_vm2, %v2334_v32  ;;  %v2357_v52 = vld [vmem:[#allocation2 + $0x132] sm:$0x1]  ;;  %v1166_v57 = vadd.f32 %v11029_v30, %v1165_v50  ;;  %v9560_v62 = vpop.f32.mrb[58].mxu0 }
 0x17c   : > { %1612 = vst.msk [vmem:[#allocation2 + $0x378] sm:$0xff] %vm1500_vm1, %v1499_v34  ;;  %v2393_v53 = vld [vmem:[#allocation2 + $0x168] sm:$0x1]  ;;  %v2397_v54 = vld [vmem:[#allocation2 + $0x16a] sm:$0x1]  ;;  %1999 = vst.msk [vmem:[#allocation2 + $0x190] sm:$0xff] %vm1500_vm1, %v1887_v39  ;;  %v2958_v56 = vpack.c.bf16 %v2935_v48, %v2934_v29  ;;  %v2358_v58 = vmax.f32 %v2356_v51, %v2357_v52  ;;  %v1177_v4 = vadd.f32 %v11029_v30, %v9560_v62 }
 0x17d   : > { %v2401_v55 = vld [vmem:[#allocation2 + $0x16c] sm:$0x1]  ;;  %2355 = vst.msk [vmem:[#allocation3 + $0x59] sm:$0x1] %vm2098_vm2, %v2354_v44  ;;  %v2404_v59 = vld [vmem:[#allocation2 + $0x14e] sm:$0x1]  ;;  %v2394_v0 = vmax.f32 %v2392_v35, %v2393_v53  ;;  %v2398_v1 = vmax.f32 %v2396_v37, %v2397_v54 }
 0x17e   : > { %1610 = vst.msk [vmem:[#allocation2 + $0x368] sm:$0xff] %vm1500_vm1, %v1497_v45  ;;  %v2405_v60 = vld [vmem:[#allocation2 + $0x16e] sm:$0x1]  ;;  %1997 = vst.msk [vmem:[#allocation2 + $0x180] sm:$0xff] %vm1500_vm1, %v1885_v46  ;;  %v1446_v61 = vmax.f32 %v1174_v49, 0.0  ;;  %v2402_v2 = vmax.f32 %v2400_v38, %v2401_v55  ;;  %9625 = vmatprep.mubr.msk.bf16.mxu1 %vm1500_vm1, %v2958_v56  ;;  %v1444_v3 = vmax.f32 %v1166_v57, 0.0 }
 0x17f   : > { %1998 = vst.msk [vmem:[#allocation2 + $0x188] sm:$0xff] %vm1500_vm1, %v1886_v47  ;;  %v1168_v5 = vpop.f32.mrb[59].mxu0  ;;  %v2360_v6 = vld [vmem:[#allocation2 + $0x114] sm:$0x1]  ;;  %v2406_v8 = vmax.f32 %v2404_v59, %v2405_v60  ;;  %v1776_v11 = vld [vmem:[#allocation2 + $0x199] sm:$0xff]  ;;  %v1447_v16 = vmax.f32 %v1177_v4, 0.0 }
 0x180   : > { %2359 = vst.msk [vmem:[#allocation3 + $0x5a] sm:$0x1] %vm2098_vm2, %v2358_v58  ;;  %v2361_v7 = vld [vmem:[#allocation2 + $0x134] sm:$0x1]  ;;  %v1169_v12 = vadd.f32 %v11029_v30, %v1168_v5  ;;  %2395 = vst.msk [vmem:[#allocation3 + $0x65] sm:$0x1] %vm2098_vm2, %v2394_v0  ;;  %v1888_v14 = vmax.f32 %v1664_v9, %v1776_v11 }
 0x181   : > { %v1667_v10 = vld [vmem:[#allocation2 + $0x1b0] sm:$0xff]  ;;  %1559 = vst.msk [vmem:[#allocation2 + $0x1d0] sm:$0xff] %vm1500_vm1, %v1446_v61  ;;  %v2362_v13 = vmax.f32 %v2360_v6, %v2361_v7  ;;  %v1665_v15 = vld [vmem:[#allocation2 + $0x1a0] sm:$0xff]  ;;  %1557 = vst.msk [vmem:[#allocation2 + $0x1c0] sm:$0xff] %vm1500_vm1, %v1444_v3  ;;  %v9563_v28 = vpop.f32.mrb[60].mxu0 }
 0x182   : > { %2399 = vst.msk [vmem:[#allocation3 + $0x66] sm:$0x1] %vm2098_vm2, %v2398_v1  ;;  %2403 = vst.msk [vmem:[#allocation3 + $0x67] sm:$0x1] %vm2098_vm2, %v2402_v2  ;;  %v2364_v17 = vld [vmem:[#allocation2 + $0x116] sm:$0x1]  ;;  %v1190_v34 = vadd.f32 %v11029_v30, %v9563_v28 }
 0x183   : > { %v2365_v18 = vld [vmem:[#allocation2 + $0x136] sm:$0x1]  ;;  %2407 = vst.msk [vmem:[#allocation3 + $0x68] sm:$0x1] %vm2098_vm2, %v2406_v8  ;;  %v1445_v19 = vmax.f32 %v1169_v12, 0.0  ;;  %v1666_v24 = vld [vmem:[#allocation2 + $0x1a8] sm:$0xff] }
 0x184   : > { %v1779_v63 = vld [vmem:[#allocation2 + $0x1b1] sm:$0xff]  ;;  %2363 = vst.msk [vmem:[#allocation3 + $0x5b] sm:$0x1] %vm2098_vm2, %v2362_v13  ;;  %v2366_v20 = vmax.f32 %v2364_v17, %v2365_v18  ;;  %v1777_v25 = vld [vmem:[#allocation2 + $0x1a1] sm:$0xff]  ;;  %v1778_v26 = vld [vmem:[#allocation2 + $0x1a9] sm:$0xff]  ;;  %v1181_v35 = vpop.f32.mrb[61].mxu0 }
 0x185   : > { %v2368_v21 = vld [vmem:[#allocation2 + $0x118] sm:$0x1]  ;;  %2000 = vst.msk [vmem:[#allocation2 + $0x198] sm:$0xff] %vm1500_vm1, %v1888_v14  ;;  %v1891_v23 = vmax.f32 %v1667_v10, %v1779_v63  ;;  %1560 = vst.msk [vmem:[#allocation2 + $0x1d8] sm:$0xff] %vm1500_vm1, %v1447_v16  ;;  %v1889_v29 = vmax.f32 %v1665_v15, %v1777_v25  ;;  %v1890_v31 = vmax.f32 %v1666_v24, %v1778_v26  ;;  %v2372_v32 = vld [vmem:[#allocation2 + $0x11a] sm:$0x1] }
 0x186   : > { %v2369_v22 = vld [vmem:[#allocation2 + $0x138] sm:$0x1]  ;;  %1558 = vst.msk [vmem:[#allocation2 + $0x1c8] sm:$0xff] %vm1500_vm1, %v1445_v19  ;;  %v2373_v33 = vld [vmem:[#allocation2 + $0x13a] sm:$0x1]  ;;  %v1182_v38 = vadd.f32 %v11029_v30, %v1181_v35  ;;  %v1450_v40 = vmax.f32 %v1190_v34, 0.0 }
 0x187   : > { %v2370_v27 = vmax.f32 %v2368_v21, %v2369_v22  ;;  %2367 = vst.msk [vmem:[#allocation3 + $0x5c] sm:$0x1] %vm2098_vm2, %v2366_v20  ;;  %v2374_v37 = vmax.f32 %v2372_v32, %v2373_v33  ;;  %v1668_v39 = vld [vmem:[#allocation2 + $0x1b8] sm:$0xff]  ;;  %v9564_v41 = vpop.f32.mrb[62].mxu0  ;;  %v11122_v42 = vld [vmem:[#allocation2 + $0x370] sm:$0xff]  ;;  %v1722_v18 = vld [vmem:[#allocation2 + $0x368] sm:$0xff] }
 0x188   : > { %2003 = vst.msk [vmem:[#allocation2 + $0x1b0] sm:$0xff] %vm1500_vm1, %v1891_v23  ;;  %2001 = vst.msk [vmem:[#allocation2 + $0x1a0] sm:$0xff] %vm1500_vm1, %v1889_v29  ;;  %v1448_v43 = vmax.f32 %v1182_v38, 0.0  ;;  %v1193_v44 = vadd.f32 %v11029_v30, %v9564_v41  ;;  %v1184_v45 = vpop.f32.mrb[63].mxu0  ;;  %v2376_v46 = vld [vmem:[#allocation2 + $0x140] sm:$0x1] }
 0x189   : > { %2371 = vst.msk [vmem:[#allocation3 + $0x5d] sm:$0x1] %vm2098_vm2, %v2370_v27  ;;  %2375 = vst.msk [vmem:[#allocation3 + $0x5e] sm:$0x1] %vm2098_vm2, %v2374_v37  ;;  %v2377_v47 = vld [vmem:[#allocation2 + $0x160] sm:$0x1]  ;;  %v1185_v50 = vadd.f32 %v11029_v30, %v1184_v45 }
 0x18a   : > { %2002 = vst.msk [vmem:[#allocation2 + $0x1a8] sm:$0xff] %vm1500_vm1, %v1890_v31  ;;  %v1671_v48 = vld [vmem:[#allocation2 + $0x1d0] sm:$0xff]  ;;  %v1780_v49 = vld [vmem:[#allocation2 + $0x1b9] sm:$0xff]  ;;  %1563 = vst.msk [vmem:[#allocation2 + $0x1f0] sm:$0xff] %vm1500_vm1, %v1450_v40  ;;  %v2378_v51 = vmax.f32 %v2376_v46, %v2377_v47  ;;  %v1451_v55 = vmax.f32 %v1193_v44, 0.0  ;;  %v9567_v7 = vpop.f32.mrb[64].mxu0 }
 0x18b   : > { %v1835_v52 = vld [vmem:[#allocation2 + $0x371] sm:$0xff]  ;;  %v1892_v53 = vmax.f32 %v1668_v39, %v1780_v49  ;;  %v1669_v54 = vld [vmem:[#allocation2 + $0x1c0] sm:$0xff]  ;;  %1561 = vst.msk [vmem:[#allocation2 + $0x1e0] sm:$0xff] %vm1500_vm1, %v1448_v43  ;;  %v1449_v59 = vmax.f32 %v1185_v50, 0.0  ;;  %v2448_v0 = vld [vmem:[#allocation2 + $0x188] sm:$0x1]  ;;  %v1206_v14 = vadd.f32 %v11029_v30, %v9567_v7 }
 0x18c   : > { %v2380_v56 = vld [vmem:[#allocation2 + $0x142] sm:$0x1]  ;;  %v1783_v58 = vld [vmem:[#allocation2 + $0x1d1] sm:$0xff]  ;;  %2379 = vst.msk [vmem:[#allocation3 + $0x61] sm:$0x1] %vm2098_vm2, %v2378_v51  ;;  %v1947_v9 = vmax.f32 %v11122_v42, %v1835_v52  ;;  %v1197_v15 = vpop.f32.mrb[65].mxu0 }
 0x18d   : > { %v2381_v57 = vld [vmem:[#allocation2 + $0x162] sm:$0x1]  ;;  %v2384_v61 = vld [vmem:[#allocation2 + $0x144] sm:$0x1]  ;;  %v2452_v1 = vld [vmem:[#allocation2 + $0x18a] sm:$0x1]  ;;  %v1895_v3 = vmax.f32 %v1671_v48, %v1783_v58  ;;  %v1198_v21 = vadd.f32 %v11029_v30, %v1197_v15 }
 0x18e   : > { %v2382_v60 = vmax.f32 %v2380_v56, %v2381_v57  ;;  %v2385_v62 = vld [vmem:[#allocation2 + $0x164] sm:$0x1]  ;;  %v2456_v2 = vld [vmem:[#allocation2 + $0x18c] sm:$0x1]  ;;  %2004 = vst.msk [vmem:[#allocation2 + $0x1b8] sm:$0xff] %vm1500_vm1, %v1892_v53  ;;  %1564 = vst.msk [vmem:[#allocation2 + $0x1f8] sm:$0xff] %vm1500_vm1, %v1451_v55 }
 0x18f   : > { %v1670_v4 = vld [vmem:[#allocation2 + $0x1c8] sm:$0xff]  ;;  %v2386_v8 = vmax.f32 %v2384_v61, %v2385_v62  ;;  %v2936_v13 = vld [vmem:[#allocation3 + $0x51] sm:$0xff]  ;;  %1562 = vst.msk [vmem:[#allocation2 + $0x1e8] sm:$0xff] %vm1500_vm1, %v1449_v59  ;;  %v2388_v16 = vld [vmem:[#allocation2 + $0x146] sm:$0x1]  ;;  %v1454_v25 = vmax.f32 %v1206_v14, 0.0 }
 0x190   : > { %v1781_v5 = vld [vmem:[#allocation2 + $0x1c1] sm:$0xff]  ;;  %v1782_v6 = vld [vmem:[#allocation2 + $0x1c9] sm:$0xff]  ;;  %2383 = vst.msk [vmem:[#allocation3 + $0x62] sm:$0x1] %vm2098_vm2, %v2382_v60  ;;  %v2937_v24 = vld [vmem:[#allocation3 + $0x59] sm:$0xff]  ;;  %v9568_v26 = vpop.f32.mrb[66].mxu0 }
 0x191   : > { %v2460_v10 = vld [vmem:[#allocation2 + $0x18e] sm:$0x1]  ;;  %v1893_v11 = vmax.f32 %v1669_v54, %v1781_v5  ;;  %v1894_v12 = vmax.f32 %v1670_v4, %v1782_v6  ;;  %v2389_v17 = vld [vmem:[#allocation2 + $0x166] sm:$0x1]  ;;  %v2449_v63 = vld [vmem:[#allocation2 + $0x1a8] sm:$0x1]  ;;  %v2959_v33 = vpack.c.bf16 %v2937_v24, %v2936_v13  ;;  %v1209_v35 = vadd.f32 %v11029_v30, %v9568_v26 }
 0x192   : > { %v2453_v19 = vld [vmem:[#allocation2 + $0x1aa] sm:$0x1]  ;;  %v2457_v20 = vld [vmem:[#allocation2 + $0x1ac] sm:$0x1]  ;;  %2007 = vst.msk [vmem:[#allocation2 + $0x1d0] sm:$0xff] %vm1500_vm1, %v1895_v3  ;;  %v2390_v22 = vmax.f32 %v2388_v16, %v2389_v17  ;;  %v2450_v27 = vmax.f32 %v2448_v0, %v2449_v63  ;;  %v1672_v32 = vld [vmem:[#allocation2 + $0x1d8] sm:$0xff] }
 0x193   : > { %2387 = vst.msk [vmem:[#allocation3 + $0x63] sm:$0x1] %vm2098_vm2, %v2386_v8  ;;  %v2461_v23 = vld [vmem:[#allocation2 + $0x1ae] sm:$0x1]  ;;  %v2454_v28 = vmax.f32 %v2452_v1, %v2453_v19  ;;  %v2458_v29 = vmax.f32 %v2456_v2, %v2457_v20  ;;  %v1452_v34 = vmax.f32 %v1198_v21, 0.0  ;;  %v1200_v37 = vpop.f32.mrb[67].mxu0  ;;  %9626 = vmatmul.mubr.msk.bf16.gmra.mrb[12].mxu1 %vm1500_vm1, %v2959_v33 }
 0x194   : > { %2005 = vst.msk [vmem:[#allocation2 + $0x1c0] sm:$0xff] %vm1500_vm1, %v1893_v11  ;;  %2006 = vst.msk [vmem:[#allocation2 + $0x1c8] sm:$0xff] %vm1500_vm1, %v1894_v12  ;;  %v1834_v31 = vld [vmem:[#allocation2 + $0x369] sm:$0xff]  ;;  %v2462_v38 = vmax.f32 %v2460_v10, %v2461_v23  ;;  %v11143_v39 = vld [vmem:[#allocation2 + $0x361] sm:$0xff]  ;;  %v1201_v42 = vadd.f32 %v11029_v30, %v1200_v37  ;;  %v1455_v48 = vmax.f32 %v1209_v35, 0.0  ;;  %v9571_v61 = vpop.f32.mrb[68].mxu0 }
 0x195   : > { %2391 = vst.msk [vmem:[#allocation3 + $0x64] sm:$0x1] %vm2098_vm2, %v2390_v22  ;;  %v10263_v40 = vld [vmem:[%s12808_s3 + $0x8] sm:$0xff]   ;;  %v1784_v41 = vld [vmem:[#allocation2 + $0x1d9] sm:$0xff]  ;;  %v2408_v43 = vld [vmem:[#allocation2 + $0x150] sm:$0x1]  ;;  %v1946_v45 = vmax.f32 %v1722_v18, %v1834_v31  ;;  %v1222_v4 = vadd.f32 %v11029_v30, %v9571_v61 }
 0x196   : > { %2059 = vst.msk [vmem:[#allocation2 + $0x370] sm:$0xff] %vm1500_vm1, %v1947_v9  ;;  %1567 = vst.msk [vmem:[#allocation2 + $0x210] sm:$0xff] %vm1500_vm1, %v1454_v25  ;;  %v2409_v44 = vld [vmem:[#allocation2 + $0x170] sm:$0x1]  ;;  %v1896_v47 = vmax.f32 %v1672_v32, %v1784_v41  ;;  %v2412_v50 = vld [vmem:[#allocation2 + $0x152] sm:$0x1]  ;;  %9647 = vmatprep.subr.bf16.mxu1 %v10263_v40 }
 0x197   : > { %2451 = vst.msk [vmem:[#allocation3 + $0x75] sm:$0x1] %vm2098_vm2, %v2450_v27  ;;  %2455 = vst.msk [vmem:[#allocation3 + $0x76] sm:$0x1] %vm2098_vm2, %v2454_v28  ;;  %v1675_v46 = vld [vmem:[#allocation2 + $0x1f0] sm:$0xff]  ;;  %v2410_v49 = vmax.f32 %v2408_v43, %v2409_v44  ;;  %v1673_v53 = vld [vmem:[#allocation2 + $0x1e0] sm:$0xff]  ;;  %9648 = vmatpush3.bf16.msra.mxu1 %v10263_v40 }
 0x198   : > { %2459 = vst.msk [vmem:[#allocation3 + $0x77] sm:$0x1] %vm2098_vm2, %v2458_v29  ;;  %v2413_v51 = vld [vmem:[#allocation2 + $0x172] sm:$0x1]  ;;  %2463 = vst.msk [vmem:[#allocation3 + $0x78] sm:$0x1] %vm2098_vm2, %v2462_v38 }
 0x199   : > { %1565 = vst.msk [vmem:[#allocation2 + $0x200] sm:$0xff] %vm1500_vm1, %v1452_v34  ;;  %v1787_v52 = vld [vmem:[#allocation2 + $0x1f1] sm:$0xff]  ;;  %v1453_v54 = vmax.f32 %v1201_v42, 0.0  ;;  %v2414_v55 = vmax.f32 %v2412_v50, %v2413_v51  ;;  %2058 = vst.msk [vmem:[#allocation2 + $0x368] sm:$0xff] %vm1500_vm1, %v1946_v45  ;;  %v1674_v58 = vld [vmem:[#allocation2 + $0x1e8] sm:$0xff]  ;;  %v1458_v12 = vmax.f32 %v1222_v4, 0.0 }
 0x19a   : > { %v2416_v56 = vld [vmem:[#allocation2 + $0x154] sm:$0x1]  ;;  %2008 = vst.msk [vmem:[#allocation2 + $0x1d8] sm:$0xff] %vm1500_vm1, %v1896_v47  ;;  %v1899_v57 = vmax.f32 %v1675_v46, %v1787_v52  ;;  %v1785_v59 = vld [vmem:[#allocation2 + $0x1e1] sm:$0xff]  ;;  %v1786_v60 = vld [vmem:[#allocation2 + $0x1e9] sm:$0xff]  ;;  %v1213_v16 = vpop.f32.mrb[69].mxu0 }
 0x19b   : > { %1568 = vst.msk [vmem:[#allocation2 + $0x218] sm:$0xff] %vm1500_vm1, %v1455_v48  ;;  %v1897_v62 = vmax.f32 %v1673_v53, %v1785_v59  ;;  %v1898_v0 = vmax.f32 %v1674_v58, %v1786_v60  ;;  %1566 = vst.msk [vmem:[#allocation2 + $0x208] sm:$0xff] %vm1500_vm1, %v1453_v54  ;;  %v2417_v1 = vld [vmem:[#allocation2 + $0x174] sm:$0x1]  ;;  %v2420_v2 = vld [vmem:[#allocation2 + $0x156] sm:$0x1]  ;;  %v1214_v18 = vadd.f32 %v11029_v30, %v1213_v16 }
 0x19c   : > { %2411 = vst.msk [vmem:[#allocation3 + $0x69] sm:$0x1] %vm2098_vm2, %v2410_v49  ;;  %2415 = vst.msk [vmem:[#allocation3 + $0x6a] sm:$0x1] %vm2098_vm2, %v2414_v55  ;;  %v2421_v3 = vld [vmem:[#allocation2 + $0x176] sm:$0x1]  ;;  %v2418_v5 = vmax.f32 %v2416_v56, %v2417_v1 }
 0x19d   : > { %2011 = vst.msk [vmem:[#allocation2 + $0x1f0] sm:$0xff] %vm1500_vm1, %v1899_v57  ;;  %v2422_v6 = vmax.f32 %v2420_v2, %v2421_v3  ;;  %2009 = vst.msk [vmem:[#allocation2 + $0x1e0] sm:$0xff] %vm1500_vm1, %v1897_v62  ;;  %v2424_v7 = vld [vmem:[#allocation2 + $0x158] sm:$0x1]  ;;  %v2428_v10 = vld [vmem:[#allocation2 + $0x15a] sm:$0x1] }
 0x19e   : > { %2010 = vst.msk [vmem:[#allocation2 + $0x1e8] sm:$0xff] %vm1500_vm1, %v1898_v0  ;;  %v2425_v8 = vld [vmem:[#allocation2 + $0x178] sm:$0x1]  ;;  %v2429_v11 = vld [vmem:[#allocation2 + $0x17a] sm:$0x1]  ;;  %1571 = vst.msk [vmem:[#allocation2 + $0x230] sm:$0xff] %vm1500_vm1, %v1458_v12 }
 0x19f   : > { %2419 = vst.msk [vmem:[#allocation3 + $0x6b] sm:$0x1] %vm2098_vm2, %v2418_v5  ;;  %2423 = vst.msk [vmem:[#allocation3 + $0x6c] sm:$0x1] %vm2098_vm2, %v2422_v6  ;;  %v2426_v9 = vmax.f32 %v2424_v7, %v2425_v8  ;;  %v1676_v13 = vld [vmem:[#allocation2 + $0x1f8] sm:$0xff]  ;;  %v2430_v15 = vmax.f32 %v2428_v10, %v2429_v11  ;;  %v9572_v63 = vpop.f32.mrb[70].mxu0 }
 0x1a0   : > { %v1788_v14 = vld [vmem:[#allocation2 + $0x1f9] sm:$0xff]  ;;  %v1679_v21 = vld [vmem:[#allocation2 + $0x210] sm:$0xff]  ;;  %v1225_v24 = vadd.f32 %v11029_v30, %v9572_v63  ;;  %v1216_v25 = vpop.f32.mrb[71].mxu0  ;;  %v2504_v27 = vld [vmem:[#allocation2 + $0x1c8] sm:$0x1]  ;;  %v1456_v34 = vmax.f32 %v1214_v18, 0.0 }
 0x1a1   : > { %v1900_v17 = vmax.f32 %v1676_v13, %v1788_v14  ;;  %2427 = vst.msk [vmem:[#allocation3 + $0x6d] sm:$0x1] %vm2098_vm2, %v2426_v9  ;;  %v2432_v19 = vld [vmem:[#allocation2 + $0x180] sm:$0x1]  ;;  %2431 = vst.msk [vmem:[#allocation3 + $0x6e] sm:$0x1] %vm2098_vm2, %v2430_v15  ;;  %v1217_v35 = vadd.f32 %v11029_v30, %v1216_v25 }
 0x1a2   : > { %v2433_v20 = vld [vmem:[#allocation2 + $0x1a0] sm:$0x1]  ;;  %v1791_v22 = vld [vmem:[#allocation2 + $0x211] sm:$0xff]  ;;  %v2508_v28 = vld [vmem:[#allocation2 + $0x1ca] sm:$0x1]  ;;  %v9575_v37 = vpop.f32.mrb[72].mxu0 }
 0x1a3   : > { %v1677_v23 = vld [vmem:[#allocation2 + $0x200] sm:$0xff]  ;;  %v2434_v26 = vmax.f32 %v2432_v19, %v2433_v20  ;;  %2012 = vst.msk [vmem:[#allocation2 + $0x1f8] sm:$0xff] %vm1500_vm1, %v1900_v17  ;;  %v1903_v29 = vmax.f32 %v1679_v21, %v1791_v22  ;;  %v1678_v31 = vld [vmem:[#allocation2 + $0x208] sm:$0xff]  ;;  %v1459_v43 = vmax.f32 %v1225_v24, 0.0  ;;  %v1238_v44 = vadd.f32 %v11029_v30, %v9575_v37  ;;  %v1229_v45 = vpop.f32.mrb[73].mxu0  ;;  %1569 = vst.msk [vmem:[#allocation2 + $0x220] sm:$0xff] %vm1500_vm1, %v1456_v34 }
 0x1a4   : > { %v1789_v32 = vld [vmem:[#allocation2 + $0x201] sm:$0xff]  ;;  %v1790_v33 = vld [vmem:[#allocation2 + $0x209] sm:$0xff]  ;;  %v1230_v51 = vadd.f32 %v11029_v30, %v1229_v45  ;;  %v1457_v54 = vmax.f32 %v1217_v35, 0.0  ;;  %v9576_v56 = vpop.f32.mrb[74].mxu0  ;;  %v2468_v14 = vld [vmem:[#allocation2 + $0x192] sm:$0x1] }
 0x1a5   : > { %v2512_v38 = vld [vmem:[#allocation2 + $0x1cc] sm:$0x1]  ;;  %v2516_v40 = vld [vmem:[#allocation2 + $0x1ce] sm:$0x1]  ;;  %v1901_v41 = vmax.f32 %v1677_v23, %v1789_v32  ;;  %v1902_v42 = vmax.f32 %v1678_v31, %v1790_v33  ;;  %2435 = vst.msk [vmem:[#allocation3 + $0x71] sm:$0x1] %vm2098_vm2, %v2434_v26  ;;  %v1241_v62 = vadd.f32 %v11029_v30, %v9576_v56 }
 0x1a6   : > { %v2436_v46 = vld [vmem:[#allocation2 + $0x182] sm:$0x1]  ;;  %v2505_v48 = vld [vmem:[#allocation2 + $0x1e8] sm:$0x1]  ;;  %v2509_v49 = vld [vmem:[#allocation2 + $0x1ea] sm:$0x1] }
 0x1a7   : > { %v2437_v47 = vld [vmem:[#allocation2 + $0x1a2] sm:$0x1]  ;;  %v2513_v50 = vld [vmem:[#allocation2 + $0x1ec] sm:$0x1]  ;;  %2015 = vst.msk [vmem:[#allocation2 + $0x210] sm:$0xff] %vm1500_vm1, %v1903_v29  ;;  %2013 = vst.msk [vmem:[#allocation2 + $0x200] sm:$0xff] %vm1500_vm1, %v1901_v41  ;;  %v2506_v57 = vmax.f32 %v2504_v27, %v2505_v48  ;;  %v2510_v58 = vmax.f32 %v2508_v28, %v2509_v49 }
 0x1a8   : > { %v2438_v52 = vmax.f32 %v2436_v46, %v2437_v47  ;;  %v2517_v53 = vld [vmem:[#allocation2 + $0x1ee] sm:$0x1]  ;;  %2014 = vst.msk [vmem:[#allocation2 + $0x208] sm:$0xff] %vm1500_vm1, %v1902_v42  ;;  %1572 = vst.msk [vmem:[#allocation2 + $0x238] sm:$0xff] %vm1500_vm1, %v1459_v43  ;;  %v1462_v55 = vmax.f32 %v1238_v44, 0.0  ;;  %v10264_v59 = vld [vmem:[%s12808_s3 + $0x20] sm:$0xff]   ;;  %v2514_v3 = vmax.f32 %v2512_v38, %v2513_v50 }
 0x1a9   : > { %v2938_v60 = vld [vmem:[#allocation3 + $0x61] sm:$0xff]  ;;  %v1460_v61 = vmax.f32 %v1230_v51, 0.0  ;;  %v1232_v0 = vpop.f32.mrb[75].mxu0  ;;  %v2518_v4 = vmax.f32 %v2516_v40, %v2517_v53  ;;  %1570 = vst.msk [vmem:[#allocation2 + $0x228] sm:$0xff] %vm1500_vm1, %v1457_v54  ;;  %v2464_v9 = vld [vmem:[#allocation2 + $0x190] sm:$0x1]  ;;  %9677 = vmatprep.subr.bf16.mxu1 %v10264_v59 }
 0x1aa   : > { %2439 = vst.msk [vmem:[#allocation3 + $0x72] sm:$0x1] %vm2098_vm2, %v2438_v52  ;;  %v2440_v1 = vld [vmem:[#allocation2 + $0x184] sm:$0x1]  ;;  %v1233_v5 = vadd.f32 %v11029_v30, %v1232_v0  ;;  %v2444_v7 = vld [vmem:[#allocation2 + $0x186] sm:$0x1] }
 0x1ab   : > { %v2441_v2 = vld [vmem:[#allocation2 + $0x1a4] sm:$0x1]  ;;  %1575 = vst.msk [vmem:[#allocation2 + $0x250] sm:$0xff] %vm1500_vm1, %v1462_v55  ;;  %v2445_v8 = vld [vmem:[#allocation2 + $0x1a6] sm:$0x1]  ;;  %v2939_v10 = vld [vmem:[#allocation3 + $0x69] sm:$0xff] }
 0x1ac   : > { %v2442_v6 = vmax.f32 %v2440_v1, %v2441_v2  ;;  %2507 = vst.msk [vmem:[#allocation3 + $0x85] sm:$0x1] %vm2098_vm2, %v2506_v57  ;;  %2511 = vst.msk [vmem:[#allocation3 + $0x86] sm:$0x1] %vm2098_vm2, %v2510_v58  ;;  %v1463_v11 = vmax.f32 %v1241_v62, 0.0  ;;  %v2446_v12 = vmax.f32 %v2444_v7, %v2445_v8  ;;  %v2960_v15 = vpack.c.bf16 %v2939_v10, %v2938_v60  ;;  %v1680_v23 = vld [vmem:[#allocation2 + $0x218] sm:$0xff] }
 0x1ad   : > { %1573 = vst.msk [vmem:[#allocation2 + $0x240] sm:$0xff] %vm1500_vm1, %v1460_v61  ;;  %v2465_v13 = vld [vmem:[#allocation2 + $0x1b0] sm:$0x1]  ;;  %v1461_v16 = vmax.f32 %v1233_v5, 0.0  ;;  %v2469_v18 = vld [vmem:[#allocation2 + $0x1b2] sm:$0x1] }
 0x1ae   : > { %2515 = vst.msk [vmem:[#allocation3 + $0x87] sm:$0x1] %vm2098_vm2, %v2514_v3  ;;  %2519 = vst.msk [vmem:[#allocation3 + $0x88] sm:$0x1] %vm2098_vm2, %v2518_v4  ;;  %v2466_v17 = vmax.f32 %v2464_v9, %v2465_v13  ;;  %v2472_v63 = vld [vmem:[#allocation2 + $0x194] sm:$0x1]  ;;  %v2470_v19 = vmax.f32 %v2468_v14, %v2469_v18  ;;  %9629 = vmatprep.mubr.msk.bf16.mxu1 %vm1500_vm1, %v2960_v15 }
 0x1af   : > { %2443 = vst.msk [vmem:[#allocation3 + $0x73] sm:$0x1] %vm2098_vm2, %v2442_v6  ;;  %2447 = vst.msk [vmem:[#allocation3 + $0x74] sm:$0x1] %vm2098_vm2, %v2446_v12  ;;  %v2473_v20 = vld [vmem:[#allocation2 + $0x1b4] sm:$0x1] }
 0x1b0   : > { %1576 = vst.msk [vmem:[#allocation2 + $0x258] sm:$0xff] %vm1500_vm1, %v1463_v11  ;;  %v2476_v21 = vld [vmem:[#allocation2 + $0x196] sm:$0x1]  ;;  %v1792_v24 = vld [vmem:[#allocation2 + $0x219] sm:$0xff]  ;;  %1574 = vst.msk [vmem:[#allocation2 + $0x248] sm:$0xff] %vm1500_vm1, %v1461_v16  ;;  %v2474_v25 = vmax.f32 %v2472_v63, %v2473_v20  ;;  %v9579_v27 = vpop.f32.mrb[76].mxu0 }
 0x1b1   : > { %v2477_v22 = vld [vmem:[#allocation2 + $0x1b6] sm:$0x1]  ;;  %2467 = vst.msk [vmem:[#allocation3 + $0x79] sm:$0x1] %vm2098_vm2, %v2466_v17  ;;  %v1904_v28 = vmax.f32 %v1680_v23, %v1792_v24  ;;  %2471 = vst.msk [vmem:[#allocation3 + $0x7a] sm:$0x1] %vm2098_vm2, %v2470_v19  ;;  %v1254_v29 = vadd.f32 %v11029_v30, %v9579_v27 }
 0x1b2   : > { %v2478_v26 = vmax.f32 %v2476_v21, %v2477_v22  ;;  %v1683_v31 = vld [vmem:[#allocation2 + $0x230] sm:$0xff]  ;;  %v1681_v33 = vld [vmem:[#allocation2 + $0x220] sm:$0xff]  ;;  %2475 = vst.msk [vmem:[#allocation3 + $0x7b] sm:$0x1] %vm2098_vm2, %v2474_v25  ;;  %v1245_v34 = vpop.f32.mrb[77].mxu0  ;;  %v1682_v37 = vld [vmem:[#allocation2 + $0x228] sm:$0xff] }
 0x1b3   : > { %v1795_v32 = vld [vmem:[#allocation2 + $0x231] sm:$0xff]  ;;  %2016 = vst.msk [vmem:[#allocation2 + $0x218] sm:$0xff] %vm1500_vm1, %v1904_v28  ;;  %v1793_v38 = vld [vmem:[#allocation2 + $0x221] sm:$0xff]  ;;  %v1794_v40 = vld [vmem:[#allocation2 + $0x229] sm:$0xff]  ;;  %v1466_v41 = vmax.f32 %v1254_v29, 0.0  ;;  %v1246_v42 = vadd.f32 %v11029_v30, %v1245_v34  ;;  %v9580_v43 = vpop.f32.mrb[78].mxu0 }
 0x1b4   : > { %2479 = vst.msk [vmem:[#allocation3 + $0x7c] sm:$0x1] %vm2098_vm2, %v2478_v26  ;;  %v1907_v35 = vmax.f32 %v1683_v31, %v1795_v32  ;;  %v1684_v44 = vld [vmem:[#allocation2 + $0x238] sm:$0xff]  ;;  %v1905_v45 = vmax.f32 %v1681_v33, %v1793_v38  ;;  %v1906_v46 = vmax.f32 %v1682_v37, %v1794_v40  ;;  %v11212_v49 = vld [vmem:[%s12807_s2] ss:$0 sm:$0xff]  ;;  %v1248_v51 = vpop.f32.mrb[79].mxu0 }
 0x1b5   : > { %v1796_v47 = vld [vmem:[#allocation2 + $0x239] sm:$0xff]  ;;  %v2480_v48 = vld [vmem:[#allocation2 + $0x198] sm:$0x1]  ;;  %v1257_v50 = vadd.f32 %v11212_v49, %v9580_v43  ;;  %1579 = vst.msk [vmem:[#allocation2 + $0x270] sm:$0xff] %vm1500_vm1, %v1466_v41  ;;  %v1249_v55 = vadd.f32 %v11212_v49, %v1248_v51  ;;  %v1687_v56 = vld [vmem:[#allocation2 + $0x250] sm:$0xff]  ;;  %v1464_v61 = vmax.f32 %v1246_v42, 0.0 }
 0x1b6   : > { %2019 = vst.msk [vmem:[#allocation2 + $0x230] sm:$0xff] %vm1500_vm1, %v1907_v35  ;;  %v1908_v52 = vmax.f32 %v1684_v44, %v1796_v47  ;;  %v2481_v53 = vld [vmem:[#allocation2 + $0x1b8] sm:$0x1]  ;;  %v2484_v54 = vld [vmem:[#allocation2 + $0x19a] sm:$0x1]  ;;  %2017 = vst.msk [vmem:[#allocation2 + $0x220] sm:$0xff] %vm1500_vm1, %v1905_v45 }
 0x1b7   : > { %v2485_v30 = vld [vmem:[#allocation2 + $0x1ba] sm:$0x1]  ;;  %2018 = vst.msk [vmem:[#allocation2 + $0x228] sm:$0xff] %vm1500_vm1, %v1906_v46  ;;  %v1799_v57 = vld [vmem:[#allocation2 + $0x251] sm:$0xff]  ;;  %v1685_v58 = vld [vmem:[#allocation2 + $0x240] sm:$0xff]  ;;  %v2482_v59 = vmax.f32 %v2480_v48, %v2481_v53  ;;  %v1467_v62 = vmax.f32 %v1257_v50, 0.0 }
 0x1b8   : > { %v2486_v60 = vmax.f32 %v2484_v54, %v2485_v30  ;;  %2020 = vst.msk [vmem:[#allocation2 + $0x238] sm:$0xff] %vm1500_vm1, %v1908_v52  ;;  %v1911_v0 = vmax.f32 %v1687_v56, %v1799_v57  ;;  %v1686_v1 = vld [vmem:[#allocation2 + $0x248] sm:$0xff]  ;;  %v1465_v4 = vmax.f32 %v1249_v55, 0.0  ;;  %v9583_v5 = vpop.f32.mrb[80].mxu0  ;;  %1577 = vst.msk [vmem:[#allocation2 + $0x260] sm:$0xff] %vm1500_vm1, %v1464_v61  ;;  %v1688_v43 = vld [vmem:[#allocation2 + $0x258] sm:$0xff] }
 0x1b9   : > { %v1797_v2 = vld [vmem:[#allocation2 + $0x241] sm:$0xff]  ;;  %v1798_v3 = vld [vmem:[#allocation2 + $0x249] sm:$0xff]  ;;  %2483 = vst.msk [vmem:[#allocation3 + $0x7d] sm:$0x1] %vm2098_vm2, %v2482_v59  ;;  %v1270_v8 = vadd.f32 %v11212_v49, %v9583_v5  ;;  %v1261_v9 = vpop.f32.mrb[81].mxu0  ;;  %v2940_v48 = vld [vmem:[#allocation3 + $0x71] sm:$0xff] }
 0x1ba   : > { %v1909_v6 = vmax.f32 %v1685_v58, %v1797_v2  ;;  %v1910_v7 = vmax.f32 %v1686_v1, %v1798_v3  ;;  %2487 = vst.msk [vmem:[#allocation3 + $0x7e] sm:$0x1] %vm2098_vm2, %v2486_v60  ;;  %v2488_v10 = vld [vmem:[#allocation2 + $0x1c0] sm:$0x1]  ;;  %v1262_v12 = vadd.f32 %v11212_v49, %v1261_v9  ;;  %v9584_v13 = vpop.f32.mrb[82].mxu0 }
 0x1bb   : > { %1580 = vst.msk [vmem:[#allocation2 + $0x278] sm:$0xff] %vm1500_vm1, %v1467_v62  ;;  %v2489_v11 = vld [vmem:[#allocation2 + $0x1e0] sm:$0x1]  ;;  %2023 = vst.msk [vmem:[#allocation2 + $0x250] sm:$0xff] %vm1500_vm1, %v1911_v0  ;;  %v2492_v15 = vld [vmem:[#allocation2 + $0x1c2] sm:$0x1]  ;;  %v1273_v18 = vadd.f32 %v11212_v49, %v9584_v13 }
 0x1bc   : > { %1578 = vst.msk [vmem:[#allocation2 + $0x268] sm:$0xff] %vm1500_vm1, %v1465_v4  ;;  %v2490_v14 = vmax.f32 %v2488_v10, %v2489_v11  ;;  %v2493_v16 = vld [vmem:[#allocation2 + $0x1e2] sm:$0x1]  ;;  %2021 = vst.msk [vmem:[#allocation2 + $0x240] sm:$0xff] %vm1500_vm1, %v1909_v6  ;;  %v1470_v17 = vmax.f32 %v1270_v8, 0.0  ;;  %v1264_v63 = vpop.f32.mrb[83].mxu0 }
 0x1bd   : > { %2022 = vst.msk [vmem:[#allocation2 + $0x248] sm:$0xff] %vm1500_vm1, %v1910_v7  ;;  %v2494_v19 = vmax.f32 %v2492_v15, %v2493_v16  ;;  %v2496_v20 = vld [vmem:[#allocation2 + $0x1c4] sm:$0x1]  ;;  %v2560_v22 = vld [vmem:[#allocation2 + $0x208] sm:$0x1]  ;;  %v1468_v25 = vmax.f32 %v1262_v12, 0.0  ;;  %v1265_v26 = vadd.f32 %v11212_v49, %v1264_v63 }
 0x1be   : > { %v2497_v21 = vld [vmem:[#allocation2 + $0x1e4] sm:$0x1]  ;;  %v2564_v23 = vld [vmem:[#allocation2 + $0x20a] sm:$0x1]  ;;  %v2568_v24 = vld [vmem:[#allocation2 + $0x20c] sm:$0x1] }
 0x1bf   : > { %2491 = vst.msk [vmem:[#allocation3 + $0x81] sm:$0x1] %vm2098_vm2, %v2490_v14  ;;  %v2498_v27 = vmax.f32 %v2496_v20, %v2497_v21  ;;  %v2500_v28 = vld [vmem:[#allocation2 + $0x1c6] sm:$0x1]  ;;  %v1471_v31 = vmax.f32 %v1273_v18, 0.0  ;;  %v1469_v44 = vmax.f32 %v1265_v26, 0.0 }
 0x1c0   : > { %v2501_v29 = vld [vmem:[#allocation2 + $0x1e6] sm:$0x1]  ;;  %1583 = vst.msk [vmem:[#allocation2 + $0x290] sm:$0xff] %vm1500_vm1, %v1470_v17  ;;  %v2520_v33 = vld [vmem:[#allocation2 + $0x1d0] sm:$0x1]  ;;  %1581 = vst.msk [vmem:[#allocation2 + $0x280] sm:$0xff] %vm1500_vm1, %v1468_v25 }
 0x1c1   : > { %2495 = vst.msk [vmem:[#allocation3 + $0x82] sm:$0x1] %vm2098_vm2, %v2494_v19  ;;  %v2502_v32 = vmax.f32 %v2500_v28, %v2501_v29  ;;  %v2521_v34 = vld [vmem:[#allocation2 + $0x1f0] sm:$0x1]  ;;  %v2561_v35 = vld [vmem:[#allocation2 + $0x228] sm:$0x1] }
 0x1c2   : > { %v2565_v37 = vld [vmem:[#allocation2 + $0x22a] sm:$0x1]  ;;  %v2569_v38 = vld [vmem:[#allocation2 + $0x22c] sm:$0x1]  ;;  %2499 = vst.msk [vmem:[#allocation3 + $0x83] sm:$0x1] %vm2098_vm2, %v2498_v27  ;;  %v2522_v40 = vmax.f32 %v2520_v33, %v2521_v34  ;;  %v2562_v45 = vmax.f32 %v2560_v22, %v2561_v35 }
 0x1c3   : > { %v2572_v41 = vld [vmem:[#allocation2 + $0x20e] sm:$0x1]  ;;  %1584 = vst.msk [vmem:[#allocation2 + $0x298] sm:$0xff] %vm1500_vm1, %v1471_v31  ;;  %v2566_v46 = vmax.f32 %v2564_v23, %v2565_v37  ;;  %v2570_v47 = vmax.f32 %v2568_v24, %v2569_v38  ;;  %v2941_v50 = vld [vmem:[#allocation3 + $0x79] sm:$0xff]  ;;  %v9587_v52 = vpop.f32.mrb[84].mxu0  ;;  %v1691_v30 = vld [vmem:[#allocation2 + $0x270] sm:$0xff] }
 0x1c4   : > { %v2573_v42 = vld [vmem:[#allocation2 + $0x22e] sm:$0x1]  ;;  %2503 = vst.msk [vmem:[#allocation3 + $0x84] sm:$0x1] %vm2098_vm2, %v2502_v32  ;;  %v1800_v51 = vld [vmem:[#allocation2 + $0x259] sm:$0xff]  ;;  %v2961_v54 = vpack.c.bf16 %v2941_v50, %v2940_v48  ;;  %v1803_v56 = vld [vmem:[#allocation2 + $0x271] sm:$0xff]  ;;  %v1286_v58 = vadd.f32 %v11212_v49, %v9587_v52 }
 0x1c5   : > { %2523 = vst.msk [vmem:[#allocation3 + $0x89] sm:$0x1] %vm2098_vm2, %v2522_v40  ;;  %v2574_v53 = vmax.f32 %v2572_v41, %v2573_v42  ;;  %v1912_v55 = vmax.f32 %v1688_v43, %v1800_v51  ;;  %v1690_v57 = vld [vmem:[#allocation2 + $0x268] sm:$0xff]  ;;  %v1277_v59 = vpop.f32.mrb[85].mxu0  ;;  %2563 = vst.msk [vmem:[#allocation3 + $0x95] sm:$0x1] %vm2098_vm2, %v2562_v45  ;;  %v1915_v60 = vmax.f32 %v1691_v30, %v1803_v56 }
 0x1c6   : > { %1582 = vst.msk [vmem:[#allocation2 + $0x288] sm:$0xff] %vm1500_vm1, %v1469_v44  ;;  %v2524_v61 = vld [vmem:[#allocation2 + $0x1d2] sm:$0x1]  ;;  %v1278_v62 = vadd.f32 %v11212_v49, %v1277_v59  ;;  %9630 = vmatmul.mubr.msk.bf16.gmra.mrb[16].mxu1 %vm1500_vm1, %v2961_v54  ;;  %v1689_v0 = vld [vmem:[#allocation2 + $0x260] sm:$0xff]  ;;  %v1802_v2 = vld [vmem:[#allocation2 + $0x269] sm:$0xff]  ;;  %v1474_v3 = vmax.f32 %v1286_v58, 0.0 }
 0x1c7   : > { %2567 = vst.msk [vmem:[#allocation3 + $0x96] sm:$0x1] %vm2098_vm2, %v2566_v46  ;;  %2571 = vst.msk [vmem:[#allocation3 + $0x97] sm:$0x1] %vm2098_vm2, %v2570_v47  ;;  %v1801_v1 = vld [vmem:[#allocation2 + $0x261] sm:$0xff]  ;;  %v9588_v4 = vpop.f32.mrb[86].mxu0  ;;  %v1914_v7 = vmax.f32 %v1690_v57, %v1802_v2 }
 0x1c8   : > { %2575 = vst.msk [vmem:[#allocation3 + $0x98] sm:$0x1] %vm2098_vm2, %v2574_v53  ;;  %v1692_v5 = vld [vmem:[#allocation2 + $0x278] sm:$0xff]  ;;  %v1913_v6 = vmax.f32 %v1689_v0, %v1801_v1  ;;  %v1695_v8 = vld [vmem:[#allocation2 + $0x290] sm:$0xff]  ;;  %v1472_v10 = vmax.f32 %v1278_v62, 0.0  ;;  %v1289_v11 = vadd.f32 %v11212_v49, %v9588_v4  ;;  %v1280_v16 = vpop.f32.mrb[87].mxu0 }
 0x1c9   : > { %2024 = vst.msk [vmem:[#allocation2 + $0x258] sm:$0xff] %vm1500_vm1, %v1912_v55  ;;  %2027 = vst.msk [vmem:[#allocation2 + $0x270] sm:$0xff] %vm1500_vm1, %v1915_v60  ;;  %v2525_v9 = vld [vmem:[#allocation2 + $0x1f2] sm:$0x1]  ;;  %v1804_v12 = vld [vmem:[#allocation2 + $0x279] sm:$0xff]  ;;  %v1281_v22 = vadd.f32 %v11212_v49, %v1280_v16  ;;  %v9591_v34 = vpop.f32.mrb[88].mxu0 }
 0x1ca   : > { %v2526_v13 = vmax.f32 %v2524_v61, %v2525_v9  ;;  %v2528_v14 = vld [vmem:[#allocation2 + $0x1d4] sm:$0x1]  ;;  %1587 = vst.msk [vmem:[#allocation2 + $0x2b0] sm:$0xff] %vm1500_vm1, %v1474_v3  ;;  %2025 = vst.msk [vmem:[#allocation2 + $0x260] sm:$0xff] %vm1500_vm1, %v1913_v6  ;;  %v1916_v17 = vmax.f32 %v1692_v5, %v1804_v12  ;;  %v1693_v63 = vld [vmem:[#allocation2 + $0x280] sm:$0xff]  ;;  %v1475_v21 = vmax.f32 %v1289_v11, 0.0  ;;  %v1302_v41 = vadd.f32 %v11212_v49, %v9591_v34 }
 0x1cb   : > { %v2529_v15 = vld [vmem:[#allocation2 + $0x1f4] sm:$0x1]  ;;  %2026 = vst.msk [vmem:[#allocation2 + $0x268] sm:$0xff] %vm1500_vm1, %v1914_v7  ;;  %v2532_v20 = vld [vmem:[#allocation2 + $0x1d6] sm:$0x1]  ;;  %1585 = vst.msk [vmem:[#allocation2 + $0x2a0] sm:$0xff] %vm1500_vm1, %v1472_v10 }
 0x1cc   : > { %v1807_v18 = vld [vmem:[#allocation2 + $0x291] sm:$0xff]  ;;  %v2530_v19 = vmax.f32 %v2528_v14, %v2529_v15  ;;  %2527 = vst.msk [vmem:[#allocation3 + $0x8a] sm:$0x1] %vm2098_vm2, %v2526_v13  ;;  %v1473_v33 = vmax.f32 %v1281_v22, 0.0  ;;  %v2540_v38 = vld [vmem:[#allocation2 + $0x1da] sm:$0x1] }
 0x1cd   : > { %v1919_v23 = vmax.f32 %v1695_v8, %v1807_v18  ;;  %v2533_v24 = vld [vmem:[#allocation2 + $0x1f6] sm:$0x1]  ;;  %v2536_v25 = vld [vmem:[#allocation2 + $0x1d8] sm:$0x1]  ;;  %2028 = vst.msk [vmem:[#allocation2 + $0x278] sm:$0xff] %vm1500_vm1, %v1916_v17  ;;  %v1694_v27 = vld [vmem:[#allocation2 + $0x288] sm:$0xff] }
 0x1ce   : > { %v2537_v26 = vld [vmem:[#allocation2 + $0x1f8] sm:$0x1]  ;;  %v1805_v28 = vld [vmem:[#allocation2 + $0x281] sm:$0xff]  ;;  %v1806_v29 = vld [vmem:[#allocation2 + $0x289] sm:$0xff]  ;;  %2531 = vst.msk [vmem:[#allocation3 + $0x8b] sm:$0x1] %vm2098_vm2, %v2530_v19  ;;  %v2534_v31 = vmax.f32 %v2532_v20, %v2533_v24 }
 0x1cf   : > { %v2538_v32 = vmax.f32 %v2536_v25, %v2537_v26  ;;  %1588 = vst.msk [vmem:[#allocation2 + $0x2b8] sm:$0xff] %vm1500_vm1, %v1475_v21  ;;  %v1917_v35 = vmax.f32 %v1693_v63, %v1805_v28  ;;  %v1918_v37 = vmax.f32 %v1694_v27, %v1806_v29  ;;  %2031 = vst.msk [vmem:[#allocation2 + $0x290] sm:$0xff] %vm1500_vm1, %v1919_v23  ;;  %v2541_v40 = vld [vmem:[#allocation2 + $0x1fa] sm:$0x1]  ;;  %v1293_v42 = vpop.f32.mrb[89].mxu0  ;;  %v1478_v51 = vmax.f32 %v1302_v41, 0.0 }
 0x1d0   : > { %2535 = vst.msk [vmem:[#allocation3 + $0x8c] sm:$0x1] %vm2098_vm2, %v2534_v31  ;;  %v2542_v43 = vmax.f32 %v2540_v38, %v2541_v40  ;;  %v1294_v44 = vadd.f32 %v11212_v49, %v1293_v42  ;;  %v9592_v45 = vpop.f32.mrb[90].mxu0  ;;  %v2544_v46 = vld [vmem:[#allocation2 + $0x200] sm:$0x1]  ;;  %v1696_v58 = vld [vmem:[#allocation2 + $0x298] sm:$0xff] }
 0x1d1   : > { %2539 = vst.msk [vmem:[#allocation3 + $0x8d] sm:$0x1] %vm2098_vm2, %v2538_v32  ;;  %v2545_v47 = vld [vmem:[#allocation2 + $0x220] sm:$0x1]  ;;  %v2616_v48 = vld [vmem:[#allocation2 + $0x248] sm:$0x1]  ;;  %v1305_v52 = vadd.f32 %v11212_v49, %v9592_v45 }
 0x1d2   : > { %1586 = vst.msk [vmem:[#allocation2 + $0x2a8] sm:$0xff] %vm1500_vm1, %v1473_v33  ;;  %v2620_v50 = vld [vmem:[#allocation2 + $0x24a] sm:$0x1]  ;;  %2029 = vst.msk [vmem:[#allocation2 + $0x280] sm:$0xff] %vm1500_vm1, %v1917_v35  ;;  %v1296_v53 = vpop.f32.mrb[91].mxu0  ;;  %v2546_v54 = vmax.f32 %v2544_v46, %v2545_v47  ;;  %v1476_v59 = vmax.f32 %v1294_v44, 0.0 }
 0x1d3   : > { %2030 = vst.msk [vmem:[#allocation2 + $0x288] sm:$0xff] %vm1500_vm1, %v1918_v37  ;;  %v2548_v30 = vld [vmem:[#allocation2 + $0x202] sm:$0x1]  ;;  %v2624_v56 = vld [vmem:[#allocation2 + $0x24c] sm:$0x1]  ;;  %v1297_v60 = vadd.f32 %v11212_v49, %v1296_v53  ;;  %1591 = vst.msk [vmem:[#allocation2 + $0x2d0] sm:$0xff] %vm1500_vm1, %v1478_v51 }
 0x1d4   : > { %v2549_v55 = vld [vmem:[#allocation2 + $0x222] sm:$0x1]  ;;  %v2628_v57 = vld [vmem:[#allocation2 + $0x24e] sm:$0x1]  ;;  %2543 = vst.msk [vmem:[#allocation3 + $0x8e] sm:$0x1] %vm2098_vm2, %v2542_v43 }
 0x1d5   : > { %v2550_v61 = vmax.f32 %v2548_v30, %v2549_v55  ;;  %v2552_v62 = vld [vmem:[#allocation2 + $0x204] sm:$0x1]  ;;  %v2617_v1 = vld [vmem:[#allocation2 + $0x268] sm:$0x1]  ;;  %v2621_v2 = vld [vmem:[#allocation2 + $0x26a] sm:$0x1] }
 0x1d6   : > { %v2553_v0 = vld [vmem:[#allocation2 + $0x224] sm:$0x1]  ;;  %v2625_v3 = vld [vmem:[#allocation2 + $0x26c] sm:$0x1]  ;;  %2547 = vst.msk [vmem:[#allocation3 + $0x91] sm:$0x1] %vm2098_vm2, %v2546_v54  ;;  %v2618_v10 = vmax.f32 %v2616_v48, %v2617_v1  ;;  %v2622_v11 = vmax.f32 %v2620_v50, %v2621_v2 }
 0x1d7   : > { %v2554_v4 = vmax.f32 %v2552_v62, %v2553_v0  ;;  %v2629_v5 = vld [vmem:[#allocation2 + $0x26e] sm:$0x1]  ;;  %v1699_v6 = vld [vmem:[#allocation2 + $0x2b0] sm:$0xff]  ;;  %v1808_v7 = vld [vmem:[#allocation2 + $0x299] sm:$0xff]  ;;  %1589 = vst.msk [vmem:[#allocation2 + $0x2c0] sm:$0xff] %vm1500_vm1, %v1476_v59  ;;  %v1479_v8 = vmax.f32 %v1305_v52, 0.0  ;;  %v2626_v16 = vmax.f32 %v2624_v56, %v2625_v3 }
 0x1d8   : > { %v1477_v9 = vmax.f32 %v1297_v60, 0.0  ;;  %2551 = vst.msk [vmem:[#allocation3 + $0x92] sm:$0x1] %vm2098_vm2, %v2550_v61  ;;  %v1920_v12 = vmax.f32 %v1696_v58, %v1808_v7  ;;  %v1811_v13 = vld [vmem:[#allocation2 + $0x2b1] sm:$0xff]  ;;  %v1697_v14 = vld [vmem:[#allocation2 + $0x2a0] sm:$0xff]  ;;  %v2630_v17 = vmax.f32 %v2628_v57, %v2629_v5  ;;  %v9595_v26 = vpop.f32.mrb[92].mxu0 }
 0x1d9   : > { %2555 = vst.msk [vmem:[#allocation3 + $0x93] sm:$0x1] %vm2098_vm2, %v2554_v4  ;;  %v2556_v15 = vld [vmem:[#allocation2 + $0x206] sm:$0x1]  ;;  %v1923_v18 = vmax.f32 %v1699_v6, %v1811_v13  ;;  %v2576_v19 = vld [vmem:[#allocation2 + $0x210] sm:$0x1]  ;;  %v1318_v29 = vadd.f32 %v11212_v49, %v9595_v26 }
 0x1da   : > { %1592 = vst.msk [vmem:[#allocation2 + $0x2d8] sm:$0xff] %vm1500_vm1, %v1479_v8  ;;  %1590 = vst.msk [vmem:[#allocation2 + $0x2c8] sm:$0xff] %vm1500_vm1, %v1477_v9  ;;  %v2557_v63 = vld [vmem:[#allocation2 + $0x226] sm:$0x1]  ;;  %v2577_v20 = vld [vmem:[#allocation2 + $0x230] sm:$0x1] }
 0x1db   : > { %2619 = vst.msk [vmem:[#allocation3 + $0xa5] sm:$0x1] %vm2098_vm2, %v2618_v10  ;;  %2623 = vst.msk [vmem:[#allocation3 + $0xa6] sm:$0x1] %vm2098_vm2, %v2622_v11  ;;  %v1698_v21 = vld [vmem:[#allocation2 + $0x2a8] sm:$0xff]  ;;  %v2558_v24 = vmax.f32 %v2556_v15, %v2557_v63  ;;  %v2578_v25 = vmax.f32 %v2576_v19, %v2577_v20  ;;  %v1309_v33 = vpop.f32.mrb[93].mxu0 }
 0x1dc   : > { %2032 = vst.msk [vmem:[#allocation2 + $0x298] sm:$0xff] %vm1500_vm1, %v1920_v12  ;;  %v1809_v22 = vld [vmem:[#allocation2 + $0x2a1] sm:$0xff]  ;;  %v1810_v23 = vld [vmem:[#allocation2 + $0x2a9] sm:$0xff]  ;;  %v1700_v35 = vld [vmem:[#allocation2 + $0x2b8] sm:$0xff]  ;;  %v1482_v40 = vmax.f32 %v1318_v29, 0.0  ;;  %v1310_v41 = vadd.f32 %v11212_v49, %v1309_v33  ;;  %v9596_v47 = vpop.f32.mrb[94].mxu0 }
 0x1dd   : > { %2627 = vst.msk [vmem:[#allocation3 + $0xa7] sm:$0x1] %vm2098_vm2, %v2626_v16  ;;  %2631 = vst.msk [vmem:[#allocation3 + $0xa8] sm:$0x1] %vm2098_vm2, %v2630_v17  ;;  %v1921_v27 = vmax.f32 %v1697_v14, %v1809_v22  ;;  %v1922_v28 = vmax.f32 %v1698_v21, %v1810_v23  ;;  %v2942_v31 = vld [vmem:[#allocation3 + $0x81] sm:$0xff]  ;;  %v2943_v32 = vld [vmem:[#allocation3 + $0x89] sm:$0xff]  ;;  %v1321_v54 = vadd.f32 %v11212_v49, %v9596_v47 }
 0x1de   : > { %2035 = vst.msk [vmem:[#allocation2 + $0x2b0] sm:$0xff] %vm1500_vm1, %v1923_v18  ;;  %v2962_v34 = vpack.c.bf16 %v2943_v32, %v2942_v31  ;;  %v2580_v37 = vld [vmem:[#allocation2 + $0x212] sm:$0x1]  ;;  %v1812_v43 = vld [vmem:[#allocation2 + $0x2b9] sm:$0xff]  ;;  %v2584_v45 = vld [vmem:[#allocation2 + $0x214] sm:$0x1] }
 0x1df   : > { %2559 = vst.msk [vmem:[#allocation3 + $0x94] sm:$0x1] %vm2098_vm2, %v2558_v24  ;;  %2579 = vst.msk [vmem:[#allocation3 + $0x99] sm:$0x1] %vm2098_vm2, %v2578_v25  ;;  %v2581_v38 = vld [vmem:[#allocation2 + $0x232] sm:$0x1]  ;;  %v1924_v48 = vmax.f32 %v1700_v35, %v1812_v43 }
 0x1e0   : > { %2033 = vst.msk [vmem:[#allocation2 + $0x2a0] sm:$0xff] %vm1500_vm1, %v1921_v27  ;;  %2034 = vst.msk [vmem:[#allocation2 + $0x2a8] sm:$0xff] %vm1500_vm1, %v1922_v28  ;;  %v1703_v42 = vld [vmem:[#allocation2 + $0x2d0] sm:$0xff]  ;;  %v2582_v44 = vmax.f32 %v2580_v37, %v2581_v38  ;;  %9633 = vmatprep.mubr.msk.bf16.mxu1 %vm1500_vm1, %v2962_v34  ;;  %v1701_v50 = vld [vmem:[#allocation2 + $0x2c0] sm:$0xff]  ;;  %v1480_v58 = vmax.f32 %v1310_v41, 0.0  ;;  %v1312_v59 = vpop.f32.mrb[95].mxu0 }
 0x1e1   : > { %v2585_v46 = vld [vmem:[#allocation2 + $0x234] sm:$0x1]  ;;  %v2588_v52 = vld [vmem:[#allocation2 + $0x216] sm:$0x1]  ;;  %1595 = vst.msk [vmem:[#allocation2 + $0x2f0] sm:$0xff] %vm1500_vm1, %v1482_v40  ;;  %v1702_v55 = vld [vmem:[#allocation2 + $0x2c8] sm:$0xff]  ;;  %v1313_v2 = vadd.f32 %v11212_v49, %v1312_v59 }
 0x1e2   : > { %v2586_v51 = vmax.f32 %v2584_v45, %v2585_v46  ;;  %v2589_v53 = vld [vmem:[#allocation2 + $0x236] sm:$0x1]  ;;  %2583 = vst.msk [vmem:[#allocation3 + $0x9a] sm:$0x1] %vm2098_vm2, %v2582_v44  ;;  %v2592_v57 = vld [vmem:[#allocation2 + $0x218] sm:$0x1] }
 0x1e3   : > { %v1815_v30 = vld [vmem:[#allocation2 + $0x2d1] sm:$0xff]  ;;  %v2590_v56 = vmax.f32 %v2588_v52, %v2589_v53  ;;  %2036 = vst.msk [vmem:[#allocation2 + $0x2b8] sm:$0xff] %vm1500_vm1, %v1924_v48  ;;  %v1813_v61 = vld [vmem:[#allocation2 + $0x2c1] sm:$0xff]  ;;  %v1814_v62 = vld [vmem:[#allocation2 + $0x2c9] sm:$0xff]  ;;  %v1483_v1 = vmax.f32 %v1321_v54, 0.0  ;;  %v9599_v3 = vpop.f32.mrb[96].mxu0 }
 0x1e4   : > { %v1927_v60 = vmax.f32 %v1703_v42, %v1815_v30  ;;  %2587 = vst.msk [vmem:[#allocation3 + $0x9b] sm:$0x1] %vm2098_vm2, %v2586_v51  ;;  %v2593_v0 = vld [vmem:[#allocation2 + $0x238] sm:$0x1]  ;;  %v2672_v4 = vld [vmem:[#allocation2 + $0x288] sm:$0x1]  ;;  %v1925_v6 = vmax.f32 %v1701_v50, %v1813_v61  ;;  %v1926_v7 = vmax.f32 %v1702_v55, %v1814_v62  ;;  %v1334_v11 = vadd.f32 %v11212_v49, %v9599_v3 }
 0x1e5   : > { %v2676_v5 = vld [vmem:[#allocation2 + $0x28a] sm:$0x1]  ;;  %2591 = vst.msk [vmem:[#allocation3 + $0x9c] sm:$0x1] %vm2098_vm2, %v2590_v56  ;;  %v2594_v8 = vmax.f32 %v2592_v57, %v2593_v0  ;;  %v2596_v9 = vld [vmem:[#allocation2 + $0x21a] sm:$0x1] }
 0x1e6   : > { %v2597_v10 = vld [vmem:[#allocation2 + $0x23a] sm:$0x1]  ;;  %1593 = vst.msk [vmem:[#allocation2 + $0x2e0] sm:$0xff] %vm1500_vm1, %v1480_v58  ;;  %v1325_v12 = vpop.f32.mrb[97].mxu0  ;;  %v2680_v13 = vld [vmem:[#allocation2 + $0x28c] sm:$0x1] }
 0x1e7   : > { %v2684_v14 = vld [vmem:[#allocation2 + $0x28e] sm:$0x1]  ;;  %2039 = vst.msk [vmem:[#allocation2 + $0x2d0] sm:$0xff] %vm1500_vm1, %v1927_v60  ;;  %v2598_v15 = vmax.f32 %v2596_v9, %v2597_v10  ;;  %1596 = vst.msk [vmem:[#allocation2 + $0x2f8] sm:$0xff] %vm1500_vm1, %v1483_v1  ;;  %v1481_v16 = vmax.f32 %v1313_v2, 0.0  ;;  %v1326_v17 = vadd.f32 %v11212_v49, %v1325_v12  ;;  %v9600_v18 = vpop.f32.mrb[98].mxu0 }
 0x1e8   : > { %v2673_v63 = vld [vmem:[#allocation2 + $0x2a8] sm:$0x1]  ;;  %v2677_v19 = vld [vmem:[#allocation2 + $0x2aa] sm:$0x1]  ;;  %v2681_v20 = vld [vmem:[#allocation2 + $0x2ac] sm:$0x1]  ;;  %v1337_v21 = vadd.f32 %v11212_v49, %v9600_v18 }
 0x1e9   : > { %2037 = vst.msk [vmem:[#allocation2 + $0x2c0] sm:$0xff] %vm1500_vm1, %v1925_v6  ;;  %2038 = vst.msk [vmem:[#allocation2 + $0x2c8] sm:$0xff] %vm1500_vm1, %v1926_v7  ;;  %v2600_v22 = vld [vmem:[#allocation2 + $0x240] sm:$0x1]  ;;  %v2685_v23 = vld [vmem:[#allocation2 + $0x2ae] sm:$0x1]  ;;  %v2674_v27 = vmax.f32 %v2672_v4, %v2673_v63  ;;  %v2678_v28 = vmax.f32 %v2676_v5, %v2677_v19  ;;  %v2682_v34 = vmax.f32 %v2680_v13, %v2681_v20 }
 0x1ea   : > { %2595 = vst.msk [vmem:[#allocation3 + $0x9d] sm:$0x1] %vm2098_vm2, %v2594_v8  ;;  %2599 = vst.msk [vmem:[#allocation3 + $0x9e] sm:$0x1] %vm2098_vm2, %v2598_v15  ;;  %v1486_v24 = vmax.f32 %v1334_v11, 0.0  ;;  %v1484_v25 = vmax.f32 %v1326_v17, 0.0  ;;  %v2686_v35 = vmax.f32 %v2684_v14, %v2685_v23 }
 0x1eb   : > { %1594 = vst.msk [vmem:[#allocation2 + $0x2e8] sm:$0xff] %vm1500_vm1, %v1481_v16  ;;  %v1328_v26 = vpop.f32.mrb[99].mxu0  ;;  %v1487_v29 = vmax.f32 %v1337_v21, 0.0  ;;  %v2601_v32 = vld [vmem:[#allocation2 + $0x260] sm:$0x1]  ;;  %v1704_v47 = vld [vmem:[#allocation2 + $0x2d8] sm:$0xff] }
 0x1ec   : > { %v1329_v31 = vadd.f32 %v11212_v49, %v1328_v26  ;;  %v2604_v33 = vld [vmem:[#allocation2 + $0x242] sm:$0x1]  ;;  %1599 = vst.msk [vmem:[#allocation2 + $0x310] sm:$0xff] %vm1500_vm1, %v1486_v24  ;;  %1597 = vst.msk [vmem:[#allocation2 + $0x300] sm:$0xff] %vm1500_vm1, %v1484_v25  ;;  %v2602_v37 = vmax.f32 %v2600_v22, %v2601_v32  ;;  %v2608_v40 = vld [vmem:[#allocation2 + $0x244] sm:$0x1] }
 0x1ed   : > { %v2605_v38 = vld [vmem:[#allocation2 + $0x262] sm:$0x1]  ;;  %v2609_v41 = vld [vmem:[#allocation2 + $0x264] sm:$0x1]  ;;  %2675 = vst.msk [vmem:[#allocation3 + $0xb5] sm:$0x1] %vm2098_vm2, %v2674_v27 }
 0x1ee   : > { %2679 = vst.msk [vmem:[#allocation3 + $0xb6] sm:$0x1] %vm2098_vm2, %v2678_v28  ;;  %v1485_v42 = vmax.f32 %v1329_v31, 0.0  ;;  %v2606_v43 = vmax.f32 %v2604_v33, %v2605_v38  ;;  %v2610_v44 = vmax.f32 %v2608_v40, %v2609_v41  ;;  %v2612_v45 = vld [vmem:[#allocation2 + $0x246] sm:$0x1]  ;;  %v1707_v48 = vld [vmem:[#allocation2 + $0x2f0] sm:$0xff] }
 0x1ef   : > { %1600 = vst.msk [vmem:[#allocation2 + $0x318] sm:$0xff] %vm1500_vm1, %v1487_v29  ;;  %v2613_v46 = vld [vmem:[#allocation2 + $0x266] sm:$0x1]  ;;  %v1816_v50 = vld [vmem:[#allocation2 + $0x2d9] sm:$0xff]  ;;  %v9603_v52 = vpop.f32.mrb[100].mxu0  ;;  %v1819_v54 = vld [vmem:[#allocation2 + $0x2f1] sm:$0xff] }
 0x1f0   : > { %2683 = vst.msk [vmem:[#allocation3 + $0xb7] sm:$0x1] %vm2098_vm2, %v2682_v34  ;;  %2687 = vst.msk [vmem:[#allocation3 + $0xb8] sm:$0x1] %vm2098_vm2, %v2686_v35  ;;  %v2614_v51 = vmax.f32 %v2612_v45, %v2613_v46  ;;  %v1928_v53 = vmax.f32 %v1704_v47, %v1816_v50  ;;  %v2632_v30 = vld [vmem:[#allocation2 + $0x250] sm:$0x1]  ;;  %v1350_v56 = vadd.f32 %v11212_v49, %v9603_v52 }
 0x1f1   : > { %2603 = vst.msk [vmem:[#allocation3 + $0xa1] sm:$0x1] %vm2098_vm2, %v2602_v37  ;;  %2607 = vst.msk [vmem:[#allocation3 + $0xa2] sm:$0x1] %vm2098_vm2, %v2606_v43  ;;  %v2633_v55 = vld [vmem:[#allocation2 + $0x270] sm:$0x1]  ;;  %v1931_v59 = vmax.f32 %v1707_v48, %v1819_v54 }
 0x1f2   : > { %1598 = vst.msk [vmem:[#allocation2 + $0x308] sm:$0xff] %vm1500_vm1, %v1485_v42  ;;  %v1341_v57 = vpop.f32.mrb[101].mxu0  ;;  %v2944_v58 = vld [vmem:[#allocation3 + $0x91] sm:$0xff]  ;;  %v2634_v60 = vmax.f32 %v2632_v30, %v2633_v55  ;;  %v2945_v62 = vld [vmem:[#allocation3 + $0x99] sm:$0xff]  ;;  %2040 = vst.msk [vmem:[#allocation2 + $0x2d8] sm:$0xff] %vm1500_vm1, %v1928_v53  ;;  %v1490_v2 = vmax.f32 %v1350_v56, 0.0 }
 0x1f3   : > { %2611 = vst.msk [vmem:[#allocation3 + $0xa3] sm:$0x1] %vm2098_vm2, %v2610_v44  ;;  %2615 = vst.msk [vmem:[#allocation3 + $0xa4] sm:$0x1] %vm2098_vm2, %v2614_v51  ;;  %v1342_v61 = vadd.f32 %v11212_v49, %v1341_v57  ;;  %v1705_v0 = vld [vmem:[#allocation2 + $0x2e0] sm:$0xff]  ;;  %v1706_v1 = vld [vmem:[#allocation2 + $0x2e8] sm:$0xff]  ;;  %v2963_v4 = vpack.c.bf16 %v2945_v62, %v2944_v58 }
 0x1f4   : > { %v9604_v3 = vpop.f32.mrb[102].mxu0  ;;  %v1708_v5 = vld [vmem:[#allocation2 + $0x2f8] sm:$0xff]  ;;  %v1817_v6 = vld [vmem:[#allocation2 + $0x2e1] sm:$0xff]  ;;  %v1818_v7 = vld [vmem:[#allocation2 + $0x2e9] sm:$0xff]  ;;  %2635 = vst.msk [vmem:[#allocation3 + $0xa9] sm:$0x1] %vm2098_vm2, %v2634_v60 }
 0x1f5   : > { %v1488_v8 = vmax.f32 %v1342_v61, 0.0  ;;  %v1353_v9 = vadd.f32 %v11212_v49, %v9604_v3  ;;  %v1344_v10 = vpop.f32.mrb[103].mxu0  ;;  %v1929_v11 = vmax.f32 %v1705_v0, %v1817_v6  ;;  %v1930_v12 = vmax.f32 %v1706_v1, %v1818_v7  ;;  %2043 = vst.msk [vmem:[#allocation2 + $0x2f0] sm:$0xff] %vm1500_vm1, %v1931_v59  ;;  %v1711_v13 = vld [vmem:[#allocation2 + $0x310] sm:$0xff]  ;;  %v1820_v14 = vld [vmem:[#allocation2 + $0x2f9] sm:$0xff]  ;;  %1603 = vst.msk [vmem:[#allocation2 + $0x330] sm:$0xff] %vm1500_vm1, %v1490_v2 }
 0x1f6   : > { %v2636_v15 = vld [vmem:[#allocation2 + $0x252] sm:$0x1]  ;;  %v1345_v16 = vadd.f32 %v11212_v49, %v1344_v10  ;;  %9634 = vmatmul.mubr.msk.bf16.gmra.mrb[20].mxu1 %vm1500_vm1, %v2963_v4  ;;  %v1932_v17 = vmax.f32 %v1708_v5, %v1820_v14  ;;  %v1709_v63 = vld [vmem:[#allocation2 + $0x300] sm:$0xff]  ;;  %v2640_v23 = vld [vmem:[#allocation2 + $0x254] sm:$0x1]  ;;  %v9607_v32 = vpop.f32.mrb[104].mxu0 }
 0x1f7   : > { %v1823_v18 = vld [vmem:[#allocation2 + $0x311] sm:$0xff]  ;;  %1601 = vst.msk [vmem:[#allocation2 + $0x320] sm:$0xff] %vm1500_vm1, %v1488_v8  ;;  %v1491_v20 = vmax.f32 %v1353_v9, 0.0  ;;  %2041 = vst.msk [vmem:[#allocation2 + $0x2e0] sm:$0xff] %vm1500_vm1, %v1929_v11  ;;  %v1366_v40 = vadd.f32 %v11212_v49, %v9607_v32  ;;  %v2652_v43 = vld [vmem:[#allocation2 + $0x25a] sm:$0x1] }
 0x1f8   : > { %v2637_v19 = vld [vmem:[#allocation2 + $0x272] sm:$0x1]  ;;  %2042 = vst.msk [vmem:[#allocation2 + $0x2e8] sm:$0xff] %vm1500_vm1, %v1930_v12  ;;  %v1935_v21 = vmax.f32 %v1711_v13, %v1823_v18  ;;  %v2641_v24 = vld [vmem:[#allocation2 + $0x274] sm:$0x1]  ;;  %2044 = vst.msk [vmem:[#allocation2 + $0x2f8] sm:$0xff] %vm1500_vm1, %v1932_v17 }
 0x1f9   : > { %v2638_v22 = vmax.f32 %v2636_v15, %v2637_v19  ;;  %v2644_v25 = vld [vmem:[#allocation2 + $0x256] sm:$0x1]  ;;  %v1710_v26 = vld [vmem:[#allocation2 + $0x308] sm:$0xff]  ;;  %v2642_v29 = vmax.f32 %v2640_v23, %v2641_v24  ;;  %1604 = vst.msk [vmem:[#allocation2 + $0x338] sm:$0xff] %vm1500_vm1, %v1491_v20  ;;  %v1489_v31 = vmax.f32 %v1345_v16, 0.0  ;;  %v1357_v45 = vpop.f32.mrb[105].mxu0 }
 0x1fa   : > { %v1821_v27 = vld [vmem:[#allocation2 + $0x301] sm:$0xff]  ;;  %v1822_v28 = vld [vmem:[#allocation2 + $0x309] sm:$0xff]  ;;  %v2645_v35 = vld [vmem:[#allocation2 + $0x276] sm:$0x1]  ;;  %v1494_v47 = vmax.f32 %v1366_v40, 0.0  ;;  %v1358_v48 = vadd.f32 %v11212_v49, %v1357_v45  ;;  %v9608_v50 = vpop.f32.mrb[106].mxu0 }
 0x1fb   : > { %v1933_v33 = vmax.f32 %v1709_v63, %v1821_v27  ;;  %v1934_v34 = vmax.f32 %v1710_v26, %v1822_v28  ;;  %2047 = vst.msk [vmem:[#allocation2 + $0x310] sm:$0xff] %vm1500_vm1, %v1935_v21  ;;  %v2648_v37 = vld [vmem:[#allocation2 + $0x258] sm:$0x1]  ;;  %v2646_v41 = vmax.f32 %v2644_v25, %v2645_v35  ;;  %v2653_v44 = vld [vmem:[#allocation2 + $0x27a] sm:$0x1]  ;;  %1602 = vst.msk [vmem:[#allocation2 + $0x328] sm:$0xff] %vm1500_vm1, %v1489_v31 }
 0x1fc   : > { %2639 = vst.msk [vmem:[#allocation3 + $0xaa] sm:$0x1] %vm2098_vm2, %v2638_v22  ;;  %v2649_v38 = vld [vmem:[#allocation2 + $0x278] sm:$0x1]  ;;  %2643 = vst.msk [vmem:[#allocation3 + $0xab] sm:$0x1] %vm2098_vm2, %v2642_v29  ;;  %v2654_v46 = vmax.f32 %v2652_v43, %v2653_v44  ;;  %v1369_v30 = vadd.f32 %v11212_v49, %v9608_v50 }
 0x1fd   : > { %v2650_v42 = vmax.f32 %v2648_v37, %v2649_v38  ;;  %2045 = vst.msk [vmem:[#allocation2 + $0x300] sm:$0xff] %vm1500_vm1, %v1933_v33  ;;  %2046 = vst.msk [vmem:[#allocation2 + $0x308] sm:$0xff] %vm1500_vm1, %v1934_v34  ;;  %v1724_v51 = vld [vmem:[#allocation2 + $0x378] sm:$0x7]  ;;  %v2728_v53 = vld [vmem:[#allocation2 + $0x2c8] sm:$0x1] }
 0x1fe   : > { %v1836_v52 = vld [vmem:[#allocation2 + $0x379] sm:$0x7]  ;;  %v2732_v54 = vld [vmem:[#allocation2 + $0x2ca] sm:$0x1]  ;;  %2647 = vst.msk [vmem:[#allocation3 + $0xac] sm:$0x1] %vm2098_vm2, %v2646_v41 }
 0x1ff   : > { %2651 = vst.msk [vmem:[#allocation3 + $0xad] sm:$0x1] %vm2098_vm2, %v2650_v42  ;;  %v1948_v55 = vmax.f32 %v1724_v51, %v1836_v52  ;;  %v1360_v56 = vpop.f32.mrb[107].mxu0  ;;  %v2736_v57 = vld [vmem:[#allocation2 + $0x2cc] sm:$0x1]  ;;  %v1712_v59 = vld [vmem:[#allocation2 + $0x318] sm:$0xff] }
 0x200   : > { %v2740_v58 = vld [vmem:[#allocation2 + $0x2ce] sm:$0x1]  ;;  %2655 = vst.msk [vmem:[#allocation3 + $0xae] sm:$0x1] %vm2098_vm2, %v2654_v46  ;;  %v1824_v60 = vld [vmem:[#allocation2 + $0x319] sm:$0xff]  ;;  %v1492_v61 = vmax.f32 %v1358_v48, 0.0  ;;  %v1361_v62 = vadd.f32 %v11212_v49, %v1360_v56 }
 0x201   : > { %1607 = vst.msk [vmem:[#allocation2 + $0x350] sm:$0xff] %vm1500_vm1, %v1494_v47  ;;  %v2729_v0 = vld [vmem:[#allocation2 + $0x2e8] sm:$0x1]  ;;  %v2733_v1 = vld [vmem:[#allocation2 + $0x2ea] sm:$0x1]  ;;  %v1936_v3 = vmax.f32 %v1712_v59, %v1824_v60  ;;  %v1715_v5 = vld [vmem:[#allocation2 + $0x330] sm:$0xff] }
 0x202   : > { %v2737_v2 = vld [vmem:[#allocation2 + $0x2ec] sm:$0x1]  ;;  %2061 = vst.msk [vmem:[#allocation2 + $0x378] sm:$0x7] %vm2060_vm3, %v1948_v55  ;;  %v2741_v4 = vld [vmem:[#allocation2 + $0x2ee] sm:$0x1]  ;;  %v2730_v9 = vmax.f32 %v2728_v53, %v2729_v0  ;;  %v2734_v10 = vmax.f32 %v2732_v54, %v2733_v1 }
 0x203   : > { %v1827_v6 = vld [vmem:[#allocation2 + $0x331] sm:$0xff]  ;;  %1605 = vst.msk [vmem:[#allocation2 + $0x340] sm:$0xff] %vm1500_vm1, %v1492_v61  ;;  %v1495_v7 = vmax.f32 %v1369_v30, 0.0  ;;  %v1493_v8 = vmax.f32 %v1361_v62, 0.0  ;;  %2048 = vst.msk [vmem:[#allocation2 + $0x318] sm:$0xff] %vm1500_vm1, %v1936_v3  ;;  %v1713_v12 = vld [vmem:[#allocation2 + $0x320] sm:$0xff]  ;;  %v2738_v14 = vmax.f32 %v2736_v57, %v2737_v2  ;;  %v2742_v15 = vmax.f32 %v2740_v58, %v2741_v4 }
 0x204   : > { %v1939_v11 = vmax.f32 %v1715_v5, %v1827_v6  ;;  %v2656_v49 = vld [vmem:[#allocation2 + $0x280] sm:$0x1]  ;;  %v1714_v16 = vld [vmem:[#allocation2 + $0x328] sm:$0xff]  ;;  %2731 = vst.msk [vmem:[#allocation3 + $0xc5] sm:$0x1] %vm2098_vm2, %v2730_v9  ;;  %v1716_v28 = vld [vmem:[#allocation2 + $0x338] sm:$0xff] }
 0x205   : > { %v2657_v13 = vld [vmem:[#allocation2 + $0x2a0] sm:$0x1]  ;;  %v1825_v17 = vld [vmem:[#allocation2 + $0x321] sm:$0xff]  ;;  %v1826_v18 = vld [vmem:[#allocation2 + $0x329] sm:$0xff]  ;;  %1608 = vst.msk [vmem:[#allocation2 + $0x358] sm:$0xff] %vm1500_vm1, %v1495_v7 }
 0x206   : > { %1606 = vst.msk [vmem:[#allocation2 + $0x348] sm:$0xff] %vm1500_vm1, %v1493_v8  ;;  %v2658_v63 = vmax.f32 %v2656_v49, %v2657_v13  ;;  %v1937_v19 = vmax.f32 %v1713_v12, %v1825_v17  ;;  %v1938_v20 = vmax.f32 %v1714_v16, %v1826_v18  ;;  %2051 = vst.msk [vmem:[#allocation2 + $0x330] sm:$0xff] %vm1500_vm1, %v1939_v11  ;;  %v1721_v21 = vld [vmem:[#allocation2 + $0x360] sm:$0xff]  ;;  %v2688_v42 = vld [vmem:[#allocation2 + $0x290] sm:$0x1] }
 0x207   : > { %2735 = vst.msk [vmem:[#allocation3 + $0xc6] sm:$0x1] %vm2098_vm2, %v2734_v10  ;;  %2739 = vst.msk [vmem:[#allocation3 + $0xc7] sm:$0x1] %vm2098_vm2, %v2738_v14  ;;  %v2660_v22 = vld [vmem:[#allocation2 + $0x282] sm:$0x1]  ;;  %v1945_v29 = vmax.f32 %v1721_v21, %v11143_v39 }
 0x208   : > { %2743 = vst.msk [vmem:[#allocation3 + $0xc8] sm:$0x1] %vm2098_vm2, %v2742_v15  ;;  %2659 = vst.msk [vmem:[#allocation3 + $0xb1] sm:$0x1] %vm2098_vm2, %v2658_v63  ;;  %v2661_v23 = vld [vmem:[#allocation2 + $0x2a2] sm:$0x1] }
 0x209   : > { %v2946_v24 = vld [vmem:[#allocation3 + $0xa1] sm:$0xff]  ;;  %v2947_v25 = vld [vmem:[#allocation3 + $0xa9] sm:$0xff]  ;;  %2049 = vst.msk [vmem:[#allocation2 + $0x320] sm:$0xff] %vm1500_vm1, %v1937_v19  ;;  %2050 = vst.msk [vmem:[#allocation2 + $0x328] sm:$0xff] %vm1500_vm1, %v1938_v20  ;;  %v2662_v26 = vmax.f32 %v2660_v22, %v2661_v23 }
 0x20a   : > { %v2964_v27 = vpack.c.bf16 %v2947_v25, %v2946_v24  ;;  %v2664_v31 = vld [vmem:[#allocation2 + $0x284] sm:$0x1]  ;;  %v1828_v33 = vld [vmem:[#allocation2 + $0x339] sm:$0xff]  ;;  %v1719_v34 = vld [vmem:[#allocation2 + $0x350] sm:$0xff] }
 0x20b   : > { %v2665_v32 = vld [vmem:[#allocation2 + $0x2a4] sm:$0x1]  ;;  %2663 = vst.msk [vmem:[#allocation3 + $0xb2] sm:$0x1] %vm2098_vm2, %v2662_v26  ;;  %v2668_v37 = vld [vmem:[#allocation2 + $0x286] sm:$0x1]  ;;  %v1940_v38 = vmax.f32 %v1716_v28, %v1828_v33 }
 0x20c   : > { %v2666_v35 = vmax.f32 %v2664_v31, %v2665_v32  ;;  %9637 = vmatprep.mubr.msk.bf16.mxu1 %vm1500_vm1, %v2964_v27  ;;  %v1717_v40 = vld [vmem:[#allocation2 + $0x340] sm:$0xff]  ;;  %v2689_v43 = vld [vmem:[#allocation2 + $0x2b0] sm:$0x1]  ;;  %v1720_v44 = vld [vmem:[#allocation2 + $0x358] sm:$0xff] }
 0x20d   : > { %v2669_v41 = vld [vmem:[#allocation2 + $0x2a6] sm:$0x1]  ;;  %v1831_v45 = vld [vmem:[#allocation2 + $0x351] sm:$0xff]  ;;  %v1832_v46 = vld [vmem:[#allocation2 + $0x359] sm:$0xff]  ;;  %v2690_v47 = vmax.f32 %v2688_v42, %v2689_v43  ;;  %2052 = vst.msk [vmem:[#allocation2 + $0x338] sm:$0xff] %vm1500_vm1, %v1940_v38 }
 0x20e   : > { %2667 = vst.msk [vmem:[#allocation3 + $0xb3] sm:$0x1] %vm2098_vm2, %v2666_v35  ;;  %v2670_v39 = vmax.f32 %v2668_v37, %v2669_v41  ;;  %v2784_v48 = vld [vmem:[#allocation2 + $0x308] sm:$0x1]  ;;  %v2788_v50 = vld [vmem:[#allocation2 + $0x30a] sm:$0x1]  ;;  %v1943_v52 = vmax.f32 %v1719_v34, %v1831_v45  ;;  %v1944_v53 = vmax.f32 %v1720_v44, %v1832_v46 }
 0x20f   : > { %v2792_v51 = vld [vmem:[#allocation2 + $0x30c] sm:$0x1]  ;;  %v1829_v30 = vld [vmem:[#allocation2 + $0x341] sm:$0xff]  ;;  %2057 = vst.msk [vmem:[#allocation2 + $0x360] sm:$0xff] %vm1500_vm1, %v1945_v29  ;;  %v2796_v56 = vld [vmem:[#allocation2 + $0x30e] sm:$0x1] }
 0x210   : > { %v1718_v54 = vld [vmem:[#allocation2 + $0x348] sm:$0xff]  ;;  %v1941_v57 = vmax.f32 %v1717_v40, %v1829_v30  ;;  %2671 = vst.msk [vmem:[#allocation3 + $0xb4] sm:$0x1] %vm2098_vm2, %v2670_v39  ;;  %2691 = vst.msk [vmem:[#allocation3 + $0xb9] sm:$0x1] %vm2098_vm2, %v2690_v47 }
 0x211   : > { %v1830_v55 = vld [vmem:[#allocation2 + $0x349] sm:$0xff]  ;;  %v2692_v59 = vld [vmem:[#allocation2 + $0x292] sm:$0x1]  ;;  %v2696_v61 = vld [vmem:[#allocation2 + $0x294] sm:$0x1]  ;;  %2056 = vst.msk [vmem:[#allocation2 + $0x358] sm:$0xff] %vm1500_vm1, %v1944_v53 }
 0x212   : > { %v1942_v58 = vmax.f32 %v1718_v54, %v1830_v55  ;;  %v2693_v60 = vld [vmem:[#allocation2 + $0x2b2] sm:$0x1]  ;;  %v2785_v62 = vld [vmem:[#allocation2 + $0x328] sm:$0x1]  ;;  %v2789_v0 = vld [vmem:[#allocation2 + $0x32a] sm:$0x1] }
 0x213   : > { %v2793_v1 = vld [vmem:[#allocation2 + $0x32c] sm:$0x1]  ;;  %2055 = vst.msk [vmem:[#allocation2 + $0x350] sm:$0xff] %vm1500_vm1, %v1943_v52  ;;  %v2694_v2 = vmax.f32 %v2692_v59, %v2693_v60  ;;  %v2797_v3 = vld [vmem:[#allocation2 + $0x32e] sm:$0x1]  ;;  %2053 = vst.msk [vmem:[#allocation2 + $0x340] sm:$0xff] %vm1500_vm1, %v1941_v57  ;;  %v2786_v6 = vmax.f32 %v2784_v48, %v2785_v62  ;;  %v2790_v7 = vmax.f32 %v2788_v50, %v2789_v0 }
 0x214   : > { %2054 = vst.msk [vmem:[#allocation2 + $0x348] sm:$0xff] %vm1500_vm1, %v1942_v58  ;;  %v2697_v4 = vld [vmem:[#allocation2 + $0x2b4] sm:$0x1]  ;;  %v2700_v5 = vld [vmem:[#allocation2 + $0x296] sm:$0x1]  ;;  %v2794_v8 = vmax.f32 %v2792_v51, %v2793_v1  ;;  %v2798_v49 = vmax.f32 %v2796_v56, %v2797_v3 }
 0x215   : > { %2695 = vst.msk [vmem:[#allocation3 + $0xba] sm:$0x1] %vm2098_vm2, %v2694_v2  ;;  %v2698_v9 = vmax.f32 %v2696_v61, %v2697_v4  ;;  %v2701_v10 = vld [vmem:[#allocation2 + $0x2b6] sm:$0x1]  ;;  %v2704_v11 = vld [vmem:[#allocation2 + $0x298] sm:$0x1] }
 0x216   : > { %v2705_v12 = vld [vmem:[#allocation2 + $0x2b8] sm:$0x1]  ;;  %v2702_v13 = vmax.f32 %v2700_v5, %v2701_v10  ;;  %v2708_v15 = vld [vmem:[#allocation2 + $0x29a] sm:$0x1]  ;;  %v2712_v17 = vld [vmem:[#allocation2 + $0x2c0] sm:$0x1] }
 0x217   : > { %v2706_v14 = vmax.f32 %v2704_v11, %v2705_v12  ;;  %v2709_v16 = vld [vmem:[#allocation2 + $0x2ba] sm:$0x1]  ;;  %2787 = vst.msk [vmem:[#allocation3 + $0xd5] sm:$0x1] %vm2098_vm2, %v2786_v6  ;;  %2791 = vst.msk [vmem:[#allocation3 + $0xd6] sm:$0x1] %vm2098_vm2, %v2790_v7 }
 0x218   : > { %2795 = vst.msk [vmem:[#allocation3 + $0xd7] sm:$0x1] %vm2098_vm2, %v2794_v8  ;;  %2699 = vst.msk [vmem:[#allocation3 + $0xbb] sm:$0x1] %vm2098_vm2, %v2698_v9  ;;  %v2710_v18 = vmax.f32 %v2708_v15, %v2709_v16  ;;  %v2713_v63 = vld [vmem:[#allocation2 + $0x2e0] sm:$0x1] }
 0x219   : > { %v2716_v19 = vld [vmem:[#allocation2 + $0x2c2] sm:$0x1]  ;;  %2799 = vst.msk [vmem:[#allocation3 + $0xd8] sm:$0x1] %vm2098_vm2, %v2798_v49  ;;  %2703 = vst.msk [vmem:[#allocation3 + $0xbc] sm:$0x1] %vm2098_vm2, %v2702_v13  ;;  %v2714_v21 = vmax.f32 %v2712_v17, %v2713_v63 }
 0x21a   : > { %v2717_v20 = vld [vmem:[#allocation2 + $0x2e2] sm:$0x1]  ;;  %2707 = vst.msk [vmem:[#allocation3 + $0xbd] sm:$0x1] %vm2098_vm2, %v2706_v14  ;;  %v2720_v23 = vld [vmem:[#allocation2 + $0x2c4] sm:$0x1] }
 0x21b   : > { %v2718_v22 = vmax.f32 %v2716_v19, %v2717_v20  ;;  %v2721_v24 = vld [vmem:[#allocation2 + $0x2e4] sm:$0x1]  ;;  %2711 = vst.msk [vmem:[#allocation3 + $0xbe] sm:$0x1] %vm2098_vm2, %v2710_v18  ;;  %v2724_v26 = vld [vmem:[#allocation2 + $0x2c6] sm:$0x1] }
 0x21c   : > { %v2722_v25 = vmax.f32 %v2720_v23, %v2721_v24  ;;  %v2725_v27 = vld [vmem:[#allocation2 + $0x2e6] sm:$0x1]  ;;  %2715 = vst.msk [vmem:[#allocation3 + $0xc1] sm:$0x1] %vm2098_vm2, %v2714_v21  ;;  %v2744_v29 = vld [vmem:[#allocation2 + $0x2d0] sm:$0x1] }
 0x21d   : > { %2719 = vst.msk [vmem:[#allocation3 + $0xc2] sm:$0x1] %vm2098_vm2, %v2718_v22  ;;  %v2726_v28 = vmax.f32 %v2724_v26, %v2725_v27  ;;  %v2745_v31 = vld [vmem:[#allocation2 + $0x2f0] sm:$0x1]  ;;  %v2748_v33 = vld [vmem:[#allocation2 + $0x2d2] sm:$0x1] }
 0x21e   : > { %2723 = vst.msk [vmem:[#allocation3 + $0xc3] sm:$0x1] %vm2098_vm2, %v2722_v25  ;;  %v2746_v32 = vmax.f32 %v2744_v29, %v2745_v31  ;;  %v2749_v34 = vld [vmem:[#allocation2 + $0x2f2] sm:$0x1]  ;;  %v2752_v37 = vld [vmem:[#allocation2 + $0x2d4] sm:$0x1] }
 0x21f   : > { %2727 = vst.msk [vmem:[#allocation3 + $0xc4] sm:$0x1] %vm2098_vm2, %v2726_v28  ;;  %v2750_v35 = vmax.f32 %v2748_v33, %v2749_v34  ;;  %v2753_v38 = vld [vmem:[#allocation2 + $0x2f4] sm:$0x1]  ;;  %v2756_v40 = vld [vmem:[#allocation2 + $0x2d6] sm:$0x1] }
 0x220   : > { %2747 = vst.msk [vmem:[#allocation3 + $0xc9] sm:$0x1] %vm2098_vm2, %v2746_v32  ;;  %v2948_v41 = vld [vmem:[#allocation3 + $0xb1] sm:$0xff]  ;;  %v2754_v42 = vmax.f32 %v2752_v37, %v2753_v38  ;;  %v2764_v47 = vld [vmem:[#allocation2 + $0x2da] sm:$0x1]  ;;  %v2880_v20 = vld [vmem:[#allocation3] sm:$0xff] }
 0x221   : > { %v2757_v43 = vld [vmem:[#allocation2 + $0x2f6] sm:$0x1]  ;;  %v2760_v44 = vld [vmem:[#allocation2 + $0x2d8] sm:$0x1]  ;;  %2751 = vst.msk [vmem:[#allocation3 + $0xca] sm:$0x1] %vm2098_vm2, %v2750_v35 }
 0x222   : > { %v2761_v45 = vld [vmem:[#allocation2 + $0x2f8] sm:$0x1]  ;;  %v2758_v46 = vmax.f32 %v2756_v40, %v2757_v43  ;;  %v2765_v48 = vld [vmem:[#allocation2 + $0x2fa] sm:$0x1]  ;;  %v2768_v50 = vld [vmem:[#allocation2 + $0x300] sm:$0x1] }
 0x223   : > { %v2762_v39 = vmax.f32 %v2760_v44, %v2761_v45  ;;  %v2949_v51 = vld [vmem:[#allocation3 + $0xb9] sm:$0xff]  ;;  %2755 = vst.msk [vmem:[#allocation3 + $0xcb] sm:$0x1] %vm2098_vm2, %v2754_v42  ;;  %v2766_v52 = vmax.f32 %v2764_v47, %v2765_v48  ;;  %v2772_v54 = vld [vmem:[#allocation2 + $0x302] sm:$0x1]  ;;  %v2881_v21 = vld [vmem:[#allocation3 + $0x8] sm:$0xff] }
 0x224   : > { %v2769_v53 = vld [vmem:[#allocation2 + $0x320] sm:$0x1]  ;;  %v11392_v30 = vpack.c.bf16 %v2949_v51, %v2948_v41  ;;  %2759 = vst.msk [vmem:[#allocation3 + $0xcc] sm:$0x1] %vm2098_vm2, %v2758_v46  ;;  %v2773_v56 = vld [vmem:[#allocation2 + $0x322] sm:$0x1]  ;;  %v2908_v24 = vpack.c.bf16 %v2881_v21, %v2880_v20 }
 0x225   : > { %2763 = vst.msk [vmem:[#allocation3 + $0xcd] sm:$0x1] %vm2098_vm2, %v2762_v39  ;;  %v2770_v55 = vmax.f32 %v2768_v50, %v2769_v53  ;;  %v2776_v57 = vld [vmem:[#allocation2 + $0x304] sm:$0x1]  ;;  %2767 = vst.msk [vmem:[#allocation3 + $0xce] sm:$0x1] %vm2098_vm2, %v2766_v52  ;;  %v2774_v59 = vmax.f32 %v2772_v54, %v2773_v56 }
 0x226   : > { %v2777_v58 = vld [vmem:[#allocation2 + $0x324] sm:$0x1]  ;;  %v2780_v61 = vld [vmem:[#allocation2 + $0x306] sm:$0x1]  ;;  %9638 = vmatmul.mubr.msk.bf16.gmra.mrb[24].mxu1 %vm1500_vm1, %v11392_v30  ;;  %v2800_v1 = vld [vmem:[#allocation2 + $0x310] sm:$0x1] }
 0x227   : > { %v2778_v60 = vmax.f32 %v2776_v57, %v2777_v58  ;;  %v2781_v62 = vld [vmem:[#allocation2 + $0x326] sm:$0x1]  ;;  %2771 = vst.msk [vmem:[#allocation3 + $0xd1] sm:$0x1] %vm2098_vm2, %v2770_v55  ;;  %v2801_v2 = vld [vmem:[#allocation2 + $0x330] sm:$0x1] }
 0x228   : > { %v2782_v0 = vmax.f32 %v2780_v61, %v2781_v62  ;;  %v2804_v3 = vld [vmem:[#allocation2 + $0x312] sm:$0x1]  ;;  %2775 = vst.msk [vmem:[#allocation3 + $0xd2] sm:$0x1] %vm2098_vm2, %v2774_v59  ;;  %v2802_v4 = vmax.f32 %v2800_v1, %v2801_v2  ;;  %v2808_v6 = vld [vmem:[#allocation2 + $0x314] sm:$0x1] }
 0x229   : > { %2779 = vst.msk [vmem:[#allocation3 + $0xd3] sm:$0x1] %vm2098_vm2, %v2778_v60  ;;  %v2805_v5 = vld [vmem:[#allocation2 + $0x332] sm:$0x1]  ;;  %v2809_v7 = vld [vmem:[#allocation2 + $0x334] sm:$0x1] }
 0x22a   : > { %2783 = vst.msk [vmem:[#allocation3 + $0xd4] sm:$0x1] %vm2098_vm2, %v2782_v0  ;;  %v2806_v8 = vmax.f32 %v2804_v3, %v2805_v5  ;;  %v2810_v9 = vmax.f32 %v2808_v6, %v2809_v7  ;;  %v2812_v10 = vld [vmem:[#allocation2 + $0x316] sm:$0x1]  ;;  %v2816_v12 = vld [vmem:[#allocation2 + $0x318] sm:$0x1] }
 0x22b   : > { %v2813_v11 = vld [vmem:[#allocation2 + $0x336] sm:$0x1]  ;;  %2803 = vst.msk [vmem:[#allocation3 + $0xd9] sm:$0x1] %vm2098_vm2, %v2802_v4  ;;  %v2817_v13 = vld [vmem:[#allocation2 + $0x338] sm:$0x1] }
 0x22c   : > { %v2814_v49 = vmax.f32 %v2812_v10, %v2813_v11  ;;  %v2820_v14 = vld [vmem:[#allocation2 + $0x31a] sm:$0x1]  ;;  %2807 = vst.msk [vmem:[#allocation3 + $0xda] sm:$0x1] %vm2098_vm2, %v2806_v8  ;;  %2811 = vst.msk [vmem:[#allocation3 + $0xdb] sm:$0x1] %vm2098_vm2, %v2810_v9  ;;  %v2818_v16 = vmax.f32 %v2816_v12, %v2817_v13 }
 0x22d   : > { %v2821_v15 = vld [vmem:[#allocation2 + $0x33a] sm:$0x1]  ;;  %v2950_v18 = vld [vmem:[#allocation3 + $0xc1] sm:$0xff]  ;;  %v2951_v63 = vld [vmem:[#allocation3 + $0xc9] sm:$0xff] }
 0x22e   : > { %v2822_v17 = vmax.f32 %v2820_v14, %v2821_v15  ;;  %2815 = vst.msk [vmem:[#allocation3 + $0xdc] sm:$0x1] %vm2098_vm2, %v2814_v49  ;;  %2819 = vst.msk [vmem:[#allocation3 + $0xdd] sm:$0x1] %vm2098_vm2, %v2818_v16  ;;  %v11409_v19 = vpack.c.bf16 %v2951_v63, %v2950_v18  ;;  %v2824_v26 = vld [vmem:[#allocation2 + $0x340] sm:$0x1] }
 0x22f   : > { %v2825_v27 = vld [vmem:[#allocation2 + $0x360] sm:$0x1]  ;;  %v2883_v28 = vld [vmem:[#allocation3 + $0x18] sm:$0xff]  ;;  %v2841_v33 = vld [vmem:[#allocation2 + $0x368] sm:$0x1] }
 0x230   : > { %2823 = vst.msk [vmem:[#allocation3 + $0xde] sm:$0x1] %vm2098_vm2, %v2822_v17  ;;  %9641 = vmatprep.mubr.msk.bf16.mxu1 %vm1500_vm1, %v11409_v19  ;;  %v2826_v29 = vmax.f32 %v2824_v26, %v2825_v27  ;;  %v2873_v31 = vld [vmem:[#allocation2 + $0x378] sm:$0x1]  ;;  %v2877_v32 = vld [vmem:[#allocation2 + $0x37a] sm:$0x1] }
 0x231   : > { %v2952_v22 = vld [vmem:[#allocation3 + $0xd1] sm:$0xff]  ;;  %v2845_v34 = vld [vmem:[#allocation2 + $0x36a] sm:$0x1]  ;;  %v2849_v35 = vld [vmem:[#allocation2 + $0x36c] sm:$0x1] }
 0x232   : > { %v2872_v37 = vld [vmem:[#allocation2 + $0x358] sm:$0x1]  ;;  %v2876_v38 = vld [vmem:[#allocation2 + $0x35a] sm:$0x1]  ;;  %v2840_v40 = vld [vmem:[#allocation2 + $0x348] sm:$0x1] }
 0x233   : > { %v2853_v41 = vld [vmem:[#allocation2 + $0x36e] sm:$0x1]  ;;  %v2882_v42 = vld [vmem:[#allocation3 + $0x10] sm:$0xff]  ;;  %2827 = vst.msk [vmem:[#allocation3 + $0xe1] sm:$0x1] %vm2098_vm2, %v2826_v29  ;;  %v2884_v39 = vld [vmem:[#allocation3 + $0x20] sm:$0xff]  ;;  %v2874_v57 = vmax.f32 %v2872_v37, %v2873_v31  ;;  %v2878_v58 = vmax.f32 %v2876_v38, %v2877_v32  ;;  %v2842_v0 = vmax.f32 %v2840_v40, %v2841_v33 }
 0x234   : > { %v2885_v43 = vld [vmem:[#allocation3 + $0x28] sm:$0xff]  ;;  %v2856_v48 = vld [vmem:[#allocation2 + $0x350] sm:$0x1]  ;;  %v2860_v51 = vld [vmem:[#allocation2 + $0x352] sm:$0x1]  ;;  %v11422_v52 = vpack.c.bf16 %v2883_v28, %v2882_v42 }
 0x235   : > { %v2844_v44 = vld [vmem:[#allocation2 + $0x34a] sm:$0x1]  ;;  %v2848_v45 = vld [vmem:[#allocation2 + $0x34c] sm:$0x1]  ;;  %v2852_v46 = vld [vmem:[#allocation2 + $0x34e] sm:$0x1]  ;;  %v11424_v3 = vpack.c.bf16 %v2885_v43, %v2884_v39 }
 0x236   : > { %v10265_v47 = vld [vmem:[%s12808_s3 + $0x28] sm:$0xff]   ;;  %v2857_v50 = vld [vmem:[#allocation2 + $0x370] sm:$0x1]  ;;  %v2828_v53 = vld [vmem:[#allocation2 + $0x342] sm:$0x1]  ;;  %v2846_v1 = vmax.f32 %v2844_v44, %v2845_v34  ;;  %v2850_v2 = vmax.f32 %v2848_v45, %v2849_v35  ;;  %v2854_v6 = vmax.f32 %v2852_v46, %v2853_v41 }
 0x237   : > { %v2953_v23 = vld [vmem:[#allocation3 + $0xd9] sm:$0xff]  ;;  %v2829_v54 = vld [vmem:[#allocation2 + $0x362] sm:$0x1]  ;;  %v2832_v55 = vld [vmem:[#allocation2 + $0x344] sm:$0x1]  ;;  %v2858_v56 = vmax.f32 %v2856_v48, %v2857_v50 }
 0x238   : > { %v11413_v25 = vpack.c.bf16 %v2953_v23, %v2952_v22  ;;  %v2830_v59 = vmax.f32 %v2828_v53, %v2829_v54  ;;  %v2833_v60 = vld [vmem:[#allocation2 + $0x364] sm:$0x1]  ;;  %v2836_v61 = vld [vmem:[#allocation2 + $0x346] sm:$0x1]  ;;  %v2861_v7 = vld [vmem:[#allocation2 + $0x372] sm:$0x1] }
 0x239   : > { %v2837_v62 = vld [vmem:[#allocation2 + $0x366] sm:$0x1]  ;;  %v2834_v4 = vmax.f32 %v2832_v55, %v2833_v60  ;;  %2859 = vst.msk [vmem:[#allocation3 + $0xe9] sm:$0x1] %vm2098_vm2, %v2858_v56  ;;  %v2864_v8 = vld [vmem:[#allocation2 + $0x354] sm:$0x1]  ;;  %v2862_v10 = vmax.f32 %v2860_v51, %v2861_v7 }
 0x23a   : > { %9642 = vmatmul.mubr.msk.bf16.gmra.mrb[28].mxu1 %vm1500_vm1, %v11413_v25  ;;  %v2838_v5 = vmax.f32 %v2836_v61, %v2837_v62  ;;  %v2865_v9 = vld [vmem:[#allocation2 + $0x374] sm:$0x1]  ;;  %2875 = vst.msk [vmem:[#allocation3 + $0xed] sm:$0x1] %vm2098_vm2, %v2874_v57  ;;  %2879 = vst.msk [vmem:[#allocation3 + $0xee] sm:$0x1] %vm2098_vm2, %v2878_v58 }
 0x23b   : > { %9649 = vmatprep.mubr.msk.bf16.mxu1 %vm1500_vm1, %v2908_v24  ;;  %2831 = vst.msk [vmem:[#allocation3 + $0xe2] sm:$0x1] %vm2098_vm2, %v2830_v59  ;;  %2843 = vst.msk [vmem:[#allocation3 + $0xe5] sm:$0x1] %vm2098_vm2, %v2842_v0  ;;  %v2866_v11 = vmax.f32 %v2864_v8, %v2865_v9  ;;  %v2868_v12 = vld [vmem:[#allocation2 + $0x356] sm:$0x1] }
 0x23c   : > { %2847 = vst.msk [vmem:[#allocation3 + $0xe6] sm:$0x1] %vm2098_vm2, %v2846_v1  ;;  %2851 = vst.msk [vmem:[#allocation3 + $0xe7] sm:$0x1] %vm2098_vm2, %v2850_v2  ;;  %v2869_v49 = vld [vmem:[#allocation2 + $0x376] sm:$0x1] }
 0x23d   : > { %v10484_v13 = vld [vmem:[%s12808_s3 + $0x20] sm:$0xff]   ;;  %2835 = vst.msk [vmem:[#allocation3 + $0xe3] sm:$0x1] %vm2098_vm2, %v2834_v4  ;;  %2839 = vst.msk [vmem:[#allocation3 + $0xe4] sm:$0x1] %vm2098_vm2, %v2838_v5  ;;  %v2870_v14 = vmax.f32 %v2868_v12, %v2869_v49  ;;  %v10266_v15 = vld [vmem:[%s12808_s3 + $0x30] sm:$0xff]  }
 0x23e   : > { %2855 = vst.msk [vmem:[#allocation3 + $0xe8] sm:$0x1] %vm2098_vm2, %v2854_v6  ;;  %2863 = vst.msk [vmem:[#allocation3 + $0xea] sm:$0x1] %vm2098_vm2, %v2862_v10  ;;  %v2887_v16 = vld [vmem:[#allocation3 + $0x38] sm:$0xff]  ;;  %v2889_v17 = vld [vmem:[#allocation3 + $0x48] sm:$0xff] }
 0x23f   : > { %2867 = vst.msk [vmem:[#allocation3 + $0xeb] sm:$0x1] %vm2098_vm2, %v2866_v11  ;;  %2871 = vst.msk [vmem:[#allocation3 + $0xec] sm:$0x1] %vm2098_vm2, %v2870_v14  ;;  %v2886_v18 = vld [vmem:[#allocation3 + $0x30] sm:$0xff]  ;;  %v2888_v20 = vld [vmem:[#allocation3 + $0x40] sm:$0xff] }
 0x240   : > { %v11449_v63 = vpack.c.bf16 %v2887_v16, %v2886_v18  ;;  %v11451_v21 = vpack.c.bf16 %v2889_v17, %v2888_v20  ;;  %v2891_v22 = vld [vmem:[#allocation3 + $0x58] sm:$0xff]  ;;  %v2893_v23 = vld [vmem:[#allocation3 + $0x68] sm:$0xff]  ;;  %v2890_v24 = vld [vmem:[#allocation3 + $0x50] sm:$0xff] }
 0x241   : > { %v11457_v26 = vpack.c.bf16 %v2891_v22, %v2890_v24  ;;  %v2892_v27 = vld [vmem:[#allocation3 + $0x60] sm:$0xff]  ;;  %v2895_v29 = vld [vmem:[#allocation3 + $0x78] sm:$0xff]  ;;  %v2897_v31 = vld [vmem:[#allocation3 + $0x88] sm:$0xff] }
 0x242   : > { %9650 = vmatmul.mubr.msk.bf16.vlgmr.msra.gmra.mrb[4].mxu1 %vm1500_vm1, %v11422_v52  ;;  %v11459_v28 = vpack.c.bf16 %v2893_v23, %v2892_v27  ;;  %v2894_v32 = vld [vmem:[#allocation3 + $0x70] sm:$0xff]  ;;  %v2896_v34 = vld [vmem:[#allocation3 + $0x80] sm:$0xff]  ;;  %v2899_v37 = vld [vmem:[#allocation3 + $0x98] sm:$0xff] }
 0x243   : > { %9678 = vmatpush3.bf16.msra.mxu1 %v10484_v13  ;;  %9653 = vmatprep.mubr.msk.bf16.mxu1 %vm1500_vm1, %v11424_v3  ;;  %v11465_v33 = vpack.c.bf16 %v2895_v29, %v2894_v32  ;;  %v11467_v35 = vpack.c.bf16 %v2897_v31, %v2896_v34  ;;  %v2901_v38 = vld [vmem:[#allocation3 + $0xa8] sm:$0xff]  ;;  %v2898_v40 = vld [vmem:[#allocation3 + $0x90] sm:$0xff]  ;;  %v2900_v42 = vld [vmem:[#allocation3 + $0xa0] sm:$0xff] }
 0x244   : > { %9679 = vmatprep.subr.bf16.mxu1 %v10265_v47  ;;  %v11473_v41 = vpack.c.bf16 %v2899_v37, %v2898_v40  ;;  %v11475_v43 = vpack.c.bf16 %v2901_v38, %v2900_v42  ;;  %v2903_v44 = vld [vmem:[#allocation3 + $0xb8] sm:$0xff]  ;;  %v2905_v45 = vld [vmem:[#allocation3 + $0xc8] sm:$0xff]  ;;  %v2902_v46 = vld [vmem:[#allocation3 + $0xb0] sm:$0xff] }
 0x245   : > { %v11481_v39 = vpack.c.bf16 %v2903_v44, %v2902_v46  ;;  %v2907_v50 = vld [vmem:[#allocation3 + $0xd8] sm:$0xff]  ;;  %v3370_v51 = vld [vmem:[#allocation3 + $0x2] sm:$0xff]  ;;  %v3371_v53 = vld [vmem:[#allocation3 + $0xa] sm:$0xff] }
 0x246   : > { %v2906_v54 = vld [vmem:[#allocation3 + $0xd0] sm:$0xff]  ;;  %v3398_v56 = vpack.c.bf16 %v3371_v53, %v3370_v51  ;;  %v3373_v57 = vld [vmem:[#allocation3 + $0x1a] sm:$0xff]  ;;  %v3374_v61 = vld [vmem:[#allocation3 + $0x22] sm:$0xff] }
 0x247   : > { %9680 = vmatpush3.bf16.msra.mxu1 %v10265_v47  ;;  %v2904_v47 = vld [vmem:[#allocation3 + $0xc0] sm:$0xff]  ;;  %v11489_v55 = vpack.c.bf16 %v2907_v50, %v2906_v54  ;;  %v3375_v58 = vld [vmem:[#allocation3 + $0x2a] sm:$0xff]  ;;  %v3372_v59 = vld [vmem:[#allocation3 + $0x12] sm:$0xff] }
 0x248   : > { %9709 = vmatprep.subr.bf16.mxu1 %v10266_v15  ;;  %v11483_v48 = vpack.c.bf16 %v2905_v45, %v2904_v47  ;;  %v11494_v60 = vpack.c.bf16 %v3373_v57, %v3372_v59  ;;  %v10267_v62 = vld [vmem:[%s12808_s3 + $0x38] sm:$0xff]   ;;  %v11499_v0 = vpack.c.bf16 %v3375_v58, %v3374_v61  ;;  %v10268_v1 = vld [vmem:[%s12808_s3 + $0x40] sm:$0xff]   ;;  %v3379_v4 = vld [vmem:[#allocation3 + $0x4a] sm:$0xff] }
 0x249   : > { %v3377_v2 = vld [vmem:[#allocation3 + $0x3a] sm:$0xff]  ;;  %v3376_v5 = vld [vmem:[#allocation3 + $0x32] sm:$0xff]  ;;  %v3378_v7 = vld [vmem:[#allocation3 + $0x42] sm:$0xff] }
 0x24a   : > { %9654 = vmatmul.mubr.msk.bf16.gmra.mrb[8].mxu1 %vm1500_vm1, %v11449_v63  ;;  %v11508_v6 = vpack.c.bf16 %v3377_v2, %v3376_v5  ;;  %v11510_v8 = vpack.c.bf16 %v3379_v4, %v3378_v7  ;;  %v3381_v9 = vld [vmem:[#allocation3 + $0x5a] sm:$0xff]  ;;  %v3383_v10 = vld [vmem:[#allocation3 + $0x6a] sm:$0xff]  ;;  %v3380_v11 = vld [vmem:[#allocation3 + $0x52] sm:$0xff] }
 0x24b   : > { %9657 = vmatprep.mubr.msk.bf16.mxu1 %vm1500_vm1, %v11451_v21  ;;  %v11516_v12 = vpack.c.bf16 %v3381_v9, %v3380_v11  ;;  %v3382_v49 = vld [vmem:[#allocation3 + $0x62] sm:$0xff]  ;;  %v3385_v14 = vld [vmem:[#allocation3 + $0x7a] sm:$0xff]  ;;  %v3384_v16 = vld [vmem:[#allocation3 + $0x72] sm:$0xff] }
 0x24c   : > { %v11518_v13 = vpack.c.bf16 %v3383_v10, %v3382_v49  ;;  %v11524_v17 = vpack.c.bf16 %v3385_v14, %v3384_v16  ;;  %v3386_v18 = vld [vmem:[#allocation3 + $0x82] sm:$0xff]  ;;  %v3389_v22 = vld [vmem:[#allocation3 + $0x9a] sm:$0xff]  ;;  %v3391_v23 = vld [vmem:[#allocation3 + $0xaa] sm:$0xff] }
 0x24d   : > { %v3388_v24 = vld [vmem:[#allocation3 + $0x92] sm:$0xff]  ;;  %v3390_v29 = vld [vmem:[#allocation3 + $0xa2] sm:$0xff]  ;;  %v3393_v32 = vld [vmem:[#allocation3 + $0xba] sm:$0xff] }
 0x24e   : > { %v11532_v27 = vpack.c.bf16 %v3389_v22, %v3388_v24  ;;  %v11534_v31 = vpack.c.bf16 %v3391_v23, %v3390_v29  ;;  %v3395_v34 = vld [vmem:[#allocation3 + $0xca] sm:$0xff]  ;;  %v3392_v37 = vld [vmem:[#allocation3 + $0xb2] sm:$0xff]  ;;  %v3394_v40 = vld [vmem:[#allocation3 + $0xc2] sm:$0xff] }
 0x24f   : > { %v11540_v38 = vpack.c.bf16 %v3393_v32, %v3392_v37  ;;  %v11542_v42 = vpack.c.bf16 %v3395_v34, %v3394_v40  ;;  %v3397_v44 = vld [vmem:[#allocation3 + $0xda] sm:$0xff]  ;;  %v3396_v45 = vld [vmem:[#allocation3 + $0xd2] sm:$0xff]  ;;  %v10269_v47 = vld [vmem:[%s12808_s3 + $0x48] sm:$0xff]  }
 0x250   : > { %v11548_v46 = vpack.c.bf16 %v3397_v44, %v3396_v45  ;;  %v10270_v50 = vld [vmem:[%s12808_s3 + $0x50] sm:$0xff]   ;;  %v3670_v51 = vld [vmem:[#allocation3 + $0xe8] sm:$0xff]  ;;  %v3917_v53 = vld [vmem:[#allocation3 + $0x19] sm:$0xff] }
 0x251   : > { %v3919_v58 = vld [vmem:[#allocation3 + $0x29] sm:$0xff]  ;;  %v3921_v59 = vld [vmem:[#allocation3 + $0x39] sm:$0xff]  ;;  %v3918_v61 = vld [vmem:[#allocation3 + $0x21] sm:$0xff] }
 0x252   : > { %9658 = vmatmul.mubr.msk.bf16.gmra.mrb[12].mxu1 %vm1500_vm1, %v11457_v26  ;;  %v10271_v2 = vld [vmem:[%s12808_s3 + $0x58] sm:$0xff]   ;;  %v10272_v5 = vld [vmem:[%s12808_s3 + $0x60] sm:$0xff]   ;;  %v3923_v7 = vld [vmem:[#allocation3 + $0x49] sm:$0xff] }
 0x253   : > { %9661 = vmatprep.mubr.msk.bf16.mxu1 %vm1500_vm1, %v11459_v28  ;;  %v3925_v9 = vld [vmem:[#allocation3 + $0x59] sm:$0xff]  ;;  %v3922_v10 = vld [vmem:[#allocation3 + $0x41] sm:$0xff]  ;;  %v3924_v49 = vld [vmem:[#allocation3 + $0x51] sm:$0xff] }
 0x254   : > { %v11603_v11 = vpack.c.bf16 %v3923_v7, %v3922_v10  ;;  %v11605_v14 = vpack.c.bf16 %v3925_v9, %v3924_v49  ;;  %v3929_v16 = vld [vmem:[#allocation3 + $0x79] sm:$0xff]  ;;  %v3928_v23 = vld [vmem:[#allocation3 + $0x71] sm:$0xff]  ;;  %v3931_v29 = vld [vmem:[#allocation3 + $0x89] sm:$0xff] }
 0x255   : > { %v11613_v24 = vpack.c.bf16 %v3929_v16, %v3928_v23  ;;  %v3933_v32 = vld [vmem:[#allocation3 + $0x99] sm:$0xff]  ;;  %v3930_v34 = vld [vmem:[#allocation3 + $0x81] sm:$0xff]  ;;  %v3932_v40 = vld [vmem:[#allocation3 + $0x91] sm:$0xff] }
 0x256   : > { %v11619_v37 = vpack.c.bf16 %v3931_v29, %v3930_v34  ;;  %v11621_v44 = vpack.c.bf16 %v3933_v32, %v3932_v40  ;;  %v3935_v45 = vld [vmem:[#allocation3 + $0xa9] sm:$0xff] }
 0x25a   : > { %9662 = vmatmul.mubr.msk.bf16.gmra.mrb[16].mxu1 %vm1500_vm1, %v11465_v33 }
 0x25b   : > { %9665 = vmatprep.mubr.msk.bf16.mxu1 %vm1500_vm1, %v11467_v35 }
 0x262   : > { %9666 = vmatmul.mubr.msk.bf16.gmra.mrb[20].mxu1 %vm1500_vm1, %v11473_v41 }
 0x263   : > { %9669 = vmatprep.mubr.msk.bf16.mxu1 %vm1500_vm1, %v11475_v43 }
 0x26a   : > { %9670 = vmatmul.mubr.msk.bf16.gmra.mrb[24].mxu1 %vm1500_vm1, %v11481_v39 }
 0x26b   : > { %9673 = vmatprep.mubr.msk.bf16.mxu1 %vm1500_vm1, %v11483_v48 }
 0x272   : > { %9674 = vmatmul.mubr.msk.bf16.gmra.mrb[28].mxu1 %vm1500_vm1, %v11489_v55 }
 0x273   : > { %9681 = vmatprep.mubr.msk.bf16.mxu1 %vm1500_vm1, %v3398_v56  ;;  %v3916_v56 = vld [vmem:[#allocation3 + $0x11] sm:$0xff] }
 0x274   : > { %v3944_v57 = vpack.c.bf16 %v3917_v53, %v3916_v56  ;;  %v4216_v56 = vld [vmem:[#allocation3 + $0xea] sm:$0xff] }
 0x27a   : > { %9682 = vmatmul.mubr.msk.bf16.vlgmr.msra.gmra.mrb[4].mxu1 %vm1500_vm1, %v11494_v60 }
 0x27b   : > { %9710 = vmatpush3.bf16.msra.mxu1 %v10266_v15  ;;  %9685 = vmatprep.mubr.msk.bf16.mxu1 %vm1500_vm1, %v11499_v0  ;;  %v3387_v15 = vld [vmem:[#allocation3 + $0x8a] sm:$0xff] }
 0x27c   : > { %9711 = vmatprep.subr.bf16.mxu1 %v10267_v62  ;;  %v11526_v20 = vpack.c.bf16 %v3387_v15, %v3386_v18  ;;  %v3927_v15 = vld [vmem:[#allocation3 + $0x69] sm:$0xff]  ;;  %v3926_v18 = vld [vmem:[#allocation3 + $0x61] sm:$0xff] }
 0x27d   : > { %v11611_v22 = vpack.c.bf16 %v3927_v15, %v3926_v18 }
 0x27f   : > { %9712 = vmatpush3.bf16.msra.mxu1 %v10267_v62  ;;  %v11589_v62 = vpack.c.bf16 %v3919_v58, %v3918_v61  ;;  %v10275_v58 = vld [vmem:[%s12808_s3 + $0x78] sm:$0xff]  }
 0x280   : > { %9741 = vmatprep.subr.bf16.mxu1 %v10268_v1 }
 0x282   : > { %9686 = vmatmul.mubr.msk.bf16.gmra.mrb[8].mxu1 %vm1500_vm1, %v11508_v6 }
 0x283   : > { %9689 = vmatprep.mubr.msk.bf16.mxu1 %vm1500_vm1, %v11510_v8 }
 0x28a   : > { %9690 = vmatmul.mubr.msk.bf16.gmra.mrb[12].mxu1 %vm1500_vm1, %v11516_v12 }
 0x28b   : > { %9693 = vmatprep.mubr.msk.bf16.mxu1 %vm1500_vm1, %v11518_v13 }
 0x292   : > { %9694 = vmatmul.mubr.msk.bf16.gmra.mrb[16].mxu1 %vm1500_vm1, %v11524_v17 }
 0x293   : > { %9697 = vmatprep.mubr.msk.bf16.mxu1 %vm1500_vm1, %v11526_v20 }
 0x29a   : > { %9698 = vmatmul.mubr.msk.bf16.gmra.mrb[20].mxu1 %vm1500_vm1, %v11532_v27 }
 0x29b   : > { %9701 = vmatprep.mubr.msk.bf16.mxu1 %vm1500_vm1, %v11534_v31 }
 0x2a2   : > { %9702 = vmatmul.mubr.msk.bf16.gmra.mrb[24].mxu1 %vm1500_vm1, %v11540_v38 }
 0x2a3   : > { %9705 = vmatprep.mubr.msk.bf16.mxu1 %vm1500_vm1, %v11542_v42 }
 0x2aa   : > { %9706 = vmatmul.mubr.msk.bf16.gmra.mrb[28].mxu1 %vm1500_vm1, %v11548_v46 }
 0x2ab   : > { %9713 = vmatprep.mubr.msk.bf16.mxu1 %vm1500_vm1, %v11422_v52  ;;  %v3669_v52 = vld [vmem:[#allocation3 + $0xe0] sm:$0xff] }
 0x2ac   : > { %v11584_v54 = vpack.c.bf16 %v3670_v51, %v3669_v52  ;;  %v3942_v52 = vld [vmem:[#allocation3 + $0xe1] sm:$0xff]  ;;  %v3943_v51 = vld [vmem:[#allocation3 + $0xe9] sm:$0xff] }
 0x2ad   : > { %v11637_v53 = vpack.c.bf16 %v3943_v51, %v3942_v52 }
 0x2b2   : > { %9714 = vmatmul.mubr.msk.bf16.vlgmr.msra.gmra.mrb[4].mxu1 %vm1500_vm1, %v11424_v3 }
 0x2b3   : > { %9742 = vmatpush3.bf16.msra.mxu1 %v10268_v1  ;;  %9717 = vmatprep.mubr.msk.bf16.mxu1 %vm1500_vm1, %v11449_v63  ;;  %v3920_v1 = vld [vmem:[#allocation3 + $0x31] sm:$0xff] }
 0x2b4   : > { %9743 = vmatprep.subr.bf16.mxu1 %v10269_v47  ;;  %v11594_v4 = vpack.c.bf16 %v3921_v59, %v3920_v1  ;;  %v10276_v59 = vld [vmem:[%s12808_s3 + $0x80] sm:$0xff]  }
 0x2b5   : > { %v4762_v1 = vld [vmem:[#allocation3 + $0xf9] sm:$0xff] }
 0x2b7   : > { %9744 = vmatpush3.bf16.msra.mxu1 %v10269_v47  ;;  %v3934_v47 = vld [vmem:[#allocation3 + $0xa1] sm:$0xff] }
 0x2b8   : > { %9773 = vmatprep.subr.bf16.mxu1 %v10270_v50 }
 0x2ba   : > { %9718 = vmatmul.mubr.msk.bf16.gmra.mrb[8].mxu1 %vm1500_vm1, %v11451_v21 }
 0x2bb   : > { %9721 = vmatprep.mubr.msk.bf16.mxu1 %vm1500_vm1, %v11457_v26 }
 0x2c2   : > { %9722 = vmatmul.mubr.msk.bf16.gmra.mrb[12].mxu1 %vm1500_vm1, %v11459_v28 }
 0x2c3   : > { %9725 = vmatprep.mubr.msk.bf16.mxu1 %vm1500_vm1, %v11465_v33 }
 0x2ca   : > { %9726 = vmatmul.mubr.msk.bf16.gmra.mrb[16].mxu1 %vm1500_vm1, %v11467_v35 }
 0x2cb   : > { %9729 = vmatprep.mubr.msk.bf16.mxu1 %vm1500_vm1, %v11473_v41 }
 0x2d2   : > { %9730 = vmatmul.mubr.msk.bf16.gmra.mrb[20].mxu1 %vm1500_vm1, %v11475_v43 }
 0x2d3   : > { %9733 = vmatprep.mubr.msk.bf16.mxu1 %vm1500_vm1, %v11481_v39 }
 0x2da   : > { %9734 = vmatmul.mubr.msk.bf16.gmra.mrb[24].mxu1 %vm1500_vm1, %v11483_v48 }
 0x2db   : > { %9737 = vmatprep.mubr.msk.bf16.mxu1 %vm1500_vm1, %v11489_v55 }
 0x2e2   : > { %9738 = vmatmul.mubr.msk.bf16.gmra.mrb[28].mxu1 %vm1500_vm1, %v11584_v54 }
 0x2e3   : > { %9745 = vmatprep.mubr.msk.bf16.mxu1 %vm1500_vm1, %v3944_v57 }
 0x2ea   : > { %9746 = vmatmul.mubr.msk.bf16.vlgmr.msra.gmra.mrb[4].mxu1 %vm1500_vm1, %v11589_v62 }
 0x2eb   : > { %9774 = vmatpush3.bf16.msra.mxu1 %v10270_v50  ;;  %9749 = vmatprep.mubr.msk.bf16.mxu1 %vm1500_vm1, %v11594_v4  ;;  %v11627_v50 = vpack.c.bf16 %v3935_v45, %v3934_v47 }
 0x2ec   : > { %9775 = vmatprep.subr.bf16.mxu1 %v10271_v2 }
 0x2ef   : > { %9776 = vmatpush3.bf16.msra.mxu1 %v10271_v2 }
 0x2f0   : > { %9805 = vmatprep.subr.bf16.mxu1 %v10272_v5 }
 0x2f2   : > { %9750 = vmatmul.mubr.msk.bf16.gmra.mrb[8].mxu1 %vm1500_vm1, %v11603_v11 }
 0x2f3   : > { %9753 = vmatprep.mubr.msk.bf16.mxu1 %vm1500_vm1, %v11605_v14 }
 0x2fa   : > { %9754 = vmatmul.mubr.msk.bf16.gmra.mrb[12].mxu1 %vm1500_vm1, %v11611_v22 }
 0x2fb   : > { %9757 = vmatprep.mubr.msk.bf16.mxu1 %vm1500_vm1, %v11613_v24 }
 0x302   : > { %9758 = vmatmul.mubr.msk.bf16.gmra.mrb[16].mxu1 %vm1500_vm1, %v11619_v37 }
 0x303   : > { %9761 = vmatprep.mubr.msk.bf16.mxu1 %vm1500_vm1, %v11621_v44 }
 0x30a   : > { %9762 = vmatmul.mubr.msk.bf16.gmra.mrb[20].mxu1 %vm1500_vm1, %v11627_v50 }
 0x30b   : > { %9765 = vmatprep.mubr.msk.bf16.mxu1 %vm1500_vm1, %v11392_v30  ;;  %v10273_v30 = vld [vmem:[%s12808_s3 + $0x68] sm:$0xff]  }
 0x312   : > { %9766 = vmatmul.mubr.msk.bf16.gmra.mrb[24].mxu1 %vm1500_vm1, %v11409_v19  ;;  %v10274_v19 = vld [vmem:[%s12808_s3 + $0x70] sm:$0xff]  }
 0x313   : > { %9769 = vmatprep.mubr.msk.bf16.mxu1 %vm1500_vm1, %v11413_v25 }
 0x31a   : > { %9770 = vmatmul.mubr.msk.bf16.gmra.mrb[28].mxu1 %vm1500_vm1, %v11637_v53 }
 0x31b   : > { %9777 = vmatprep.mubr.msk.bf16.mxu1 %vm1500_vm1, %v11494_v60  ;;  %v4215_v60 = vld [vmem:[#allocation3 + $0xe2] sm:$0xff] }
 0x31c   : > { %v11673_v57 = vpack.c.bf16 %v4216_v56, %v4215_v60 }
 0x322   : > { %9778 = vmatmul.mubr.msk.bf16.vlgmr.msra.gmra.mrb[4].mxu1 %vm1500_vm1, %v11499_v0 }
 0x323   : > { %9806 = vmatpush3.bf16.msra.mxu1 %v10272_v5  ;;  %9781 = vmatprep.mubr.msk.bf16.mxu1 %vm1500_vm1, %v11508_v6 }
 0x324   : > { %9807 = vmatprep.subr.bf16.mxu1 %v10273_v30 }
 0x327   : > { %9808 = vmatpush3.bf16.msra.mxu1 %v10273_v30 }
 0x328   : > { %9837 = vmatprep.subr.bf16.mxu1 %v10274_v19 }
 0x32a   : > { %9782 = vmatmul.mubr.msk.bf16.gmra.mrb[8].mxu1 %vm1500_vm1, %v11510_v8 }
 0x32b   : > { %9785 = vmatprep.mubr.msk.bf16.mxu1 %vm1500_vm1, %v11516_v12 }
 0x332   : > { %9786 = vmatmul.mubr.msk.bf16.gmra.mrb[12].mxu1 %vm1500_vm1, %v11518_v13 }
 0x333   : > { %9789 = vmatprep.mubr.msk.bf16.mxu1 %vm1500_vm1, %v11524_v17 }
 0x33a   : > { %9790 = vmatmul.mubr.msk.bf16.gmra.mrb[16].mxu1 %vm1500_vm1, %v11526_v20 }
 0x33b   : > { %9793 = vmatprep.mubr.msk.bf16.mxu1 %vm1500_vm1, %v11532_v27 }
 0x342   : > { %9794 = vmatmul.mubr.msk.bf16.gmra.mrb[20].mxu1 %vm1500_vm1, %v11534_v31 }
 0x343   : > { %9797 = vmatprep.mubr.msk.bf16.mxu1 %vm1500_vm1, %v11540_v38 }
 0x34a   : > { %9798 = vmatmul.mubr.msk.bf16.gmra.mrb[24].mxu1 %vm1500_vm1, %v11542_v42 }
 0x34b   : > { %9801 = vmatprep.mubr.msk.bf16.mxu1 %vm1500_vm1, %v11548_v46 }
 0x352   : > { %9802 = vmatmul.mubr.msk.bf16.gmra.mrb[28].mxu1 %vm1500_vm1, %v11673_v57 }
 0x353   : > { %9809 = vmatprep.mubr.msk.bf16.mxu1 %vm1500_vm1, %v11424_v3  ;;  %v10278_v3 = vld [vmem:[%s12810_s5 + $0x40] sm:$0xff]  }
 0x354   : > { %9221 = vmatprep.subr.bf16.mxu0 %v10278_v3 }
 0x35a   : > { %9810 = vmatmul.mubr.msk.bf16.vlgmr.msra.gmra.mrb[4].mxu1 %vm1500_vm1, %v11449_v63  ;;  %v10279_v63 = vld [vmem:[%s12810_s5] sm:$0xff]  }
 0x35b   : > { %9838 = vmatpush3.bf16.msra.mxu1 %v10274_v19  ;;  %9813 = vmatprep.mubr.msk.bf16.mxu1 %vm1500_vm1, %v11451_v21  ;;  %v10280_v21 = vld [vmem:[%s12810_s5 + $0x48] sm:$0xff]  }
 0x35c   : > { %9839 = vmatprep.subr.bf16.mxu1 %v10275_v58  ;;  %9222 = vmatpush3.bf16.msra.mxu0 %v10279_v63 }
 0x35d   : > { %9223 = vmatprep.subr.bf16.mxu0 %v10280_v21  ;;  %v5489_v21 = vlaneseq }
 0x35f   : > { %9840 = vmatpush3.bf16.msra.mxu1 %v10275_v58  ;;  %vm11861_vm5 = vcmp.lt.s32.totalorder %v5489_v21, 64  ;;  %vm5515_vm7 = vcmp.ge.s32.totalorder %v5489_v21, 64  ;;  %vm5516_vm8 = vcmp.lt.s32.totalorder %v5489_v21, 128 }
 0x360   : > { %9869 = vmatprep.subr.bf16.mxu1 %v10276_v59  ;;  %vm12091_vm9 = vmand %vm5515_vm7, %vm5516_vm8 }
 0x362   : > { %9814 = vmatmul.mubr.msk.bf16.gmra.mrb[8].mxu1 %vm1500_vm1, %v11457_v26  ;;  %v10281_v26 = vld [vmem:[%s12810_s5 + $0x8] sm:$0xff]  }
 0x363   : > { %9817 = vmatprep.mubr.msk.bf16.mxu1 %vm1500_vm1, %v11459_v28  ;;  %9224 = vmatpush3.bf16.msra.mxu0 %v10281_v26  ;;  %v4488_v28 = vld [vmem:[#allocation3 + $0xf0] sm:$0xff]  ;;  %v10550_v26 = vmov 1966171168  }
 0x36a   : > { %9818 = vmatmul.mubr.msk.bf16.gmra.mrb[12].mxu1 %vm1500_vm1, %v11465_v33  ;;  %v4489_v33 = vld [vmem:[#allocation3 + $0xf8] sm:$0xff] }
 0x36b   : > { %9821 = vmatprep.mubr.msk.bf16.mxu1 %vm1500_vm1, %v11467_v35  ;;  %v4503_v35 = vpack.c.bf16 %v4489_v33, %v4488_v28  ;;  %v5499_v28 = vunpack.c.l.s4 %v10550_v26 }
 0x372   : > { %9822 = vmatmul.mubr.msk.bf16.gmra.mrb[16].mxu1 %vm1500_vm1, %v11473_v41  ;;  %v10277_v41 = vld [vmem:[%s12808_s3 + $0x88] sm:$0xff]  }
 0x373   : > { %9825 = vmatprep.mubr.msk.bf16.mxu1 %vm1500_vm1, %v11475_v43  ;;  %v4754_v43 = vld [vmem:[#allocation3 + $0xb9] sm:$0xff] }
 0x37a   : > { %9826 = vmatmul.mubr.msk.bf16.gmra.mrb[20].mxu1 %vm1500_vm1, %v11481_v39  ;;  %v4756_v39 = vld [vmem:[#allocation3 + $0xc9] sm:$0xff] }
 0x37b   : > { %9829 = vmatprep.mubr.msk.bf16.mxu1 %vm1500_vm1, %v11483_v48  ;;  %v4753_v48 = vld [vmem:[#allocation3 + $0xb1] sm:$0xff] }
 0x382   : > { %9830 = vmatmul.mubr.msk.bf16.gmra.mrb[24].mxu1 %vm1500_vm1, %v11489_v55  ;;  %v4772_v55 = vpack.c.bf16 %v4754_v43, %v4753_v48 }
 0x383   : > { %9833 = vmatprep.mubr.msk.bf16.mxu1 %vm1500_vm1, %v11584_v54  ;;  %v4755_v54 = vld [vmem:[#allocation3 + $0xc1] sm:$0xff] }
 0x384   : > { %v4773_v61 = vpack.c.bf16 %v4756_v39, %v4755_v54  ;;  %v10292_v54 = vld [vmem:[%s12810_s5 + $0x78] sm:$0xff]  }
 0x38a   : > { %9834 = vmatmul.mubr.msk.bf16.gmra.mrb[28].mxu1 %vm1500_vm1, %v4503_v35 }
 0x38b   : > { %9841 = vmatprep.mubr.msk.bf16.mxu1 %vm1500_vm1, %v11589_v62  ;;  %v4761_v62 = vld [vmem:[#allocation3 + $0xf1] sm:$0xff] }
 0x38c   : > { %v4776_v2 = vpack.c.bf16 %v4762_v1, %v4761_v62  ;;  %v5500_v1 = vunpack.c.0.s8 %v5499_v28 }
 0x392   : > { %9842 = vmatmul.mubr.msk.bf16.vlgmr.msra.gmra.mrb[4].mxu1 %vm1500_vm1, %v11594_v4  ;;  %v11810_v4 = vld [vmem:[%s12809_s4] ss:$0 sm:$0xff] }
 0x393   : > { %9870 = vmatpush3.bf16.msra.mxu1 %v10276_v59  ;;  %9845 = vmatprep.mubr.msk.bf16.mxu1 %vm1500_vm1, %v11603_v11 }
 0x394   : > { %9871 = vmatprep.subr.bf16.mxu1 %v10277_v41 }
 0x397   : > { %9872 = vmatpush3.bf16.msra.mxu1 %v10277_v41 }
 0x39a   : > { %9846 = vmatmul.mubr.msk.bf16.gmra.mrb[8].mxu1 %vm1500_vm1, %v11605_v14 }
 0x39b   : > { %9849 = vmatprep.mubr.msk.bf16.mxu1 %vm1500_vm1, %v11611_v22 }
 0x3a2   : > { %9850 = vmatmul.mubr.msk.bf16.gmra.mrb[12].mxu1 %vm1500_vm1, %v11613_v24 }
 0x3a3   : > { %9853 = vmatprep.mubr.msk.bf16.mxu1 %vm1500_vm1, %v11619_v37 }
 0x3aa   : > { %9854 = vmatmul.mubr.msk.bf16.gmra.mrb[16].mxu1 %vm1500_vm1, %v11621_v44 }
 0x3ab   : > { %9857 = vmatprep.mubr.msk.bf16.mxu1 %vm1500_vm1, %v11627_v50 }
 0x3b2   : > { %9858 = vmatmul.mubr.msk.bf16.gmra.mrb[20].mxu1 %vm1500_vm1, %v4772_v55 }
 0x3b3   : > { %9861 = vmatprep.mubr.msk.bf16.mxu1 %vm1500_vm1, %v4773_v61 }
 0x3ba   : > { %9862 = vmatmul.mubr.msk.bf16.gmra.mrb[24].mxu1 %vm1500_vm1, %v11413_v25  ;;  %v5034_v25 = vld [vmem:[#allocation3 + $0xf2] sm:$0xff] }
 0x3bb   : > { %9865 = vmatprep.mubr.msk.bf16.mxu1 %vm1500_vm1, %v11637_v53 }
 0x3c2   : > { %9866 = vmatmul.mubr.msk.bf16.gmra.mrb[28].mxu1 %vm1500_vm1, %v4776_v2  ;;  %v11839_v2 = vshrl.u32 %v5489_v21, 7 }
 0x3c3   : > { %9873 = vmatprep.mubr.msk.bf16.mxu1 %vm1500_vm1, %v11499_v0  ;;  %v5035_v0 = vld [vmem:[#allocation3 + $0xfa] sm:$0xff] }
 0x3ca   : > { %9874 = vmatmul.mubr.msk.bf16.vlgmr.msra.gmra.mrb[4].mxu1 %vm1500_vm1, %v11508_v6  ;;  %v5049_v6 = vpack.c.bf16 %v5035_v0, %v5034_v25 }
 0x3cb   : > { %9877 = vmatprep.mubr.msk.bf16.mxu1 %vm1500_vm1, %v11510_v8  ;;  %v10282_v8 = vld [vmem:[%s12810_s5 + $0x50] sm:$0xff]  }
 0x3cc   : > { %9225 = vmatprep.subr.bf16.mxu0 %v10282_v8 }
 0x3d2   : > { %9878 = vmatmul.mubr.msk.bf16.gmra.mrb[8].mxu1 %vm1500_vm1, %v11516_v12  ;;  %v10283_v12 = vld [vmem:[%s12810_s5 + $0x10] sm:$0xff]  }
 0x3d3   : > { %9881 = vmatprep.mubr.msk.bf16.mxu1 %vm1500_vm1, %v11518_v13  ;;  %9226 = vmatpush3.bf16.msra.mxu0 %v10283_v12  ;;  %v10284_v13 = vld [vmem:[%s12810_s5 + $0x58] sm:$0xff]  }
 0x3d4   : > { %9227 = vmatprep.subr.bf16.mxu0 %v10284_v13 }
 0x3da   : > { %9882 = vmatmul.mubr.msk.bf16.gmra.mrb[12].mxu1 %vm1500_vm1, %v11524_v17  ;;  %v10285_v17 = vld [vmem:[%s12810_s5 + $0x18] sm:$0xff]  }
 0x3db   : > { %9885 = vmatprep.mubr.msk.bf16.mxu1 %vm1500_vm1, %v11526_v20  ;;  %9228 = vmatpush3.bf16.msra.mxu0 %v10285_v17  ;;  %v10286_v20 = vld [vmem:[%s12810_s5 + $0x60] sm:$0xff]  }
 0x3dc   : > { %9229 = vmatprep.subr.bf16.mxu0 %v10286_v20 }
 0x3e2   : > { %9886 = vmatmul.mubr.msk.bf16.gmra.mrb[16].mxu1 %vm1500_vm1, %v11532_v27  ;;  %v10287_v27 = vld [vmem:[%s12810_s5 + $0x20] sm:$0xff]  }
 0x3e3   : > { %9889 = vmatprep.mubr.msk.bf16.mxu1 %vm1500_vm1, %v11534_v31  ;;  %9230 = vmatpush3.bf16.msra.mxu0 %v10287_v27  ;;  %v10288_v31 = vld [vmem:[%s12810_s5 + $0x68] sm:$0xff]  }
 0x3e4   : > { %9231 = vmatprep.subr.bf16.mxu0 %v10288_v31 }
 0x3ea   : > { %9890 = vmatmul.mubr.msk.bf16.gmra.mrb[20].mxu1 %vm1500_vm1, %v11540_v38  ;;  %v10289_v38 = vld [vmem:[%s12810_s5 + $0x28] sm:$0xff]  }
 0x3eb   : > { %9893 = vmatprep.mubr.msk.bf16.mxu1 %vm1500_vm1, %v11542_v42  ;;  %v10290_v42 = vld [vmem:[%s12810_s5 + $0x70] sm:$0xff]   ;;  %9232 = vmatpush3.bf16.msra.mxu0 %v10289_v38 }
 0x3ec   : > { %9233 = vmatprep.subr.bf16.mxu0 %v10290_v42 }
 0x3f2   : > { %9894 = vmatmul.mubr.msk.bf16.gmra.mrb[24].mxu1 %vm1500_vm1, %v11548_v46  ;;  %v10291_v46 = vld [vmem:[%s12810_s5 + $0x30] sm:$0xff]  }
 0x3f3   : > { %9897 = vmatprep.mubr.msk.bf16.mxu1 %vm1500_vm1, %v11673_v57  ;;  %9234 = vmatpush3.bf16.msra.mxu0 %v10291_v46 }
 0x3f4   : > { %9235 = vmatprep.subr.bf16.mxu0 %v10292_v54 }
 0x3fa   : > { %9898 = vmatmul.mubr.msk.bf16.gmra.mrb[28].mxu1 %vm1500_vm1, %v5049_v6 }
 0x49d   : > { %v9875_v5 = vpop.f32.mrb[4].mxu1 }
 0x49e   : > { %v5290_v7 = vadd.f32 %v9875_v5, %v11810_v4  ;;  %v5142_v9 = vpop.f32.mrb[5].mxu1 }
 0x49f   : > { %v5288_v10 = vadd.f32 %v11810_v4, %v5142_v9  ;;  %v9876_v11 = vpop.f32.mrb[6].mxu1 }
 0x4a0   : > { %v5318_v49 = vmax.f32 %v5290_v7, 0.0  ;;  %v5291_v14 = vadd.f32 %v9876_v11, %v11810_v4  ;;  %v5145_v15 = vpop.f32.mrb[7].mxu1 }
 0x4a1   : > { %v5316_v16 = vmax.f32 %v5288_v10, 0.0  ;;  %v5289_v18 = vadd.f32 %v11810_v4, %v5145_v15  ;;  %v11847_v10 = vsub.s32 %v5500_v1, %v11839_v2 }
 0x4a2   : > { %5347 = vst.msk [vmem:[#allocation4 + $0x10] sm:$0xff] %vm5344_vm4, %v5318_v49  ;;  %v5319_v22 = vmax.f32 %v5291_v14, 0.0  ;;  %v10293_v49 = vld [vmem:[%s12810_s5 + $0x38] sm:$0xff]  }
 0x4a3   : > { %5345 = vst.msk [vmem:[#allocation4] sm:$0xff] %vm5344_vm4, %v5316_v16  ;;  %v5317_v23 = vmax.f32 %v5289_v18, 0.0  ;;  %9236 = vmatpush3.bf16.msra.mxu0 %v10293_v49 }
 0x4a4   : > { %5348 = vst.msk [vmem:[#allocation4 + $0x18] sm:$0xff] %vm5344_vm4, %v5319_v22 }
 0x4a5   : > { %5346 = vst.msk [vmem:[#allocation4 + $0x8] sm:$0xff] %vm5344_vm4, %v5317_v23  ;;  %v9879_v24 = vpop.f32.mrb[8].mxu1 }
 0x4a6   : > { %v5294_v29 = vadd.f32 %v9879_v24, %v11810_v4  ;;  %v5158_v32 = vpop.f32.mrb[9].mxu1 }
 0x4a7   : > { %v5292_v34 = vadd.f32 %v11810_v4, %v5158_v32  ;;  %v9880_v37 = vpop.f32.mrb[10].mxu1 }
 0x4a8   : > { %v5322_v40 = vmax.f32 %v5294_v29, 0.0  ;;  %v5295_v44 = vadd.f32 %v9880_v37, %v11810_v4  ;;  %v5161_v45 = vpop.f32.mrb[11].mxu1 }
 0x4a9   : > { %v5320_v47 = vmax.f32 %v5292_v34, 0.0  ;;  %v5293_v50 = vadd.f32 %v11810_v4, %v5161_v45  ;;  %v5375_v51 = vld [vmem:[#allocation4 + $0x10] sm:$0xff] }
 0x4aa   : > { %5351 = vst.msk [vmem:[#allocation4 + $0x30] sm:$0xff] %vm5344_vm4, %v5322_v40  ;;  %v5323_v52 = vmax.f32 %v5295_v44, 0.0  ;;  %v5373_v30 = vld [vmem:[#allocation4] sm:$0xff] }
 0x4ab   : > { %v5403_v53 = vld [vmem:[#allocation4 + $0x11] sm:$0xff]  ;;  %5349 = vst.msk [vmem:[#allocation4 + $0x20] sm:$0xff] %vm5344_vm4, %v5320_v47  ;;  %v5321_v19 = vmax.f32 %v5293_v50, 0.0 }
 0x4ac   : > { %v5431_v60 = vmax.f32 %v5375_v51, %v5403_v53  ;;  %v5374_v56 = vld [vmem:[#allocation4 + $0x8] sm:$0xff]  ;;  %5352 = vst.msk [vmem:[#allocation4 + $0x38] sm:$0xff] %vm5344_vm4, %v5323_v52  ;;  %v5376_v25 = vld [vmem:[#allocation4 + $0x18] sm:$0xff]  ;;  %v10325_v51 = vld [vmem:[%s12810_s5 + $0x4f8] sm:$0xff]  }
 0x4ad   : > { %v5401_v57 = vld [vmem:[#allocation4 + $0x1] sm:$0xff]  ;;  %v5402_v58 = vld [vmem:[#allocation4 + $0x9] sm:$0xff]  ;;  %5350 = vst.msk [vmem:[#allocation4 + $0x28] sm:$0xff] %vm5344_vm4, %v5321_v19  ;;  %v9883_v63 = vpop.f32.mrb[12].mxu1 }
 0x4ae   : > { %v5429_v59 = vmax.f32 %v5373_v30, %v5401_v57  ;;  %v5430_v3 = vmax.f32 %v5374_v56, %v5402_v58  ;;  %5459 = vst.msk [vmem:[#allocation4 + $0x10] sm:$0xff] %vm5344_vm4, %v5431_v60  ;;  %v5298_v33 = vadd.f32 %v9883_v63, %v11810_v4  ;;  %v5174_v35 = vpop.f32.mrb[13].mxu1 }
 0x4af   : > { %v5296_v41 = vadd.f32 %v11810_v4, %v5174_v35  ;;  %v9884_v43 = vpop.f32.mrb[14].mxu1 }
 0x4b0   : > { %5457 = vst.msk [vmem:[#allocation4] sm:$0xff] %vm5344_vm4, %v5429_v59  ;;  %5458 = vst.msk [vmem:[#allocation4 + $0x8] sm:$0xff] %vm5344_vm4, %v5430_v3  ;;  %v5326_v39 = vmax.f32 %v5298_v33, 0.0  ;;  %v5299_v48 = vadd.f32 %v9884_v43, %v11810_v4  ;;  %v5177_v55 = vpop.f32.mrb[15].mxu1 }
 0x4b1   : > { %v5324_v61 = vmax.f32 %v5296_v41, 0.0  ;;  %v5297_v62 = vadd.f32 %v11810_v4, %v5177_v55  ;;  %v5379_v8 = vld [vmem:[#allocation4 + $0x30] sm:$0xff] }
 0x4b2   : > { %v5404_v0 = vld [vmem:[#allocation4 + $0x19] sm:$0xff]  ;;  %5355 = vst.msk [vmem:[#allocation4 + $0x50] sm:$0xff] %vm5344_vm4, %v5326_v39  ;;  %v5327_v6 = vmax.f32 %v5299_v48, 0.0 }
 0x4b3   : > { %v5432_v12 = vmax.f32 %v5376_v25, %v5404_v0  ;;  %v5407_v13 = vld [vmem:[#allocation4 + $0x31] sm:$0xff]  ;;  %v5377_v17 = vld [vmem:[#allocation4 + $0x20] sm:$0xff]  ;;  %5353 = vst.msk [vmem:[#allocation4 + $0x40] sm:$0xff] %vm5344_vm4, %v5324_v61  ;;  %v5325_v20 = vmax.f32 %v5297_v62, 0.0 }
 0x4b4   : > { %v5435_v27 = vmax.f32 %v5379_v8, %v5407_v13  ;;  %v5378_v31 = vld [vmem:[#allocation4 + $0x28] sm:$0xff]  ;;  %5356 = vst.msk [vmem:[#allocation4 + $0x58] sm:$0xff] %vm5344_vm4, %v5327_v6  ;;  %v5380_v30 = vld [vmem:[#allocation4 + $0x38] sm:$0xff] }
 0x4b5   : > { %v5405_v38 = vld [vmem:[#allocation4 + $0x21] sm:$0xff]  ;;  %v5406_v42 = vld [vmem:[#allocation4 + $0x29] sm:$0xff]  ;;  %5460 = vst.msk [vmem:[#allocation4 + $0x18] sm:$0xff] %vm5344_vm4, %v5432_v12  ;;  %5354 = vst.msk [vmem:[#allocation4 + $0x48] sm:$0xff] %vm5344_vm4, %v5325_v20  ;;  %v9887_v7 = vpop.f32.mrb[16].mxu1 }
 0x4b6   : > { %v5433_v46 = vmax.f32 %v5377_v17, %v5405_v38  ;;  %v5434_v5 = vmax.f32 %v5378_v31, %v5406_v42  ;;  %v5495_v9 = vld [vmem:[#allocation4 + $0x12] sm:$0x1]  ;;  %v5524_v11 = vld [vmem:[#allocation4 + $0x16] sm:$0x1]  ;;  %5463 = vst.msk [vmem:[#allocation4 + $0x30] sm:$0xff] %vm5344_vm4, %v5435_v27  ;;  %v5302_v14 = vadd.f32 %v9887_v7, %v11810_v4  ;;  %v5190_v15 = vpop.f32.mrb[17].mxu1 }
 0x4b7   : > { %v5494_v16 = vld [vmem:[#allocation4 + $0x2] sm:$0x1]  ;;  %v5523_v18 = vld [vmem:[#allocation4 + $0x6] sm:$0x1]  ;;  %v5300_v22 = vadd.f32 %v11810_v4, %v5190_v15  ;;  %v9888_v23 = vpop.f32.mrb[18].mxu1 }
 0x4b8   : > { %5461 = vst.msk [vmem:[#allocation4 + $0x20] sm:$0xff] %vm5344_vm4, %v5433_v46  ;;  %5462 = vst.msk [vmem:[#allocation4 + $0x28] sm:$0xff] %vm5344_vm4, %v5434_v5  ;;  %v5496_v24 = vmax.f32 %v5494_v16, %v5495_v9  ;;  %v5525_v29 = vmax.f32 %v5523_v18, %v5524_v11  ;;  %v5487_v32 = vld [vmem:[#allocation4 + $0x10] sm:$0x1]  ;;  %v5330_v34 = vmax.f32 %v5302_v14, 0.0  ;;  %v5303_v37 = vadd.f32 %v9888_v23, %v11810_v4  ;;  %v5193_v40 = vpop.f32.mrb[19].mxu1 }
 0x4b9   : > { %v5486_v44 = vld [vmem:[#allocation4] sm:$0x1]  ;;  %v5519_v45 = vld [vmem:[#allocation4 + $0x4] sm:$0x1]  ;;  %v5328_v47 = vmax.f32 %v5300_v22, 0.0  ;;  %v5301_v50 = vadd.f32 %v11810_v4, %v5193_v40  ;;  %v5383_v58 = vld [vmem:[#allocation4 + $0x50] sm:$0xff] }
 0x4ba   : > { %v5504_v52 = vrot.slane %v5496_v24, %v11847_v10  ;;  %v5520_v53 = vld [vmem:[#allocation4 + $0x14] sm:$0x1]  ;;  %v5408_v19 = vld [vmem:[#allocation4 + $0x39] sm:$0xff]  ;;  %5359 = vst.msk [vmem:[#allocation4 + $0x70] sm:$0xff] %vm5344_vm4, %v5330_v34  ;;  %v5331_v60 = vmax.f32 %v5303_v37, 0.0  ;;  %v5488_v56 = vmax.f32 %v5486_v44, %v5487_v32  ;;  %v5533_v33 = vrot.slane %v5525_v29, %v11847_v10 }
 0x4bb   : > { %v5521_v57 = vmax.f32 %v5519_v45, %v5520_v53  ;;  %v5436_v59 = vmax.f32 %v5380_v30, %v5408_v19  ;;  %v5411_v3 = vld [vmem:[#allocation4 + $0x51] sm:$0xff]  ;;  %v5381_v63 = vld [vmem:[#allocation4 + $0x40] sm:$0xff]  ;;  %5357 = vst.msk [vmem:[#allocation4 + $0x60] sm:$0xff] %vm5344_vm4, %v5328_v47  ;;  %v5329_v26 = vmax.f32 %v5301_v50, 0.0  ;;  %v5549_v35 = vld [vmem:[#allocation4 + $0xa] sm:$0x1] }
 0x4bc   : > { %v5511_v28 = vrot.slane %v5504_v52, %v11847_v10  ;;  %v5439_v41 = vmax.f32 %v5383_v58, %v5411_v3  ;;  %v5382_v43 = vld [vmem:[#allocation4 + $0x48] sm:$0xff]  ;;  %5360 = vst.msk [vmem:[#allocation4 + $0x78] sm:$0xff] %vm5344_vm4, %v5331_v60  ;;  %v5550_v62 = vld [vmem:[#allocation4 + $0x1a] sm:$0x1]  ;;  %v5540_v20 = vrot.slane %v5533_v33, %v11847_v10  ;;  %v5546_v11 = vld [vmem:[#allocation4 + $0x18] sm:$0x1] }
 0x4bd   : > { %v5409_v39 = vld [vmem:[#allocation4 + $0x41] sm:$0xff]  ;;  %v5410_v48 = vld [vmem:[#allocation4 + $0x49] sm:$0xff]  ;;  %5493 = vst.msk [vmem:[#allocation5] sm:$0x1] %vm11861_vm5, %v5488_v56  ;;  %5522 = vst.msk [vmem:[#allocation5 + $0x1] sm:$0x1] %vm11861_vm5, %v5521_v57  ;;  %v5551_v6 = vmax.f32 %v5549_v35, %v5550_v62 }
 0x4be   : > { %5464 = vst.msk [vmem:[#allocation4 + $0x38] sm:$0xff] %vm5344_vm4, %v5436_v59  ;;  %v5437_v55 = vmax.f32 %v5381_v63, %v5409_v39  ;;  %v5438_v54 = vmax.f32 %v5382_v43, %v5410_v48  ;;  %5358 = vst.msk [vmem:[#allocation4 + $0x68] sm:$0xff] %vm5344_vm4, %v5329_v26  ;;  %5512 = vrot.lane.b32.xlu0 %v5511_v28, %s10551_s22  ;;  %v9891_v61 = vpop.f32.mrb[20].mxu1  ;;  %v5602_v1 = vld [vmem:[#allocation4 + $0x34] sm:$0x1]  ;;  %v5384_v24 = vld [vmem:[#allocation4 + $0x58] sm:$0xff] }
 0x4bf   : > { %5467 = vst.msk [vmem:[#allocation4 + $0x50] sm:$0xff] %vm5344_vm4, %v5439_v41  ;;  %v5306_v25 = vadd.f32 %v9891_v61, %v11810_v4  ;;  %v5206_v0 = vpop.f32.mrb[21].mxu1  ;;  %v5601_v8 = vld [vmem:[#allocation4 + $0x24] sm:$0x1]  ;;  %v5575_v12 = vld [vmem:[#allocation4 + $0x20] sm:$0x1]  ;;  %v5559_v7 = vrot.slane %v5551_v6, %v11847_v10 }
 0x4c0   : > { %5465 = vst.msk [vmem:[#allocation4 + $0x40] sm:$0xff] %vm5344_vm4, %v5437_v55  ;;  %5466 = vst.msk [vmem:[#allocation4 + $0x48] sm:$0xff] %vm5344_vm4, %v5438_v54  ;;  %v5304_v13 = vadd.f32 %v11810_v4, %v5206_v0  ;;  %v9892_v17 = vpop.f32.mrb[22].mxu1  ;;  %v5603_v27 = vmax.f32 %v5601_v8, %v5602_v1  ;;  %v5576_v31 = vld [vmem:[#allocation4 + $0x30] sm:$0x1] }
 0x4c1   : > { %v5545_v38 = vld [vmem:[#allocation4 + $0x8] sm:$0x1]  ;;  %v5334_v42 = vmax.f32 %v5306_v25, 0.0  ;;  %v5307_v46 = vadd.f32 %v9892_v17, %v11810_v4  ;;  %v5209_v5 = vpop.f32.mrb[23].mxu1  ;;  %v5577_v9 = vmax.f32 %v5575_v12, %v5576_v31  ;;  %v5571_v49 = vld [vmem:[#allocation4 + $0xc] sm:$0x1]  ;;  %v5566_v34 = vrot.slane %v5559_v7, %v11847_v10 }
 0x4c2   : > { %v5332_v14 = vmax.f32 %v5304_v13, 0.0  ;;  %v5305_v15 = vadd.f32 %v11810_v4, %v5209_v5  ;;  %5541 = vrot.lane.b32.xlu0 %v5540_v20, %s10551_s22  ;;  %v5611_v16 = vrot.slane %v5603_v27, %v11847_v10  ;;  %v5547_v18 = vmax.f32 %v5545_v38, %v5546_v11  ;;  %v5598_v22 = vld [vmem:[#allocation4 + $0x32] sm:$0x1]  ;;  %v5597_v23 = vld [vmem:[#allocation4 + $0x22] sm:$0x1]  ;;  %v5412_v29 = vld [vmem:[#allocation4 + $0x59] sm:$0xff] }
 0x4c3   : > { %5363 = vst.msk [vmem:[#allocation4 + $0x90] sm:$0xff] %vm5344_vm4, %v5334_v42  ;;  %v5335_v32 = vmax.f32 %v5307_v46, 0.0  ;;  %v5585_v37 = vrot.slane %v5577_v9, %v11847_v10  ;;  %v5599_v40 = vmax.f32 %v5597_v23, %v5598_v22  ;;  %v5572_v44 = vld [vmem:[#allocation4 + $0x1c] sm:$0x1]  ;;  %v5387_v45 = vld [vmem:[#allocation4 + $0x70] sm:$0xff]  ;;  %v5440_v47 = vmax.f32 %v5384_v24, %v5412_v29  ;;  %v5385_v52 = vld [vmem:[#allocation4 + $0x60] sm:$0xff]  ;;  %5567 = vrot.lane.b32.xlu1 %v5566_v34, %s10551_s22 }
 0x4c4   : > { %v5415_v50 = vld [vmem:[#allocation4 + $0x71] sm:$0xff]  ;;  %5361 = vst.msk [vmem:[#allocation4 + $0x80] sm:$0xff] %vm5344_vm4, %v5332_v14  ;;  %v5333_v53 = vmax.f32 %v5305_v15, 0.0  ;;  %v5618_v30 = vrot.slane %v5611_v16, %v11847_v10  ;;  %v5653_v19 = vld [vmem:[#allocation4 + $0x2c] sm:$0x1]  ;;  %v5573_v56 = vmax.f32 %v5571_v49, %v5572_v44 }
 0x4c5   : > { %v5627_v60 = vld [vmem:[#allocation4 + $0x28] sm:$0x1]  ;;  %5548 = vst.msk [vmem:[#allocation5 + $0x2] sm:$0x1] %vm11861_vm5, %v5547_v18  ;;  %v5443_v57 = vmax.f32 %v5387_v45, %v5415_v50  ;;  %v5414_v3 = vld [vmem:[#allocation4 + $0x69] sm:$0xff]  ;;  %v9895_v28 = vpop.f32.mrb[24].mxu1  ;;  %v5592_v39 = vrot.slane %v5585_v37, %v11847_v10 }
 0x4c6   : > { %v5386_v58 = vld [vmem:[#allocation4 + $0x68] sm:$0xff]  ;;  %5364 = vst.msk [vmem:[#allocation4 + $0x98] sm:$0xff] %vm5344_vm4, %v5335_v32  ;;  %5468 = vst.msk [vmem:[#allocation4 + $0x58] sm:$0xff] %vm5344_vm4, %v5440_v47  ;;  %5619 = vrot.lane.b32.xlu0 %v5618_v30, %s10551_s22  ;;  %v5654_v33 = vld [vmem:[#allocation4 + $0x3c] sm:$0x1]  ;;  %v5310_v41 = vadd.f32 %v9895_v28, %v11810_v4  ;;  %v5222_v43 = vpop.f32.mrb[25].mxu1 }
 0x4c7   : > { %v5413_v59 = vld [vmem:[#allocation4 + $0x61] sm:$0xff]  ;;  %5600 = vst.msk [vmem:[#allocation5 + $0x4] sm:$0x1] %vm11861_vm5, %v5599_v40  ;;  %v5442_v26 = vmax.f32 %v5386_v58, %v5414_v3  ;;  %v5628_v35 = vld [vmem:[#allocation4 + $0x38] sm:$0x1]  ;;  %v5655_v48 = vmax.f32 %v5653_v19, %v5654_v33  ;;  %v5308_v62 = vadd.f32 %v11810_v4, %v5222_v43  ;;  %v9896_v1 = vpop.f32.mrb[26].mxu1  ;;  %5593 = vrot.lane.b32.xlu1 %v5592_v39, %s10551_s22 }
 0x4c8   : > { %v5441_v63 = vmax.f32 %v5385_v52, %v5413_v59  ;;  %5362 = vst.msk [vmem:[#allocation4 + $0x88] sm:$0xff] %vm5344_vm4, %v5333_v53  ;;  %5471 = vst.msk [vmem:[#allocation4 + $0x70] sm:$0xff] %vm5344_vm4, %v5443_v57  ;;  %v5629_v55 = vmax.f32 %v5627_v60, %v5628_v35  ;;  %v5705_v54 = vld [vmem:[#allocation4 + $0x46] sm:$0x1]  ;;  %v5706_v61 = vld [vmem:[#allocation4 + $0x56] sm:$0x1]  ;;  %v5311_v12 = vadd.f32 %v9896_v1, %v11810_v4 }
 0x4c9   : > { %5574 = vst.msk [vmem:[#allocation5 + $0x3] sm:$0x1] %vm11861_vm5, %v5573_v56  ;;  %v5707_v25 = vmax.f32 %v5705_v54, %v5706_v61  ;;  %v5679_v0 = vld [vmem:[#allocation4 + $0x42] sm:$0x1]  ;;  %v5680_v6 = vld [vmem:[#allocation4 + $0x52] sm:$0x1]  ;;  %v5663_v17 = vrot.slane %v5655_v48, %v11847_v10 }
 0x4ca   : > { %5469 = vst.msk [vmem:[#allocation4 + $0x60] sm:$0xff] %vm5344_vm4, %v5441_v63  ;;  %5470 = vst.msk [vmem:[#allocation4 + $0x68] sm:$0xff] %vm5344_vm4, %v5442_v26  ;;  %v5338_v8 = vmax.f32 %v5310_v41, 0.0  ;;  %v5225_v13 = vpop.f32.mrb[27].mxu1  ;;  %v5637_v20 = vrot.slane %v5629_v55, %v11847_v10  ;;  %v5649_v27 = vld [vmem:[#allocation4 + $0x2a] sm:$0x1]  ;;  %v5681_v7 = vmax.f32 %v5679_v0, %v5680_v6 }
 0x4cb   : > { %v5650_v31 = vld [vmem:[#allocation4 + $0x3a] sm:$0x1]  ;;  %v5336_v42 = vmax.f32 %v5308_v62, 0.0  ;;  %v5309_v46 = vadd.f32 %v11810_v4, %v5225_v13  ;;  %v5715_v5 = vrot.slane %v5707_v25, %v11847_v10  ;;  %v5623_v9 = vld [vmem:[#allocation4 + $0x26] sm:$0x1]  ;;  %v5391_v49 = vld [vmem:[#allocation4 + $0x90] sm:$0xff]  ;;  %v5670_v16 = vrot.slane %v5663_v17, %v11847_v10 }
 0x4cc   : > { %v5388_v38 = vld [vmem:[#allocation4 + $0x78] sm:$0xff]  ;;  %v5624_v11 = vld [vmem:[#allocation4 + $0x36] sm:$0x1]  ;;  %5367 = vst.msk [vmem:[#allocation4 + $0xb0] sm:$0xff] %vm5344_vm4, %v5338_v8  ;;  %v5339_v15 = vmax.f32 %v5311_v12, 0.0  ;;  %v5644_v18 = vrot.slane %v5637_v20, %v11847_v10  ;;  %v5651_v22 = vmax.f32 %v5649_v27, %v5650_v31  ;;  %v5389_v32 = vld [vmem:[#allocation4 + $0x80] sm:$0xff]  ;;  %v5689_v37 = vrot.slane %v5681_v7, %v11847_v10 }
 0x4cd   : > { %v5416_v14 = vld [vmem:[#allocation4 + $0x79] sm:$0xff]  ;;  %v5702_v23 = vld [vmem:[#allocation4 + $0x54] sm:$0x1]  ;;  %5365 = vst.msk [vmem:[#allocation4 + $0xa0] sm:$0xff] %vm5344_vm4, %v5336_v42  ;;  %v5337_v34 = vmax.f32 %v5309_v46, 0.0  ;;  %5671 = vrot.lane.b32.xlu0 %v5670_v16, %s10551_s22  ;;  %v5625_v53 = vmax.f32 %v5623_v9, %v5624_v11  ;;  %v9899_v56 = vpop.f32.mrb[28].mxu1  ;;  %v5722_v63 = vrot.slane %v5715_v5, %v11847_v10 }
 0x4ce   : > { %v5444_v24 = vmax.f32 %v5388_v38, %v5416_v14  ;;  %v5419_v29 = vld [vmem:[#allocation4 + $0x91] sm:$0xff]  ;;  %v5731_v40 = vld [vmem:[#allocation4 + $0x4a] sm:$0x1]  ;;  %v5701_v44 = vld [vmem:[#allocation4 + $0x44] sm:$0x1]  ;;  %5368 = vst.msk [vmem:[#allocation4 + $0xb8] sm:$0xff] %vm5344_vm4, %v5339_v15  ;;  %5645 = vrot.lane.b32.xlu1 %v5644_v18, %s10551_s22  ;;  %v5314_v59 = vadd.f32 %v9899_v56, %v11810_v4  ;;  %v5696_v26 = vrot.slane %v5689_v37, %v11847_v10 }
 0x4cf   : > { %v5447_v45 = vmax.f32 %v5391_v49, %v5419_v29  ;;  %v5390_v47 = vld [vmem:[#allocation4 + $0x88] sm:$0xff]  ;;  %5652 = vst.msk [vmem:[#allocation5 + $0x6] sm:$0x1] %vm11861_vm5, %v5651_v22  ;;  %v5703_v30 = vmax.f32 %v5701_v44, %v5702_v23  ;;  %v5732_v57 = vld [vmem:[#allocation4 + $0x5a] sm:$0x1]  ;;  %v5238_v3 = vpop.f32.mrb[29].mxu1 }
 0x4d0   : > { %v5417_v50 = vld [vmem:[#allocation4 + $0x81] sm:$0xff]  ;;  %v5418_v52 = vld [vmem:[#allocation4 + $0x89] sm:$0xff]  ;;  %5472 = vst.msk [vmem:[#allocation4 + $0x78] sm:$0xff] %vm5344_vm4, %v5444_v24  ;;  %5366 = vst.msk [vmem:[#allocation4 + $0xa8] sm:$0xff] %vm5344_vm4, %v5337_v34  ;;  %v5733_v28 = vmax.f32 %v5731_v40, %v5732_v57  ;;  %v5312_v41 = vadd.f32 %v11810_v4, %v5238_v3  ;;  %v9900_v43 = vpop.f32.mrb[30].mxu1  ;;  %v5342_v55 = vmax.f32 %v5314_v59, 0.0 }
 0x4d1   : > { %v5445_v19 = vmax.f32 %v5389_v32, %v5417_v50  ;;  %v5446_v60 = vmax.f32 %v5390_v47, %v5418_v52  ;;  %v5758_v58 = vld [vmem:[#allocation4 + $0x70] sm:$0x1]  ;;  %5475 = vst.msk [vmem:[#allocation4 + $0x90] sm:$0xff] %vm5344_vm4, %v5447_v45  ;;  %v5757_v33 = vld [vmem:[#allocation4 + $0x60] sm:$0x1]  ;;  %5723 = vrot.lane.b32.xlu0 %v5722_v63, %s10551_s22  ;;  %v5315_v54 = vadd.f32 %v9900_v43, %v11810_v4  ;;  %v5241_v61 = vpop.f32.mrb[31].mxu1 }
 0x4d2   : > { %v5783_v35 = vld [vmem:[#allocation4 + $0x64] sm:$0x1]  ;;  %5626 = vst.msk [vmem:[#allocation5 + $0x5] sm:$0x1] %vm11861_vm5, %v5625_v53  ;;  %5704 = vst.msk [vmem:[#allocation5 + $0x8] sm:$0x1] %vm11861_vm5, %v5703_v30  ;;  %v5759_v39 = vmax.f32 %v5757_v33, %v5758_v58  ;;  %5697 = vrot.lane.b32.xlu1 %v5696_v26, %s10551_s22  ;;  %v5741_v62 = vrot.slane %v5733_v28, %v11847_v10  ;;  %v5313_v8 = vadd.f32 %v11810_v4, %v5241_v61 }
 0x4d3   : > { %5473 = vst.msk [vmem:[#allocation4 + $0x80] sm:$0xff] %vm5344_vm4, %v5445_v19  ;;  %5474 = vst.msk [vmem:[#allocation4 + $0x88] sm:$0xff] %vm5344_vm4, %v5446_v60  ;;  %v5784_v48 = vld [vmem:[#allocation4 + $0x74] sm:$0x1]  ;;  %v5676_v25 = vld [vmem:[#allocation4 + $0x50] sm:$0x1] }
 0x4d4   : > { %v5785_v1 = vmax.f32 %v5783_v35, %v5784_v48  ;;  %v5392_v0 = vld [vmem:[#allocation4 + $0x98] sm:$0xff]  ;;  %v5340_v6 = vmax.f32 %v5312_v41, 0.0  ;;  %v5767_v12 = vrot.slane %v5759_v39, %v11847_v10  ;;  %v5675_v13 = vld [vmem:[#allocation4 + $0x40] sm:$0x1]  ;;  %5371 = vst.msk [vmem:[#allocation4 + $0xd0] sm:$0xff] %vm5344_vm4, %v5342_v55  ;;  %v5343_v20 = vmax.f32 %v5315_v54, 0.0 }
 0x4d5   : > { %v5420_v17 = vld [vmem:[#allocation4 + $0x99] sm:$0xff]  ;;  %v5748_v27 = vrot.slane %v5741_v62, %v11847_v10  ;;  %v5677_v38 = vmax.f32 %v5675_v13, %v5676_v25  ;;  %v5727_v42 = vld [vmem:[#allocation4 + $0x48] sm:$0x1]  ;;  %v5728_v46 = vld [vmem:[#allocation4 + $0x58] sm:$0x1]  ;;  %v5341_v4 = vmax.f32 %v5313_v8, 0.0 }
 0x4d6   : > { %v5793_v31 = vrot.slane %v5785_v1, %v11847_v10  ;;  %v5395_v5 = vld [vmem:[#allocation4 + $0xb0] sm:$0xff]  ;;  %v5448_v7 = vmax.f32 %v5392_v0, %v5420_v17  ;;  %v5393_v11 = vld [vmem:[#allocation4 + $0xa0] sm:$0xff]  ;;  %5369 = vst.msk [vmem:[#allocation4 + $0xc0] sm:$0xff] %vm5344_vm4, %v5340_v6  ;;  %v5774_v49 = vrot.slane %v5767_v12, %v11847_v10  ;;  %v5835_v14 = vld [vmem:[#allocation4 + $0x6c] sm:$0x1]  ;;  %v5729_v16 = vmax.f32 %v5727_v42, %v5728_v46 }
 0x4d7   : > { %v5423_v9 = vld [vmem:[#allocation4 + $0xb1] sm:$0xff]  ;;  %v5809_v15 = vld [vmem:[#allocation4 + $0x68] sm:$0x1]  ;;  %v5422_v24 = vld [vmem:[#allocation4 + $0xa9] sm:$0xff]  ;;  %5372 = vst.msk [vmem:[#allocation4 + $0xd8] sm:$0xff] %vm5344_vm4, %v5343_v20  ;;  %5749 = vrot.lane.b32.xlu1 %v5748_v27, %s10551_s22 }
 0x4d8   : > { %v5451_v18 = vmax.f32 %v5395_v5, %v5423_v9  ;;  %v5394_v22 = vld [vmem:[#allocation4 + $0xa8] sm:$0xff]  ;;  %5678 = vst.msk [vmem:[#allocation5 + $0x7] sm:$0x1] %vm11861_vm5, %v5677_v38  ;;  %5775 = vrot.lane.b32.xlu0 %v5774_v49, %s10551_s22  ;;  %v5836_v34 = vld [vmem:[#allocation4 + $0x7c] sm:$0x1]  ;;  %v5800_v44 = vrot.slane %v5793_v31, %v11847_v10 }
 0x4d9   : > { %v5421_v23 = vld [vmem:[#allocation4 + $0xa1] sm:$0xff]  ;;  %5476 = vst.msk [vmem:[#allocation4 + $0x98] sm:$0xff] %vm5344_vm4, %v5448_v7  ;;  %v5450_v32 = vmax.f32 %v5394_v22, %v5422_v24  ;;  %5370 = vst.msk [vmem:[#allocation4 + $0xc8] sm:$0xff] %vm5344_vm4, %v5341_v4  ;;  %v5810_v37 = vld [vmem:[#allocation4 + $0x78] sm:$0x1]  ;;  %v5837_v45 = vmax.f32 %v5835_v14, %v5836_v34 }
 0x4da   : > { %v5449_v29 = vmax.f32 %v5393_v11, %v5421_v23  ;;  %v5888_v40 = vld [vmem:[#allocation4 + $0x96] sm:$0x1]  ;;  %5730 = vst.msk [vmem:[#allocation5 + $0x9] sm:$0x1] %vm11861_vm5, %v5729_v16  ;;  %v5811_v47 = vmax.f32 %v5809_v15, %v5810_v37  ;;  %v5887_v50 = vld [vmem:[#allocation4 + $0x86] sm:$0x1] }
 0x4db   : > { %5479 = vst.msk [vmem:[#allocation4 + $0xb0] sm:$0xff] %vm5344_vm4, %v5451_v18  ;;  %v5861_v52 = vld [vmem:[#allocation4 + $0x82] sm:$0x1]  ;;  %v5862_v53 = vld [vmem:[#allocation4 + $0x92] sm:$0x1]  ;;  %5478 = vst.msk [vmem:[#allocation4 + $0xa8] sm:$0xff] %vm5344_vm4, %v5450_v32  ;;  %v5889_v30 = vmax.f32 %v5887_v50, %v5888_v40  ;;  %5801 = vrot.lane.b32.xlu1 %v5800_v44, %s10551_s22  ;;  %v5845_v59 = vrot.slane %v5837_v45, %v11847_v10 }
 0x4dc   : > { %5477 = vst.msk [vmem:[#allocation4 + $0xa0] sm:$0xff] %vm5344_vm4, %v5449_v29  ;;  %v5863_v19 = vmax.f32 %v5861_v52, %v5862_v53  ;;  %v5753_v60 = vld [vmem:[#allocation4 + $0x4c] sm:$0x1]  ;;  %v5754_v56 = vld [vmem:[#allocation4 + $0x5c] sm:$0x1]  ;;  %v5819_v3 = vrot.slane %v5811_v47, %v11847_v10  ;;  %v5399_v35 = vld [vmem:[#allocation4 + $0xd0] sm:$0xff] }
 0x4dd   : > { %v5780_v57 = vld [vmem:[#allocation4 + $0x72] sm:$0x1]  ;;  %v5396_v58 = vld [vmem:[#allocation4 + $0xb8] sm:$0xff]  ;;  %v5755_v63 = vmax.f32 %v5753_v60, %v5754_v56  ;;  %v5779_v26 = vld [vmem:[#allocation4 + $0x62] sm:$0x1]  ;;  %v5897_v41 = vrot.slane %v5889_v30, %v11847_v10  ;;  %v5852_v62 = vrot.slane %v5845_v59, %v11847_v10 }
 0x4de   : > { %v5831_v28 = vld [vmem:[#allocation4 + $0x6a] sm:$0x1]  ;;  %v5832_v33 = vld [vmem:[#allocation4 + $0x7a] sm:$0x1]  ;;  %v5781_v43 = vmax.f32 %v5779_v26, %v5780_v57  ;;  %v5805_v48 = vld [vmem:[#allocation4 + $0x66] sm:$0x1]  ;;  %v5826_v1 = vrot.slane %v5819_v3, %v11847_v10  ;;  %v5871_v25 = vrot.slane %v5863_v19, %v11847_v10 }
 0x4df   : > { %v5833_v39 = vmax.f32 %v5831_v28, %v5832_v33  ;;  %v5806_v55 = vld [vmem:[#allocation4 + $0x76] sm:$0x1]  ;;  %v5424_v54 = vld [vmem:[#allocation4 + $0xb9] sm:$0xff]  ;;  %5756 = vst.msk [vmem:[#allocation5 + $0xa] sm:$0x1] %vm11861_vm5, %v5755_v63  ;;  %5853 = vrot.lane.b32.xlu1 %v5852_v62, %s10551_s22  ;;  %v5904_v49 = vrot.slane %v5897_v41, %v11847_v10 }
 0x4e0   : > { %v5397_v61 = vld [vmem:[#allocation4 + $0xc0] sm:$0xff]  ;;  %v5807_v0 = vmax.f32 %v5805_v48, %v5806_v55  ;;  %v10294_v6 = vld [vmem:[%s12810_s5 + $0xc0] sm:$0xff]   ;;  %v5452_v8 = vmax.f32 %v5396_v58, %v5424_v54  ;;  %v5913_v20 = vld [vmem:[#allocation4 + $0x8a] sm:$0x1]  ;;  %5782 = vst.msk [vmem:[#allocation5 + $0xb] sm:$0x1] %vm11861_vm5, %v5781_v43  ;;  %5827 = vrot.lane.b32.xlu0 %v5826_v1, %s10551_s22  ;;  %v5878_v14 = vrot.slane %v5871_v25, %v11847_v10 }
 0x4e1   : > { %v5400_v12 = vld [vmem:[#allocation4 + $0xd8] sm:$0x1f]  ;;  %5834 = vst.msk [vmem:[#allocation5 + $0xd] sm:$0x1] %vm11861_vm5, %v5833_v39  ;;  %v5398_v38 = vld [vmem:[#allocation4 + $0xc8] sm:$0xff]  ;;  %9243 = vmatprep.subr.bf16.mxu0 %v10294_v6  ;;  %v10301_v59 = vld [vmem:[%s12810_s5 + $0x4c8] sm:$0xff]  }
 0x4e2   : > { %v5427_v13 = vld [vmem:[#allocation4 + $0xd1] sm:$0xff]  ;;  %v5428_v17 = vld [vmem:[#allocation4 + $0xd9] sm:$0x1f]  ;;  %v5425_v42 = vld [vmem:[#allocation4 + $0xc1] sm:$0xff]  ;;  %5808 = vst.msk [vmem:[#allocation5 + $0xc] sm:$0x1] %vm11861_vm5, %v5807_v0 }
 0x4e3   : > { %v5455_v27 = vmax.f32 %v5399_v35, %v5427_v13  ;;  %v5456_v31 = vmax.f32 %v5400_v12, %v5428_v17  ;;  %v5426_v46 = vld [vmem:[#allocation4 + $0xc9] sm:$0xff]  ;;  %5480 = vst.msk [vmem:[#allocation4 + $0xb8] sm:$0xff] %vm5344_vm4, %v5452_v8  ;;  %v5453_v5 = vmax.f32 %v5397_v61, %v5425_v42  ;;  %v5914_v9 = vld [vmem:[#allocation4 + $0x9a] sm:$0x1]  ;;  %v5966_v4 = vld [vmem:[#allocation4 + $0xb4] sm:$0x1]  ;;  %5905 = vrot.lane.b32.xlu1 %v5904_v49, %s10551_s22 }
 0x4e4   : > { %v5454_v7 = vmax.f32 %v5398_v38, %v5426_v46  ;;  %v5940_v11 = vld [vmem:[#allocation4 + $0xb0] sm:$0x1]  ;;  %v5915_v15 = vmax.f32 %v5913_v20, %v5914_v9  ;;  %v5939_v16 = vld [vmem:[#allocation4 + $0xa0] sm:$0x1]  ;;  %v5965_v18 = vld [vmem:[#allocation4 + $0xa4] sm:$0x1]  ;;  %5879 = vrot.lane.b32.xlu0 %v5878_v14, %s10551_s22 }
 0x4e5   : > { %5485 = vst.msk [vmem:[#allocation4 + $0xd8] sm:$0x1f] %vm5484_vm6, %v5456_v31  ;;  %v5941_v22 = vmax.f32 %v5939_v16, %v5940_v11  ;;  %v5967_v23 = vmax.f32 %v5965_v18, %v5966_v4  ;;  %v5884_v24 = vld [vmem:[#allocation4 + $0x94] sm:$0x1]  ;;  %v5883_v32 = vld [vmem:[#allocation4 + $0x84] sm:$0x1] }
 0x4e6   : > { %5483 = vst.msk [vmem:[#allocation4 + $0xd0] sm:$0xff] %vm5344_vm4, %v5455_v27  ;;  %5481 = vst.msk [vmem:[#allocation4 + $0xc0] sm:$0xff] %vm5344_vm4, %v5453_v5  ;;  %v5923_v29 = vrot.slane %v5915_v15, %v11847_v10  ;;  %v5858_v34 = vld [vmem:[#allocation4 + $0x90] sm:$0x1]  ;;  %v5857_v37 = vld [vmem:[#allocation4 + $0x80] sm:$0x1]  ;;  %v5885_v44 = vmax.f32 %v5883_v32, %v5884_v24 }
 0x4e7   : > { %5482 = vst.msk [vmem:[#allocation4 + $0xc8] sm:$0xff] %vm5344_vm4, %v5454_v7  ;;  %v5949_v40 = vrot.slane %v5941_v22, %v11847_v10  ;;  %v5859_v45 = vmax.f32 %v5857_v37, %v5858_v34  ;;  %v10297_v47 = vld [vmem:[%s12810_s5 + $0x4c0] sm:$0xff]   ;;  %v5975_v52 = vrot.slane %v5967_v23, %v11847_v10  ;;  %v5909_v30 = vld [vmem:[#allocation4 + $0x88] sm:$0x1]  ;;  %v6017_v56 = vld [vmem:[#allocation4 + $0xac] sm:$0x1] }
 0x4e8   : > { %v5930_v50 = vrot.slane %v5923_v29, %v11847_v10  ;;  %v10299_v53 = vld [vmem:[%s12810_s5 + $0x480] sm:$0xff]   ;;  %v5991_v57 = vld [vmem:[#allocation4 + $0xa8] sm:$0x1]  ;;  %5886 = vst.msk [vmem:[#allocation5 + $0xf] sm:$0x1] %vm11861_vm5, %v5885_v44  ;;  %9419 = vmatprep.subr.bf16.mxu1 %v10297_v47  ;;  %v10303_v26 = vld [vmem:[%s12810_s5 + $0x488] sm:$0xff]  }
 0x4e9   : > { %v5910_v19 = vld [vmem:[#allocation4 + $0x98] sm:$0x1]  ;;  %v5956_v60 = vrot.slane %v5949_v40, %v11847_v10  ;;  %5860 = vst.msk [vmem:[#allocation5 + $0xe] sm:$0x1] %vm11861_vm5, %v5859_v45  ;;  %9420 = vmatpush3.bf16.msra.mxu1 %v10299_v53  ;;  %v5982_v48 = vrot.slane %v5975_v52, %v11847_v10  ;;  %v5935_v8 = vld [vmem:[#allocation4 + $0x8c] sm:$0x1] }
 0x4ea   : > { %v5911_v58 = vmax.f32 %v5909_v30, %v5910_v19  ;;  %5931 = vrot.lane.b32.xlu0 %v5930_v50, %s10551_s22  ;;  %v6018_v3 = vld [vmem:[#allocation4 + $0xbc] sm:$0x1]  ;;  %v5992_v63 = vld [vmem:[#allocation4 + $0xb8] sm:$0x1]  ;;  %9421 = vmatprep.subr.bf16.mxu1 %v10301_v59  ;;  %v5962_v17 = vld [vmem:[#allocation4 + $0xb2] sm:$0x1] }
 0x4eb   : > { %5957 = vrot.lane.b32.xlu1 %v5956_v60, %s10551_s22  ;;  %v6019_v33 = vmax.f32 %v6017_v56, %v6018_v3  ;;  %v5993_v35 = vmax.f32 %v5991_v57, %v5992_v63  ;;  %v5936_v13 = vld [vmem:[#allocation4 + $0x9c] sm:$0x1]  ;;  %v5961_v20 = vld [vmem:[#allocation4 + $0xa2] sm:$0x1]  ;;  %v10305_v46 = vld [vmem:[%s12810_s5 + $0x4d0] sm:$0xff]  }
 0x4ec   : > { %v6118_v28 = vld [vmem:[#allocation4 + $0xdc] sm:$0x1]  ;;  %5912 = vst.msk [vmem:[#allocation5 + $0x10] sm:$0x1] %vm11861_vm5, %v5911_v58  ;;  %v6096_v6 = vld [vmem:[#allocation4 + $0xda] sm:$0x1]  ;;  %v5937_v42 = vmax.f32 %v5935_v8, %v5936_v13  ;;  %v5963_v9 = vmax.f32 %v5961_v20, %v5962_v17 }
 0x4ed   : > { %v6070_v41 = vld [vmem:[#allocation4 + $0xd6] sm:$0x1]  ;;  %v6044_v43 = vld [vmem:[#allocation4 + $0xd2] sm:$0x1]  ;;  %v6069_v55 = vld [vmem:[#allocation4 + $0xc6] sm:$0x1]  ;;  %v6027_v62 = vrot.slane %v6019_v33, %v11847_v10  ;;  %v6001_v1 = vrot.slane %v5993_v35, %v11847_v10  ;;  %9422 = vmatpush3.bf16.msra.mxu1 %v10303_v26 }
 0x4ee   : > { %v6117_v39 = vld [vmem:[#allocation4 + $0xcc] sm:$0x1]  ;;  %v6043_v54 = vld [vmem:[#allocation4 + $0xc2] sm:$0x1]  ;;  %v6071_v25 = vmax.f32 %v6069_v55, %v6070_v41  ;;  %v6095_v0 = vld [vmem:[#allocation4 + $0xca] sm:$0x1]  ;;  %5983 = vrot.lane.b32.xlu0 %v5982_v48, %s10551_s22  ;;  %9423 = vmatprep.subr.bf16.mxu1 %v10305_v46 }
 0x4ef   : > { %v6119_v61 = vmax.f32 %v6117_v39, %v6118_v28  ;;  %v6045_v12 = vmax.f32 %v6043_v54, %v6044_v43  ;;  %v6034_v27 = vrot.slane %v6027_v62, %v11847_v10  ;;  %v6008_v31 = vrot.slane %v6001_v1, %v11847_v10  ;;  %v10307_v11 = vld [vmem:[%s12810_s5 + $0x490] sm:$0xff]   ;;  %v6014_v49 = vld [vmem:[#allocation4 + $0xba] sm:$0x1]  ;;  %5938 = vst.msk [vmem:[#allocation5 + $0x11] sm:$0x1] %vm11861_vm5, %v5937_v42  ;;  %v10309_v22 = vld [vmem:[%s12810_s5 + $0x4d8] sm:$0xff]  }
 0x4f0   : > { %v6097_v38 = vmax.f32 %v6095_v0, %v6096_v6  ;;  %v6079_v5 = vrot.slane %v6071_v25, %v11847_v10  ;;  %v6013_v4 = vld [vmem:[#allocation4 + $0xaa] sm:$0x1]  ;;  %v5987_v15 = vld [vmem:[#allocation4 + $0xa6] sm:$0x1]  ;;  %v5988_v16 = vld [vmem:[#allocation4 + $0xb6] sm:$0x1] }
 0x4f1   : > { %6120 = vst.msk [vmem:[#allocation5 + $0x18] sm:$0x1] %vm11861_vm5, %v6119_v61  ;;  %v6053_v7 = vrot.slane %v6045_v12, %v11847_v10  ;;  %6009 = vrot.lane.b32.xlu1 %v6008_v31, %s10551_s22  ;;  %v6015_v14 = vmax.f32 %v6013_v4, %v6014_v49  ;;  %5964 = vst.msk [vmem:[#allocation5 + $0x12] sm:$0x1] %vm11861_vm5, %v5963_v9  ;;  %9424 = vmatpush3.bf16.msra.mxu1 %v10307_v11  ;;  %v10311_v23 = vld [vmem:[%s12810_s5 + $0x498] sm:$0xff]   ;;  %v10313_v47 = vld [vmem:[%s12810_s5 + $0x4e0] sm:$0xff]  }
 0x4f2   : > { %6035 = vrot.lane.b32.xlu0 %v6034_v27, %s10551_s22  ;;  %v5989_v18 = vmax.f32 %v5987_v15, %v5988_v16  ;;  %v6105_v29 = vrot.slane %v6097_v38, %v11847_v10  ;;  %v6066_v32 = vld [vmem:[#allocation4 + $0xd4] sm:$0x1]  ;;  %v6065_v34 = vld [vmem:[#allocation4 + $0xc4] sm:$0x1]  ;;  %v6040_v37 = vld [vmem:[#allocation4 + $0xd0] sm:$0x1]  ;;  %v6086_v40 = vrot.slane %v6079_v5, %v11847_v10  ;;  %9425 = vmatprep.subr.bf16.mxu1 %v10309_v22 }
 0x4f3   : > { %v6060_v24 = vrot.slane %v6053_v7, %v11847_v10  ;;  %6016 = vst.msk [vmem:[#allocation5 + $0x14] sm:$0x1] %vm11861_vm5, %v6015_v14  ;;  %v6067_v44 = vmax.f32 %v6065_v34, %v6066_v32  ;;  %v6039_v45 = vld [vmem:[#allocation4 + $0xc0] sm:$0x1]  ;;  %v6092_v52 = vld [vmem:[#allocation4 + $0xd8] sm:$0x1] }
 0x4f4   : > { %5990 = vst.msk [vmem:[#allocation5 + $0x13] sm:$0x1] %vm11861_vm5, %v5989_v18  ;;  %v6041_v50 = vmax.f32 %v6039_v45, %v6040_v37  ;;  %v10315_v53 = vld [vmem:[%s12810_s5 + $0x4a0] sm:$0xff]   ;;  %v6091_v30 = vld [vmem:[#allocation4 + $0xc8] sm:$0x1]  ;;  %v6112_v19 = vrot.slane %v6105_v29, %v11847_v10  ;;  %v10317_v56 = vld [vmem:[%s12810_s5 + $0x4e8] sm:$0xff]  }
 0x4f5   : > { %6061 = vrot.lane.b32.xlu1 %v6060_v24, %s10551_s22  ;;  %9426 = vmatpush3.bf16.msra.mxu1 %v10311_v23  ;;  %6068 = vst.msk [vmem:[#allocation5 + $0x16] sm:$0x1] %vm11861_vm5, %v6067_v44  ;;  %v6093_v60 = vmax.f32 %v6091_v30, %v6092_v52  ;;  %v10319_v57 = vld [vmem:[%s12810_s5 + $0x4a8] sm:$0xff]   ;;  %v10321_v10 = vld [vmem:[%s12810_s5 + $0x4f0] sm:$0xff]   ;;  %v10327_v59 = vld [vmem:[%s12810_s5 + $0x4b8] sm:$0xff]   ;;  %v12116_v61 = vsub.s32 1, %v11839_v2 }
 0x4f6   : > { %6087 = vrot.lane.b32.xlu0 %v6086_v40, %s10551_s22  ;;  %6042 = vst.msk [vmem:[#allocation5 + $0x15] sm:$0x1] %vm11861_vm5, %v6041_v50  ;;  %9427 = vmatprep.subr.bf16.mxu1 %v10313_v47  ;;  %v10323_v58 = vld [vmem:[%s12810_s5 + $0x4b0] sm:$0xff]   ;;  %v10329_v3 = vld [vmem:[%s12810_s5 + $0x5c0] sm:$0xff]   ;;  %v12119_v62 = vsub.s32 0, %v11839_v2  ;;  %v12122_v1 = vsub.s32 3, %v11839_v2 }
 0x4f7   : > { %6094 = vst.msk [vmem:[#allocation5 + $0x17] sm:$0x1] %vm11861_vm5, %v6093_v60  ;;  %v10295_v20 = vld [vmem:[%s12810_s5 + $0x80] sm:$0xff]   ;;  %v10296_v38 = vld [vmem:[%s12810_s5 + $0xc8] sm:$0xff]   ;;  %v10300_v9 = vld [vmem:[%s12810_s5 + $0xd0] sm:$0xff]   ;;  %v12203_v50 = vsub.s32 2, %v11839_v2 }
 0x4f8   : > { %v10298_v46 = vld [vmem:[%s12810_s5 + $0x88] sm:$0xff]   ;;  %v10302_v11 = vld [vmem:[%s12810_s5 + $0x90] sm:$0xff]   ;;  %v10304_v49 = vld [vmem:[%s12810_s5 + $0xd8] sm:$0xff]   ;;  %v12206_v52 = vsub.s32 5, %v11839_v2 }
 0x4f9   : > { %6113 = vrot.lane.b32.xlu1 %v6112_v19, %s10551_s22  ;;  %9428 = vmatpush3.bf16.msra.mxu1 %v10315_v53  ;;  %v10306_v15 = vld [vmem:[%s12810_s5 + $0x98] sm:$0xff]   ;;  %v10308_v18 = vld [vmem:[%s12810_s5 + $0xe0] sm:$0xff]   ;;  %v10312_v29 = vld [vmem:[%s12810_s5 + $0xe8] sm:$0xff]   ;;  %s323_s22 = sand.u32 1, %s10539_s10  }
 0x4fa   : > { %9429 = vmatprep.subr.bf16.mxu1 %v10317_v56  ;;  %v10310_v23 = vld [vmem:[%s12810_s5 + $0xa0] sm:$0xff]   ;;  %v10314_v34 = vld [vmem:[%s12810_s5 + $0xa8] sm:$0xff]   ;;  %v10316_v40 = vld [vmem:[%s12810_s5 + $0xf0] sm:$0xff]   ;;  %v12219_v56 = vsub.s32 7, %v11839_v2  ;;  %s324_s23 = scalar_lea.vmem [#allocation6], %s323_s22  ;;  %s8480_s28 = scalar_lea.sflag [#allocation7], %s323_s22 }
 0x4fb   : > { %v10318_v45 = vld [vmem:[%s12810_s5 + $0xb0] sm:$0xff]   ;;  %v10320_v47 = vld [vmem:[%s12810_s5 + $0xf8] sm:$0xff]   ;;  %v10324_v19 = vld [vmem:[%s12810_s5 + $0x140] sm:$0xff]   ;;  %s8492_s24 = sshll.u32 %s324_s23, 4  ;;  %s12765_s24 = int_to_ptr.vmem [resolvable:$true] %s8492_s24 }
 0x4fc   : > { %v10322_v53 = vld [vmem:[%s12810_s5 + $0xb8] sm:$0xff]   ;;  %s10485_s13 = scalar_lea.vmem %s12765_s24, 16  ;;  %p10492_p0 = scmp.lt.s32.totalorder %s12765_s24, %s10490_s14 }
 0x4fd   : > { %9430 = vmatpush3.bf16.msra.mxu1 %v10319_v57  ;;  %v10326_v57 = vld [vmem:[%s12810_s5 + $0x100] sm:$0xff]   ;;  %p10486_p11 = scmp.ne.s32.totalorder %s12765_s24, %s10485_s13  ;;  %p10493_p1 = scmp.lt.s32.totalorder %s10491_s16, %s10485_s13 }
 0x4fe   : > { %9431 = vmatprep.subr.bf16.mxu1 %v10321_v10 }
 0x4ff   : > { %p10487_p12 = pnand %p10486_p11, %p10642_p5  ;;  %p10494_p2 = por %p10493_p1, %p10492_p0 }
 0x501   : > { %9432 = vmatpush3.bf16.msra.mxu1 %v10323_v58  ;;  %p10488_p13 = pneg %p10487_p12 }
 0x502   : > { %9433 = vmatprep.subr.bf16.mxu1 %v10325_v51  ;;  %v10328_v51 = vld [vmem:[%s12810_s5 + $0x148] sm:$0xff]  }
 0x503   : > { %p10495_p3 = pnand %p10494_p2, %p10488_p13 }
 0x505   : > { %9434 = vmatpush3.bf16.msra.mxu1 %v10327_v59 }
 0x506   : > { %9463 = vmatprep.subr.bf16.mxu1 %v10329_v3 }
 0x530   : > { %v5513_v26 = vpop.permute.xlu0 %5512 }
 0x531   : > { %5518 = vst.msk [vmem:[#allocation5] sm:$0x1] %vm12091_vm9, %v5513_v26 }
 0x534   : > { %v5542_v28 = vpop.permute.xlu0 %5541 }
 0x535   : > { %5544 = vst.msk [vmem:[#allocation5 + $0x1] sm:$0x1] %vm12091_vm9, %v5542_v28  ;;  %v5568_v33 = vpop.permute.xlu1 %5567 }
 0x536   : > { %5570 = vst.msk [vmem:[#allocation5 + $0x2] sm:$0x1] %vm12091_vm9, %v5568_v33 }
 0x538   : > { %v5620_v35 = vpop.permute.xlu0 %5619 }
 0x539   : > { %5622 = vst.msk [vmem:[#allocation5 + $0x4] sm:$0x1] %vm12091_vm9, %v5620_v35  ;;  %v5594_v21 = vpop.permute.xlu1 %5593  ;;  %v10331_v35 = vld [vmem:[%s12810_s5 + $0x580] sm:$0xff]  }
 0x53a   : > { %5596 = vst.msk [vmem:[#allocation5 + $0x3] sm:$0x1] %vm12091_vm9, %v5594_v21  ;;  %v10330_v21 = vld [vmem:[%s12810_s5 + $0x108] sm:$0xff]  }
 0x53f   : > { %v5672_v41 = vpop.permute.xlu0 %5671 }
 0x540   : > { %v5646_v43 = vpop.permute.xlu1 %5645  ;;  %5674 = vst.msk [vmem:[#allocation5 + $0x6] sm:$0x1] %vm12091_vm9, %v5672_v41  ;;  %v10333_v41 = vld [vmem:[%s12810_s5 + $0x5c8] sm:$0xff]  }
 0x541   : > { %5648 = vst.msk [vmem:[#allocation5 + $0x5] sm:$0x1] %vm12091_vm9, %v5646_v43 }
 0x543   : > { %v5724_v39 = vpop.permute.xlu0 %5723 }
 0x544   : > { %v5698_v48 = vpop.permute.xlu1 %5697  ;;  %5726 = vst.msk [vmem:[#allocation5 + $0x8] sm:$0x1] %vm12091_vm9, %v5724_v39  ;;  %v10332_v39 = vld [vmem:[%s12810_s5 + $0x150] sm:$0xff]  }
 0x545   : > { %5700 = vst.msk [vmem:[#allocation5 + $0x7] sm:$0x1] %vm12091_vm9, %v5698_v48  ;;  %v10335_v48 = vld [vmem:[%s12810_s5 + $0x588] sm:$0xff]  }
 0x549   : > { %v5750_v55 = vpop.permute.xlu1 %5749 }
 0x54a   : > { %5752 = vst.msk [vmem:[#allocation5 + $0x9] sm:$0x1] %vm12091_vm9, %v5750_v55  ;;  %v5776_v54 = vpop.permute.xlu0 %5775  ;;  %v10334_v55 = vld [vmem:[%s12810_s5 + $0x110] sm:$0xff]  }
 0x54b   : > { %5778 = vst.msk [vmem:[#allocation5 + $0xa] sm:$0x1] %vm12091_vm9, %v5776_v54  ;;  %v10337_v54 = vld [vmem:[%s12810_s5 + $0x5d0] sm:$0xff]  }
 0x54c   : > { %v12126_v0 = vld [vmem:[#allocation5] sm:$0xff] }
 0x54d   : > { %v5802_v25 = vpop.permute.xlu1 %5801  ;;  %v6136_v6 = vrot.slane %v12126_v0, %v12116_v61  ;;  %v6132_v8 = vrot.slane %v12126_v0, %v12119_v62  ;;  %v6144_v12 = vrot.slane %v12126_v0, %v12122_v1  ;;  %v6140_v30 = vrot.slane %v12126_v0, %v12203_v50 }
 0x54e   : > { %5804 = vst.msk [vmem:[#allocation5 + $0xb] sm:$0x1] %vm12091_vm9, %v5802_v25  ;;  %v6152_v60 = vrot.slane %v12126_v0, %v12206_v52  ;;  %v10336_v25 = vld [vmem:[%s12810_s5 + $0x158] sm:$0xff]  }
 0x54f   : > { %v6255_v13 = vpack.c.bf16 %v6136_v6, %v6136_v6  ;;  %v6254_v17 = vpack.c.bf16 %v6132_v8, %v6132_v8  ;;  %v6257_v42 = vpack.c.bf16 %v6144_v12, %v6144_v12  ;;  %v6256_v58 = vpack.c.bf16 %v6140_v30, %v6140_v30  ;;  %v10339_v6 = vld [vmem:[%s12810_s5 + $0x590] sm:$0xff]   ;;  %v10338_v8 = vld [vmem:[%s12810_s5 + $0x118] sm:$0xff]  }
 0x550   : > { %v6259_v26 = vpack.c.bf16 %v6152_v60, %v6152_v60  ;;  %v10341_v12 = vld [vmem:[%s12810_s5 + $0x5d8] sm:$0xff]   ;;  %v10366_v60 = vld [vmem:[%s12810_s5 + $0x1e0] sm:$0xff]  }
 0x551   : > { %v5854_v27 = vpop.permute.xlu1 %5853  ;;  %7883 = vmatprep.mubr.bf16.mxu0 %v6255_v13  ;;  %v10340_v13 = vld [vmem:[%s12810_s5 + $0x160] sm:$0xff]   ;;  %v10364_v30 = vld [vmem:[%s12810_s5 + $0x1d8] sm:$0xff]  }
 0x552   : > { %v5828_v31 = vpop.permute.xlu0 %5827  ;;  %5856 = vst.msk [vmem:[#allocation5 + $0xd] sm:$0x1] %vm12091_vm9, %v5854_v27  ;;  %7884 = vmatmul.mubr.bf16.vlgmr.msra.gmra.mrb[108].mxu0 %v6254_v17  ;;  %v10343_v17 = vld [vmem:[%s12810_s5 + $0x598] sm:$0xff]   ;;  %v10345_v27 = vld [vmem:[%s12810_s5 + $0x5e0] sm:$0xff]  }
 0x553   : > { %5830 = vst.msk [vmem:[#allocation5 + $0xc] sm:$0x1] %vm12091_vm9, %v5828_v31  ;;  %9244 = vmatpush3.bf16.msra.mxu0 %v10295_v20  ;;  %7923 = vmatprep.mubr.bf16.mxu0 %v6257_v42  ;;  %v10342_v20 = vld [vmem:[%s12810_s5 + $0x120] sm:$0xff]   ;;  %v10344_v31 = vld [vmem:[%s12810_s5 + $0x168] sm:$0xff]  }
 0x554   : > { %9245 = vmatprep.subr.bf16.mxu0 %v10296_v38  ;;  %v10347_v38 = vld [vmem:[%s12810_s5 + $0x5a0] sm:$0xff]   ;;  %v10346_v42 = vld [vmem:[%s12810_s5 + $0x128] sm:$0xff]  }
 0x555   : > { %v5906_v5 = vpop.permute.xlu1 %5905 }
 0x556   : > { %v5880_v7 = vpop.permute.xlu0 %5879  ;;  %5908 = vst.msk [vmem:[#allocation5 + $0xf] sm:$0x1] %vm12091_vm9, %v5906_v5  ;;  %v10348_v5 = vld [vmem:[%s12810_s5 + $0x170] sm:$0xff]  }
 0x557   : > { %5882 = vst.msk [vmem:[#allocation5 + $0xe] sm:$0x1] %vm12091_vm9, %v5880_v7  ;;  %9246 = vmatpush3.bf16.msra.mxu0 %v10298_v46  ;;  %v10349_v46 = vld [vmem:[%s12810_s5 + $0x5e8] sm:$0xff]  }
 0x558   : > { %9247 = vmatprep.subr.bf16.mxu0 %v10300_v9  ;;  %v10351_v7 = vld [vmem:[%s12810_s5 + $0x5a8] sm:$0xff]   ;;  %v10350_v9 = vld [vmem:[%s12810_s5 + $0x130] sm:$0xff]  }
 0x55b   : > { %9248 = vmatpush3.bf16.msra.mxu0 %v10302_v11  ;;  %v10353_v11 = vld [vmem:[%s12810_s5 + $0x5f0] sm:$0xff]  }
 0x55c   : > { %v5932_v4 = vpop.permute.xlu0 %5931  ;;  %9249 = vmatprep.subr.bf16.mxu0 %v10304_v49  ;;  %v12308_v49 = vsub.s32 4, %v11839_v2 }
 0x55d   : > { %5934 = vst.msk [vmem:[#allocation5 + $0x10] sm:$0x1] %vm12091_vm9, %v5932_v4  ;;  %v5958_v14 = vpop.permute.xlu1 %5957  ;;  %v10352_v4 = vld [vmem:[%s12810_s5 + $0x178] sm:$0xff]  }
 0x55e   : > { %5960 = vst.msk [vmem:[#allocation5 + $0x11] sm:$0x1] %vm12091_vm9, %v5958_v14  ;;  %v10355_v14 = vld [vmem:[%s12810_s5 + $0x5b0] sm:$0xff]  }
 0x55f   : > { %9250 = vmatpush3.bf16.msra.mxu0 %v10306_v15  ;;  %v10354_v15 = vld [vmem:[%s12810_s5 + $0x138] sm:$0xff]  }
 0x560   : > { %v5984_v16 = vpop.permute.xlu0 %5983  ;;  %9251 = vmatprep.subr.bf16.mxu0 %v10308_v18  ;;  %v6148_v18 = vrot.slane %v12126_v0, %v12308_v49 }
 0x561   : > { %5986 = vst.msk [vmem:[#allocation5 + $0x12] sm:$0x1] %vm12091_vm9, %v5984_v16  ;;  %v10357_v16 = vld [vmem:[%s12810_s5 + $0x5f8] sm:$0xff]  }
 0x563   : > { %v6010_v22 = vpop.permute.xlu1 %6009  ;;  %9252 = vmatpush3.bf16.msra.mxu0 %v10310_v23  ;;  %v6160_v23 = vrot.slane %v12126_v0, %v12219_v56 }
 0x564   : > { %v6036_v24 = vpop.permute.xlu0 %6035  ;;  %6012 = vst.msk [vmem:[#allocation5 + $0x13] sm:$0x1] %vm12091_vm9, %v6010_v22  ;;  %9253 = vmatprep.subr.bf16.mxu0 %v10312_v29  ;;  %v10356_v22 = vld [vmem:[%s12810_s5 + $0x1c0] sm:$0xff]   ;;  %v10359_v29 = vld [vmem:[%s12810_s5 + $0x5b8] sm:$0xff]  }
 0x565   : > { %6038 = vst.msk [vmem:[#allocation5 + $0x14] sm:$0x1] %vm12091_vm9, %v6036_v24  ;;  %v12327_v24 = vsub.s32 6, %v11839_v2  ;;  %v10360_v2 = vld [vmem:[%s12810_s5 + $0x1c8] sm:$0xff]  }
 0x567   : > { %v6062_v32 = vpop.permute.xlu1 %6061  ;;  %9254 = vmatpush3.bf16.msra.mxu0 %v10314_v34 }
 0x568   : > { %v6088_v37 = vpop.permute.xlu0 %6087  ;;  %6064 = vst.msk [vmem:[#allocation5 + $0x15] sm:$0x1] %vm12091_vm9, %v6062_v32  ;;  %9255 = vmatprep.subr.bf16.mxu0 %v10316_v40  ;;  %v10358_v32 = vld [vmem:[%s12810_s5 + $0x180] sm:$0xff]   ;;  %v6261_v40 = vpack.c.bf16 %v6160_v23, %v6160_v23 }
 0x569   : > { %6090 = vst.msk [vmem:[#allocation5 + $0x16] sm:$0x1] %vm12091_vm9, %v6088_v37  ;;  %v6258_v37 = vpack.c.bf16 %v6148_v18, %v6148_v18  ;;  %v10397_v18 = vld [vmem:[%s12810_s5 + $0x298] sm:$0xff]   ;;  %v10399_v23 = vld [vmem:[%s12810_s5 + $0x2a0] sm:$0xff]  }
 0x56b   : > { %v6114_v44 = vpop.permute.xlu1 %6113  ;;  %9256 = vmatpush3.bf16.msra.mxu0 %v10318_v45  ;;  %v10361_v45 = vld [vmem:[%s12810_s5 + $0x188] sm:$0xff]  }
 0x56c   : > { %6116 = vst.msk [vmem:[#allocation5 + $0x17] sm:$0x1] %vm12091_vm9, %v6114_v44  ;;  %9257 = vmatprep.subr.bf16.mxu0 %v10320_v47  ;;  %v10362_v47 = vld [vmem:[%s12810_s5 + $0x1d0] sm:$0xff]  }
 0x56f   : > { %9258 = vmatpush3.bf16.msra.mxu0 %v10322_v53  ;;  %v10363_v53 = vld [vmem:[%s12810_s5 + $0x190] sm:$0xff]  }
 0x570   : > { %9265 = vmatprep.subr.bf16.mxu0 %v10324_v19  ;;  %v10365_v19 = vld [vmem:[%s12810_s5 + $0x198] sm:$0xff]  }
 0x572   : > { %7924 = vmatmul.mubr.bf16.vlgmr.msra.gmra.mrb[112].mxu0 %v6256_v58  ;;  %v10368_v58 = vld [vmem:[%s12810_s5 + $0x1e8] sm:$0xff]  }
 0x573   : > { %v12224_v10 = vld [vmem:[#allocation5 + $0x10] sm:$0xff]  ;;  %9266 = vmatpush3.bf16.msra.mxu0 %v10326_v57  ;;  %7963 = vmatprep.mubr.bf16.mxu0 %v6259_v26  ;;  %v10367_v57 = vld [vmem:[%s12810_s5 + $0x1a0] sm:$0xff]   ;;  %v12376_v26 = vld [vmem:[#allocation5 + $0x8] sm:$0xff] }
 0x574   : > { %v6208_v59 = vrot.slane %v12224_v10, %v12122_v1  ;;  %v6204_v3 = vrot.slane %v12224_v10, %v12203_v50  ;;  %v6224_v63 = vrot.slane %v12224_v10, %v12219_v56  ;;  %9267 = vmatprep.subr.bf16.mxu0 %v10328_v51  ;;  %v6220_v34 = vrot.slane %v12224_v10, %v12327_v24  ;;  %v10369_v51 = vld [vmem:[%s12810_s5 + $0x1a8] sm:$0xff]  }
 0x576   : > { %v6273_v28 = vpack.c.bf16 %v6208_v59, %v6208_v59  ;;  %v6272_v33 = vpack.c.bf16 %v6204_v3, %v6204_v3  ;;  %v6277_v43 = vpack.c.bf16 %v6224_v63, %v6224_v63  ;;  %v6276_v44 = vpack.c.bf16 %v6220_v34, %v6220_v34  ;;  %v10370_v59 = vld [vmem:[%s12810_s5 + $0x1f0] sm:$0xff]   ;;  %v10372_v63 = vld [vmem:[%s12810_s5 + $0x1f8] sm:$0xff]  }
 0x577   : > { %9268 = vmatpush3.bf16.msra.mxu0 %v10330_v21  ;;  %v10371_v3 = vld [vmem:[%s12810_s5 + $0x1b0] sm:$0xff]   ;;  %v6168_v21 = vrot.slane %v12376_v26, %v12116_v61 }
 0x578   : > { %8243 = vmatprep.mubr.bf16.mxu1 %v6273_v28  ;;  %9269 = vmatprep.subr.bf16.mxu0 %v10332_v39  ;;  %v10373_v28 = vld [vmem:[%s12810_s5 + $0x1b8] sm:$0xff]   ;;  %v10376_v39 = vld [vmem:[%s12810_s5 + $0x248] sm:$0xff]   ;;  %v10402_v34 = vld [vmem:[%s12810_s5 + $0x2f0] sm:$0xff]  }
 0x579   : > { %8244 = vmatmul.mubr.bf16.vlgmr.msra.gmra.mrb[32].mxu1 %v6272_v33  ;;  %v6156_v33 = vrot.slane %v12126_v0, %v12327_v24  ;;  %v10377_v0 = vld [vmem:[%s12810_s5 + $0x208] sm:$0xff]  }
 0x57a   : > { %9464 = vmatpush3.bf16.msra.mxu1 %v10331_v35  ;;  %8323 = vmatprep.mubr.bf16.mxu1 %v6277_v43  ;;  %v10374_v35 = vld [vmem:[%s12810_s5 + $0x240] sm:$0xff]  }
 0x57b   : > { %9465 = vmatprep.subr.bf16.mxu1 %v10333_v41  ;;  %9270 = vmatpush3.bf16.msra.mxu0 %v10334_v55  ;;  %v10375_v41 = vld [vmem:[%s12810_s5 + $0x200] sm:$0xff]   ;;  %v6260_v43 = vpack.c.bf16 %v6156_v33, %v6156_v33  ;;  %v10378_v55 = vld [vmem:[%s12810_s5 + $0x250] sm:$0xff]   ;;  %v10417_v33 = vld [vmem:[%s12810_s5 + $0x328] sm:$0xff]  }
 0x57c   : > { %9271 = vmatprep.subr.bf16.mxu0 %v10336_v25  ;;  %v10380_v25 = vld [vmem:[%s12810_s5 + $0x258] sm:$0xff]  }
 0x57e   : > { %9466 = vmatpush3.bf16.msra.mxu1 %v10335_v48  ;;  %v6263_v48 = vpack.c.bf16 %v6168_v21, %v6168_v21  ;;  %v10419_v21 = vld [vmem:[%s12810_s5 + $0x330] sm:$0xff]  }
 0x57f   : > { %9467 = vmatprep.subr.bf16.mxu1 %v10337_v54  ;;  %9272 = vmatpush3.bf16.msra.mxu0 %v10338_v8  ;;  %v10379_v54 = vld [vmem:[%s12810_s5 + $0x210] sm:$0xff]   ;;  %v10382_v8 = vld [vmem:[%s12810_s5 + $0x260] sm:$0xff]  }
 0x580   : > { %9273 = vmatprep.subr.bf16.mxu0 %v10340_v13  ;;  %v10384_v13 = vld [vmem:[%s12810_s5 + $0x268] sm:$0xff]  }
 0x582   : > { %9468 = vmatpush3.bf16.msra.mxu1 %v10339_v6  ;;  %v10381_v6 = vld [vmem:[%s12810_s5 + $0x218] sm:$0xff]  }
 0x583   : > { %9469 = vmatprep.subr.bf16.mxu1 %v10341_v12  ;;  %9274 = vmatpush3.bf16.msra.mxu0 %v10342_v20  ;;  %v10383_v12 = vld [vmem:[%s12810_s5 + $0x220] sm:$0xff]   ;;  %v10386_v20 = vld [vmem:[%s12810_s5 + $0x270] sm:$0xff]  }
 0x584   : > { %9275 = vmatprep.subr.bf16.mxu0 %v10344_v31  ;;  %v10388_v31 = vld [vmem:[%s12810_s5 + $0x278] sm:$0xff]  }
 0x586   : > { %9470 = vmatpush3.bf16.msra.mxu1 %v10343_v17  ;;  %v10385_v17 = vld [vmem:[%s12810_s5 + $0x228] sm:$0xff]  }
 0x587   : > { %9471 = vmatprep.subr.bf16.mxu1 %v10345_v27  ;;  %9276 = vmatpush3.bf16.msra.mxu0 %v10346_v42  ;;  %v10387_v27 = vld [vmem:[%s12810_s5 + $0x230] sm:$0xff]   ;;  %v6164_v42 = vrot.slane %v12376_v26, %v12119_v62 }
 0x588   : > { %9277 = vmatprep.subr.bf16.mxu0 %v10348_v5  ;;  %v6176_v5 = vrot.slane %v12376_v26, %v12122_v1  ;;  %v10394_v1 = vld [vmem:[%s12810_s5 + $0x2d0] sm:$0xff]  }
 0x58a   : > { %9472 = vmatpush3.bf16.msra.mxu1 %v10347_v38  ;;  %v10389_v38 = vld [vmem:[%s12810_s5 + $0x238] sm:$0xff]  }
 0x58b   : > { %9473 = vmatprep.subr.bf16.mxu1 %v10349_v46  ;;  %9278 = vmatpush3.bf16.msra.mxu0 %v10350_v9  ;;  %v10390_v46 = vld [vmem:[%s12810_s5 + $0x2c0] sm:$0xff]   ;;  %v6262_v9 = vpack.c.bf16 %v6164_v42, %v6164_v42  ;;  %v10434_v42 = vld [vmem:[%s12810_s5 + $0x3f0] sm:$0xff]  }
 0x58c   : > { %9279 = vmatprep.subr.bf16.mxu0 %v10352_v4  ;;  %v6265_v4 = vpack.c.bf16 %v6176_v5, %v6176_v5 }
 0x58e   : > { %9474 = vmatpush3.bf16.msra.mxu1 %v10351_v7  ;;  %v10391_v7 = vld [vmem:[%s12810_s5 + $0x280] sm:$0xff]  }
 0x58f   : > { %9475 = vmatprep.subr.bf16.mxu1 %v10353_v11  ;;  %9280 = vmatpush3.bf16.msra.mxu0 %v10354_v15  ;;  %v10392_v11 = vld [vmem:[%s12810_s5 + $0x2c8] sm:$0xff]   ;;  %v10395_v15 = vld [vmem:[%s12810_s5 + $0x290] sm:$0xff]  }
 0x590   : > { %9287 = vmatprep.subr.bf16.mxu0 %v10356_v22  ;;  %v10398_v22 = vld [vmem:[%s12810_s5 + $0x2e0] sm:$0xff]  }
 0x592   : > { %9476 = vmatpush3.bf16.msra.mxu1 %v10355_v14  ;;  %7964 = vmatmul.mubr.bf16.vlgmr.msra.gmra.mrb[116].mxu0 %v6258_v37  ;;  %v10393_v14 = vld [vmem:[%s12810_s5 + $0x288] sm:$0xff]   ;;  %v10403_v37 = vld [vmem:[%s12810_s5 + $0x2b0] sm:$0xff]  }
 0x593   : > { %9477 = vmatprep.subr.bf16.mxu1 %v10357_v16  ;;  %9288 = vmatpush3.bf16.msra.mxu0 %v10358_v32  ;;  %v10396_v16 = vld [vmem:[%s12810_s5 + $0x2d8] sm:$0xff]   ;;  %v10401_v32 = vld [vmem:[%s12810_s5 + $0x2a8] sm:$0xff]  }
 0x594   : > { %8003 = vmatprep.mubr.bf16.mxu0 %v6261_v40  ;;  %9289 = vmatprep.subr.bf16.mxu0 %v10360_v2  ;;  %v10404_v2 = vld [vmem:[%s12810_s5 + $0x2f8] sm:$0xff]  }
 0x595   : > { %v10405_v40 = vld [vmem:[%s12810_s5 + $0x2b8] sm:$0xff]  }
 0x596   : > { %9478 = vmatpush3.bf16.msra.mxu1 %v10359_v29  ;;  %v10400_v29 = vld [vmem:[%s12810_s5 + $0x2e8] sm:$0xff]  }
 0x597   : > { %9290 = vmatpush3.bf16.msra.mxu0 %v10361_v45  ;;  %v10406_v45 = vld [vmem:[%s12810_s5 + $0x340] sm:$0xff]  }
 0x598   : > { %9291 = vmatprep.subr.bf16.mxu0 %v10362_v47  ;;  %v6184_v47 = vrot.slane %v12376_v26, %v12206_v52 }
 0x599   : > { %8324 = vmatmul.mubr.bf16.vlgmr.msra.gmra.mrb[36].mxu1 %v6276_v44  ;;  %v6172_v44 = vrot.slane %v12376_v26, %v12203_v50  ;;  %v10409_v50 = vld [vmem:[%s12810_s5 + $0x308] sm:$0xff]  }
 0x59b   : > { %9292 = vmatpush3.bf16.msra.mxu0 %v10363_v53  ;;  %v10407_v53 = vld [vmem:[%s12810_s5 + $0x300] sm:$0xff]  }
 0x59c   : > { %9293 = vmatprep.subr.bf16.mxu0 %v10364_v30  ;;  %v6264_v30 = vpack.c.bf16 %v6172_v44, %v6172_v44  ;;  %v10448_v44 = vld [vmem:[%s12810_s5 + $0x468] sm:$0xff]  }
 0x59f   : > { %9294 = vmatpush3.bf16.msra.mxu0 %v10365_v19  ;;  %v10408_v19 = vld [vmem:[%s12810_s5 + $0x348] sm:$0xff]  }
 0x5a0   : > { %9295 = vmatprep.subr.bf16.mxu0 %v10366_v60  ;;  %v6267_v60 = vpack.c.bf16 %v6184_v47, %v6184_v47  ;;  %v6671_v47 = vld [vmem:[%s12811_s6] sm:$0x1] }
 0x5a3   : > { %9296 = vmatpush3.bf16.msra.mxu0 %v10367_v57  ;;  %v10410_v57 = vld [vmem:[%s12810_s5 + $0x350] sm:$0xff]  }
 0x5a4   : > { %9297 = vmatprep.subr.bf16.mxu0 %v10368_v58  ;;  %v10411_v58 = vld [vmem:[%s12810_s5 + $0x310] sm:$0xff]  }
 0x5a7   : > { %9298 = vmatpush3.bf16.msra.mxu0 %v10369_v51  ;;  %v10412_v51 = vld [vmem:[%s12810_s5 + $0x358] sm:$0xff]  }
 0x5a8   : > { %9299 = vmatprep.subr.bf16.mxu0 %v10370_v59  ;;  %v10413_v59 = vld [vmem:[%s12810_s5 + $0x318] sm:$0xff]  }
 0x5ab   : > { %9300 = vmatpush3.bf16.msra.mxu0 %v10371_v3  ;;  %v10414_v3 = vld [vmem:[%s12810_s5 + $0x360] sm:$0xff]  }
 0x5ac   : > { %9301 = vmatprep.subr.bf16.mxu0 %v10372_v63  ;;  %v10415_v63 = vld [vmem:[%s12810_s5 + $0x320] sm:$0xff]  }
 0x5af   : > { %9302 = vmatpush3.bf16.msra.mxu0 %v10373_v28  ;;  %v10416_v28 = vld [vmem:[%s12810_s5 + $0x368] sm:$0xff]  }
 0x5b0   : > { %9309 = vmatprep.subr.bf16.mxu0 %v10374_v35  ;;  %v10418_v35 = vld [vmem:[%s12810_s5 + $0x370] sm:$0xff]  }
 0x5b2   : > { %8004 = vmatmul.mubr.bf16.vlgmr.msra.gmra.mrb[120].mxu0 %v6260_v43  ;;  %v10421_v43 = vld [vmem:[%s12810_s5 + $0x338] sm:$0xff]  }
 0x5b3   : > { %9310 = vmatpush3.bf16.msra.mxu0 %v10375_v41  ;;  %8043 = vmatprep.mubr.bf16.mxu0 %v6263_v48  ;;  %v10420_v41 = vld [vmem:[%s12810_s5 + $0x378] sm:$0xff]   ;;  %v10422_v48 = vld [vmem:[%s12810_s5 + $0x3c0] sm:$0xff]  }
 0x5b4   : > { %9311 = vmatprep.subr.bf16.mxu0 %v10376_v39  ;;  %v6180_v39 = vrot.slane %v12376_v26, %v12308_v49 }
 0x5b7   : > { %9312 = vmatpush3.bf16.msra.mxu0 %v10377_v0  ;;  %v6192_v0 = vrot.slane %v12376_v26, %v12219_v56  ;;  %v10426_v56 = vld [vmem:[%s12810_s5 + $0x3d0] sm:$0xff]  }
 0x5b8   : > { %9313 = vmatprep.subr.bf16.mxu0 %v10378_v55  ;;  %v10423_v55 = vld [vmem:[%s12810_s5 + $0x380] sm:$0xff]  }
 0x5bb   : > { %9314 = vmatpush3.bf16.msra.mxu0 %v10379_v54  ;;  %v6266_v54 = vpack.c.bf16 %v6180_v39, %v6180_v39  ;;  %v10454_v39 = vld [vmem:[%s12810_s5 + $0x540] sm:$0xff]  }
 0x5bc   : > { %9315 = vmatprep.subr.bf16.mxu0 %v10380_v25  ;;  %v10424_v25 = vld [vmem:[%s12810_s5 + $0x3c8] sm:$0xff]  }
 0x5bf   : > { %9316 = vmatpush3.bf16.msra.mxu0 %v10381_v6  ;;  %v6269_v6 = vpack.c.bf16 %v6192_v0, %v6192_v0  ;;  %v10455_v0 = vld [vmem:[%s12810_s5 + $0x500] sm:$0xff]  }
 0x5c0   : > { %9317 = vmatprep.subr.bf16.mxu0 %v10382_v8  ;;  %v10425_v8 = vld [vmem:[%s12810_s5 + $0x388] sm:$0xff]  }
 0x5c3   : > { %9318 = vmatpush3.bf16.msra.mxu0 %v10383_v12  ;;  %v10427_v12 = vld [vmem:[%s12810_s5 + $0x390] sm:$0xff]  }
 0x5c4   : > { %9319 = vmatprep.subr.bf16.mxu0 %v10384_v13  ;;  %v10428_v13 = vld [vmem:[%s12810_s5 + $0x3d8] sm:$0xff]  }
 0x5c7   : > { %9320 = vmatpush3.bf16.msra.mxu0 %v10385_v17  ;;  %v10429_v17 = vld [vmem:[%s12810_s5 + $0x398] sm:$0xff]  }
 0x5c8   : > { %9321 = vmatprep.subr.bf16.mxu0 %v10386_v20  ;;  %v10430_v20 = vld [vmem:[%s12810_s5 + $0x3e0] sm:$0xff]  }
 0x5cb   : > { %9322 = vmatpush3.bf16.msra.mxu0 %v10387_v27  ;;  %v10431_v27 = vld [vmem:[%s12810_s5 + $0x3a0] sm:$0xff]  }
 0x5cc   : > { %9323 = vmatprep.subr.bf16.mxu0 %v10388_v31  ;;  %v10432_v31 = vld [vmem:[%s12810_s5 + $0x3e8] sm:$0xff]  }
 0x5cf   : > { %9324 = vmatpush3.bf16.msra.mxu0 %v10389_v38  ;;  %v10433_v38 = vld [vmem:[%s12810_s5 + $0x3a8] sm:$0xff]  }
 0x5d0   : > { %9331 = vmatprep.subr.bf16.mxu0 %v10390_v46 }
 0x5d2   : > { %8044 = vmatmul.mubr.bf16.vlgmr.msra.gmra.mrb[124].mxu0 %v6262_v9 }
 0x5d3   : > { %9332 = vmatpush3.bf16.msra.mxu0 %v10391_v7  ;;  %8083 = vmatprep.mubr.bf16.mxu0 %v6265_v4 }
 0x5d4   : > { %9333 = vmatprep.subr.bf16.mxu0 %v10392_v11  ;;  %v10435_v11 = vld [vmem:[%s12810_s5 + $0x3b0] sm:$0xff]  }
 0x5d7   : > { %9334 = vmatpush3.bf16.msra.mxu0 %v10393_v14  ;;  %v10436_v14 = vld [vmem:[%s12810_s5 + $0x3f8] sm:$0xff]  }
 0x5d8   : > { %9335 = vmatprep.subr.bf16.mxu0 %v10394_v1  ;;  %v10437_v1 = vld [vmem:[%s12810_s5 + $0x3b8] sm:$0xff]  }
 0x5db   : > { %9336 = vmatpush3.bf16.msra.mxu0 %v10395_v15  ;;  %v6188_v15 = vrot.slane %v12376_v26, %v12327_v24  ;;  %v10441_v24 = vld [vmem:[%s12810_s5 + $0x408] sm:$0xff]   ;;  %v10443_v26 = vld [vmem:[%s12810_s5 + $0x410] sm:$0xff]  }
 0x5dc   : > { %9337 = vmatprep.subr.bf16.mxu0 %v10396_v16  ;;  %v10438_v16 = vld [vmem:[%s12810_s5 + $0x440] sm:$0xff]  }
 0x5df   : > { %9338 = vmatpush3.bf16.msra.mxu0 %v10397_v18  ;;  %v6200_v18 = vrot.slane %v12224_v10, %v12116_v61  ;;  %v10442_v61 = vld [vmem:[%s12810_s5 + $0x450] sm:$0xff]  }
 0x5e0   : > { %9339 = vmatprep.subr.bf16.mxu0 %v10398_v22  ;;  %v10439_v22 = vld [vmem:[%s12810_s5 + $0x400] sm:$0xff]  }
 0x5e3   : > { %9340 = vmatpush3.bf16.msra.mxu0 %v10399_v23  ;;  %v6268_v23 = vpack.c.bf16 %v6188_v15, %v6188_v15 }
 0x5e4   : > { %9341 = vmatprep.subr.bf16.mxu0 %v10400_v29  ;;  %v10440_v29 = vld [vmem:[%s12810_s5 + $0x448] sm:$0xff]  }
 0x5e7   : > { %9342 = vmatpush3.bf16.msra.mxu0 %v10401_v32  ;;  %v6271_v32 = vpack.c.bf16 %v6200_v18, %v6200_v18  ;;  %v10469_v18 = vld [vmem:[%s12810_s5 + $0x538] sm:$0xff]  }
 0x5e8   : > { %9343 = vmatprep.subr.bf16.mxu0 %v10402_v34  ;;  %v10444_v34 = vld [vmem:[%s12810_s5 + $0x458] sm:$0xff]  }
 0x5eb   : > { %9344 = vmatpush3.bf16.msra.mxu0 %v10403_v37  ;;  %v10445_v37 = vld [vmem:[%s12810_s5 + $0x418] sm:$0xff]  }
 0x5ec   : > { %9345 = vmatprep.subr.bf16.mxu0 %v10404_v2  ;;  %v10446_v2 = vld [vmem:[%s12810_s5 + $0x460] sm:$0xff]  }
 0x5ef   : > { %9346 = vmatpush3.bf16.msra.mxu0 %v10405_v40  ;;  %v10447_v40 = vld [vmem:[%s12810_s5 + $0x420] sm:$0xff]  }
 0x5f0   : > { %9353 = vmatprep.subr.bf16.mxu0 %v10406_v45  ;;  %v10449_v45 = vld [vmem:[%s12810_s5 + $0x428] sm:$0xff]  }
 0x5f2   : > { %8084 = vmatmul.mubr.bf16.vlgmr.msra.gmra.mrb[128].mxu0 %v6264_v30 }
 0x5f3   : > { %9354 = vmatpush3.bf16.msra.mxu0 %v10407_v53  ;;  %8123 = vmatprep.mubr.bf16.mxu0 %v6267_v60  ;;  %v10450_v53 = vld [vmem:[%s12810_s5 + $0x470] sm:$0xff]  }
 0x5f4   : > { %9355 = vmatprep.subr.bf16.mxu0 %v10408_v19 }
 0x5f7   : > { %9356 = vmatpush3.bf16.msra.mxu0 %v10409_v50 }
 0x5f8   : > { %9357 = vmatprep.subr.bf16.mxu0 %v10410_v57 }
 0x5fb   : > { %9358 = vmatpush3.bf16.msra.mxu0 %v10411_v58  ;;  %v10451_v58 = vld [vmem:[%s12810_s5 + $0x430] sm:$0xff]  }
 0x5fc   : > { %9359 = vmatprep.subr.bf16.mxu0 %v10412_v51 }
 0x5ff   : > { %9360 = vmatpush3.bf16.msra.mxu0 %v10413_v59 }
 0x600   : > { %9361 = vmatprep.subr.bf16.mxu0 %v10414_v3  ;;  %v10452_v3 = vld [vmem:[%s12810_s5 + $0x478] sm:$0xff]  }
 0x603   : > { %9362 = vmatpush3.bf16.msra.mxu0 %v10415_v63 }
 0x604   : > { %9363 = vmatprep.subr.bf16.mxu0 %v10416_v28 }
 0x607   : > { %9364 = vmatpush3.bf16.msra.mxu0 %v10417_v33 }
 0x608   : > { %9365 = vmatprep.subr.bf16.mxu0 %v10418_v35 }
 0x60b   : > { %9366 = vmatpush3.bf16.msra.mxu0 %v10419_v21 }
 0x60c   : > { %9367 = vmatprep.subr.bf16.mxu0 %v10420_v41  ;;  %v10453_v41 = vld [vmem:[%s12810_s5 + $0x438] sm:$0xff]  }
 0x60f   : > { %9368 = vmatpush3.bf16.msra.mxu0 %v10421_v43  ;;  %v6196_v43 = vrot.slane %v12224_v10, %v12119_v62  ;;  %v10457_v62 = vld [vmem:[%s12810_s5 + $0x508] sm:$0xff]  }
 0x610   : > { %9375 = vmatprep.subr.bf16.mxu0 %v10422_v48  ;;  %v6216_v48 = vrot.slane %v12224_v10, %v12206_v52  ;;  %v10458_v52 = vld [vmem:[%s12810_s5 + $0x550] sm:$0xff]  }
 0x612   : > { %8124 = vmatmul.mubr.bf16.vlgmr.msra.gmra.mrb[132].mxu0 %v6266_v54  ;;  %v10456_v54 = vld [vmem:[%s12810_s5 + $0x548] sm:$0xff]  }
 0x613   : > { %9376 = vmatpush3.bf16.msra.mxu0 %v10423_v55  ;;  %8163 = vmatprep.mubr.bf16.mxu0 %v6269_v6  ;;  %v6270_v55 = vpack.c.bf16 %v6196_v43, %v6196_v43  ;;  %v10459_v6 = vld [vmem:[%s12810_s5 + $0x510] sm:$0xff]   ;;  %v10479_v43 = vld [vmem:[%s12812_s7 + $0x28] sm:$0xff]  }
 0x614   : > { %9377 = vmatprep.subr.bf16.mxu0 %v10424_v25  ;;  %v6275_v25 = vpack.c.bf16 %v6216_v48, %v6216_v48  ;;  %v10481_v48 = vld [vmem:[%s12812_s7 + $0x38] sm:$0xff]  }
 0x617   : > { %9378 = vmatpush3.bf16.msra.mxu0 %v10425_v8  ;;  %v10460_v8 = vld [vmem:[%s12810_s5 + $0x558] sm:$0xff]  }
 0x618   : > { %9379 = vmatprep.subr.bf16.mxu0 %v10426_v56  ;;  %v10461_v56 = vld [vmem:[%s12810_s5 + $0x518] sm:$0xff]  }
 0x61b   : > { %9380 = vmatpush3.bf16.msra.mxu0 %v10427_v12  ;;  %v10462_v12 = vld [vmem:[%s12810_s5 + $0x560] sm:$0xff]  }
 0x61c   : > { %9381 = vmatprep.subr.bf16.mxu0 %v10428_v13  ;;  %v10463_v13 = vld [vmem:[%s12810_s5 + $0x520] sm:$0xff]  }
 0x61f   : > { %9382 = vmatpush3.bf16.msra.mxu0 %v10429_v17  ;;  %v10464_v17 = vld [vmem:[%s12810_s5 + $0x568] sm:$0xff]  }
 0x620   : > { %9383 = vmatprep.subr.bf16.mxu0 %v10430_v20  ;;  %v10465_v20 = vld [vmem:[%s12810_s5 + $0x528] sm:$0xff]  }
 0x623   : > { %9384 = vmatpush3.bf16.msra.mxu0 %v10431_v27  ;;  %v10466_v27 = vld [vmem:[%s12810_s5 + $0x570] sm:$0xff]  }
 0x624   : > { %9385 = vmatprep.subr.bf16.mxu0 %v10432_v31 }
 0x625   : > { %v9237_v46 = vpop.f32.mrb[108].mxu0 }
 0x626   : > { %v9238_v5 = vpop.f32.mrb[109].mxu0 }
 0x627   : > { %v9239_v7 = vadd.f32 %v9238_v5, %v9237_v46  ;;  %9386 = vmatpush3.bf16.msra.mxu0 %v10433_v38  ;;  %v9240_v9 = vpop.f32.mrb[110].mxu0  ;;  %v10467_v5 = vld [vmem:[%s12810_s5 + $0x530] sm:$0xff]  }
 0x628   : > { %v9241_v4 = vpop.f32.mrb[111].mxu0  ;;  %9387 = vmatprep.subr.bf16.mxu0 %v10434_v42 }
 0x629   : > { %v7886_v60 = vadd.f32 %v9239_v7, %v6671_v47 }
 0x62b   : > { %9388 = vmatpush3.bf16.msra.mxu0 %v10435_v11  ;;  %v10468_v11 = vld [vmem:[%s12810_s5 + $0x578] sm:$0xff]  }
 0x62c   : > { %9389 = vmatprep.subr.bf16.mxu0 %v10436_v14 }
 0x62f   : > { %9390 = vmatpush3.bf16.msra.mxu0 %v10437_v1 }
 0x630   : > { %9397 = vmatprep.subr.bf16.mxu0 %v10438_v16 }
 0x632   : > { %8164 = vmatmul.mubr.bf16.vlgmr.msra.gmra.mrb[136].mxu0 %v6268_v23  ;;  %v10470_v23 = vld [vmem:[%s12810_s5 + $0x600] sm:$0xff]  }
 0x633   : > { %9398 = vmatpush3.bf16.msra.mxu0 %v10439_v22  ;;  %8203 = vmatprep.mubr.bf16.mxu0 %v6271_v32  ;;  %v6212_v22 = vrot.slane %v12224_v10, %v12308_v49  ;;  %v10471_v32 = vld [vmem:[%s12810_s5 + $0x608] sm:$0xff]   ;;  %v10472_v10 = vld [vmem:[%s12810_s5 + $0x610] sm:$0xff]   ;;  %v10473_v49 = vld [vmem:[%s12810_s5 + $0x618] sm:$0xff]  }
 0x634   : > { %9399 = vmatprep.subr.bf16.mxu0 %v10440_v29 }
 0x635   : > { %v6274_v29 = vpack.c.bf16 %v6212_v22, %v6212_v22 }
 0x637   : > { %9400 = vmatpush3.bf16.msra.mxu0 %v10441_v24  ;;  %v8811_v24 = vld [vmem:[#allocation5 + $0x18] ss:$0 sm:$0xff] }
 0x638   : > { %9401 = vmatprep.subr.bf16.mxu0 %v10442_v61  ;;  %v6278_v61 = vpack.c.bf16 %v8811_v24, %v8811_v24 }
 0x63b   : > { %9402 = vmatpush3.bf16.msra.mxu0 %v10443_v26 }
 0x63c   : > { %9403 = vmatprep.subr.bf16.mxu0 %v10444_v34 }
 0x63f   : > { %9404 = vmatpush3.bf16.msra.mxu0 %v10445_v37 }
 0x640   : > { %9405 = vmatprep.subr.bf16.mxu0 %v10446_v2 }
 0x643   : > { %9406 = vmatpush3.bf16.msra.mxu0 %v10447_v40 }
 0x644   : > { %9407 = vmatprep.subr.bf16.mxu0 %v10448_v44 }
 0x645   : > { %v9259_v30 = vpop.f32.mrb[112].mxu0 }
 0x646   : > { %v9260_v19 = vpop.f32.mrb[113].mxu0 }
 0x647   : > { %v9261_v50 = vadd.f32 %v9260_v19, %v9259_v30  ;;  %v9262_v57 = vpop.f32.mrb[114].mxu0  ;;  %9408 = vmatpush3.bf16.msra.mxu0 %v10449_v45 }
 0x648   : > { %v9263_v51 = vpop.f32.mrb[115].mxu0  ;;  %9409 = vmatprep.subr.bf16.mxu0 %v10450_v53  ;;  %v10475_v57 = vld [vmem:[%s12812_s7 + $0x8] sm:$0xff]  }
 0x649   : > { %v7926_v63 = vadd.f32 %v9261_v50, %v7886_v60  ;;  %v10474_v50 = vld [vmem:[%s12812_s7] sm:$0xff]   ;;  %v10476_v51 = vld [vmem:[%s12812_s7 + $0x10] sm:$0xff]  }
 0x64b   : > { %9410 = vmatpush3.bf16.msra.mxu0 %v10451_v58 }
 0x64c   : > { %v9435_v59 = vpop.f32.mrb[32].mxu1  ;;  %9411 = vmatprep.subr.bf16.mxu0 %v10452_v3 }
 0x64d   : > { %v9436_v28 = vpop.f32.mrb[33].mxu1 }
 0x64e   : > { %v12641_v33 = vadd.f32 %v9436_v28, %v9435_v59  ;;  %v9438_v35 = vpop.f32.mrb[34].mxu1 }
 0x64f   : > { %v9439_v21 = vpop.f32.mrb[35].mxu1  ;;  %9412 = vmatpush3.bf16.msra.mxu0 %v10453_v41  ;;  %v10478_v41 = vld [vmem:[%s12812_s7 + $0x20] sm:$0xff]  }
 0x650   : > { %9441 = vmatprep.subr.bf16.mxu0 %v10454_v39  ;;  %v10477_v21 = vld [vmem:[%s12812_s7 + $0x18] sm:$0xff]   ;;  %v10480_v39 = vld [vmem:[%s12812_s7 + $0x30] sm:$0xff]  }
 0x652   : > { %8204 = vmatmul.mubr.bf16.vlgmr.msra.gmra.mrb[140].mxu0 %v6270_v55 }
 0x653   : > { %9442 = vmatpush3.bf16.msra.mxu0 %v10455_v0  ;;  %8283 = vmatprep.mubr.bf16.mxu0 %v6275_v25 }
 0x654   : > { %9443 = vmatprep.subr.bf16.mxu0 %v10456_v54 }
 0x657   : > { %9444 = vmatpush3.bf16.msra.mxu0 %v10457_v62 }
 0x658   : > { %9445 = vmatprep.subr.bf16.mxu0 %v10458_v52 }
 0x65b   : > { %9446 = vmatpush3.bf16.msra.mxu0 %v10459_v6 }
 0x65c   : > { %9447 = vmatprep.subr.bf16.mxu0 %v10460_v8 }
 0x65f   : > { %9448 = vmatpush3.bf16.msra.mxu0 %v10461_v56 }
 0x660   : > { %9449 = vmatprep.subr.bf16.mxu0 %v10462_v12 }
 0x663   : > { %9450 = vmatpush3.bf16.msra.mxu0 %v10463_v13 }
 0x664   : > { %9451 = vmatprep.subr.bf16.mxu0 %v10464_v17 }
 0x665   : > { %v9281_v31 = vpop.f32.mrb[116].mxu0 }
 0x666   : > { %v9282_v38 = vpop.f32.mrb[117].mxu0 }
 0x667   : > { %v9283_v42 = vadd.f32 %v9282_v38, %v9281_v31  ;;  %v9284_v46 = vpop.f32.mrb[118].mxu0  ;;  %9452 = vmatpush3.bf16.msra.mxu0 %v10465_v20 }
 0x668   : > { %v9285_v7 = vpop.f32.mrb[119].mxu0  ;;  %9453 = vmatprep.subr.bf16.mxu0 %v10466_v27 }
 0x669   : > { %v7966_v4 = vadd.f32 %v9283_v42, %v7926_v63 }
 0x66b   : > { %9454 = vmatpush3.bf16.msra.mxu0 %v10467_v5 }
 0x66c   : > { %v9479_v9 = vpop.f32.mrb[36].mxu1  ;;  %9455 = vmatprep.subr.bf16.mxu0 %v10468_v11 }
 0x66d   : > { %v9480_v14 = vpop.f32.mrb[37].mxu1 }
 0x66e   : > { %v12695_v1 = vadd.f32 %v9480_v14, %v9479_v9  ;;  %v9482_v15 = vpop.f32.mrb[38].mxu1 }
 0x66f   : > { %v9483_v16 = vpop.f32.mrb[39].mxu1  ;;  %9456 = vmatpush3.bf16.msra.mxu0 %v10469_v18 }
 0x670   : > { %9901 = vmatprep.subr.bf16.mxu0 %v10549_v36 }
 0x672   : > { %8284 = vmatmul.mubr.bf16.vlgmr.msra.gmra.mrb[144].mxu0 %v6274_v29 }
 0x673   : > { %9902 = vmatpush3.bf16.msra.mxu0 %v10470_v23  ;;  %9909 = vmatprep.mubr.msk.bf16.mxu0 %vm10552_vm10, %v10549_v36 }
 0x674   : > { %9903 = vmatprep.subr.bf16.mxu0 %v10549_v36 }
 0x677   : > { %9904 = vmatpush3.bf16.msra.mxu0 %v10471_v32 }
 0x678   : > { %9905 = vmatprep.subr.bf16.mxu0 %v10549_v36 }
 0x67b   : > { %9906 = vmatpush3.bf16.msra.mxu0 %v10472_v10 }
 0x67c   : > { %9907 = vmatprep.subr.bf16.mxu0 %v10549_v36 }
 0x67f   : > { %9908 = vmatpush3.bf16.msra.mxu0 %v10473_v49 }
 0x680   : > { %9913 = vmatprep.subr.bf16.mxu0 %v10549_v36 }
 0x682   : > { %9910 = vmatmul.mubr.msk.bf16.vlgmr.msra.gmra.mrb[148].mxu0 %vm5344_vm4, %v6278_v61 }
 0x683   : > { %9929 = vmatprep.mubr.msk.bf16.mxu0 %vm10552_vm10, %v10549_v36  ;;  %9914 = vmatpush3.bf16.msra.mxu0 %v10474_v50 }
 0x684   : > { %9915 = vmatprep.subr.bf16.mxu0 %v10549_v36 }
 0x685   : > { %v9303_v26 = vpop.f32.mrb[120].mxu0 }
 0x686   : > { %v9304_v34 = vpop.f32.mrb[121].mxu0 }
 0x687   : > { %v9305_v37 = vadd.f32 %v9304_v34, %v9303_v26  ;;  %v9306_v2 = vpop.f32.mrb[122].mxu0  ;;  %9916 = vmatpush3.bf16.msra.mxu0 %v10475_v57 }
 0x688   : > { %v9307_v40 = vpop.f32.mrb[123].mxu0  ;;  %9917 = vmatprep.subr.bf16.mxu0 %v10549_v36 }
 0x689   : > { %v8006_v44 = vadd.f32 %v9305_v37, %v7966_v4 }
 0x68b   : > { %9918 = vmatpush3.bf16.msra.mxu0 %v10476_v51 }
 0x68c   : > { %9919 = vmatprep.subr.bf16.mxu0 %v10549_v36 }
 0x68f   : > { %9920 = vmatpush3.bf16.msra.mxu0 %v10477_v21 }
 0x690   : > { %9921 = vmatprep.subr.bf16.mxu0 %v10549_v36 }
 0x693   : > { %9922 = vmatpush3.bf16.msra.mxu0 %v10478_v41 }
 0x694   : > { %9923 = vmatprep.subr.bf16.mxu0 %v10549_v36 }
 0x697   : > { %9924 = vmatpush3.bf16.msra.mxu0 %v10479_v43 }
 0x698   : > { %9925 = vmatprep.subr.bf16.mxu0 %v10549_v36 }
 0x69b   : > { %9926 = vmatpush3.bf16.msra.mxu0 %v10480_v39 }
 0x69c   : > { %9927 = vmatprep.subr.bf16.mxu0 %v10549_v36 }
 0x69f   : > { %9928 = vmatpush3.bf16.msra.mxu0 %v10481_v48 }
 0x6a5   : > { %v9325_v45 = vpop.f32.mrb[124].mxu0 }
 0x6a6   : > { %v9326_v47 = vpop.f32.mrb[125].mxu0 }
 0x6a7   : > { %v9327_v53 = vadd.f32 %v9326_v47, %v9325_v45  ;;  %v9328_v30 = vpop.f32.mrb[126].mxu0 }
 0x6a8   : > { %v9329_v19 = vpop.f32.mrb[127].mxu0 }
 0x6a9   : > { %v8046_v60 = vadd.f32 %v9327_v53, %v8006_v44 }
 0x6c5   : > { %v9347_v58 = vpop.f32.mrb[128].mxu0 }
 0x6c6   : > { %v9348_v59 = vpop.f32.mrb[129].mxu0 }
 0x6c7   : > { %v9349_v3 = vadd.f32 %v9348_v59, %v9347_v58  ;;  %v9350_v63 = vpop.f32.mrb[130].mxu0 }
 0x6c8   : > { %v9351_v28 = vpop.f32.mrb[131].mxu0 }
 0x6c9   : > { %v8086_v35 = vadd.f32 %v9349_v3, %v8046_v60 }
 0x6e5   : > { %v9369_v0 = vpop.f32.mrb[132].mxu0 }
 0x6e6   : > { %v9370_v55 = vpop.f32.mrb[133].mxu0 }
 0x6e7   : > { %v9371_v54 = vadd.f32 %v9370_v55, %v9369_v0  ;;  %v9372_v25 = vpop.f32.mrb[134].mxu0 }
 0x6e8   : > { %v9373_v62 = vpop.f32.mrb[135].mxu0 }
 0x6e9   : > { %v8126_v52 = vadd.f32 %v9371_v54, %v8086_v35 }
 0x705   : > { %v9391_v6 = vpop.f32.mrb[136].mxu0 }
 0x706   : > { %v9392_v8 = vpop.f32.mrb[137].mxu0 }
 0x707   : > { %v9393_v56 = vadd.f32 %v9392_v8, %v9391_v6  ;;  %v9394_v12 = vpop.f32.mrb[138].mxu0 }
 0x708   : > { %v9395_v13 = vpop.f32.mrb[139].mxu0 }
 0x709   : > { %v8166_v17 = vadd.f32 %v9393_v56, %v8126_v52 }
 0x725   : > { %v9413_v20 = vpop.f32.mrb[140].mxu0 }
 0x726   : > { %v9414_v27 = vpop.f32.mrb[141].mxu0 }
 0x727   : > { %v9415_v31 = vadd.f32 %v9414_v27, %v9413_v20  ;;  %v9416_v38 = vpop.f32.mrb[142].mxu0 }
 0x728   : > { %v9417_v42 = vpop.f32.mrb[143].mxu0 }
 0x729   : > { %v8206_v46 = vadd.f32 %v9415_v31, %v8166_v17 }
 0x72b   : > { %v8246_v36 = vadd.f32 %v12641_v33, %v8206_v46  ;;  %v8389_v33 = vld [vmem:[%s12813_s8] sm:$0x1] }
 0x745   : > { %v9457_v5 = vpop.f32.mrb[144].mxu0 }
 0x746   : > { %v9458_v7 = vpop.f32.mrb[145].mxu0 }
 0x747   : > { %v9459_v9 = vadd.f32 %v9458_v7, %v9457_v5  ;;  %v9460_v11 = vpop.f32.mrb[146].mxu0 }
 0x748   : > { %v9461_v4 = vpop.f32.mrb[147].mxu0 }
 0x749   : > { %v8286_v14 = vadd.f32 %v9459_v9, %v8246_v36 }
 0x74b   : > { %v8326_v15 = vadd.f32 %v12695_v1, %v8286_v14 }
 0x755   : > { %v8365_v16 = vpop.f32.mrb[148].mxu0 }
 0x756   : > { %v8366_v18 = vadd.f32 %v8365_v16, %v8326_v15  ;;  %v9911_v22 = vpop.f32.mrb[149].mxu0 }
 0x757   : > { %v8368_v23 = vpop.f32.mrb[150].mxu0 }
 0x758   : > { %v8371_v29 = vmax.f32 %v8366_v18, 0.0  ;;  %v9912_v32 = vpop.f32.mrb[151].mxu0 }
 0x75a   : > { %v8372_v10 = vpack.c.bf16 %v8371_v29, %v8371_v29 }
 0x75c   : > { %9930 = vmatmul.mubr.bf16.vlgmr.msra.gmra.mrb[152].mxu0 %v8372_v10 }
 0x82f   : > { %v8472_v49 = vpop.f32.mrb[152].mxu0 }
 0x830   : > { %v8473_v24 = vadd.f32 %v8472_v49, %v8389_v33  ;;  %v9931_v1 = vpop.f32.mrb[153].mxu0 }
 0x831   : > { %v8475_v61 = vpop.f32.mrb[154].mxu0 }
 0x832   : > { %8478 = vst [vmem:[%s324_s23] sm:$0x1] %v8473_v24  ;;  %v9932_v26 = vpop.f32.mrb[155].mxu0 }
 0x833   : > { %10498 = shalt.err (!%p10495_p3)
}
 0x834   : > { %s10499_s22 = scalar_lea.hbm %s12763_s27, 16  ;;  %s10503_s23 = scalar_lea.hbm %s12814_s9, 32 }
 0x835   : > { %p10500_p4 = scmp.ne.s32.totalorder %s12763_s27, %s10499_s22  ;;  %p10504_p9 = scmp.lt.u32.totalorder %s12763_s27, %s12814_s9 }
 0x836   : > { %p10505_p10 = scmp.lt.u32.totalorder %s10503_s23, %s10499_s22  ;;  %p10507_p12 = scmp.lt.u32.totalorder %s10499_s22, %s12763_s27 }
 0x837   : > { %p10501_p7 = pnand %p10500_p4, %p10642_p5 }
 0x838   : > { %p10506_p11 = por %p10505_p10, %p10504_p9 }
 0x839   : > { %p10502_p8 = pneg %p10501_p7 }
 0x83a   : > { %p10508_p13 = por %p10507_p12, %p10506_p11 }
 0x83c   : > { %p10509_p0 = pnand %p10508_p13, %p10502_p8 }
 0x83e   : > { %10512 = shalt.err (!%p10509_p0)
}
 0x83f   : > { %10160 = dma.vmem_to_hbm [thread:$0]  (%p10642_p5), %s12765_s24, 16, %s12763_s27, %s8480_s28  }
 0x840 PF: > { %p10166_p1 = scmp.ge.s32.totalorder %s10547_s12, 2  ;;  %s8504_s13 = sand.u32 1, %s10535_s30  }
 0x841   : > { %s8505_s29 = scalar_lea.sflag [#allocation7], %s8504_s13 }
 0x842   : > { %p10163_p2 = pnand %p10166_p1, %p10646_p6 }
 0x844   : > { %10530 = dma.done.wait (!%p10163_p2), %s8505_s29, 16  }
 0x845   : > { %10532 = vsyncadd (!%p10163_p2), %s8505_s29, 4294967280  ;;  %p19_p3 = scmp.ge.s32.totalorder %s10629_s15, 4   ;;  %s12821_s30 = smov %s10539_s10 }
 0x846   : > { %s12822_s10 = smov %s10543_s11  ;;  %s12823_s11 = smov %s10640_s18 }
 0x847   : > { %s12824_s12 = smov %s10629_s15  ;;  %21 = sbr.rel (!%p19_p3) target bundleno = 3 (0x3), region = 91 }
 0x84e   :  { %8509 = vsyncpa [#allocation7], 1 }
 0x84f   :  { %8511 = vsyncpa [#allocation7 + $0x1], 1 }

</bundles_post_ra>
